<compile_context>
chip_gen: v6e
topology: v6e:2x2x1
jax: 0.10.0
libtpu: 0.0.40
codegen_flags: <defaults>
</compile_context>

<pallas_src>
import functools

import jax
import jax.numpy as jnp
from jax.experimental import pallas as pl
from jax.experimental.pallas import tpu as pltpu

LRELU_CONV = 0.1
LRELU_FC = 0.2


def _round_up(x, m):
    return (x + m - 1) // m * m


# ----------------------------------------------------------------------------
# Kernel 1: fused  out = leaky_relu(x @ w + b)   (conv1/conv2 as matmul)
# ----------------------------------------------------------------------------
def _matmul_bias_lrelu_kernel(x_ref, w_ref, b_ref, o_ref, *, alpha):
    acc = jnp.dot(x_ref[...], w_ref[...], preferred_element_type=jnp.float32)
    acc = acc + b_ref[...]
    o_ref[...] = jnp.where(acc >= 0, acc, alpha * acc).astype(o_ref.dtype)


def fused_linear_lrelu(x, w, b, alpha, out_dtype=jnp.bfloat16, tm_max=512):
    """leaky_relu(x @ w + b).  Single VMEM block when it fits, else M-tiled."""
    M, K = x.shape
    K2, N = w.shape
    assert K == K2, (K, K2)
    cost = pl.CostEstimate(
        flops=2 * M * K * N,
        transcendentals=0,
        bytes_accessed=M * K * 2 + K * N * 2 + N * 4
        + M * N * jnp.dtype(out_dtype).itemsize,
    )
    kern = functools.partial(_matmul_bias_lrelu_kernel, alpha=alpha)

    if M <= tm_max:
        # Whole problem VMEM-resident, no grid (no pointless double buffering).
        return pl.pallas_call(
            kern,
            out_shape=jax.ShapeDtypeStruct((M, N), out_dtype),
            cost_estimate=cost,
        )(x, w, b)

    # M-tiled path: force an even block count so v7x's 2 TensorCores balance.
    nblk = pl.cdiv(M, tm_max)
    nblk = nblk + (nblk % 2)
    tm = _round_up(pl.cdiv(M, nblk), 8)
    grid_m = pl.cdiv(M, tm)
    vmem_need = 2 * (tm * K + tm * N) * 2 + K * N * 2 + N * 4
    vmem_limit = min(max(4 * vmem_need, 32 * 2**20), 48 * 2**20)

    return pl.pallas_call(
        kern,
        out_shape=jax.ShapeDtypeStruct((M, N), out_dtype),
        grid=(grid_m,),
        in_specs=[
            pl.BlockSpec((tm, K), lambda i: (i, 0)),
            pl.BlockSpec((K, N), lambda i: (0, 0)),   # weight stays resident
            pl.BlockSpec((1, N), lambda i: (0, 0)),
        ],
        out_specs=pl.BlockSpec((tm, N), lambda i: (i, 0)),
        compiler_params=pltpu.CompilerParams(
            dimension_semantics=("parallel",),
            vmem_limit_bytes=vmem_limit,
        ),
        cost_estimate=cost,
    )(x, w, b)


# ----------------------------------------------------------------------------
# Kernel 2: fused network tail — conv3 + conv4 + conv5 + flatten + dual FC head
#   p3_ref : (9, N, 9*C2)  conv3 patches, one row-group per conv3 output pos
#   w4_ref : (9, C3, C4)   conv4 weight split per kernel position
#   FC weights are the MERGED (t|r) wide / block-diagonal layers.
# ----------------------------------------------------------------------------
def _tail_kernel(*refs, n_fc, alpha_conv, alpha_fc):
    p3_ref, w3_ref, b3_ref, w4_ref, b4_ref, w5_ref, b5_ref = refs[:7]
    fc_refs = refs[7:7 + 2 * n_fc]
    out_ref = refs[7 + 2 * n_fc]

    def lrelu(a, alpha):
        return jnp.where(a >= 0, a, alpha * a)

    npos = w4_ref.shape[0]          # 9: conv3 output positions == conv4 kernel taps
    # conv3 + conv4 fused: conv4 has a single spatial output (3x3 map, k=3 s=2),
    # so accumulate its contribution per conv3 output position.
    acc4 = b4_ref[...]              # (1, C4) f32, broadcasts on first add
    for p in range(npos):
        x_p = p3_ref[p]             # (N, 9*C2) bf16
        a3 = jnp.dot(x_p, w3_ref[...],
                     preferred_element_type=jnp.float32) + b3_ref[...]
        h3 = lrelu(a3, alpha_conv).astype(jnp.bfloat16)          # (N, C3)
        acc4 = acc4 + jnp.dot(h3, w4_ref[p],
                              preferred_element_type=jnp.float32)
    h4 = lrelu(acc4, alpha_conv).astype(jnp.bfloat16)            # (N, C4)

    # conv5 (1x1 conv) == plain matmul; 1x1 spatial => NCHW flatten == channels.
    a5 = jnp.dot(h4, w5_ref[...],
                 preferred_element_type=jnp.float32) + b5_ref[...]
    h = lrelu(a5, alpha_conv).astype(jnp.bfloat16)               # (N, 128)

    # Merged dual FC head: 5 wide matmuls instead of 2x5 narrow dependent ones.
    # TODO(synk): dropout omitted (eval/inference semantics).
    a = None
    for li in range(n_fc):
        w_ref, b_ref = fc_refs[2 * li], fc_refs[2 * li + 1]
        a = jnp.dot(h, w_ref[...],
                    preferred_element_type=jnp.float32) + b_ref[...]
        a = lrelu(a, alpha_fc)
        h = a.astype(jnp.bfloat16)
    out_ref[...] = a                 # f32 (N, out_comb): t at [:,0:3], r at [:,64:67]


def fused_tail(p3, params, alpha_conv=LRELU_CONV, alpha_fc=LRELU_FC):
    w3, b3 = params["conv3"]
    w4, b4 = params["conv4"]
    w5, b5 = params["conv5"]
    fc = params["fc"]
    n = p3.shape[1]
    n_fc = len(fc)

    args = [p3, w3, b3, w4, b4, w5, b5]
    for (w, b) in fc:
        args += [w, b]
    out_comb = fc[-1][0].shape[1]

    flops = 2 * n * (w4.shape[0] * w3.shape[0] * w3.shape[1]
                     + w4.shape[0] * w4.shape[1] * w4.shape[2]
                     + w5.shape[0] * w5.shape[1]
                     + sum(int(w.shape[0]) * int(w.shape[1]) for (w, _) in fc))
    bytes_acc = sum(int(a.size) * a.dtype.itemsize for a in args) + n * out_comb * 4
    cost = pl.CostEstimate(flops=flops, transcendentals=0, bytes_accessed=bytes_acc)

    return pl.pallas_call(
        functools.partial(_tail_kernel, n_fc=n_fc,
                          alpha_conv=alpha_conv, alpha_fc=alpha_fc),
        out_shape=jax.ShapeDtypeStruct((n, out_comb), jnp.float32),
        cost_estimate=cost,
    )(*args)


# ----------------------------------------------------------------------------
# XLA-level im2col glue (cheap at this problem size)
# ----------------------------------------------------------------------------
def _im2col_2d(x_nhwc, kh, kw, stride):
    n, h, w, c = x_nhwc.shape
    oh = (h - kh) // stride + 1
    ow = (w - kw) // stride + 1
    cols = []
    for i in range(kh):
        for j in range(kw):
            cols.append(x_nhwc[:, i:i + stride * oh:stride,
                               j:j + stride * ow:stride, :])
    p = jnp.concatenate(cols, axis=-1)             # (N, OH, OW, KH*KW*C)
    return p.reshape(n * oh * ow, kh * kw * c), oh, ow


def _im2col_positions(x_nhwc, kh, kw, stride):
    """Patches grouped per output position: (OH*OW, N, KH*KW*C)."""
    n, h, w, c = x_nhwc.shape
    oh = (h - kh) // stride + 1
    ow = (w - kw) // stride + 1
    pos = []
    for a in range(oh):
        for b in range(ow):
            cols = [x_nhwc[:, a * stride + i, b * stride + j, :]
                    for i in range(kh) for j in range(kw)]
            pos.append(jnp.concatenate(cols, axis=-1))   # (N, KH*KW*C)
    return jnp.stack(pos, axis=0), oh, ow


# ----------------------------------------------------------------------------
# Parameter initialization — kernel-ready layouts prepared ONCE.
# ----------------------------------------------------------------------------
def init_params(key, fc_in=128):
    conv_cfg = [  # (in, out, k, stride)
        (6, 64, 3, 2),
        (64, 128, 3, 2),
        (128, 256, 3, 2),
        (256, 512, 3, 2),
        (512, 128, 1, 1),
    ]
    fc_cfg = [(fc_in, 512), (512, 128), (128, 64), (64, 16), (16, 3)]

    keys = jax.random.split(key, len(conv_cfg) + 2 * len(fc_cfg))
    ki = 0
    params = {}

    conv_prepped = []
    for (ci, co, ks, st) in conv_cfg:
        kw_, kb_ = jax.random.split(keys[ki]); ki += 1
        fan_in = ci * ks * ks
        w = ((2.0 / fan_in) ** 0.5) * jax.random.normal(
            kw_, (co, ci, ks, ks), jnp.float32)            # kaiming_normal
        bound = 1.0 / (fan_in ** 0.5)
        b = jax.random.uniform(kb_, (co,), jnp.float32, -bound, bound)
        # (KH*KW*C_in, C_out) bf16 — row index = (i*KW + j)*C_in + c
        w2d = jnp.transpose(w, (2, 3, 1, 0)).reshape(ks * ks * ci, co)
        conv_prepped.append((w2d.astype(jnp.bfloat16), b.reshape(1, co),
                             st, ks, ci, co))

    # conv1 / conv2: standalone im2col + matmul kernels
    params["conv12"] = [(w, b, st, k, k)
                        for (w, b, st, k, _, _) in conv_prepped[:2]]
    # conv3 / conv4 / conv5 feed the fused tail kernel
    w3, b3, _, _, _, _ = conv_prepped[2]
    params["conv3"] = (w3, b3)
    w4, b4, _, k4, c3_in, c4 = conv_prepped[3]
    params["conv4"] = (w4.reshape(k4 * k4, c3_in, c4), b4)   # (9, 256, 512)
    w5, b5, _, _, _, _ = conv_prepped[4]
    params["conv5"] = (w5, b5)

    # Dual FC head: raw torch-default init, then merged into wide/block-diag layers.
    raw = {"t": [], "r": []}
    for branch in ("t", "r"):
        for (fi, fo) in fc_cfg:
            kw_, kb_ = jax.random.split(keys[ki]); ki += 1
            bound = 1.0 / (fi ** 0.5)
            wt = jax.random.uniform(kw_, (fo, fi), jnp.float32, -bound, bound)
            bt = jax.random.uniform(kb_, (fo,), jnp.float32, -bound, bound)
            raw[branch].append((wt, bt))

    slot = [max(fo, 64) for (_, fo) in fc_cfg]   # per-branch lane slot widths
    fc_comb = []
    for li, (fi, fo) in enumerate(fc_cfg):
        wt, bt = raw["t"][li]
        wr, br = raw["r"][li]
        so = slot[li]
        out_comb = 2 * so
        if li == 0:
            # both branches read the same conv features: [W_t | W_r]
            w = jnp.zeros((fi, out_comb), jnp.float32)
            w = w.at[:, :fo].set(wt.T)
            w = w.at[:, so:so + fo].set(wr.T)
        else:
            # block-diagonal: t occupies cols [0:fo], r occupies [so:so+fo]
            si = slot[li - 1]
            w = jnp.zeros((2 * si, out_comb), jnp.float32)
            w = w.at[:fi, :fo].set(wt.T)
            w = w.at[si:si + fi, so:so + fo].set(wr.T)
        bcomb = jnp.zeros((1, out_comb), jnp.float32)
        bcomb = bcomb.at[0, :fo].set(bt)
        bcomb = bcomb.at[0, so:so + fo].set(br)
        fc_comb.append((w.astype(jnp.bfloat16), bcomb))

    params["fc"] = fc_comb
    params["out_dim"] = fc_cfg[-1][1]
    params["r_offset"] = slot[-1]
    return params


# ----------------------------------------------------------------------------
# Forward pass (matches TranslationSubNet.forward with fast_inference=False)
# ----------------------------------------------------------------------------
def translation_subnet_forward(x_nchw, params):
    # NCHW -> NHWC, bf16 activations throughout the conv stack.
    h = jnp.transpose(x_nchw, (0, 2, 3, 1)).astype(jnp.bfloat16)

    # conv1, conv2: im2col + fused matmul/bias/LeakyReLU kernel.
    for (w2d, b, stride, kh, kw) in params["conv12"]:
        n = h.shape[0]
        patches, oh, ow = _im2col_2d(h, kh, kw, stride)
        y = fused_linear_lrelu(patches, w2d, b, LRELU_CONV)
        h = y.reshape(n, oh, ow, w2d.shape[1])

    # conv3 patches grouped per conv3 output position -> single fused tail kernel
    # (conv3 + conv4 + conv5 + flatten + merged dual FC head).
    p3, oh3, ow3 = _im2col_positions(h, 3, 3, 2)
    assert oh3 == 3 and ow3 == 3, "fused tail assumes a 3x3 conv3 map (in_ks == (1,1))"
    out = fused_tail(p3, params)

    d = params["out_dim"]
    ro = params["r_offset"]
    t = out[:, :d]
    r = out[:, ro:ro + d]
    return t, r


if __name__ == "__main__":
    key = jax.random.PRNGKey(0)
    k_x, k_p = jax.random.split(key)

    # Input: batch=2, 6 channels, 35x35 spatial -> conv stack output (2,128,1,1),
    # i.e. in_ks = (1, 1) and the first FC has 128 input features.
    N, C, H, W = 2, 6, 35, 35
    x = jax.random.normal(k_x, (N, C, H, W), jnp.float32)

    params = init_params(k_p, fc_in=128)   # 128 * 1 * 1

    fwd = jax.jit(functools.partial(translation_subnet_forward, params=params))
    t, r = fwd(x)
    t = jax.block_until_ready(t)
    r = jax.block_until_ready(r)
    assert t.shape == (N, 3) and r.shape == (N, 3), (t.shape, r.shape)
    assert jnp.all(jnp.isfinite(t)) and jnp.all(jnp.isfinite(r))
    print("KERNEL_OK")
</pallas_src>

<mosaic_0001>
module attributes {stable_mosaic.version = 11 : i64} {
  func.func @_matmul_bias_lrelu_kernel(%arg0: i32, %arg1: memref<296x54xbf16, #tpu.memory_space<vmem>>, %arg2: memref<54x64xbf16, #tpu.memory_space<vmem>>, %arg3: memref<1x64xf32, #tpu.memory_space<vmem>>, %arg4: memref<296x64xbf16, #tpu.memory_space<vmem>>) attributes {dimension_semantics = [#tpu.dimension_semantics<parallel>], iteration_bounds = array<i64: 2>, scalar_prefetch = 0 : i64, scratch_operands = 0 : i64, tpu.core_type = #tpu.core_type<tc>, window_params = [{transform_indices = @transform_0, window_bounds = array<i64: 296, 54>}, {pipeline_mode = #tpu.pipeline_mode<synchronous>, transform_indices = @transform_1, window_bounds = array<i64: 54, 64>}, {pipeline_mode = #tpu.pipeline_mode<synchronous>, transform_indices = @transform_2, window_bounds = array<i64: 1, 64>}, {transform_indices = @transform_3, window_bounds = array<i64: 296, 64>}]} {
    %c0 = arith.constant 0 : index
    %c0_0 = arith.constant 0 : index
    %0 = vector.load %arg1[%c0, %c0_0] : memref<296x54xbf16, #tpu.memory_space<vmem>>, vector<296x54xbf16>
    %c0_1 = arith.constant 0 : index
    %c0_2 = arith.constant 0 : index
    %1 = vector.load %arg2[%c0_1, %c0_2] : memref<54x64xbf16, #tpu.memory_space<vmem>>, vector<54x64xbf16>
    %cst = arith.constant dense<0.000000e+00> : vector<296x64xf32>
    %2 = tpu.matmul %0, %1, %cst {dimension_numbers = #tpu.dot_dimension_numbers<[1], [0], [0], [1], [0, 0, 1, 1], [], []>} : vector<296x54xbf16>, vector<54x64xbf16>, vector<296x64xf32> -> vector<296x64xf32>
    %c0_3 = arith.constant 0 : index
    %c0_4 = arith.constant 0 : index
    %3 = vector.load %arg3[%c0_3, %c0_4] : memref<1x64xf32, #tpu.memory_space<vmem>>, vector<1x64xf32>
    %4 = vector.broadcast %3 : vector<1x64xf32> to vector<296x64xf32>
    %5 = arith.addf %2, %4 : vector<296x64xf32>
    %cst_5 = arith.constant 0.000000e+00 : f32
    %6 = vector.broadcast %cst_5 : f32 to vector<296x64xf32>
    %7 = arith.cmpf oge, %5, %6 : vector<296x64xf32>
    %cst_6 = arith.constant 1.000000e-01 : f32
    %8 = vector.broadcast %cst_6 : f32 to vector<296x64xf32>
    %9 = arith.mulf %8, %5 : vector<296x64xf32>
    %10 = arith.select %7, %5, %9 : vector<296x64xi1>, vector<296x64xf32>
    %11 = arith.truncf %10 : vector<296x64xf32> to vector<296x64xbf16>
    %c0_7 = arith.constant 0 : index
    %c0_8 = arith.constant 0 : index
    %12 = vector.load %arg4[%c0_7, %c0_8] : memref<296x64xbf16, #tpu.memory_space<vmem>>, vector<296x64xbf16>
    tpu.vector_store %arg4[%c0_7, %c0_8], %11 {strides = array<i32>} : memref<296x64xbf16, #tpu.memory_space<vmem>>, vector<296x64xbf16>,
    return
  }
  func.func @transform_0(%arg0: i32) -> (i32, i32) {
    %c0_i32 = arith.constant 0 : i32
    %c0_i32_0 = arith.constant 0 : i32
    return %arg0, %c0_i32 : i32, i32
  }
  func.func @transform_1(%arg0: i32) -> (i32, i32) {
    %c0_i32 = arith.constant 0 : i32
    %c0_i32_0 = arith.constant 0 : i32
    %c0_i32_1 = arith.constant 0 : i32
    return %c0_i32, %c0_i32_0 : i32, i32
  }
  func.func @transform_2(%arg0: i32) -> (i32, i32) {
    %c0_i32 = arith.constant 0 : i32
    %c0_i32_0 = arith.constant 0 : i32
    %c0_i32_1 = arith.constant 0 : i32
    return %c0_i32, %c0_i32_0 : i32, i32
  }
  func.func @transform_3(%arg0: i32) -> (i32, i32) {
    %c0_i32 = arith.constant 0 : i32
    %c0_i32_0 = arith.constant 0 : i32
    return %arg0, %c0_i32 : i32, i32
  }
}

module attributes {stable_mosaic.version = 11 : i64} {
  func.func @_matmul_bias_lrelu_kernel(%arg0: memref<128x576xbf16, #tpu.memory_space<vmem>>, %arg1: memref<576x128xbf16, #tpu.memory_space<vmem>>, %arg2: memref<1x128xf32, #tpu.memory_space<vmem>>, %arg3: memref<128x128xbf16, #tpu.memory_space<vmem>>) attributes {dimension_semantics = [], scalar_prefetch = 0 : i64, scratch_operands = 0 : i64, tpu.core_type = #tpu.core_type<tc>} {
    %c0 = arith.constant 0 : index
    %c0_0 = arith.constant 0 : index
    %0 = vector.load %arg0[%c0, %c0_0] : memref<128x576xbf16, #tpu.memory_space<vmem>>, vector<128x576xbf16>
    %c0_1 = arith.constant 0 : index
    %c0_2 = arith.constant 0 : index
    %1 = vector.load %arg1[%c0_1, %c0_2] : memref<576x128xbf16, #tpu.memory_space<vmem>>, vector<576x128xbf16>
    %cst = arith.constant dense<0.000000e+00> : vector<128x128xf32>
    %2 = tpu.matmul %0, %1, %cst {dimension_numbers = #tpu.dot_dimension_numbers<[1], [0], [0], [1], [0, 0, 1, 1], [], []>} : vector<128x576xbf16>, vector<576x128xbf16>, vector<128x128xf32> -> vector<128x128xf32>
    %c0_3 = arith.constant 0 : index
    %c0_4 = arith.constant 0 : index
    %3 = vector.load %arg2[%c0_3, %c0_4] : memref<1x128xf32, #tpu.memory_space<vmem>>, vector<1x128xf32>
    %4 = vector.broadcast %3 : vector<1x128xf32> to vector<128x128xf32>
    %5 = arith.addf %2, %4 : vector<128x128xf32>
    %cst_5 = arith.constant 0.000000e+00 : f32
    %6 = vector.broadcast %cst_5 : f32 to vector<128x128xf32>
    %7 = arith.cmpf oge, %5, %6 : vector<128x128xf32>
    %cst_6 = arith.constant 1.000000e-01 : f32
    %8 = vector.broadcast %cst_6 : f32 to vector<128x128xf32>
    %9 = arith.mulf %8, %5 : vector<128x128xf32>
    %10 = arith.select %7, %5, %9 : vector<128x128xi1>, vector<128x128xf32>
    %11 = arith.truncf %10 : vector<128x128xf32> to vector<128x128xbf16>
    %c0_7 = arith.constant 0 : index
    %c0_8 = arith.constant 0 : index
    %12 = vector.load %arg3[%c0_7, %c0_8] : memref<128x128xbf16, #tpu.memory_space<vmem>>, vector<128x128xbf16>
    tpu.vector_store %arg3[%c0_7, %c0_8], %11 {strides = array<i32>} : memref<128x128xbf16, #tpu.memory_space<vmem>>, vector<128x128xbf16>,
    return
  }
}

module attributes {stable_mosaic.version = 11 : i64} {
  func.func @_tail_kernel(%arg0: memref<9x2x1152xbf16, #tpu.memory_space<vmem>>, %arg1: memref<1152x256xbf16, #tpu.memory_space<vmem>>, %arg2: memref<1x256xf32, #tpu.memory_space<vmem>>, %arg3: memref<9x256x512xbf16, #tpu.memory_space<vmem>>, %arg4: memref<1x512xf32, #tpu.memory_space<vmem>>, %arg5: memref<512x128xbf16, #tpu.memory_space<vmem>>, %arg6: memref<1x128xf32, #tpu.memory_space<vmem>>, %arg7: memref<128x1024xbf16, #tpu.memory_space<vmem>>, %arg8: memref<1x1024xf32, #tpu.memory_space<vmem>>, %arg9: memref<1024x256xbf16, #tpu.memory_space<vmem>>, %arg10: memref<1x256xf32, #tpu.memory_space<vmem>>, %arg11: memref<256x128xbf16, #tpu.memory_space<vmem>>, %arg12: memref<1x128xf32, #tpu.memory_space<vmem>>, %arg13: memref<128x128xbf16, #tpu.memory_space<vmem>>, %arg14: memref<1x128xf32, #tpu.memory_space<vmem>>, %arg15: memref<128x128xbf16, #tpu.memory_space<vmem>>, %arg16: memref<1x128xf32, #tpu.memory_space<vmem>>, %arg17: memref<2x128xf32, #tpu.memory_space<vmem>>) attributes {dimension_semantics = [], scalar_prefetch = 0 : i64, scratch_operands = 0 : i64, tpu.core_type = #tpu.core_type<tc>} {
    %c0 = arith.constant 0 : index
    %c0_0 = arith.constant 0 : index
    %0 = vector.load %arg4[%c0, %c0_0] : memref<1x512xf32, #tpu.memory_space<vmem>>, vector<1x512xf32>
    %c0_1 = arith.constant 0 : index
    %c0_2 = arith.constant 0 : index
    %c0_3 = arith.constant 0 : index
    %1 = vector.load %arg0[%c0_1, %c0_2, %c0_3] : memref<9x2x1152xbf16, #tpu.memory_space<vmem>>, vector<1x2x1152xbf16>
    %2 = vector.shape_cast %1 : vector<1x2x1152xbf16> to vector<2x1152xbf16>
    %c0_4 = arith.constant 0 : index
    %c0_5 = arith.constant 0 : index
    %3 = vector.load %arg1[%c0_4, %c0_5] : memref<1152x256xbf16, #tpu.memory_space<vmem>>, vector<1152x256xbf16>
    %cst = arith.constant dense<0.000000e+00> : vector<2x256xf32>
    %4 = tpu.matmul %2, %3, %cst {dimension_numbers = #tpu.dot_dimension_numbers<[1], [0], [0], [1], [0, 0, 1, 1], [], []>} : vector<2x1152xbf16>, vector<1152x256xbf16>, vector<2x256xf32> -> vector<2x256xf32>
    %c0_6 = arith.constant 0 : index
    %c0_7 = arith.constant 0 : index
    %5 = vector.load %arg2[%c0_6, %c0_7] : memref<1x256xf32, #tpu.memory_space<vmem>>, vector<1x256xf32>
    %6 = vector.broadcast %5 : vector<1x256xf32> to vector<2x256xf32>
    %7 = arith.addf %4, %6 : vector<2x256xf32>
    %cst_8 = arith.constant 0.000000e+00 : f32
    %8 = vector.broadcast %cst_8 : f32 to vector<2x256xf32>
    %9 = arith.cmpf oge, %7, %8 : vector<2x256xf32>
    %cst_9 = arith.constant 1.000000e-01 : f32
    %10 = vector.broadcast %cst_9 : f32 to vector<2x256xf32>
    %11 = arith.mulf %10, %7 : vector<2x256xf32>
    %12 = arith.select %9, %7, %11 : vector<2x256xi1>, vector<2x256xf32>
    %13 = arith.truncf %12 : vector<2x256xf32> to vector<2x256xbf16>
    %c0_10 = arith.constant 0 : index
    %c0_11 = arith.constant 0 : index
    %c0_12 = arith.constant 0 : index
    %14 = vector.load %arg3[%c0_10, %c0_11, %c0_12] : memref<9x256x512xbf16, #tpu.memory_space<vmem>>, vector<1x256x512xbf16>
    %15 = vector.shape_cast %14 : vector<1x256x512xbf16> to vector<256x512xbf16>
    %cst_13 = arith.constant dense<0.000000e+00> : vector<2x512xf32>
    %16 = tpu.matmul %13, %15, %cst_13 {dimension_numbers = #tpu.dot_dimension_numbers<[1], [0], [0], [1], [0, 0, 1, 1], [], []>} : vector<2x256xbf16>, vector<256x512xbf16>, vector<2x512xf32> -> vector<2x512xf32>
    %17 = vector.broadcast %0 : vector<1x512xf32> to vector<2x512xf32>
    %18 = arith.addf %17, %16 : vector<2x512xf32>
    %c1 = arith.constant 1 : index
    %c0_14 = arith.constant 0 : index
    %c0_15 = arith.constant 0 : index
    %19 = vector.load %arg0[%c1, %c0_14, %c0_15] : memref<9x2x1152xbf16, #tpu.memory_space<vmem>>, vector<1x2x1152xbf16>
    %20 = vector.shape_cast %19 : vector<1x2x1152xbf16> to vector<2x1152xbf16>
    %c0_16 = arith.constant 0 : index
    %c0_17 = arith.constant 0 : index
    %21 = vector.load %arg1[%c0_16, %c0_17] : memref<1152x256xbf16, #tpu.memory_space<vmem>>, vector<1152x256xbf16>
    %cst_18 = arith.constant dense<0.000000e+00> : vector<2x256xf32>
    %22 = tpu.matmul %20, %21, %cst_18 {dimension_numbers = #tpu.dot_dimension_numbers<[1], [0], [0], [1], [0, 0, 1, 1], [], []>} : vector<2x1152xbf16>, vector<1152x256xbf16>, vector<2x256xf32> -> vector<2x256xf32>
    %c0_19 = arith.constant 0 : index
    %c0_20 = arith.constant 0 : index
    %23 = vector.load %arg2[%c0_19, %c0_20] : memref<1x256xf32, #tpu.memory_space<vmem>>, vector<1x256xf32>
    %24 = vector.broadcast %23 : vector<1x256xf32> to vector<2x256xf32>
    %25 = arith.addf %22, %24 : vector<2x256xf32>
    %cst_21 = arith.constant 0.000000e+00 : f32
    %26 = vector.broadcast %cst_21 : f32 to vector<2x256xf32>
    %27 = arith.cmpf oge, %25, %26 : vector<2x256xf32>
    %cst_22 = arith.constant 1.000000e-01 : f32
    %28 = vector.broadcast %cst_22 : f32 to vector<2x256xf32>
    %29 = arith.mulf %28, %25 : vector<2x256xf32>
    %30 = arith.select %27, %25, %29 : vector<2x256xi1>, vector<2x256xf32>
    %31 = arith.truncf %30 : vector<2x256xf32> to vector<2x256xbf16>
    %c1_23 = arith.constant 1 : index
    %c0_24 = arith.constant 0 : index
    %c0_25 = arith.constant 0 : index
    %32 = vector.load %arg3[%c1_23, %c0_24, %c0_25] : memref<9x256x512xbf16, #tpu.memory_space<vmem>>, vector<1x256x512xbf16>
    %33 = vector.shape_cast %32 : vector<1x256x512xbf16> to vector<256x512xbf16>
    %cst_26 = arith.constant dense<0.000000e+00> : vector<2x512xf32>
    %34 = tpu.matmul %31, %33, %cst_26 {dimension_numbers = #tpu.dot_dimension_numbers<[1], [0], [0], [1], [0, 0, 1, 1], [], []>} : vector<2x256xbf16>, vector<256x512xbf16>, vector<2x512xf32> -> vector<2x512xf32>
    %35 = arith.addf %18, %34 : vector<2x512xf32>
    %c2 = arith.constant 2 : index
    %c0_27 = arith.constant 0 : index
    %c0_28 = arith.constant 0 : index
    %36 = vector.load %arg0[%c2, %c0_27, %c0_28] : memref<9x2x1152xbf16, #tpu.memory_space<vmem>>, vector<1x2x1152xbf16>
    %37 = vector.shape_cast %36 : vector<1x2x1152xbf16> to vector<2x1152xbf16>
    %c0_29 = arith.constant 0 : index
    %c0_30 = arith.constant 0 : index
    %38 = vector.load %arg1[%c0_29, %c0_30] : memref<1152x256xbf16, #tpu.memory_space<vmem>>, vector<1152x256xbf16>
    %cst_31 = arith.constant dense<0.000000e+00> : vector<2x256xf32>
    %39 = tpu.matmul %37, %38, %cst_31 {dimension_numbers = #tpu.dot_dimension_numbers<[1], [0], [0], [1], [0, 0, 1, 1], [], []>} : vector<2x1152xbf16>, vector<1152x256xbf16>, vector<2x256xf32> -> vector<2x256xf32>
    %c0_32 = arith.constant 0 : index
    %c0_33 = arith.constant 0 : index
    %40 = vector.load %arg2[%c0_32, %c0_33] : memref<1x256xf32, #tpu.memory_space<vmem>>, vector<1x256xf32>
    %41 = vector.broadcast %40 : vector<1x256xf32> to vector<2x256xf32>
    %42 = arith.addf %39, %41 : vector<2x256xf32>
    %cst_34 = arith.constant 0.000000e+00 : f32
    %43 = vector.broadcast %cst_34 : f32 to vector<2x256xf32>
    %44 = arith.cmpf oge, %42, %43 : vector<2x256xf32>
    %cst_35 = arith.constant 1.000000e-01 : f32
    %45 = vector.broadcast %cst_35 : f32 to vector<2x256xf32>
    %46 = arith.mulf %45, %42 : vector<2x256xf32>
    %47 = arith.select %44, %42, %46 : vector<2x256xi1>, vector<2x256xf32>
    %48 = arith.truncf %47 : vector<2x256xf32> to vector<2x256xbf16>
    %c2_36 = arith.constant 2 : index
    %c0_37 = arith.constant 0 : index
    %c0_38 = arith.constant 0 : index
    %49 = vector.load %arg3[%c2_36, %c0_37, %c0_38] : memref<9x256x512xbf16, #tpu.memory_space<vmem>>, vector<1x256x512xbf16>
    %50 = vector.shape_cast %49 : vector<1x256x512xbf16> to vector<256x512xbf16>
    %cst_39 = arith.constant dense<0.000000e+00> : vector<2x512xf32>
    %51 = tpu.matmul %48, %50, %cst_39 {dimension_numbers = #tpu.dot_dimension_numbers<[1], [0], [0], [1], [0, 0, 1, 1], [], []>} : vector<2x256xbf16>, vector<256x512xbf16>, vector<2x512xf32> -> vector<2x512xf32>
    %52 = arith.addf %35, %51 : vector<2x512xf32>
    %c3 = arith.constant 3 : index
    %c0_40 = arith.constant 0 : index
    %c0_41 = arith.constant 0 : index
    %53 = vector.load %arg0[%c3, %c0_40, %c0_41] : memref<9x2x1152xbf16, #tpu.memory_space<vmem>>, vector<1x2x1152xbf16>
    %54 = vector.shape_cast %53 : vector<1x2x1152xbf16> to vector<2x1152xbf16>
    %c0_42 = arith.constant 0 : index
    %c0_43 = arith.constant 0 : index
    %55 = vector.load %arg1[%c0_42, %c0_43] : memref<1152x256xbf16, #tpu.memory_space<vmem>>, vector<1152x256xbf16>
    %cst_44 = arith.constant dense<0.000000e+00> : vector<2x256xf32>
    %56 = tpu.matmul %54, %55, %cst_44 {dimension_numbers = #tpu.dot_dimension_numbers<[1], [0], [0], [1], [0, 0, 1, 1], [], []>} : vector<2x1152xbf16>, vector<1152x256xbf16>, vector<2x256xf32> -> vector<2x256xf32>
    %c0_45 = arith.constant 0 : index
    %c0_46 = arith.constant 0 : index
    %57 = vector.load %arg2[%c0_45, %c0_46] : memref<1x256xf32, #tpu.memory_space<vmem>>, vector<1x256xf32>
    %58 = vector.broadcast %57 : vector<1x256xf32> to vector<2x256xf32>
    %59 = arith.addf %56, %58 : vector<2x256xf32>
    %cst_47 = arith.constant 0.000000e+00 : f32
    %60 = vector.broadcast %cst_47 : f32 to vector<2x256xf32>
    %61 = arith.cmpf oge, %59, %60 : vector<2x256xf32>
    %cst_48 = arith.constant 1.000000e-01 : f32
    %62 = vector.broadcast %cst_48 : f32 to vector<2x256xf32>
    %63 = arith.mulf %62, %59 : vector<2x256xf32>
    %64 = arith.select %61, %59, %63 : vector<2x256xi1>, vector<2x256xf32>
    %65 = arith.truncf %64 : vector<2x256xf32> to vector<2x256xbf16>
    %c3_49 = arith.constant 3 : index
    %c0_50 = arith.constant 0 : index
    %c0_51 = arith.constant 0 : index
    %66 = vector.load %arg3[%c3_49, %c0_50, %c0_51] : memref<9x256x512xbf16, #tpu.memory_space<vmem>>, vector<1x256x512xbf16>
    %67 = vector.shape_cast %66 : vector<1x256x512xbf16> to vector<256x512xbf16>
    %cst_52 = arith.constant dense<0.000000e+00> : vector<2x512xf32>
    %68 = tpu.matmul %65, %67, %cst_52 {dimension_numbers = #tpu.dot_dimension_numbers<[1], [0], [0], [1], [0, 0, 1, 1], [], []>} : vector<2x256xbf16>, vector<256x512xbf16>, vector<2x512xf32> -> vector<2x512xf32>
    %69 = arith.addf %52, %68 : vector<2x512xf32>
    %c4 = arith.constant 4 : index
    %c0_53 = arith.constant 0 : index
    %c0_54 = arith.constant 0 : index
    %70 = vector.load %arg0[%c4, %c0_53, %c0_54] : memref<9x2x1152xbf16, #tpu.memory_space<vmem>>, vector<1x2x1152xbf16>
    %71 = vector.shape_cast %70 : vector<1x2x1152xbf16> to vector<2x1152xbf16>
    %c0_55 = arith.constant 0 : index
    %c0_56 = arith.constant 0 : index
    %72 = vector.load %arg1[%c0_55, %c0_56] : memref<1152x256xbf16, #tpu.memory_space<vmem>>, vector<1152x256xbf16>
    %cst_57 = arith.constant dense<0.000000e+00> : vector<2x256xf32>
    %73 = tpu.matmul %71, %72, %cst_57 {dimension_numbers = #tpu.dot_dimension_numbers<[1], [0], [0], [1], [0, 0, 1, 1], [], []>} : vector<2x1152xbf16>, vector<1152x256xbf16>, vector<2x256xf32> -> vector<2x256xf32>
    %c0_58 = arith.constant 0 : index
    %c0_59 = arith.constant 0 : index
    %74 = vector.load %arg2[%c0_58, %c0_59] : memref<1x256xf32, #tpu.memory_space<vmem>>, vector<1x256xf32>
    %75 = vector.broadcast %74 : vector<1x256xf32> to vector<2x256xf32>
    %76 = arith.addf %73, %75 : vector<2x256xf32>
    %cst_60 = arith.constant 0.000000e+00 : f32
    %77 = vector.broadcast %cst_60 : f32 to vector<2x256xf32>
    %78 = arith.cmpf oge, %76, %77 : vector<2x256xf32>
    %cst_61 = arith.constant 1.000000e-01 : f32
    %79 = vector.broadcast %cst_61 : f32 to vector<2x256xf32>
    %80 = arith.mulf %79, %76 : vector<2x256xf32>
    %81 = arith.select %78, %76, %80 : vector<2x256xi1>, vector<2x256xf32>
    %82 = arith.truncf %81 : vector<2x256xf32> to vector<2x256xbf16>
    %c4_62 = arith.constant 4 : index
    %c0_63 = arith.constant 0 : index
    %c0_64 = arith.constant 0 : index
    %83 = vector.load %arg3[%c4_62, %c0_63, %c0_64] : memref<9x256x512xbf16, #tpu.memory_space<vmem>>, vector<1x256x512xbf16>
    %84 = vector.shape_cast %83 : vector<1x256x512xbf16> to vector<256x512xbf16>
    %cst_65 = arith.constant dense<0.000000e+00> : vector<2x512xf32>
    %85 = tpu.matmul %82, %84, %cst_65 {dimension_numbers = #tpu.dot_dimension_numbers<[1], [0], [0], [1], [0, 0, 1, 1], [], []>} : vector<2x256xbf16>, vector<256x512xbf16>, vector<2x512xf32> -> vector<2x512xf32>
    %86 = arith.addf %69, %85 : vector<2x512xf32>
    %c5 = arith.constant 5 : index
    %c0_66 = arith.constant 0 : index
    %c0_67 = arith.constant 0 : index
    %87 = vector.load %arg0[%c5, %c0_66, %c0_67] : memref<9x2x1152xbf16, #tpu.memory_space<vmem>>, vector<1x2x1152xbf16>
    %88 = vector.shape_cast %87 : vector<1x2x1152xbf16> to vector<2x1152xbf16>
    %c0_68 = arith.constant 0 : index
    %c0_69 = arith.constant 0 : index
    %89 = vector.load %arg1[%c0_68, %c0_69] : memref<1152x256xbf16, #tpu.memory_space<vmem>>, vector<1152x256xbf16>
    %cst_70 = arith.constant dense<0.000000e+00> : vector<2x256xf32>
    %90 = tpu.matmul %88, %89, %cst_70 {dimension_numbers = #tpu.dot_dimension_numbers<[1], [0], [0], [1], [0, 0, 1, 1], [], []>} : vector<2x1152xbf16>, vector<1152x256xbf16>, vector<2x256xf32> -> vector<2x256xf32>
    %c0_71 = arith.constant 0 : index
    %c0_72 = arith.constant 0 : index
    %91 = vector.load %arg2[%c0_71, %c0_72] : memref<1x256xf32, #tpu.memory_space<vmem>>, vector<1x256xf32>
    %92 = vector.broadcast %91 : vector<1x256xf32> to vector<2x256xf32>
    %93 = arith.addf %90, %92 : vector<2x256xf32>
    %cst_73 = arith.constant 0.000000e+00 : f32
    %94 = vector.broadcast %cst_73 : f32 to vector<2x256xf32>
    %95 = arith.cmpf oge, %93, %94 : vector<2x256xf32>
    %cst_74 = arith.constant 1.000000e-01 : f32
    %96 = vector.broadcast %cst_74 : f32 to vector<2x256xf32>
    %97 = arith.mulf %96, %93 : vector<2x256xf32>
    %98 = arith.select %95, %93, %97 : vector<2x256xi1>, vector<2x256xf32>
    %99 = arith.truncf %98 : vector<2x256xf32> to vector<2x256xbf16>
    %c5_75 = arith.constant 5 : index
    %c0_76 = arith.constant 0 : index
    %c0_77 = arith.constant 0 : index
    %100 = vector.load %arg3[%c5_75, %c0_76, %c0_77] : memref<9x256x512xbf16, #tpu.memory_space<vmem>>, vector<1x256x512xbf16>
    %101 = vector.shape_cast %100 : vector<1x256x512xbf16> to vector<256x512xbf16>
    %cst_78 = arith.constant dense<0.000000e+00> : vector<2x512xf32>
    %102 = tpu.matmul %99, %101, %cst_78 {dimension_numbers = #tpu.dot_dimension_numbers<[1], [0], [0], [1], [0, 0, 1, 1], [], []>} : vector<2x256xbf16>, vector<256x512xbf16>, vector<2x512xf32> -> vector<2x512xf32>
    %103 = arith.addf %86, %102 : vector<2x512xf32>
    %c6 = arith.constant 6 : index
    %c0_79 = arith.constant 0 : index
    %c0_80 = arith.constant 0 : index
    %104 = vector.load %arg0[%c6, %c0_79, %c0_80] : memref<9x2x1152xbf16, #tpu.memory_space<vmem>>, vector<1x2x1152xbf16>
    %105 = vector.shape_cast %104 : vector<1x2x1152xbf16> to vector<2x1152xbf16>
    %c0_81 = arith.constant 0 : index
    %c0_82 = arith.constant 0 : index
    %106 = vector.load %arg1[%c0_81, %c0_82] : memref<1152x256xbf16, #tpu.memory_space<vmem>>, vector<1152x256xbf16>
    %cst_83 = arith.constant dense<0.000000e+00> : vector<2x256xf32>
    %107 = tpu.matmul %105, %106, %cst_83 {dimension_numbers = #tpu.dot_dimension_numbers<[1], [0], [0], [1], [0, 0, 1, 1], [], []>} : vector<2x1152xbf16>, vector<1152x256xbf16>, vector<2x256xf32> -> vector<2x256xf32>
    %c0_84 = arith.constant 0 : index
    %c0_85 = arith.constant 0 : index
    %108 = vector.load %arg2[%c0_84, %c0_85] : memref<1x256xf32, #tpu.memory_space<vmem>>, vector<1x256xf32>
    %109 = vector.broadcast %108 : vector<1x256xf32> to vector<2x256xf32>
    %110 = arith.addf %107, %109 : vector<2x256xf32>
    %cst_86 = arith.constant 0.000000e+00 : f32
    %111 = vector.broadcast %cst_86 : f32 to vector<2x256xf32>
    %112 = arith.cmpf oge, %110, %111 : vector<2x256xf32>
    %cst_87 = arith.constant 1.000000e-01 : f32
    %113 = vector.broadcast %cst_87 : f32 to vector<2x256xf32>
    %114 = arith.mulf %113, %110 : vector<2x256xf32>
    %115 = arith.select %112, %110, %114 : vector<2x256xi1>, vector<2x256xf32>
    %116 = arith.truncf %115 : vector<2x256xf32> to vector<2x256xbf16>
    %c6_88 = arith.constant 6 : index
    %c0_89 = arith.constant 0 : index
    %c0_90 = arith.constant 0 : index
    %117 = vector.load %arg3[%c6_88, %c0_89, %c0_90] : memref<9x256x512xbf16, #tpu.memory_space<vmem>>, vector<1x256x512xbf16>
    %118 = vector.shape_cast %117 : vector<1x256x512xbf16> to vector<256x512xbf16>
    %cst_91 = arith.constant dense<0.000000e+00> : vector<2x512xf32>
    %119 = tpu.matmul %116, %118, %cst_91 {dimension_numbers = #tpu.dot_dimension_numbers<[1], [0], [0], [1], [0, 0, 1, 1], [], []>} : vector<2x256xbf16>, vector<256x512xbf16>, vector<2x512xf32> -> vector<2x512xf32>
    %120 = arith.addf %103, %119 : vector<2x512xf32>
    %c7 = arith.constant 7 : index
    %c0_92 = arith.constant 0 : index
    %c0_93 = arith.constant 0 : index
    %121 = vector.load %arg0[%c7, %c0_92, %c0_93] : memref<9x2x1152xbf16, #tpu.memory_space<vmem>>, vector<1x2x1152xbf16>
    %122 = vector.shape_cast %121 : vector<1x2x1152xbf16> to vector<2x1152xbf16>
    %c0_94 = arith.constant 0 : index
    %c0_95 = arith.constant 0 : index
    %123 = vector.load %arg1[%c0_94, %c0_95] : memref<1152x256xbf16, #tpu.memory_space<vmem>>, vector<1152x256xbf16>
    %cst_96 = arith.constant dense<0.000000e+00> : vector<2x256xf32>
    %124 = tpu.matmul %122, %123, %cst_96 {dimension_numbers = #tpu.dot_dimension_numbers<[1], [0], [0], [1], [0, 0, 1, 1], [], []>} : vector<2x1152xbf16>, vector<1152x256xbf16>, vector<2x256xf32> -> vector<2x256xf32>
    %c0_97 = arith.constant 0 : index
    %c0_98 = arith.constant 0 : index
    %125 = vector.load %arg2[%c0_97, %c0_98] : memref<1x256xf32, #tpu.memory_space<vmem>>, vector<1x256xf32>
    %126 = vector.broadcast %125 : vector<1x256xf32> to vector<2x256xf32>
    %127 = arith.addf %124, %126 : vector<2x256xf32>
    %cst_99 = arith.constant 0.000000e+00 : f32
    %128 = vector.broadcast %cst_99 : f32 to vector<2x256xf32>
    %129 = arith.cmpf oge, %127, %128 : vector<2x256xf32>
    %cst_100 = arith.constant 1.000000e-01 : f32
    %130 = vector.broadcast %cst_100 : f32 to vector<2x256xf32>
    %131 = arith.mulf %130, %127 : vector<2x256xf32>
    %132 = arith.select %129, %127, %131 : vector<2x256xi1>, vector<2x256xf32>
    %133 = arith.truncf %132 : vector<2x256xf32> to vector<2x256xbf16>
    %c7_101 = arith.constant 7 : index
    %c0_102 = arith.constant 0 : index
    %c0_103 = arith.constant 0 : index
    %134 = vector.load %arg3[%c7_101, %c0_102, %c0_103] : memref<9x256x512xbf16, #tpu.memory_space<vmem>>, vector<1x256x512xbf16>
    %135 = vector.shape_cast %134 : vector<1x256x512xbf16> to vector<256x512xbf16>
    %cst_104 = arith.constant dense<0.000000e+00> : vector<2x512xf32>
    %136 = tpu.matmul %133, %135, %cst_104 {dimension_numbers = #tpu.dot_dimension_numbers<[1], [0], [0], [1], [0, 0, 1, 1], [], []>} : vector<2x256xbf16>, vector<256x512xbf16>, vector<2x512xf32> -> vector<2x512xf32>
    %137 = arith.addf %120, %136 : vector<2x512xf32>
    %c8 = arith.constant 8 : index
    %c0_105 = arith.constant 0 : index
    %c0_106 = arith.constant 0 : index
    %138 = vector.load %arg0[%c8, %c0_105, %c0_106] : memref<9x2x1152xbf16, #tpu.memory_space<vmem>>, vector<1x2x1152xbf16>
    %139 = vector.shape_cast %138 : vector<1x2x1152xbf16> to vector<2x1152xbf16>
    %c0_107 = arith.constant 0 : index
    %c0_108 = arith.constant 0 : index
    %140 = vector.load %arg1[%c0_107, %c0_108] : memref<1152x256xbf16, #tpu.memory_space<vmem>>, vector<1152x256xbf16>
    %cst_109 = arith.constant dense<0.000000e+00> : vector<2x256xf32>
    %141 = tpu.matmul %139, %140, %cst_109 {dimension_numbers = #tpu.dot_dimension_numbers<[1], [0], [0], [1], [0, 0, 1, 1], [], []>} : vector<2x1152xbf16>, vector<1152x256xbf16>, vector<2x256xf32> -> vector<2x256xf32>
    %c0_110 = arith.constant 0 : index
    %c0_111 = arith.constant 0 : index
    %142 = vector.load %arg2[%c0_110, %c0_111] : memref<1x256xf32, #tpu.memory_space<vmem>>, vector<1x256xf32>
    %143 = vector.broadcast %142 : vector<1x256xf32> to vector<2x256xf32>
    %144 = arith.addf %141, %143 : vector<2x256xf32>
    %cst_112 = arith.constant 0.000000e+00 : f32
    %145 = vector.broadcast %cst_112 : f32 to vector<2x256xf32>
    %146 = arith.cmpf oge, %144, %145 : vector<2x256xf32>
    %cst_113 = arith.constant 1.000000e-01 : f32
    %147 = vector.broadcast %cst_113 : f32 to vector<2x256xf32>
    %148 = arith.mulf %147, %144 : vector<2x256xf32>
    %149 = arith.select %146, %144, %148 : vector<2x256xi1>, vector<2x256xf32>
    %150 = arith.truncf %149 : vector<2x256xf32> to vector<2x256xbf16>
    %c8_114 = arith.constant 8 : index
    %c0_115 = arith.constant 0 : index
    %c0_116 = arith.constant 0 : index
    %151 = vector.load %arg3[%c8_114, %c0_115, %c0_116] : memref<9x256x512xbf16, #tpu.memory_space<vmem>>, vector<1x256x512xbf16>
    %152 = vector.shape_cast %151 : vector<1x256x512xbf16> to vector<256x512xbf16>
    %cst_117 = arith.constant dense<0.000000e+00> : vector<2x512xf32>
    %153 = tpu.matmul %150, %152, %cst_117 {dimension_numbers = #tpu.dot_dimension_numbers<[1], [0], [0], [1], [0, 0, 1, 1], [], []>} : vector<2x256xbf16>, vector<256x512xbf16>, vector<2x512xf32> -> vector<2x512xf32>
    %154 = arith.addf %137, %153 : vector<2x512xf32>
    %cst_118 = arith.constant 0.000000e+00 : f32
    %155 = vector.broadcast %cst_118 : f32 to vector<2x512xf32>
    %156 = arith.cmpf oge, %154, %155 : vector<2x512xf32>
    %cst_119 = arith.constant 1.000000e-01 : f32
    %157 = vector.broadcast %cst_119 : f32 to vector<2x512xf32>
    %158 = arith.mulf %157, %154 : vector<2x512xf32>
    %159 = arith.select %156, %154, %158 : vector<2x512xi1>, vector<2x512xf32>
    %160 = arith.truncf %159 : vector<2x512xf32> to vector<2x512xbf16>
    %c0_120 = arith.constant 0 : index
    %c0_121 = arith.constant 0 : index
    %161 = vector.load %arg5[%c0_120, %c0_121] : memref<512x128xbf16, #tpu.memory_space<vmem>>, vector<512x128xbf16>
    %cst_122 = arith.constant dense<0.000000e+00> : vector<2x128xf32>
    %162 = tpu.matmul %160, %161, %cst_122 {dimension_numbers = #tpu.dot_dimension_numbers<[1], [0], [0], [1], [0, 0, 1, 1], [], []>} : vector<2x512xbf16>, vector<512x128xbf16>, vector<2x128xf32> -> vector<2x128xf32>
    %c0_123 = arith.constant 0 : index
    %c0_124 = arith.constant 0 : index
    %163 = vector.load %arg6[%c0_123, %c0_124] : memref<1x128xf32, #tpu.memory_space<vmem>>, vector<1x128xf32>
    %164 = vector.broadcast %163 : vector<1x128xf32> to vector<2x128xf32>
    %165 = arith.addf %162, %164 : vector<2x128xf32>
    %cst_125 = arith.constant 0.000000e+00 : f32
    %166 = vector.broadcast %cst_125 : f32 to vector<2x128xf32>
    %167 = arith.cmpf oge, %165, %166 : vector<2x128xf32>
    %cst_126 = arith.constant 1.000000e-01 : f32
    %168 = vector.broadcast %cst_126 : f32 to vector<2x128xf32>
    %169 = arith.mulf %168, %165 : vector<2x128xf32>
    %170 = arith.select %167, %165, %169 : vector<2x128xi1>, vector<2x128xf32>
    %171 = arith.truncf %170 : vector<2x128xf32> to vector<2x128xbf16>
    %c0_127 = arith.constant 0 : index
    %c0_128 = arith.constant 0 : index
    %172 = vector.load %arg7[%c0_127, %c0_128] : memref<128x1024xbf16, #tpu.memory_space<vmem>>, vector<128x1024xbf16>
    %cst_129 = arith.constant dense<0.000000e+00> : vector<2x1024xf32>
    %173 = tpu.matmul %171, %172, %cst_129 {dimension_numbers = #tpu.dot_dimension_numbers<[1], [0], [0], [1], [0, 0, 1, 1], [], []>} : vector<2x128xbf16>, vector<128x1024xbf16>, vector<2x1024xf32> -> vector<2x1024xf32>
    %c0_130 = arith.constant 0 : index
    %c0_131 = arith.constant 0 : index
    %174 = vector.load %arg8[%c0_130, %c0_131] : memref<1x1024xf32, #tpu.memory_space<vmem>>, vector<1x1024xf32>
    %175 = vector.broadcast %174 : vector<1x1024xf32> to vector<2x1024xf32>
    %176 = arith.addf %173, %175 : vector<2x1024xf32>
    %cst_132 = arith.constant 0.000000e+00 : f32
    %177 = vector.broadcast %cst_132 : f32 to vector<2x1024xf32>
    %178 = arith.cmpf oge, %176, %177 : vector<2x1024xf32>
    %cst_133 = arith.constant 2.000000e-01 : f32
    %179 = vector.broadcast %cst_133 : f32 to vector<2x1024xf32>
    %180 = arith.mulf %179, %176 : vector<2x1024xf32>
    %181 = arith.select %178, %176, %180 : vector<2x1024xi1>, vector<2x1024xf32>
    %182 = arith.truncf %181 : vector<2x1024xf32> to vector<2x1024xbf16>
    %c0_134 = arith.constant 0 : index
    %c0_135 = arith.constant 0 : index
    %183 = vector.load %arg9[%c0_134, %c0_135] : memref<1024x256xbf16, #tpu.memory_space<vmem>>, vector<1024x256xbf16>
    %cst_136 = arith.constant dense<0.000000e+00> : vector<2x256xf32>
    %184 = tpu.matmul %182, %183, %cst_136 {dimension_numbers = #tpu.dot_dimension_numbers<[1], [0], [0], [1], [0, 0, 1, 1], [], []>} : vector<2x1024xbf16>, vector<1024x256xbf16>, vector<2x256xf32> -> vector<2x256xf32>
    %c0_137 = arith.constant 0 : index
    %c0_138 = arith.constant 0 : index
    %185 = vector.load %arg10[%c0_137, %c0_138] : memref<1x256xf32, #tpu.memory_space<vmem>>, vector<1x256xf32>
    %186 = vector.broadcast %185 : vector<1x256xf32> to vector<2x256xf32>
    %187 = arith.addf %184, %186 : vector<2x256xf32>
    %cst_139 = arith.constant 0.000000e+00 : f32
    %188 = vector.broadcast %cst_139 : f32 to vector<2x256xf32>
    %189 = arith.cmpf oge, %187, %188 : vector<2x256xf32>
    %cst_140 = arith.constant 2.000000e-01 : f32
    %190 = vector.broadcast %cst_140 : f32 to vector<2x256xf32>
    %191 = arith.mulf %190, %187 : vector<2x256xf32>
    %192 = arith.select %189, %187, %191 : vector<2x256xi1>, vector<2x256xf32>
    %193 = arith.truncf %192 : vector<2x256xf32> to vector<2x256xbf16>
    %c0_141 = arith.constant 0 : index
    %c0_142 = arith.constant 0 : index
    %194 = vector.load %arg11[%c0_141, %c0_142] : memref<256x128xbf16, #tpu.memory_space<vmem>>, vector<256x128xbf16>
    %cst_143 = arith.constant dense<0.000000e+00> : vector<2x128xf32>
    %195 = tpu.matmul %193, %194, %cst_143 {dimension_numbers = #tpu.dot_dimension_numbers<[1], [0], [0], [1], [0, 0, 1, 1], [], []>} : vector<2x256xbf16>, vector<256x128xbf16>, vector<2x128xf32> -> vector<2x128xf32>
    %c0_144 = arith.constant 0 : index
    %c0_145 = arith.constant 0 : index
    %196 = vector.load %arg12[%c0_144, %c0_145] : memref<1x128xf32, #tpu.memory_space<vmem>>, vector<1x128xf32>
    %197 = vector.broadcast %196 : vector<1x128xf32> to vector<2x128xf32>
    %198 = arith.addf %195, %197 : vector<2x128xf32>
    %cst_146 = arith.constant 0.000000e+00 : f32
    %199 = vector.broadcast %cst_146 : f32 to vector<2x128xf32>
    %200 = arith.cmpf oge, %198, %199 : vector<2x128xf32>
    %cst_147 = arith.constant 2.000000e-01 : f32
    %201 = vector.broadcast %cst_147 : f32 to vector<2x128xf32>
    %202 = arith.mulf %201, %198 : vector<2x128xf32>
    %203 = arith.select %200, %198, %202 : vector<2x128xi1>, vector<2x128xf32>
    %204 = arith.truncf %203 : vector<2x128xf32> to vector<2x128xbf16>
    %c0_148 = arith.constant 0 : index
    %c0_149 = arith.constant 0 : index
    %205 = vector.load %arg13[%c0_148, %c0_149] : memref<128x128xbf16, #tpu.memory_space<vmem>>, vector<128x128xbf16>
    %cst_150 = arith.constant dense<0.000000e+00> : vector<2x128xf32>
    %206 = tpu.matmul %204, %205, %cst_150 {dimension_numbers = #tpu.dot_dimension_numbers<[1], [0], [0], [1], [0, 0, 1, 1], [], []>} : vector<2x128xbf16>, vector<128x128xbf16>, vector<2x128xf32> -> vector<2x128xf32>
    %c0_151 = arith.constant 0 : index
    %c0_152 = arith.constant 0 : index
    %207 = vector.load %arg14[%c0_151, %c0_152] : memref<1x128xf32, #tpu.memory_space<vmem>>, vector<1x128xf32>
    %208 = vector.broadcast %207 : vector<1x128xf32> to vector<2x128xf32>
    %209 = arith.addf %206, %208 : vector<2x128xf32>
    %cst_153 = arith.constant 0.000000e+00 : f32
    %210 = vector.broadcast %cst_153 : f32 to vector<2x128xf32>
    %211 = arith.cmpf oge, %209, %210 : vector<2x128xf32>
    %cst_154 = arith.constant 2.000000e-01 : f32
    %212 = vector.broadcast %cst_154 : f32 to vector<2x128xf32>
    %213 = arith.mulf %212, %209 : vector<2x128xf32>
    %214 = arith.select %211, %209, %213 : vector<2x128xi1>, vector<2x128xf32>
    %215 = arith.truncf %214 : vector<2x128xf32> to vector<2x128xbf16>
    %c0_155 = arith.constant 0 : index
    %c0_156 = arith.constant 0 : index
    %216 = vector.load %arg15[%c0_155, %c0_156] : memref<128x128xbf16, #tpu.memory_space<vmem>>, vector<128x128xbf16>
    %cst_157 = arith.constant dense<0.000000e+00> : vector<2x128xf32>
    %217 = tpu.matmul %215, %216, %cst_157 {dimension_numbers = #tpu.dot_dimension_numbers<[1], [0], [0], [1], [0, 0, 1, 1], [], []>} : vector<2x128xbf16>, vector<128x128xbf16>, vector<2x128xf32> -> vector<2x128xf32>
    %c0_158 = arith.constant 0 : index
    %c0_159 = arith.constant 0 : index
    %218 = vector.load %arg16[%c0_158, %c0_159] : memref<1x128xf32, #tpu.memory_space<vmem>>, vector<1x128xf32>
    %219 = vector.broadcast %218 : vector<1x128xf32> to vector<2x128xf32>
    %220 = arith.addf %217, %219 : vector<2x128xf32>
    %cst_160 = arith.constant 0.000000e+00 : f32
    %221 = vector.broadcast %cst_160 : f32 to vector<2x128xf32>
    %222 = arith.cmpf oge, %220, %221 : vector<2x128xf32>
    %cst_161 = arith.constant 2.000000e-01 : f32
    %223 = vector.broadcast %cst_161 : f32 to vector<2x128xf32>
    %224 = arith.mulf %223, %220 : vector<2x128xf32>
    %225 = arith.select %222, %220, %224 : vector<2x128xi1>, vector<2x128xf32>
    %c0_162 = arith.constant 0 : index
    %c0_163 = arith.constant 0 : index
    %226 = vector.load %arg17[%c0_162, %c0_163] : memref<2x128xf32, #tpu.memory_space<vmem>>, vector<2x128xf32>
    tpu.vector_store %arg17[%c0_162, %c0_163], %225 {strides = array<i32>} : memref<2x128xf32, #tpu.memory_space<vmem>>, vector<2x128xf32>,
    return
  }
}

</mosaic_0001>

<bundles_post_ra>
// kernel: translation_subnet_forward.3
= control target key start
LH: loop header
LB: loop body
LE: loop exit
PB: predicated region body
PF: predicated region fallthrough
CT: control target
= control target key end

     0   :  { %s1743_s12 = smov 0   ;;  %s1745_s13 = smov 0   ;;  %s2137_s0 = inlined_call_operand.vmem [shape: bf16[578,54], index: 0, kind: input, shape index: {}]   ;;  %s2138_s1 = inlined_call_operand.vmem [shape: bf16[54,64], index: 1, kind: input, shape index: {}]   ;;  %s2139_s2 = inlined_call_operand.vmem [shape: f32[1,64], index: 2, kind: input, shape index: {}]   ;;  %s2140_s3 = inlined_call_operand.vmem [shape: bf16[578,64], index: 3, kind: output, shape index: {}]  }
   0x1   :  { %s1747_s14 = smov 0  }
   0x2 LB: > { %s1756_s15 = sadd.s32 4294967295, %s1687_s14   ;;  %s1758_s16 = sadd.s32 1, %s1687_s14   ;;  %s1687_s14 = sphi %s1747_s14, %s2147_s14   ;;  %s1683_s13 = sphi %s1745_s13, %s2146_s13   ;;  %s1679_s12 = sphi %s1743_s12, %s2145_s12  }
   0x3   : > { %s85_s17 = ssub.s32 %s1687_s14, %s1758_s16  ;;  %s88_s18 = sadd.s32 1, %s1683_s13 }
   0x4   : > { %p86_p0 = scmp.eq.s32.totalorder %s85_s17, 0  ;;  %p98_p1 = scmp.ne.s32.totalorder %s1683_s13, %s1679_s12 }
   0x5   : > { %p99_p2 = scmp.eq.s32.totalorder %s1756_s15, 1  ;;  %p1267_p3 = scmp.ge.s32.totalorder %s1687_s14, 1 }
   0x6   : > { %s1766_s19 = scalar_select %p86_p0, %s1683_s13, %s88_s18  }
   0x7   : > { %p1768_p4 = por %p99_p2, %p98_p1  ;;  %p146_p5 = scmp.lt.s32.totalorder %s1687_s14, 3 }
   0x9   : > { %p147_p6 = pnand %p1267_p3, %p146_p5 }
   0xa   : > { %s1783_s25 = smul.u32 (!%p147_p6), 37, %s1756_s15  ;;  %s170_s8 = sand.u32 (!%p147_p6), 1, %s1679_s12  }
   0xb   : > { %150 = sbr.rel (%p147_p6) target bundleno = 388 (0x184), region = 32 }
   0xc   : > { %p178_p7 = scmp.lt.s32.totalorder (!%p147_p6), %s1783_s25, 72  ;;  %s1514_s11 = smul.u32 (!%p147_p6), 148, %s170_s8 }
   0xe   : > { %s1888_s12 = scalar_lea.vmem (!%p147_p6), [#allocation2], %s1514_s11  }
  0x10   : > { %v1606_v0 = vld [vmem:[%s2138_s1 + $0x18] ss:$0 sps:$4 sm:$0x77]   ;;  %v1721_v1 = vmov 0.0   ;;  %vm416_vm0 = vcmask 1042432   ;;  %v1607_v3 = vld [vmem:[%s2138_s1 + $0x10] sm:$0xff]  }
  0x11   : > { %1422 = vmatprep.subr.bf16.mxu0 %v1721_v1  ;;  %1506 = vmatprep.subr.bf16.mxu1 %v1721_v1  ;;  %v418_v2 = vsel %vm416_vm0, %v1606_v0, 0  ;;  %vm1722_vm1 = vmmov 0   ;;  %v1608_v4 = vld [vmem:[%s2138_s1 + $0x8] sm:$0xff]   ;;  %s179_s28 = scalar_select %p178_p7, %s1783_s25, 72  ;;  %v1609_v5 = vld [vmem:[%s2138_s1] sm:$0xff]   ;;  %vm358_vm2 = vcmask 441344  }
  0x12   : > { %1423 = vmatpush3.bf16.msra.mxu0 %v418_v2  ;;  %1510 = vmatpush3.bf16.msra.mxu1 %v418_v2  ;;  %v1882_v25 = vld [vmem:[%s2139_s2] ss:$0 sm:$0xff]  ;;  %vm864_vm5 = vcmask 519168   ;;  %s910_s14 = ssub.s32 (%p1768_p4), 73, %s1783_s25  ;;  %s1398_s17 = smul.u32 (%p1768_p4), 148, %s1756_s15 }
  0x13   : > { %1424 = vmatprep.subr.bf16.mxu0 %v1721_v1  ;;  %1507 = vmatprep.subr.bf16.mxu1 %v1721_v1  ;;  %s1268_s29 = sshll.u32 %s179_s28, 2  ;;  %p911_p8 = scmp.lt.s32.totalorder (%p1768_p4), %s910_s14, 37 }
  0x14   : > { %1430 = vmatprep.mubr.msk.bf16.mxu0 %vm1722_vm1, %v1721_v1  ;;  %1470 = vmatprep.mubr.msk.bf16.mxu1 %vm1722_vm1, %v1721_v1  ;;  %s1802_s7 = scalar_lea.vmem %s2137_s0, %s1268_s29  ;;  %s2004_s22 = scalar_lea.vmem (%p1768_p4), %s2140_s3, %s1398_s17  }
  0x15   : > { %v1610_v6 = vld [vmem:[%s1802_s7] sm:$0xff]   ;;  %v1611_v7 = vld [vmem:[%s1802_s7 + $0x50] sm:$0xff]   ;;  %v1612_v8 = vld [vmem:[%s1802_s7 + $0x8] sm:$0xff]  }
  0x16   : > { %1425 = vmatpush3.bf16.msra.mxu0 %v1607_v3  ;;  %1511 = vmatpush3.bf16.msra.mxu1 %v1607_v3  ;;  %v1613_v9 = vld [vmem:[%s1802_s7 + $0x58] sm:$0xff]   ;;  %v1614_v10 = vld [vmem:[%s1802_s7 + $0x10] sm:$0xff]   ;;  %v1615_v11 = vld [vmem:[%s1802_s7 + $0x60] sm:$0xff]  }
  0x17   : > { %1426 = vmatprep.subr.bf16.mxu0 %v1721_v1  ;;  %1508 = vmatprep.subr.bf16.mxu1 %v1721_v1  ;;  %v1616_v12 = vld [vmem:[%s1802_s7 + $0x18] sm:$0xff]   ;;  %v1617_v13 = vld [vmem:[%s1802_s7 + $0x68] sm:$0xff]   ;;  %v1618_v14 = vld [vmem:[%s1802_s7 + $0x20] sm:$0xff]  }
  0x18   : > { %v1619_v15 = vld [vmem:[%s1802_s7 + $0x70] sm:$0xff]   ;;  %v1620_v16 = vld [vmem:[%s1802_s7 + $0x28] sm:$0xff]   ;;  %v1621_v17 = vld [vmem:[%s1802_s7 + $0x78] sm:$0xff]  }
  0x19   : > { %v1622_v18 = vld [vmem:[%s1802_s7 + $0x30] sm:$0xff]   ;;  %v1623_v19 = vld [vmem:[%s1802_s7 + $0x80] sm:$0xff]   ;;  %v1624_v20 = vld [vmem:[%s1802_s7 + $0x38] sm:$0xff]  }
  0x1a   : > { %1427 = vmatpush3.bf16.msra.mxu0 %v1608_v4  ;;  %1512 = vmatpush3.bf16.msra.mxu1 %v1608_v4  ;;  %v1625_v21 = vld [vmem:[%s1802_s7 + $0x88] sm:$0xff]   ;;  %v1626_v22 = vld [vmem:[%s1802_s7 + $0x40] sm:$0xff]   ;;  %v1627_v23 = vld [vmem:[%s1802_s7 + $0x90] ss:$0 sps:$4 sm:$0xff]  }
  0x1b   : > { %1428 = vmatprep.subr.bf16.mxu0 %v1721_v1  ;;  %1509 = vmatprep.subr.bf16.mxu1 %v1721_v1  ;;  %v1628_v24 = vld [vmem:[%s1802_s7 + $0x48] sm:$0xff]  }
  0x1e   : > { %1429 = vmatpush3.bf16.msra.mxu0 %v1609_v5  ;;  %1513 = vmatpush3.bf16.msra.mxu1 %v1609_v5 }
  0x21   : > { %1431 = vmatmul.mubr.msk.bf16.vlgmr.msra.gmra.mxu0 %vm358_vm2, %v1610_v6  ;;  %1471 = vmatmul.mubr.msk.bf16.vlgmr.msra.gmra.mxu1 %vm358_vm2, %v1611_v7 }
  0x22   : > { %1434 = vmatprep.mubr.msk.bf16.mxu0 %vm1722_vm1, %v1721_v1  ;;  %1474 = vmatprep.mubr.msk.bf16.mxu1 %vm1722_vm1, %v1721_v1 }
  0x29   : > { %1435 = vmatmul.mubr.msk.bf16.gmra.mxu0 %vm358_vm2, %v1612_v8  ;;  %1475 = vmatmul.mubr.msk.bf16.gmra.mxu1 %vm358_vm2, %v1613_v9 }
  0x2a   : > { %1438 = vmatprep.mubr.msk.bf16.mxu0 %vm1722_vm1, %v1721_v1  ;;  %1478 = vmatprep.mubr.msk.bf16.mxu1 %vm1722_vm1, %v1721_v1 }
  0x31   : > { %1439 = vmatmul.mubr.msk.bf16.gmra.mxu0 %vm358_vm2, %v1614_v10  ;;  %1479 = vmatmul.mubr.msk.bf16.gmra.mxu1 %vm358_vm2, %v1615_v11 }
  0x32   : > { %1442 = vmatprep.mubr.msk.bf16.mxu0 %vm1722_vm1, %v1721_v1  ;;  %1482 = vmatprep.mubr.msk.bf16.mxu1 %vm1722_vm1, %v1721_v1 }
  0x39   : > { %1443 = vmatmul.mubr.msk.bf16.gmra.mxu0 %vm358_vm2, %v1616_v12  ;;  %1483 = vmatmul.mubr.msk.bf16.gmra.mxu1 %vm358_vm2, %v1617_v13 }
  0x3a   : > { %1446 = vmatprep.mubr.msk.bf16.mxu0 %vm1722_vm1, %v1721_v1  ;;  %1486 = vmatprep.mubr.msk.bf16.mxu1 %vm1722_vm1, %v1721_v1 }
  0x41   : > { %1447 = vmatmul.mubr.msk.bf16.gmra.mxu0 %vm358_vm2, %v1618_v14  ;;  %1487 = vmatmul.mubr.msk.bf16.gmra.mxu1 %vm358_vm2, %v1619_v15 }
  0x42   : > { %1450 = vmatprep.mubr.msk.bf16.mxu0 %vm1722_vm1, %v1721_v1  ;;  %1490 = vmatprep.mubr.msk.bf16.mxu1 %vm1722_vm1, %v1721_v1 }
  0x49   : > { %1451 = vmatmul.mubr.msk.bf16.gmra.mxu0 %vm358_vm2, %v1620_v16  ;;  %1491 = vmatmul.mubr.msk.bf16.gmra.mxu1 %vm358_vm2, %v1621_v17 }
  0x4a   : > { %1454 = vmatprep.mubr.msk.bf16.mxu0 %vm1722_vm1, %v1721_v1  ;;  %1494 = vmatprep.mubr.msk.bf16.mxu1 %vm1722_vm1, %v1721_v1 }
  0x51   : > { %1455 = vmatmul.mubr.msk.bf16.gmra.mxu0 %vm358_vm2, %v1622_v18  ;;  %1495 = vmatmul.mubr.msk.bf16.gmra.mxu1 %vm358_vm2, %v1623_v19 }
  0x52   : > { %1458 = vmatprep.mubr.msk.bf16.mxu0 %vm1722_vm1, %v1721_v1  ;;  %1498 = vmatprep.mubr.msk.bf16.mxu1 %vm1722_vm1, %v1721_v1 }
  0x59   : > { %1459 = vmatmul.mubr.msk.bf16.gmra.mxu0 %vm358_vm2, %v1624_v20  ;;  %1499 = vmatmul.mubr.msk.bf16.gmra.mxu1 %vm358_vm2, %v1625_v21 }
  0x5a   : > { %1462 = vmatprep.mubr.msk.bf16.mxu0 %vm1722_vm1, %v1721_v1  ;;  %1502 = vmatprep.mubr.msk.bf16.mxu1 %vm1722_vm1, %v1721_v1 }
  0x61   : > { %1463 = vmatmul.mubr.msk.bf16.gmra.mxu0 %vm358_vm2, %v1626_v22  ;;  %1503 = vmatmul.mubr.msk.bf16.gmra.mxu1 %vm358_vm2, %v1627_v23 }
  0x62   : > { %1466 = vmatprep.mubr.msk.bf16.mxu0 %vm1722_vm1, %v1721_v1 }
  0x69   : > { %1467 = vmatmul.mubr.msk.bf16.gmra.mxu0 %vm358_vm2, %v1628_v24 }
  0xe1   : > { %v454_v26 = vpop.f32.mrf.mxu0  ;;  %v534_v27 = vpop.f32.mrf.mxu1 }
  0xe2   : > { %v455_v28 = vadd.f32 %v1882_v25, %v454_v26  ;;  %v535_v29 = vadd.f32 %v1882_v25, %v534_v27 }
  0xe3   : > { %v1432_v30 = vpop.f32.mrf.mxu0  ;;  %v1472_v31 = vpop.f32.mrf.mxu1 }
  0xe4   : > { %vm604_vm3 = vcmp.ge.f32.partialorder %v455_v28, 0.0  ;;  %v641_v32 = vmul.f32 0.1, %v455_v28  ;;  %vm624_vm4 = vcmp.ge.f32.partialorder %v535_v29, 0.0  ;;  %v661_v33 = vmul.f32 0.1, %v535_v29 }
  0xe5   : > { %v457_v34 = vpop.f32.mrf.mxu0  ;;  %v537_v35 = vpop.f32.mrf.mxu1 }
  0xe6   : > { %v678_v36 = vsel %vm604_vm3, %v455_v28, %v641_v32  ;;  %v458_v37 = vadd.f32 %v1882_v25, %v457_v34  ;;  %v698_v38 = vsel %vm624_vm4, %v535_v29, %v661_v33  ;;  %v538_v39 = vadd.f32 %v1882_v25, %v537_v35 }
  0xe7   : > { %v1361_v40 = vpack.c.bf16 %v678_v36, %v678_v36  ;;  %v1433_v41 = vpop.f32.mrf.mxu0  ;;  %v1381_v42 = vpack.c.bf16 %v698_v38, %v698_v38  ;;  %v1473_v43 = vpop.f32.mrf.mxu1 }
  0xe8   : > { %vm605_vm6 = vcmp.ge.f32.partialorder %v458_v37, 0.0  ;;  %v642_v44 = vmul.f32 0.1, %v458_v37  ;;  %vm625_vm7 = vcmp.ge.f32.partialorder %v538_v39, 0.0  ;;  %v662_v45 = vmul.f32 0.1, %v538_v39 }
  0xe9   : > { %865 = vst.msk [vmem:[%s1888_s12] sm:$0xf] %vm864_vm5, %v1361_v40  ;;  %885 = vst.msk [vmem:[%s1888_s12 + $0x50] sm:$0xf] %vm864_vm5, %v1381_v42  ;;  %v462_v46 = vpop.f32.mrf.mxu0  ;;  %v542_v47 = vpop.f32.mrf.mxu1 }
  0xea   : > { %v679_v48 = vsel %vm605_vm6, %v458_v37, %v642_v44  ;;  %v463_v49 = vadd.f32 %v1882_v25, %v462_v46  ;;  %v699_v50 = vsel %vm625_vm7, %v538_v39, %v662_v45  ;;  %v543_v51 = vadd.f32 %v1882_v25, %v542_v47 }
  0xeb   : > { %v1362_v52 = vpack.c.bf16 %v679_v48, %v679_v48  ;;  %v1436_v53 = vpop.f32.mrf.mxu0  ;;  %v1382_v54 = vpack.c.bf16 %v699_v50, %v699_v50  ;;  %v1476_v55 = vpop.f32.mrf.mxu1 }
  0xec   : > { %vm606_vm8 = vcmp.ge.f32.partialorder %v463_v49, 0.0  ;;  %v643_v56 = vmul.f32 0.1, %v463_v49  ;;  %vm626_vm9 = vcmp.ge.f32.partialorder %v543_v51, 0.0  ;;  %v663_v57 = vmul.f32 0.1, %v543_v51 }
  0xed   : > { %866 = vst.msk [vmem:[%s1888_s12 + $0x4] sm:$0xf] %vm864_vm5, %v1362_v52  ;;  %886 = vst.msk [vmem:[%s1888_s12 + $0x54] sm:$0xf] %vm864_vm5, %v1382_v54  ;;  %v465_v58 = vpop.f32.mrf.mxu0  ;;  %v545_v59 = vpop.f32.mrf.mxu1 }
  0xee   : > { %v680_v60 = vsel %vm606_vm8, %v463_v49, %v643_v56  ;;  %v466_v61 = vadd.f32 %v1882_v25, %v465_v58  ;;  %v700_v62 = vsel %vm626_vm9, %v543_v51, %v663_v57  ;;  %v546_v63 = vadd.f32 %v1882_v25, %v545_v59 }
  0xef   : > { %v1363_v0 = vpack.c.bf16 %v680_v60, %v680_v60  ;;  %v1437_v1 = vpop.f32.mrf.mxu0  ;;  %v1383_v2 = vpack.c.bf16 %v700_v62, %v700_v62  ;;  %v1477_v3 = vpop.f32.mrf.mxu1 }
  0xf0   : > { %vm607_vm10 = vcmp.ge.f32.partialorder %v466_v61, 0.0  ;;  %v644_v4 = vmul.f32 0.1, %v466_v61  ;;  %vm627_vm11 = vcmp.ge.f32.partialorder %v546_v63, 0.0  ;;  %v664_v5 = vmul.f32 0.1, %v546_v63 }
  0xf1   : > { %867 = vst.msk [vmem:[%s1888_s12 + $0x8] sm:$0xf] %vm864_vm5, %v1363_v0  ;;  %887 = vst.msk [vmem:[%s1888_s12 + $0x58] sm:$0xf] %vm864_vm5, %v1383_v2  ;;  %v470_v6 = vpop.f32.mrf.mxu0  ;;  %v550_v7 = vpop.f32.mrf.mxu1 }
  0xf2   : > { %v681_v8 = vsel %vm607_vm10, %v466_v61, %v644_v4  ;;  %v471_v9 = vadd.f32 %v1882_v25, %v470_v6  ;;  %v701_v10 = vsel %vm627_vm11, %v546_v63, %v664_v5  ;;  %v551_v11 = vadd.f32 %v1882_v25, %v550_v7 }
  0xf3   : > { %v1364_v12 = vpack.c.bf16 %v681_v8, %v681_v8  ;;  %v1440_v13 = vpop.f32.mrf.mxu0  ;;  %v1384_v14 = vpack.c.bf16 %v701_v10, %v701_v10  ;;  %v1480_v15 = vpop.f32.mrf.mxu1 }
  0xf4   : > { %vm608_vm12 = vcmp.ge.f32.partialorder %v471_v9, 0.0  ;;  %v645_v16 = vmul.f32 0.1, %v471_v9  ;;  %vm628_vm13 = vcmp.ge.f32.partialorder %v551_v11, 0.0  ;;  %v665_v17 = vmul.f32 0.1, %v551_v11 }
  0xf5   : > { %868 = vst.msk [vmem:[%s1888_s12 + $0xc] sm:$0xf] %vm864_vm5, %v1364_v12  ;;  %888 = vst.msk [vmem:[%s1888_s12 + $0x5c] sm:$0xf] %vm864_vm5, %v1384_v14  ;;  %v473_v18 = vpop.f32.mrf.mxu0  ;;  %v553_v19 = vpop.f32.mrf.mxu1 }
  0xf6   : > { %v682_v20 = vsel %vm608_vm12, %v471_v9, %v645_v16  ;;  %v474_v21 = vadd.f32 %v1882_v25, %v473_v18  ;;  %v702_v22 = vsel %vm628_vm13, %v551_v11, %v665_v17  ;;  %v554_v23 = vadd.f32 %v1882_v25, %v553_v19 }
  0xf7   : > { %v1365_v24 = vpack.c.bf16 %v682_v20, %v682_v20  ;;  %v1441_v26 = vpop.f32.mrf.mxu0  ;;  %v1385_v27 = vpack.c.bf16 %v702_v22, %v702_v22  ;;  %v1481_v28 = vpop.f32.mrf.mxu1 }
  0xf8   : > { %vm609_vm14 = vcmp.ge.f32.partialorder %v474_v21, 0.0  ;;  %v646_v29 = vmul.f32 0.1, %v474_v21  ;;  %vm629_vm15 = vcmp.ge.f32.partialorder %v554_v23, 0.0  ;;  %v666_v30 = vmul.f32 0.1, %v554_v23 }
  0xf9   : > { %869 = vst.msk [vmem:[%s1888_s12 + $0x10] sm:$0xf] %vm864_vm5, %v1365_v24  ;;  %889 = vst.msk [vmem:[%s1888_s12 + $0x60] sm:$0xf] %vm864_vm5, %v1385_v27  ;;  %v478_v31 = vpop.f32.mrf.mxu0  ;;  %v558_v32 = vpop.f32.mrf.mxu1 }
  0xfa   : > { %v683_v33 = vsel %vm609_vm14, %v474_v21, %v646_v29  ;;  %v479_v34 = vadd.f32 %v1882_v25, %v478_v31  ;;  %v703_v35 = vsel %vm629_vm15, %v554_v23, %v666_v30  ;;  %v559_v36 = vadd.f32 %v1882_v25, %v558_v32 }
  0xfb   : > { %v1366_v37 = vpack.c.bf16 %v683_v33, %v683_v33  ;;  %v1444_v38 = vpop.f32.mrf.mxu0  ;;  %v1386_v39 = vpack.c.bf16 %v703_v35, %v703_v35  ;;  %v1484_v40 = vpop.f32.mrf.mxu1 }
  0xfc   : > { %vm610_vm0 = vcmp.ge.f32.partialorder %v479_v34, 0.0  ;;  %v647_v41 = vmul.f32 0.1, %v479_v34  ;;  %vm630_vm1 = vcmp.ge.f32.partialorder %v559_v36, 0.0  ;;  %v667_v42 = vmul.f32 0.1, %v559_v36 }
  0xfd   : > { %870 = vst.msk [vmem:[%s1888_s12 + $0x14] sm:$0xf] %vm864_vm5, %v1366_v37  ;;  %890 = vst.msk [vmem:[%s1888_s12 + $0x64] sm:$0xf] %vm864_vm5, %v1386_v39  ;;  %v481_v43 = vpop.f32.mrf.mxu0  ;;  %v561_v44 = vpop.f32.mrf.mxu1 }
  0xfe   : > { %v684_v45 = vsel %vm610_vm0, %v479_v34, %v647_v41  ;;  %v482_v46 = vadd.f32 %v1882_v25, %v481_v43  ;;  %v704_v47 = vsel %vm630_vm1, %v559_v36, %v667_v42  ;;  %v562_v48 = vadd.f32 %v1882_v25, %v561_v44 }
  0xff   : > { %v1367_v49 = vpack.c.bf16 %v684_v45, %v684_v45  ;;  %v1445_v50 = vpop.f32.mrf.mxu0  ;;  %v1387_v51 = vpack.c.bf16 %v704_v47, %v704_v47  ;;  %v1485_v52 = vpop.f32.mrf.mxu1 }
 0x100   : > { %vm611_vm2 = vcmp.ge.f32.partialorder %v482_v46, 0.0  ;;  %v648_v53 = vmul.f32 0.1, %v482_v46  ;;  %vm631_vm3 = vcmp.ge.f32.partialorder %v562_v48, 0.0  ;;  %v668_v54 = vmul.f32 0.1, %v562_v48 }
 0x101   : > { %871 = vst.msk [vmem:[%s1888_s12 + $0x18] sm:$0xf] %vm864_vm5, %v1367_v49  ;;  %891 = vst.msk [vmem:[%s1888_s12 + $0x68] sm:$0xf] %vm864_vm5, %v1387_v51  ;;  %v486_v55 = vpop.f32.mrf.mxu0  ;;  %v566_v56 = vpop.f32.mrf.mxu1 }
 0x102   : > { %v685_v57 = vsel %vm611_vm2, %v482_v46, %v648_v53  ;;  %v487_v58 = vadd.f32 %v1882_v25, %v486_v55  ;;  %v705_v59 = vsel %vm631_vm3, %v562_v48, %v668_v54  ;;  %v567_v60 = vadd.f32 %v1882_v25, %v566_v56 }
 0x103   : > { %v1368_v61 = vpack.c.bf16 %v685_v57, %v685_v57  ;;  %v1448_v62 = vpop.f32.mrf.mxu0  ;;  %v1388_v63 = vpack.c.bf16 %v705_v59, %v705_v59  ;;  %v1488_v0 = vpop.f32.mrf.mxu1 }
 0x104   : > { %vm612_vm4 = vcmp.ge.f32.partialorder %v487_v58, 0.0  ;;  %v649_v1 = vmul.f32 0.1, %v487_v58  ;;  %vm632_vm6 = vcmp.ge.f32.partialorder %v567_v60, 0.0  ;;  %v669_v2 = vmul.f32 0.1, %v567_v60 }
 0x105   : > { %872 = vst.msk [vmem:[%s1888_s12 + $0x1c] sm:$0xf] %vm864_vm5, %v1368_v61  ;;  %892 = vst.msk [vmem:[%s1888_s12 + $0x6c] sm:$0xf] %vm864_vm5, %v1388_v63  ;;  %v489_v3 = vpop.f32.mrf.mxu0  ;;  %v569_v4 = vpop.f32.mrf.mxu1 }
 0x106   : > { %v686_v5 = vsel %vm612_vm4, %v487_v58, %v649_v1  ;;  %v490_v6 = vadd.f32 %v1882_v25, %v489_v3  ;;  %v706_v7 = vsel %vm632_vm6, %v567_v60, %v669_v2  ;;  %v570_v8 = vadd.f32 %v1882_v25, %v569_v4 }
 0x107   : > { %v1369_v9 = vpack.c.bf16 %v686_v5, %v686_v5  ;;  %v1449_v10 = vpop.f32.mrf.mxu0  ;;  %v1389_v11 = vpack.c.bf16 %v706_v7, %v706_v7  ;;  %v1489_v12 = vpop.f32.mrf.mxu1 }
 0x108   : > { %vm613_vm7 = vcmp.ge.f32.partialorder %v490_v6, 0.0  ;;  %v650_v13 = vmul.f32 0.1, %v490_v6  ;;  %vm633_vm8 = vcmp.ge.f32.partialorder %v570_v8, 0.0  ;;  %v670_v14 = vmul.f32 0.1, %v570_v8 }
 0x109   : > { %873 = vst.msk [vmem:[%s1888_s12 + $0x20] sm:$0xf] %vm864_vm5, %v1369_v9  ;;  %893 = vst.msk [vmem:[%s1888_s12 + $0x70] sm:$0xf] %vm864_vm5, %v1389_v11  ;;  %v494_v15 = vpop.f32.mrf.mxu0  ;;  %v574_v16 = vpop.f32.mrf.mxu1 }
 0x10a   : > { %v687_v17 = vsel %vm613_vm7, %v490_v6, %v650_v13  ;;  %v495_v18 = vadd.f32 %v1882_v25, %v494_v15  ;;  %v707_v19 = vsel %vm633_vm8, %v570_v8, %v670_v14  ;;  %v575_v20 = vadd.f32 %v1882_v25, %v574_v16 }
 0x10b   : > { %v1370_v21 = vpack.c.bf16 %v687_v17, %v687_v17  ;;  %v1452_v22 = vpop.f32.mrf.mxu0  ;;  %v1390_v23 = vpack.c.bf16 %v707_v19, %v707_v19  ;;  %v1492_v24 = vpop.f32.mrf.mxu1 }
 0x10c   : > { %vm614_vm9 = vcmp.ge.f32.partialorder %v495_v18, 0.0  ;;  %v651_v26 = vmul.f32 0.1, %v495_v18  ;;  %vm634_vm10 = vcmp.ge.f32.partialorder %v575_v20, 0.0  ;;  %v671_v27 = vmul.f32 0.1, %v575_v20 }
 0x10d   : > { %874 = vst.msk [vmem:[%s1888_s12 + $0x24] sm:$0xf] %vm864_vm5, %v1370_v21  ;;  %894 = vst.msk [vmem:[%s1888_s12 + $0x74] sm:$0xf] %vm864_vm5, %v1390_v23  ;;  %v497_v28 = vpop.f32.mrf.mxu0  ;;  %v577_v29 = vpop.f32.mrf.mxu1 }
 0x10e   : > { %v688_v30 = vsel %vm614_vm9, %v495_v18, %v651_v26  ;;  %v498_v31 = vadd.f32 %v1882_v25, %v497_v28  ;;  %v708_v32 = vsel %vm634_vm10, %v575_v20, %v671_v27  ;;  %v578_v33 = vadd.f32 %v1882_v25, %v577_v29 }
 0x10f   : > { %v1371_v34 = vpack.c.bf16 %v688_v30, %v688_v30  ;;  %v1453_v35 = vpop.f32.mrf.mxu0  ;;  %v1391_v36 = vpack.c.bf16 %v708_v32, %v708_v32  ;;  %v1493_v37 = vpop.f32.mrf.mxu1 }
 0x110   : > { %vm615_vm11 = vcmp.ge.f32.partialorder %v498_v31, 0.0  ;;  %v652_v38 = vmul.f32 0.1, %v498_v31  ;;  %vm635_vm12 = vcmp.ge.f32.partialorder %v578_v33, 0.0  ;;  %v672_v39 = vmul.f32 0.1, %v578_v33 }
 0x111   : > { %875 = vst.msk [vmem:[%s1888_s12 + $0x28] sm:$0xf] %vm864_vm5, %v1371_v34  ;;  %895 = vst.msk [vmem:[%s1888_s12 + $0x78] sm:$0xf] %vm864_vm5, %v1391_v36  ;;  %v502_v40 = vpop.f32.mrf.mxu0  ;;  %v582_v41 = vpop.f32.mrf.mxu1 }
 0x112   : > { %v689_v42 = vsel %vm615_vm11, %v498_v31, %v652_v38  ;;  %v503_v43 = vadd.f32 %v1882_v25, %v502_v40  ;;  %v709_v44 = vsel %vm635_vm12, %v578_v33, %v672_v39  ;;  %v583_v45 = vadd.f32 %v1882_v25, %v582_v41 }
 0x113   : > { %v1372_v46 = vpack.c.bf16 %v689_v42, %v689_v42  ;;  %v1456_v47 = vpop.f32.mrf.mxu0  ;;  %v1392_v48 = vpack.c.bf16 %v709_v44, %v709_v44  ;;  %v1496_v49 = vpop.f32.mrf.mxu1 }
 0x114   : > { %vm616_vm13 = vcmp.ge.f32.partialorder %v503_v43, 0.0  ;;  %v653_v50 = vmul.f32 0.1, %v503_v43  ;;  %vm636_vm14 = vcmp.ge.f32.partialorder %v583_v45, 0.0  ;;  %v673_v51 = vmul.f32 0.1, %v583_v45 }
 0x115   : > { %876 = vst.msk [vmem:[%s1888_s12 + $0x2c] sm:$0xf] %vm864_vm5, %v1372_v46  ;;  %896 = vst.msk [vmem:[%s1888_s12 + $0x7c] sm:$0xf] %vm864_vm5, %v1392_v48  ;;  %v505_v52 = vpop.f32.mrf.mxu0  ;;  %v585_v53 = vpop.f32.mrf.mxu1 }
 0x116   : > { %v690_v54 = vsel %vm616_vm13, %v503_v43, %v653_v50  ;;  %v506_v55 = vadd.f32 %v1882_v25, %v505_v52  ;;  %v710_v56 = vsel %vm636_vm14, %v583_v45, %v673_v51  ;;  %v586_v57 = vadd.f32 %v1882_v25, %v585_v53 }
 0x117   : > { %v1373_v58 = vpack.c.bf16 %v690_v54, %v690_v54  ;;  %v1457_v59 = vpop.f32.mrf.mxu0  ;;  %v1393_v60 = vpack.c.bf16 %v710_v56, %v710_v56  ;;  %v1497_v61 = vpop.f32.mrf.mxu1 }
 0x118   : > { %vm617_vm15 = vcmp.ge.f32.partialorder %v506_v55, 0.0  ;;  %v654_v62 = vmul.f32 0.1, %v506_v55  ;;  %vm637_vm0 = vcmp.ge.f32.partialorder %v586_v57, 0.0  ;;  %v674_v63 = vmul.f32 0.1, %v586_v57 }
 0x119   : > { %877 = vst.msk [vmem:[%s1888_s12 + $0x30] sm:$0xf] %vm864_vm5, %v1373_v58  ;;  %897 = vst.msk [vmem:[%s1888_s12 + $0x80] sm:$0xf] %vm864_vm5, %v1393_v60  ;;  %v510_v0 = vpop.f32.mrf.mxu0  ;;  %v590_v1 = vpop.f32.mrf.mxu1 }
 0x11a   : > { %v691_v2 = vsel %vm617_vm15, %v506_v55, %v654_v62  ;;  %v511_v3 = vadd.f32 %v1882_v25, %v510_v0  ;;  %v711_v4 = vsel %vm637_vm0, %v586_v57, %v674_v63  ;;  %v591_v5 = vadd.f32 %v1882_v25, %v590_v1 }
 0x11b   : > { %v1374_v6 = vpack.c.bf16 %v691_v2, %v691_v2  ;;  %v1460_v7 = vpop.f32.mrf.mxu0  ;;  %v1394_v8 = vpack.c.bf16 %v711_v4, %v711_v4  ;;  %v1500_v9 = vpop.f32.mrf.mxu1 }
 0x11c   : > { %vm618_vm1 = vcmp.ge.f32.partialorder %v511_v3, 0.0  ;;  %v655_v10 = vmul.f32 0.1, %v511_v3  ;;  %vm638_vm2 = vcmp.ge.f32.partialorder %v591_v5, 0.0  ;;  %v675_v11 = vmul.f32 0.1, %v591_v5 }
 0x11d   : > { %878 = vst.msk [vmem:[%s1888_s12 + $0x34] sm:$0xf] %vm864_vm5, %v1374_v6  ;;  %898 = vst.msk [vmem:[%s1888_s12 + $0x84] sm:$0xf] %vm864_vm5, %v1394_v8  ;;  %v513_v12 = vpop.f32.mrf.mxu0  ;;  %v593_v13 = vpop.f32.mrf.mxu1 }
 0x11e   : > { %v692_v14 = vsel %vm618_vm1, %v511_v3, %v655_v10  ;;  %v514_v15 = vadd.f32 %v1882_v25, %v513_v12  ;;  %v712_v16 = vsel %vm638_vm2, %v591_v5, %v675_v11  ;;  %v594_v17 = vadd.f32 %v1882_v25, %v593_v13 }
 0x11f   : > { %v1375_v18 = vpack.c.bf16 %v692_v14, %v692_v14  ;;  %v1461_v19 = vpop.f32.mrf.mxu0  ;;  %v1395_v20 = vpack.c.bf16 %v712_v16, %v712_v16  ;;  %v1501_v21 = vpop.f32.mrf.mxu1 }
 0x120   : > { %vm619_vm3 = vcmp.ge.f32.partialorder %v514_v15, 0.0  ;;  %v656_v22 = vmul.f32 0.1, %v514_v15  ;;  %vm639_vm4 = vcmp.ge.f32.partialorder %v594_v17, 0.0  ;;  %v676_v23 = vmul.f32 0.1, %v594_v17 }
 0x121   : > { %879 = vst.msk [vmem:[%s1888_s12 + $0x38] sm:$0xf] %vm864_vm5, %v1375_v18  ;;  %899 = vst.msk [vmem:[%s1888_s12 + $0x88] sm:$0xf] %vm864_vm5, %v1395_v20  ;;  %v518_v24 = vpop.f32.mrf.mxu0  ;;  %v598_v26 = vpop.f32.mrf.mxu1 }
 0x122   : > { %v693_v27 = vsel %vm619_vm3, %v514_v15, %v656_v22  ;;  %v519_v28 = vadd.f32 %v1882_v25, %v518_v24  ;;  %v713_v29 = vsel %vm639_vm4, %v594_v17, %v676_v23  ;;  %v599_v30 = vadd.f32 %v1882_v25, %v598_v26 }
 0x123   : > { %v1376_v31 = vpack.c.bf16 %v693_v27, %v693_v27  ;;  %v1464_v32 = vpop.f32.mrf.mxu0  ;;  %v1396_v33 = vpack.c.bf16 %v713_v29, %v713_v29  ;;  %v1504_v34 = vpop.f32.mrf.mxu1 }
 0x124   : > { %vm620_vm6 = vcmp.ge.f32.partialorder %v519_v28, 0.0  ;;  %v657_v35 = vmul.f32 0.1, %v519_v28  ;;  %vm640_vm7 = vcmp.ge.f32.partialorder %v599_v30, 0.0  ;;  %v677_v36 = vmul.f32 0.1, %v599_v30 }
 0x125   : > { %880 = vst.msk [vmem:[%s1888_s12 + $0x3c] sm:$0xf] %vm864_vm5, %v1376_v31  ;;  %900 = vst.msk [vmem:[%s1888_s12 + $0x8c] sm:$0xf] %vm864_vm5, %v1396_v33  ;;  %v521_v37 = vpop.f32.mrf.mxu0  ;;  %v601_v38 = vpop.f32.mrf.mxu1 }
 0x126   : > { %v694_v39 = vsel %vm620_vm6, %v519_v28, %v657_v35  ;;  %v522_v40 = vadd.f32 %v1882_v25, %v521_v37  ;;  %v714_v41 = vsel %vm640_vm7, %v599_v30, %v677_v36 }
 0x127   : > { %v1377_v42 = vpack.c.bf16 %v694_v39, %v694_v39  ;;  %v1465_v43 = vpop.f32.mrf.mxu0  ;;  %v1397_v44 = vpack.c.bf16 %v714_v41, %v714_v41  ;;  %v1505_v45 = vpop.f32.mrf.mxu1 }
 0x128   : > { %vm621_vm8 = vcmp.ge.f32.partialorder %v522_v40, 0.0  ;;  %v658_v46 = vmul.f32 0.1, %v522_v40 }
 0x129   : > { %881 = vst.msk [vmem:[%s1888_s12 + $0x40] sm:$0xf] %vm864_vm5, %v1377_v42  ;;  %901 = vst.msk [vmem:[%s1888_s12 + $0x90] sm:$0xf] %vm864_vm5, %v1397_v44  ;;  %v526_v47 = vpop.f32.mrf.mxu0 }
 0x12a   : > { %v695_v48 = vsel %vm621_vm8, %v522_v40, %v658_v46  ;;  %v527_v49 = vadd.f32 %v1882_v25, %v526_v47 }
 0x12b   : > { %v1378_v50 = vpack.c.bf16 %v695_v48, %v695_v48  ;;  %v1468_v51 = vpop.f32.mrf.mxu0 }
 0x12c   : > { %vm622_vm9 = vcmp.ge.f32.partialorder %v527_v49, 0.0  ;;  %v659_v52 = vmul.f32 0.1, %v527_v49 }
 0x12d   : > { %882 = vst.msk [vmem:[%s1888_s12 + $0x44] sm:$0xf] %vm864_vm5, %v1378_v50  ;;  %v529_v53 = vpop.f32.mrf.mxu0 }
 0x12e   : > { %v696_v54 = vsel %vm622_vm9, %v527_v49, %v659_v52  ;;  %v530_v55 = vadd.f32 %v1882_v25, %v529_v53 }
 0x12f   : > { %v1379_v56 = vpack.c.bf16 %v696_v54, %v696_v54  ;;  %v1469_v57 = vpop.f32.mrf.mxu0 }
 0x130   : > { %vm623_vm10 = vcmp.ge.f32.partialorder %v530_v55, 0.0  ;;  %v660_v58 = vmul.f32 0.1, %v530_v55 }
 0x131   : > { %883 = vst.msk [vmem:[%s1888_s12 + $0x48] sm:$0xf] %vm864_vm5, %v1379_v56  ;;  %908 = sbr.rel (!%p1768_p4) target bundleno = 388 (0x184), region = 36 }
 0x132   : > { %v697_v59 = vsel %vm623_vm10, %v530_v55, %v660_v58 }
 0x133   : > { %v1380_v60 = vpack.c.bf16 %v697_v59, %v697_v59 }
 0x135   : > { %884 = vst.msk [vmem:[%s1888_s12 + $0x4c] sm:$0xf] %vm864_vm5, %v1380_v60 }
 0x136   : > { %s2149_s14 = smov (!%p911_p8, %s910_s14), 37 }
 0x137   : > { %s1349_s23 = sshll.u32 %s2149_s14, 6 }
 0x138   : > { %p1352_p9 = scmp.eq.s32.totalorder %s1349_s23, 0 }
 0x139   : > { %1629 = sdivrem.u32 (!%p1352_p9), %s2149_s14, 37 }
 0x13a   : > { %919 = sbr.rel (%p1352_p9) target bundleno = 388 (0x184), region = 40 }
 0x142   : > { %s2010_s20 = spop.drf %1629 }
 0x143   : > { %p1353_p10 = scmp.le.s32.totalorder %s2010_s20, 0 }
 0x144   : > { %s2142_s15 = smov (!%p1353_p10), %s2004_s22  ;;  %s2143_s24 = smov (!%p1353_p10), %s1888_s12 }
 0x145   : > { %1220 = sbr.rel (%p1353_p10) target bundleno = 363 (0x16b), region = 112  ;;  %s2019_s25 = smov (!%p1353_p10), 0  }
 0x146   : > { %s2021_s26 = smov (!%p1353_p10), 0  }
 0x14a LB: >> { %v937_v25 = vld [vmem:[%s1695_s24] sm:$0xf]  ;;  %v939_v61 = vld [vmem:[%s1695_s24 + $0x4] sm:$0xf]  ;;  %v941_v62 = vld [vmem:[%s1695_s24 + $0x8] sm:$0xf]  ;;  %s1703_s26 = sphi %s2021_s26, %s931_s26   ;;  %s1699_s25 = sphi %s2019_s25, %s2144_s25   ;;  %s1695_s24 = sphi %s2143_s24, %s1016_s24   ;;  %s1691_s15 = sphi %s2142_s15, %s1017_s15  }
 0x14b   : >> { %938 = vst [vmem:[%s1691_s15] sm:$0xf] %v937_v25  ;;  %940 = vst [vmem:[%s1691_s15 + $0x4] sm:$0xf] %v939_v61  ;;  %v943_v63 = vld [vmem:[%s1695_s24 + $0xc] sm:$0xf]  ;;  %s1011_s27 = sadd.s32 1, %s1699_s25 }
 0x14c   : >> { %942 = vst [vmem:[%s1691_s15 + $0x8] sm:$0xf] %v941_v62  ;;  %v945_v0 = vld [vmem:[%s1695_s24 + $0x10] sm:$0xf]  ;;  %v947_v1 = vld [vmem:[%s1695_s24 + $0x14] sm:$0xf]  ;;  %p1012_p11 = scmp.ge.s32.totalorder %s1011_s27, %s2010_s20 }
 0x14d   : >> { %944 = vst [vmem:[%s1691_s15 + $0xc] sm:$0xf] %v943_v63  ;;  %946 = vst [vmem:[%s1691_s15 + $0x10] sm:$0xf] %v945_v0  ;;  %v949_v2 = vld [vmem:[%s1695_s24 + $0x18] sm:$0xf] }
 0x14e   : >> { %948 = vst [vmem:[%s1691_s15 + $0x14] sm:$0xf] %v947_v1  ;;  %v951_v3 = vld [vmem:[%s1695_s24 + $0x1c] sm:$0xf]  ;;  %v953_v4 = vld [vmem:[%s1695_s24 + $0x20] sm:$0xf] }
 0x14f   : >> { %950 = vst [vmem:[%s1691_s15 + $0x18] sm:$0xf] %v949_v2  ;;  %952 = vst [vmem:[%s1691_s15 + $0x1c] sm:$0xf] %v951_v3  ;;  %v955_v5 = vld [vmem:[%s1695_s24 + $0x24] sm:$0xf] }
 0x150   : >> { %954 = vst [vmem:[%s1691_s15 + $0x20] sm:$0xf] %v953_v4  ;;  %v957_v6 = vld [vmem:[%s1695_s24 + $0x28] sm:$0xf]  ;;  %v959_v7 = vld [vmem:[%s1695_s24 + $0x2c] sm:$0xf] }
 0x151   : >> { %956 = vst [vmem:[%s1691_s15 + $0x24] sm:$0xf] %v955_v5  ;;  %958 = vst [vmem:[%s1691_s15 + $0x28] sm:$0xf] %v957_v6  ;;  %v961_v8 = vld [vmem:[%s1695_s24 + $0x30] sm:$0xf] }
 0x152   : >> { %960 = vst [vmem:[%s1691_s15 + $0x2c] sm:$0xf] %v959_v7  ;;  %v963_v9 = vld [vmem:[%s1695_s24 + $0x34] sm:$0xf]  ;;  %v965_v10 = vld [vmem:[%s1695_s24 + $0x38] sm:$0xf] }
 0x153   : >> { %962 = vst [vmem:[%s1691_s15 + $0x30] sm:$0xf] %v961_v8  ;;  %964 = vst [vmem:[%s1691_s15 + $0x34] sm:$0xf] %v963_v9  ;;  %v967_v11 = vld [vmem:[%s1695_s24 + $0x3c] sm:$0xf] }
 0x154   : >> { %966 = vst [vmem:[%s1691_s15 + $0x38] sm:$0xf] %v965_v10  ;;  %v969_v12 = vld [vmem:[%s1695_s24 + $0x40] sm:$0xf]  ;;  %v971_v13 = vld [vmem:[%s1695_s24 + $0x44] sm:$0xf] }
 0x155   : >> { %968 = vst [vmem:[%s1691_s15 + $0x3c] sm:$0xf] %v967_v11  ;;  %970 = vst [vmem:[%s1691_s15 + $0x40] sm:$0xf] %v969_v12  ;;  %v973_v14 = vld [vmem:[%s1695_s24 + $0x48] sm:$0xf] }
 0x156   : >> { %972 = vst [vmem:[%s1691_s15 + $0x44] sm:$0xf] %v971_v13  ;;  %v975_v15 = vld [vmem:[%s1695_s24 + $0x4c] sm:$0xf]  ;;  %v977_v16 = vld [vmem:[%s1695_s24 + $0x50] sm:$0xf] }
 0x157   : >> { %974 = vst [vmem:[%s1691_s15 + $0x48] sm:$0xf] %v973_v14  ;;  %976 = vst [vmem:[%s1691_s15 + $0x4c] sm:$0xf] %v975_v15  ;;  %v979_v17 = vld [vmem:[%s1695_s24 + $0x54] sm:$0xf] }
 0x158   : >> { %978 = vst [vmem:[%s1691_s15 + $0x50] sm:$0xf] %v977_v16  ;;  %v981_v18 = vld [vmem:[%s1695_s24 + $0x58] sm:$0xf]  ;;  %v983_v19 = vld [vmem:[%s1695_s24 + $0x5c] sm:$0xf] }
 0x159   : >> { %980 = vst [vmem:[%s1691_s15 + $0x54] sm:$0xf] %v979_v17  ;;  %982 = vst [vmem:[%s1691_s15 + $0x58] sm:$0xf] %v981_v18  ;;  %v985_v20 = vld [vmem:[%s1695_s24 + $0x60] sm:$0xf] }
 0x15a   : >> { %984 = vst [vmem:[%s1691_s15 + $0x5c] sm:$0xf] %v983_v19  ;;  %v987_v21 = vld [vmem:[%s1695_s24 + $0x64] sm:$0xf]  ;;  %v989_v22 = vld [vmem:[%s1695_s24 + $0x68] sm:$0xf] }
 0x15b   : >> { %986 = vst [vmem:[%s1691_s15 + $0x60] sm:$0xf] %v985_v20  ;;  %988 = vst [vmem:[%s1691_s15 + $0x64] sm:$0xf] %v987_v21  ;;  %v991_v23 = vld [vmem:[%s1695_s24 + $0x6c] sm:$0xf] }
 0x15c   : >> { %990 = vst [vmem:[%s1691_s15 + $0x68] sm:$0xf] %v989_v22  ;;  %v993_v24 = vld [vmem:[%s1695_s24 + $0x70] sm:$0xf]  ;;  %v995_v26 = vld [vmem:[%s1695_s24 + $0x74] sm:$0xf] }
 0x15d   : >> { %992 = vst [vmem:[%s1691_s15 + $0x6c] sm:$0xf] %v991_v23  ;;  %994 = vst [vmem:[%s1691_s15 + $0x70] sm:$0xf] %v993_v24  ;;  %v997_v27 = vld [vmem:[%s1695_s24 + $0x78] sm:$0xf] }
 0x15e   : >> { %996 = vst [vmem:[%s1691_s15 + $0x74] sm:$0xf] %v995_v26  ;;  %v999_v28 = vld [vmem:[%s1695_s24 + $0x7c] sm:$0xf]  ;;  %v1001_v29 = vld [vmem:[%s1695_s24 + $0x80] sm:$0xf] }
 0x15f   : >> { %998 = vst [vmem:[%s1691_s15 + $0x78] sm:$0xf] %v997_v27  ;;  %1000 = vst [vmem:[%s1691_s15 + $0x7c] sm:$0xf] %v999_v28  ;;  %v1003_v30 = vld [vmem:[%s1695_s24 + $0x84] sm:$0xf] }
 0x160   : >> { %1002 = vst [vmem:[%s1691_s15 + $0x80] sm:$0xf] %v1001_v29  ;;  %v1005_v31 = vld [vmem:[%s1695_s24 + $0x88] sm:$0xf]  ;;  %v1007_v32 = vld [vmem:[%s1695_s24 + $0x8c] sm:$0xf] }
 0x161   : >> { %1004 = vst [vmem:[%s1691_s15 + $0x84] sm:$0xf] %v1003_v30  ;;  %1006 = vst [vmem:[%s1691_s15 + $0x88] sm:$0xf] %v1005_v31  ;;  %v1009_v33 = vld [vmem:[%s1695_s24 + $0x90] sm:$0xf] }
 0x162   : >> { %1008 = vst [vmem:[%s1691_s15 + $0x8c] sm:$0xf] %v1007_v32  ;;  %1010 = vst [vmem:[%s1691_s15 + $0x90] sm:$0xf] %v1009_v33  ;;  %s2151_s27 = smov (%p1012_p11, %s1011_s27), 0  ;;  %s931_s26 = sadd.s32 1, %s1703_s26  }
 0x163   : >> { %s1014_s28 = smul.u32 148, %s2151_s27  ;;  %p930_p12 = scmp.ge.s32.totalorder %s931_s26, %s2010_s20 }
 0x164   : >> { %s2144_s25 = smov %s2151_s27 }
 0x165   : >> { %s1016_s24 = scalar_lea.vmem %s1888_s12, %s1014_s28 [#allocation2]   ;;  %s1017_s15 = scalar_lea.vmem %s2004_s22, %s1014_s28  }
 0x166   : > { %933 = sbr.rel (!%p930_p12) target bundleno = 330 (0x14a), region = 118 }
 0x16b PF: > { %1631 = sdivrem.u32 %s2149_s14, 37 }
 0x16c   : > { %s1354_s29 = smul.u32 148, %s2010_s20 }
 0x16e   : > { %s1022_s30 = scalar_lea.vmem %s1888_s12, %s1354_s29 [#allocation2]   ;;  %s1024_s4 = scalar_lea.vmem %s2004_s22, %s1354_s29  }
 0x174   : > { %s1632_s5 = spop.drf %1631 }
 0x175   : > { %p1356_p13 = scmp.le.s32.totalorder %s1632_s5, 0 }
 0x176   : > { %s1705_s6 = smov (!%p1356_p13), %s1024_s4   ;;  %s1709_s7 = smov (!%p1356_p13), %s1022_s30  }
 0x177   : > { %1234 = sbr.rel (%p1356_p13) target bundleno = 388 (0x184), region = 123  ;;  %s1713_s8 = smov (!%p1356_p13), 0  }
 0x178   : > { %s1717_s9 = smov (!%p1356_p13), 0  }
 0x17c LB: >> { %v1034_v34 = vld [vmem:[%s1711_s7] sm:$0xf]  ;;  %s1036_s10 = sadd.s32 1, %s1715_s8  ;;  %s1028_s9 = sadd.s32 1, %s1719_s9   ;;  %s1719_s9 = sphi %s1717_s9, %s1028_s9   ;;  %s1715_s8 = sphi %s1713_s8, %s1714_s8   ;;  %s1711_s7 = sphi %s1709_s7, %s1041_s7   ;;  %s1707_s6 = sphi %s1705_s6, %s1042_s6  }
 0x17d   : >> { %1035 = vst [vmem:[%s1707_s6] sm:$0xf] %v1034_v34  ;;  %p1037_p0 = scmp.ge.s32.totalorder %s1036_s10, %s1632_s5  ;;  %p1027_p1 = scmp.ge.s32.totalorder %s1028_s9, %s1632_s5 }
 0x17f   : >> { %s2153_s10 = smov (%p1037_p0, %s1036_s10), 0  ;;  %1030 = sbr.rel (!%p1027_p1) target bundleno = 380 (0x17c), region = 129 }
 0x180   : >> { %s1357_s11 = sshll.u32 %s2153_s10, 2  ;;  %s1714_s8 = smov %s2153_s10  }
 0x181   : >> { %s1041_s7 = scalar_lea.vmem %s1022_s30, %s1357_s11 [#allocation2]   ;;  %s1042_s6 = scalar_lea.vmem %s1024_s4, %s1357_s11  }
 0x184 PF: > { %p10_p2 = scmp.ge.s32.totalorder %s1758_s16, 4   ;;  %s2145_s12 = smov %s1683_s13 }
 0x185   : > { %s2146_s13 = smov %s1766_s19  ;;  %s2147_s14 = smov %s1758_s16 }
 0x186   :  { %12 = sbr.rel (!%p10_p2) target bundleno = 2 (0x2), region = 140 }

// kernel: translation_subnet_forward.4
= control target key start
LH: loop header
LB: loop body
LE: loop exit
PB: predicated region body
PF: predicated region fallthrough
CT: control target
= control target key end

     0   :  { %vm558_vm0 = vcmask 523264   ;;  %s1785_s1 = inlined_call_operand.vmem [shape: bf16[576,128], index: 1, kind: input, shape index: {}]   ;;  %s1786_s0 = inlined_call_operand.vmem [shape: bf16[128,576], index: 0, kind: input, shape index: {}]   ;;  %s1787_s2 = inlined_call_operand.vmem [shape: f32[1,128], index: 2, kind: input, shape index: {}]   ;;  %s1788_s3 = inlined_call_operand.vmem [shape: bf16[128,128], index: 3, kind: output, shape index: {}]  }
   0x1   :  { %v1342_v0 = vld [vmem:[%s1785_s1 + $0x78] sm:$0xff]   ;;  %v1346_v4 = vld [vmem:[%s1785_s1 + $0x70] sm:$0xff]   ;;  %v1350_v8 = vld [vmem:[%s1785_s1 + $0x68] sm:$0xff]  }
   0x2   :  { %v1343_v1 = vld [vmem:[%s1785_s1 + $0xf8] sm:$0xff]   ;;  %1170 = vmatprep.subr.bf16.mxu0 %v1342_v0  ;;  %v1347_v5 = vld [vmem:[%s1785_s1 + $0xf0] sm:$0xff]   ;;  %v1351_v9 = vld [vmem:[%s1785_s1 + $0xe8] sm:$0xff]  }
   0x3   :  { %v1344_v2 = vld [vmem:[%s1785_s1 + $0x38] sm:$0xff]   ;;  %1234 = vmatprep.subr.bf16.mxu1 %v1343_v1  ;;  %v1348_v6 = vld [vmem:[%s1785_s1 + $0x30] sm:$0xff]   ;;  %v1352_v10 = vld [vmem:[%s1785_s1 + $0x28] sm:$0xff]  }
   0x4   :  { %v1345_v3 = vld [vmem:[%s1785_s1 + $0xb8] sm:$0xff]   ;;  %1171 = vmatpush3.bf16.msra.mxu0 %v1344_v2  ;;  %v1349_v7 = vld [vmem:[%s1785_s1 + $0xb0] sm:$0xff]   ;;  %v1353_v11 = vld [vmem:[%s1785_s1 + $0xa8] sm:$0xff]  }
   0x5   :  { %1235 = vmatpush3.bf16.msra.mxu1 %v1345_v3  ;;  %1172 = vmatprep.subr.bf16.mxu0 %v1346_v4  ;;  %v1354_v12 = vld [vmem:[%s1785_s1 + $0x60] sm:$0xff]   ;;  %v1358_v16 = vld [vmem:[%s1785_s1 + $0x58] sm:$0xff]   ;;  %v1362_v20 = vld [vmem:[%s1785_s1 + $0x50] sm:$0xff]  }
   0x6   :  { %1236 = vmatprep.subr.bf16.mxu1 %v1347_v5  ;;  %v1355_v13 = vld [vmem:[%s1785_s1 + $0xe0] sm:$0xff]   ;;  %v1359_v17 = vld [vmem:[%s1785_s1 + $0xd8] sm:$0xff]   ;;  %v1363_v21 = vld [vmem:[%s1785_s1 + $0xd0] sm:$0xff]  }
   0x7   :  { %v1356_v14 = vld [vmem:[%s1785_s1 + $0x20] sm:$0xff]   ;;  %v1360_v18 = vld [vmem:[%s1785_s1 + $0x18] sm:$0xff]   ;;  %v1364_v22 = vld [vmem:[%s1785_s1 + $0x10] sm:$0xff]  }
   0x8   :  { %1173 = vmatpush3.bf16.msra.mxu0 %v1348_v6  ;;  %v1357_v15 = vld [vmem:[%s1785_s1 + $0xa0] sm:$0xff]   ;;  %v1361_v19 = vld [vmem:[%s1785_s1 + $0x98] sm:$0xff]   ;;  %v1365_v23 = vld [vmem:[%s1785_s1 + $0x90] sm:$0xff]  }
   0x9   :  { %1237 = vmatpush3.bf16.msra.mxu1 %v1349_v7  ;;  %1174 = vmatprep.subr.bf16.mxu0 %v1350_v8  ;;  %v1366_v24 = vld [vmem:[%s1785_s1 + $0x48] sm:$0xff]   ;;  %v1370_v28 = vld [vmem:[%s1785_s1 + $0x40] sm:$0xff]   ;;  %v1380_v36 = vld [vmem:[%s1785_s1 + $0x118] sm:$0xff]  }
   0xa   :  { %1238 = vmatprep.subr.bf16.mxu1 %v1351_v9  ;;  %v1367_v25 = vld [vmem:[%s1785_s1 + $0xc8] sm:$0xff]   ;;  %v1371_v29 = vld [vmem:[%s1785_s1 + $0xc0] sm:$0xff]   ;;  %v1393_v42 = vld [vmem:[%s1785_s1 + $0x110] sm:$0xff]  }
   0xb   :  { %v1368_v26 = vld [vmem:[%s1785_s1 + $0x8] sm:$0xff]   ;;  %v1372_v30 = vld [vmem:[%s1785_s1] sm:$0xff]   ;;  %v1389_v43 = vld [vmem:[%s1786_s0 + $0x5c] ss:$20 sps:$4 sm:$0xff]  }
   0xc   :  { %1175 = vmatpush3.bf16.msra.mxu0 %v1352_v10  ;;  %v1369_v27 = vld [vmem:[%s1785_s1 + $0x88] sm:$0xff]   ;;  %v1373_v31 = vld [vmem:[%s1785_s1 + $0x80] sm:$0xff]   ;;  %v1394_v47 = vld [vmem:[%s1786_s0 + $0x7c] ss:$20 sps:$4 sm:$0xff]  }
   0xd   :  { %1239 = vmatpush3.bf16.msra.mxu1 %v1353_v11  ;;  %1176 = vmatprep.subr.bf16.mxu0 %v1354_v12  ;;  %v1374_v32 = vld [vmem:[%s1786_s0] ss:$20 sps:$4 sm:$0xff]   ;;  %v1376_v33 = vld [vmem:[%s1786_s0 + $0x4] ss:$20 sps:$4 sm:$0xff]   ;;  %v1377_v34 = vld [vmem:[%s1786_s0 + $0x8] ss:$20 sps:$4 sm:$0xff]  }
   0xe   :  { %1240 = vmatprep.subr.bf16.mxu1 %v1355_v13  ;;  %v1379_v35 = vld [vmem:[%s1786_s0 + $0xc] ss:$20 sps:$4 sm:$0xff]   ;;  %615 = vmatprep.mubr.bf16.mxu0 %v1376_v33  ;;  %v1383_v38 = vld [vmem:[%s1786_s0 + $0x34] ss:$20 sps:$4 sm:$0xff]   ;;  %v1386_v40 = vld [vmem:[%s1786_s0 + $0x30] ss:$20 sps:$4 sm:$0xff]  }
   0xf   :  { %712 = vmatprep.mubr.bf16.mxu1 %v1379_v35  ;;  %v1381_v37 = vld [vmem:[%s1786_s0 + $0x2c] ss:$20 sps:$4 sm:$0xff]   ;;  %v1385_v39 = vld [vmem:[%s1786_s0 + $0x28] ss:$20 sps:$4 sm:$0xff]   ;;  %v1391_v44 = vld [vmem:[%s1786_s0 + $0x50] ss:$20 sps:$4 sm:$0xff]  }
  0x10   :  { %1177 = vmatpush3.bf16.msra.mxu0 %v1356_v14  ;;  %v1387_v41 = vld [vmem:[%s1786_s0 + $0x54] ss:$20 sps:$4 sm:$0xff]   ;;  %v1392_v45 = vld [vmem:[%s1786_s0 + $0x58] ss:$20 sps:$4 sm:$0xff]   ;;  %v1419_v49 = vld [vmem:[%s1785_s1 + $0x100] sm:$0xff]  }
  0x11   :  { %1241 = vmatpush3.bf16.msra.mxu1 %v1357_v15  ;;  %1178 = vmatprep.subr.bf16.mxu0 %v1358_v16  ;;  %v1406_v46 = vld [vmem:[%s1785_s1 + $0x108] sm:$0xff]   ;;  %v1396_v48 = vld [vmem:[%s1786_s0 + $0x84] ss:$20 sps:$4 sm:$0xff]   ;;  %v1399_v51 = vld [vmem:[%s1786_s0 + $0x80] ss:$20 sps:$4 sm:$0xff]  }
  0x12   :  { %1242 = vmatprep.subr.bf16.mxu1 %v1359_v17  ;;  %v1398_v50 = vld [vmem:[%s1786_s0 + $0x78] ss:$20 sps:$4 sm:$0xff]   ;;  %v1404_v54 = vld [vmem:[%s1786_s0 + $0xa0] ss:$20 sps:$4 sm:$0xff]   ;;  %v1405_v55 = vld [vmem:[%s1786_s0 + $0xa8] ss:$20 sps:$4 sm:$0xff]  }
  0x13   :  { %v1400_v52 = vld [vmem:[%s1786_s0 + $0xa4] ss:$20 sps:$4 sm:$0xff]   ;;  %v1402_v53 = vld [vmem:[%s1786_s0 + $0xac] ss:$20 sps:$4 sm:$0xff]   ;;  %v1409_v57 = vld [vmem:[%s1786_s0 + $0xd4] ss:$20 sps:$4 sm:$0xff]  }
  0x14   :  { %1179 = vmatpush3.bf16.msra.mxu0 %v1360_v18  ;;  %v1407_v56 = vld [vmem:[%s1786_s0 + $0xcc] ss:$20 sps:$4 sm:$0xff]   ;;  %v1411_v58 = vld [vmem:[%s1786_s0 + $0xc8] ss:$20 sps:$4 sm:$0xff]   ;;  %v1412_v59 = vld [vmem:[%s1786_s0 + $0xd0] ss:$20 sps:$4 sm:$0xff]  }
  0x15   :  { %1243 = vmatpush3.bf16.msra.mxu1 %v1361_v19  ;;  %1180 = vmatprep.subr.bf16.mxu0 %v1362_v20  ;;  %v1413_v60 = vld [vmem:[%s1786_s0 + $0xf4] ss:$20 sps:$4 sm:$0xff]   ;;  %v1415_v61 = vld [vmem:[%s1786_s0 + $0xfc] ss:$20 sps:$4 sm:$0xff]   ;;  %v1418_v63 = vld [vmem:[%s1786_s0 + $0xf8] ss:$20 sps:$4 sm:$0xff]  }
  0x16   :  { %1244 = vmatprep.subr.bf16.mxu1 %v1363_v21  ;;  %v1417_v62 = vld [vmem:[%s1786_s0 + $0xf0] ss:$20 sps:$4 sm:$0xff]   ;;  %v1424_v2 = vld [vmem:[%s1786_s0 + $0x118] ss:$20 sps:$4 sm:$0xff]   ;;  %v1425_v3 = vld [vmem:[%s1786_s0 + $0x120] ss:$20 sps:$4 sm:$0xff]  }
  0x17   :  { %v1420_v0 = vld [vmem:[%s1786_s0 + $0x11c] ss:$20 sps:$4 sm:$0xff]   ;;  %v1422_v1 = vld [vmem:[%s1786_s0 + $0x124] ss:$20 sps:$4 sm:$0xff]   ;;  %v1430_v8 = vld [vmem:[%s1786_s0 + $0x60] ss:$20 sps:$4 sm:$0xff]  }
  0x18   :  { %1181 = vmatpush3.bf16.msra.mxu0 %v1364_v22  ;;  %v1426_v4 = vld [vmem:[%s1786_s0 + $0x10] ss:$20 sps:$4 sm:$0xff]   ;;  %v1428_v6 = vld [vmem:[%s1786_s0 + $0x38] ss:$20 sps:$4 sm:$0xff]   ;;  %v1431_v9 = vld [vmem:[%s1786_s0 + $0x100] ss:$20 sps:$4 sm:$0xff]  }
  0x19   :  { %1245 = vmatpush3.bf16.msra.mxu1 %v1365_v23  ;;  %1182 = vmatprep.subr.bf16.mxu0 %v1366_v24  ;;  %v1427_v5 = vld [vmem:[%s1786_s0 + $0xb0] ss:$20 sps:$4 sm:$0xff]   ;;  %v1429_v7 = vld [vmem:[%s1786_s0 + $0xd8] ss:$20 sps:$4 sm:$0xff]   ;;  %v1432_v10 = vld [vmem:[%s1786_s0 + $0x88] ss:$20 sps:$4 sm:$0xff]  }
  0x1a   :  { %1246 = vmatprep.subr.bf16.mxu1 %v1367_v25  ;;  %v1433_v11 = vld [vmem:[%s1786_s0 + $0x128] ss:$20 sps:$4 sm:$0xff]   ;;  %v1693_v14 = vld [vmem:[%s1787_s2] ss:$0 sm:$0xff] }
  0x1c   :  { %1183 = vmatpush3.bf16.msra.mxu0 %v1368_v26 }
  0x1d   :  { %1247 = vmatpush3.bf16.msra.mxu1 %v1369_v27  ;;  %1184 = vmatprep.subr.bf16.mxu0 %v1370_v28 }
  0x1e   :  { %1248 = vmatprep.subr.bf16.mxu1 %v1371_v29 }
  0x20   :  { %1185 = vmatpush3.bf16.msra.mxu0 %v1372_v30 }
  0x21   :  { %1249 = vmatpush3.bf16.msra.mxu1 %v1373_v31  ;;  %1310 = vmatprep.subr.bf16.mxu0 %v1380_v36 }
  0x22   :  { %1334 = vmatprep.subr.bf16.mxu1 %v1380_v36 }
  0x23   :  { %616 = vmatmul.mubr.bf16.vlgmr.msra.gmra.mxu0 %v1374_v32 }
  0x24   :  { %713 = vmatmul.mubr.bf16.vlgmr.msra.gmra.mxu1 %v1377_v34  ;;  %1311 = vmatpush3.bf16.msra.mxu0 %v1380_v36 }
  0x25   :  { %1338 = vmatpush3.bf16.msra.mxu1 %v1380_v36  ;;  %623 = vmatprep.mubr.bf16.mxu0 %v1381_v37 }
  0x26   :  { %720 = vmatprep.mubr.bf16.mxu1 %v1383_v38  ;;  %1312 = vmatprep.subr.bf16.mxu0 %v1393_v42 }
  0x27   :  { %1335 = vmatprep.subr.bf16.mxu1 %v1393_v42 }
  0x28   :  { %1313 = vmatpush3.bf16.msra.mxu0 %v1393_v42 }
  0x29   :  { %1339 = vmatpush3.bf16.msra.mxu1 %v1393_v42  ;;  %1314 = vmatprep.subr.bf16.mxu0 %v1406_v46 }
  0x2a   :  { %1336 = vmatprep.subr.bf16.mxu1 %v1406_v46 }
  0x2b   :  { %624 = vmatmul.mubr.bf16.gmra.mxu0 %v1385_v39 }
  0x2c   :  { %721 = vmatmul.mubr.bf16.gmra.mxu1 %v1386_v40  ;;  %631 = vmatprep.mubr.bf16.mxu0 %v1387_v41 }
  0x2d   :  { %728 = vmatprep.mubr.bf16.mxu1 %v1389_v43  ;;  %1315 = vmatpush3.bf16.msra.mxu0 %v1406_v46 }
  0x2e   :  { %1340 = vmatpush3.bf16.msra.mxu1 %v1406_v46  ;;  %1316 = vmatprep.subr.bf16.mxu0 %v1419_v49 }
  0x2f   :  { %1337 = vmatprep.subr.bf16.mxu1 %v1419_v49 }
  0x31   :  { %1317 = vmatpush3.bf16.msra.mxu0 %v1419_v49 }
  0x32   :  { %1341 = vmatpush3.bf16.msra.mxu1 %v1419_v49 }
  0x33   :  { %632 = vmatmul.mubr.bf16.gmra.mxu0 %v1391_v44 }
  0x34   :  { %729 = vmatmul.mubr.bf16.gmra.mxu1 %v1392_v45  ;;  %639 = vmatprep.mubr.bf16.mxu0 %v1394_v47 }
  0x35   :  { %736 = vmatprep.mubr.bf16.mxu1 %v1396_v48 }
  0x3b   :  { %640 = vmatmul.mubr.bf16.gmra.mxu0 %v1398_v50 }
  0x3c   :  { %737 = vmatmul.mubr.bf16.gmra.mxu1 %v1399_v51  ;;  %647 = vmatprep.mubr.bf16.mxu0 %v1400_v52 }
  0x3d   :  { %744 = vmatprep.mubr.bf16.mxu1 %v1402_v53 }
  0x43   :  { %648 = vmatmul.mubr.bf16.gmra.mxu0 %v1404_v54 }
  0x44   :  { %745 = vmatmul.mubr.bf16.gmra.mxu1 %v1405_v55  ;;  %655 = vmatprep.mubr.bf16.mxu0 %v1407_v56 }
  0x45   :  { %752 = vmatprep.mubr.bf16.mxu1 %v1409_v57 }
  0x4b   :  { %656 = vmatmul.mubr.bf16.gmra.mxu0 %v1411_v58 }
  0x4c   :  { %753 = vmatmul.mubr.bf16.gmra.mxu1 %v1412_v59  ;;  %663 = vmatprep.mubr.bf16.mxu0 %v1413_v60 }
  0x4d   :  { %760 = vmatprep.mubr.bf16.mxu1 %v1415_v61 }
  0x53   :  { %664 = vmatmul.mubr.bf16.gmra.mxu0 %v1417_v62 }
  0x54   :  { %761 = vmatmul.mubr.bf16.gmra.mxu1 %v1418_v63  ;;  %671 = vmatprep.mubr.bf16.mxu0 %v1420_v0 }
  0x55   :  { %768 = vmatprep.mubr.bf16.mxu1 %v1422_v1 }
  0x5b   :  { %672 = vmatmul.mubr.bf16.gmra.mxu0 %v1424_v2 }
  0x5c   :  { %769 = vmatmul.mubr.bf16.gmra.mxu1 %v1425_v3  ;;  %1318 = vmatprep.mubr.msk.bf16.mxu0 %vm558_vm0, %v1426_v4 }
  0x5d   :  { %1326 = vmatprep.mubr.msk.bf16.mxu1 %vm558_vm0, %v1427_v5 }
  0x63   :  { %1319 = vmatmul.mubr.msk.bf16.vlgmr.msra.gmra.mxu0 %vm558_vm0, %v1428_v6 }
  0x64   :  { %1327 = vmatmul.mubr.msk.bf16.vlgmr.msra.gmra.mxu1 %vm558_vm0, %v1429_v7  ;;  %1322 = vmatprep.mubr.msk.bf16.mxu0 %vm558_vm0, %v1430_v8 }
  0x65   :  { %1330 = vmatprep.mubr.msk.bf16.mxu1 %vm558_vm0, %v1431_v9 }
  0x6b   :  { %1323 = vmatmul.mubr.msk.bf16.gmra.mxu0 %vm558_vm0, %v1432_v10 }
  0x6c   :  { %1331 = vmatmul.mubr.msk.bf16.gmra.mxu1 %vm558_vm0, %v1433_v11 }
  0xe3   :  { %v1186_v12 = vpop.f32.mrf.mxu0 }
  0xe4   :  { %v1250_v13 = vpop.f32.mrf.mxu1 }
  0xe5   :  { %v1187_v15 = vpop.f32.mrf.mxu0 }
  0xe6   :  { %v1188_v16 = vadd.f32 %v1187_v15, %v1186_v12  ;;  %v1251_v17 = vpop.f32.mrf.mxu1 }
  0xe7   :  { %v1189_v18 = vpop.f32.mrf.mxu0  ;;  %v1252_v20 = vadd.f32 %v1251_v17, %v1250_v13 }
  0xe8   :  { %v618_v19 = vadd.f32 %v1188_v16, %v1693_v14  ;;  %v1253_v21 = vpop.f32.mrf.mxu1 }
  0xe9   :  { %v1190_v22 = vpop.f32.mrf.mxu0 }
  0xea   :  { %v1254_v23 = vpop.f32.mrf.mxu1  ;;  %v1696_v24 = vadd.f32 %v1252_v20, %v618_v19  ;;  %v1191_v3 = vadd.f32 %v1190_v22, %v1189_v18 }
  0xeb   :  { %v1192_v25 = vpop.f32.mrf.mxu0  ;;  %v1255_v13 = vadd.f32 %v1254_v23, %v1253_v21 }
  0xec   :  { %1789 = vst [vmem:[#allocation2_spill] sm:$0xff] %v1696_v24  ;;  %v1256_v26 = vpop.f32.mrf.mxu1  ;;  %v621_v12 = vadd.f32 %v1191_v3, %v1693_v14 }
  0xed   :  { %v1193_v27 = vpop.f32.mrf.mxu0 }
  0xee   :  { %v1257_v28 = vpop.f32.mrf.mxu1  ;;  %v1194_v4 = vadd.f32 %v1193_v27, %v1192_v25 }
  0xef   :  { %v1195_v29 = vpop.f32.mrf.mxu0  ;;  %v1258_v19 = vadd.f32 %v1257_v28, %v1256_v26  ;;  %v1717_v28 = vadd.f32 %v1255_v13, %v621_v12 }
  0xf0   :  { %v1259_v30 = vpop.f32.mrf.mxu1  ;;  %v626_v15 = vadd.f32 %v1194_v4, %v1693_v14 }
  0xf1   :  { %v1196_v31 = vpop.f32.mrf.mxu0 }
  0xf2   :  { %v1260_v32 = vpop.f32.mrf.mxu1  ;;  %v1197_v5 = vadd.f32 %v1196_v31, %v1195_v29  ;;  %v723_v24 = vadd.f32 %v1258_v19, %v626_v15 }
  0xf3   :  { %v1198_v33 = vpop.f32.mrf.mxu0  ;;  %v1261_v20 = vadd.f32 %v1260_v32, %v1259_v30 }
  0xf4   :  { %v1262_v34 = vpop.f32.mrf.mxu1  ;;  %v629_v16 = vadd.f32 %v1197_v5, %v1693_v14 }
  0xf5   :  { %v1199_v35 = vpop.f32.mrf.mxu0 }
  0xf6   :  { %v1263_v36 = vpop.f32.mrf.mxu1  ;;  %v1200_v7 = vadd.f32 %v1199_v35, %v1198_v33  ;;  %v726_v26 = vadd.f32 %v1261_v20, %v629_v16 }
  0xf7   :  { %v1201_v37 = vpop.f32.mrf.mxu0 }
  0xf8   :  { %v1698_v38 = vpop.f32.mrf.mxu1  ;;  %v634_v18 = vadd.f32 %v1200_v7, %v1693_v14 }
  0xf9   :  { %v1202_v39 = vpop.f32.mrf.mxu0 }
  0xfa   :  { %v1266_v40 = vpop.f32.mrf.mxu1  ;;  %v1203_v27 = vadd.f32 %v1202_v39, %v1201_v37 }
  0xfb   :  { %v1204_v41 = vpop.f32.mrf.mxu0  ;;  %v1720_v30 = vadd.f32 %v1266_v40, %v1698_v38 }
  0xfc   :  { %v1268_v42 = vpop.f32.mrf.mxu1 }
  0xfd   :  { %v1205_v43 = vpop.f32.mrf.mxu0 }
  0xfe   :  { %v1269_v44 = vpop.f32.mrf.mxu1  ;;  %v1206_v9 = vadd.f32 %v1205_v43, %v1204_v41  ;;  %v1264_v41 = vadd.f32 %v1263_v36, %v1262_v34  ;;  %v1726_v34 = vadd.f32 %v1203_v27, %v1693_v14 }
  0xff   :  { %v1207_v45 = vpop.f32.mrf.mxu0  ;;  %v1270_v4 = vadd.f32 %v1269_v44, %v1268_v42 }
 0x100   :  { %v1700_v46 = vpop.f32.mrf.mxu1  ;;  %v642_v29 = vadd.f32 %v1206_v9, %v1693_v14 }
 0x101   :  { %v1208_v47 = vpop.f32.mrf.mxu0 }
 0x102   :  { %v1702_v48 = vpop.f32.mrf.mxu1  ;;  %v1209_v22 = vadd.f32 %v1208_v47, %v1207_v45  ;;  %v1723_v45 = vadd.f32 %v1264_v41, %v634_v18  ;;  %v1730_v47 = vadd.f32 %v1270_v4, %v642_v29 }
 0x103   :  { %v1210_v49 = vpop.f32.mrf.mxu0  ;;  %v1273_v38 = vadd.f32 %v1702_v48, %v1700_v46 }
 0x104   :  { %v1704_v50 = vpop.f32.mrf.mxu1  ;;  %v645_v32 = vadd.f32 %v1209_v22, %v1693_v14 }
 0x105   :  { %v1211_v51 = vpop.f32.mrf.mxu0 }
 0x106   :  { %v1706_v52 = vpop.f32.mrf.mxu1  ;;  %v1212_v31 = vadd.f32 %v1211_v51, %v1210_v49  ;;  %v1742_v7 = vadd.f32 %v1273_v38, %v645_v32 }
 0x107   :  { %v1213_v53 = vpop.f32.mrf.mxu0 }
 0x108   :  { %v1708_v54 = vpop.f32.mrf.mxu1  ;;  %v650_v36 = vadd.f32 %v1212_v31, %v1693_v14 }
 0x109   :  { %v1214_v55 = vpop.f32.mrf.mxu0 }
 0x10a   :  { %v1710_v56 = vpop.f32.mrf.mxu1  ;;  %v1215_v43 = vadd.f32 %v1214_v55, %v1213_v53  ;;  %v1276_v55 = vadd.f32 %v1706_v52, %v1704_v50 }
 0x10b   :  { %v1216_v57 = vpop.f32.mrf.mxu0 }
 0x10c   :  { %v1280_v58 = vpop.f32.mrf.mxu1  ;;  %v653_v40 = vadd.f32 %v1215_v43, %v1693_v14  ;;  %v747_v16 = vadd.f32 %v1276_v55, %v650_v36 }
 0x10d   :  { %v1217_v59 = vpop.f32.mrf.mxu0 }
 0x10e   :  { %v1281_v60 = vpop.f32.mrf.mxu1  ;;  %v1218_v33 = vadd.f32 %v1217_v59, %v1216_v57 }
 0x10f   :  { %v1219_v61 = vpop.f32.mrf.mxu0  ;;  %v1282_v57 = vadd.f32 %v1281_v60, %v1280_v58 }
 0x110   :  { %v1283_v62 = vpop.f32.mrf.mxu1  ;;  %v658_v42 = vadd.f32 %v1218_v33, %v1693_v14 }
 0x111   :  { %v1220_v63 = vpop.f32.mrf.mxu0 }
 0x112   :  { %v1284_v0 = vpop.f32.mrf.mxu1  ;;  %v1221_v21 = vadd.f32 %v1220_v63, %v1219_v61  ;;  %v755_v15 = vadd.f32 %v1282_v57, %v658_v42 }
 0x113   :  { %v1222_v1 = vpop.f32.mrf.mxu0 }
 0x114   :  { %v1286_v2 = vpop.f32.mrf.mxu1  ;;  %v661_v49 = vadd.f32 %v1221_v21, %v1693_v14 }
 0x115   :  { %v1223_v6 = vpop.f32.mrf.mxu0 }
 0x116   :  { %v1287_v8 = vpop.f32.mrf.mxu1  ;;  %v1224_v23 = vadd.f32 %v1223_v6, %v1222_v1  ;;  %v1279_v1 = vadd.f32 %v1710_v56, %v1708_v54  ;;  %v1285_v6 = vadd.f32 %v1284_v0, %v1283_v62 }
 0x117   :  { %v1225_v10 = vpop.f32.mrf.mxu0  ;;  %v1288_v46 = vadd.f32 %v1287_v8, %v1286_v2  ;;  %v1790_v8 = vld [vmem:[#allocation2_spill] sm:$0xff] }
 0x118   :  { %v1289_v11 = vpop.f32.mrf.mxu1  ;;  %v666_v51 = vadd.f32 %v1224_v23, %v1693_v14  ;;  %v758_v52 = vadd.f32 %v1285_v6, %v661_v49  ;;  %v750_v58 = vadd.f32 %v1279_v1, %v653_v40 }
 0x119   :  { %v1226_v17 = vpop.f32.mrf.mxu0 }
 0x11a   :  { %v1290_v25 = vpop.f32.mrf.mxu1  ;;  %v1227_v59 = vadd.f32 %v1226_v17, %v1225_v10  ;;  %v763_v60 = vadd.f32 %v1288_v46, %v666_v51 }
 0x11b   :  { %v1228_v35 = vpop.f32.mrf.mxu0  ;;  %v1747_v17 = vadd.f32 %v1290_v25, %v1289_v11 }
 0x11c   :  { %v1292_v3 = vpop.f32.mrf.mxu1  ;;  %v1745_v10 = vadd.f32 %v1227_v59, %v1693_v14 }
 0x11d   :  { %v1229_v5 = vpop.f32.mrf.mxu0 }
 0x11e   :  { %v1230_v37 = vadd.f32 %v1229_v5, %v1228_v35  ;;  %v1293_v39 = vpop.f32.mrf.mxu1 }
 0x11f   :  { %v1231_v44 = vpop.f32.mrf.mxu0  ;;  %v1294_v9 = vadd.f32 %v1293_v39, %v1292_v3 }
 0x120   :  { %v1295_v53 = vpop.f32.mrf.mxu1  ;;  %v674_v61 = vadd.f32 %v1230_v37, %v1693_v14 }
 0x121   :  { %v1232_v63 = vpop.f32.mrf.mxu0 }
 0x122   :  { %v1296_v48 = vpop.f32.mrf.mxu1  ;;  %v1233_v12 = vadd.f32 %v1232_v63, %v1231_v44  ;;  %v771_v62 = vadd.f32 %v1294_v9, %v674_v61 }
 0x123   :  { %v1320_v13 = vpop.f32.mrf.mxu0  ;;  %v1297_v0 = vadd.f32 %v1296_v48, %v1295_v53 }
 0x124   :  { %v820_v19 = vadd.f32 %v1320_v13, %v723_v24  ;;  %v1328_v50 = vpop.f32.mrf.mxu1  ;;  %v677_v24 = vadd.f32 %v1233_v12, %v1693_v14 }
 0x125   :  { %v852_v54 = vadd.f32 %v1328_v50, %v755_v15  ;;  %v811_v56 = vpop.f32.mrf.mxu0  ;;  %v734_v15 = vadd.f32 %v1720_v30, %v1726_v34 }
 0x126   :  { %vm876_vm1 = vcmp.ge.f32.partialorder %v820_v19, 0.0  ;;  %v892_v2 = vmul.f32 0.1, %v820_v19  ;;  %v812_v20 = vadd.f32 %v811_v56, %v1790_v8  ;;  %v843_v18 = vpop.f32.mrf.mxu1  ;;  %v774_v13 = vadd.f32 %v1297_v0, %v677_v24 }
 0x127   :  { %vm884_vm2 = vcmp.ge.f32.partialorder %v852_v54, 0.0  ;;  %v900_v22 = vmul.f32 0.1, %v852_v54  ;;  %v844_v27 = vadd.f32 %v843_v18, %v747_v16  ;;  %v1321_v29 = vpop.f32.mrf.mxu0  ;;  %v766_v16 = vadd.f32 %v1747_v17, %v1745_v10 }
 0x128   :  { %v908_v31 = vsel %vm876_vm1, %v820_v19, %v892_v2  ;;  %vm874_vm3 = vcmp.ge.f32.partialorder %v812_v20, 0.0  ;;  %v890_v33 = vmul.f32 0.1, %v812_v20  ;;  %v823_v11 = vadd.f32 %v1321_v29, %v726_v26  ;;  %v1329_v25 = vpop.f32.mrf.mxu1 }
 0x129   :  { %v916_v35 = vsel %vm884_vm2, %v852_v54, %v900_v22  ;;  %vm882_vm4 = vcmp.ge.f32.partialorder %v844_v27, 0.0  ;;  %v898_v41 = vmul.f32 0.1, %v844_v27  ;;  %v855_v43 = vadd.f32 %v1329_v25, %v758_v52  ;;  %v814_v21 = vpop.f32.mrf.mxu0 }
 0x12a   :  { %v906_v23 = vsel %vm874_vm3, %v812_v20, %v890_v33  ;;  %vm877_vm5 = vcmp.ge.f32.partialorder %v823_v11, 0.0  ;;  %v893_v3 = vmul.f32 0.1, %v823_v11  ;;  %v815_v4 = vadd.f32 %v814_v21, %v1717_v28  ;;  %v846_v14 = vpop.f32.mrf.mxu1 }
 0x12b   :  { %v914_v5 = vsel %vm882_vm4, %v844_v27, %v898_v41  ;;  %vm885_vm6 = vcmp.ge.f32.partialorder %v855_v43, 0.0  ;;  %v901_v32 = vmul.f32 0.1, %v855_v43  ;;  %v847_v37 = vadd.f32 %v846_v14, %v750_v58  ;;  %v1324_v39 = vpop.f32.mrf.mxu0 }
 0x12c   :  { %v909_v36 = vsel %vm877_vm5, %v823_v11, %v893_v3  ;;  %vm875_vm7 = vcmp.ge.f32.partialorder %v815_v4, 0.0  ;;  %v891_v26 = vmul.f32 0.1, %v815_v4  ;;  %v836_v42 = vadd.f32 %v1324_v39, %v1730_v47  ;;  %v1332_v44 = vpop.f32.mrf.mxu1 }
 0x12d   :  { %v1131_v38 = vpack.c.bf16 %v909_v36, %v908_v31  ;;  %v917_v40 = vsel %vm885_vm6, %v855_v43, %v901_v32  ;;  %vm883_vm8 = vcmp.ge.f32.partialorder %v847_v37, 0.0  ;;  %v899_v49 = vmul.f32 0.1, %v847_v37  ;;  %v827_v51 = vpop.f32.mrf.mxu0 }
 0x12e   :  { %v1151_v53 = vpack.c.bf16 %v917_v40, %v916_v35  ;;  %v907_v55 = vsel %vm875_vm7, %v815_v4, %v891_v26  ;;  %vm880_vm9 = vcmp.ge.f32.partialorder %v836_v42, 0.0  ;;  %v896_v28 = vmul.f32 0.1, %v836_v42  ;;  %v859_v57 = vpop.f32.mrf.mxu1 }
 0x12f   :  { %1163 = vst [vmem:[%s1788_s3 + $0x8] sm:$0xff] %v1131_v38   ;;  %v1126_v59 = vpack.c.bf16 %v907_v55, %v906_v23  ;;  %v915_v61 = vsel %vm883_vm8, %v847_v37, %v899_v49  ;;  %v868_v63 = vadd.f32 %v1332_v44, %v771_v62  ;;  %v828_v47 = vadd.f32 %v827_v51, %v1723_v45  ;;  %v1325_v1 = vpop.f32.mrf.mxu0 }
 0x130   :  { %1167 = vst [vmem:[%s1788_s3 + $0x28] sm:$0xff] %v1151_v53   ;;  %v1146_v6 = vpack.c.bf16 %v915_v61, %v914_v5  ;;  %v860_v46 = vadd.f32 %v859_v57, %v763_v60  ;;  %v839_v48 = vadd.f32 %v1325_v1, %v1742_v7  ;;  %v1333_v9 = vpop.f32.mrf.mxu1  ;;  %v912_v12 = vsel %vm880_vm9, %v836_v42, %v896_v28 }
 0x131   :  { %1127 = vst [vmem:[%s1788_s3] sm:$0xff] %v1126_v59   ;;  %v830_v45 = vpop.f32.mrf.mxu0  ;;  %vm888_vm10 = vcmp.ge.f32.partialorder %v868_v63, 0.0  ;;  %v904_v7 = vmul.f32 0.1, %v868_v63  ;;  %vm878_vm12 = vcmp.ge.f32.partialorder %v828_v47, 0.0  ;;  %v894_v52 = vmul.f32 0.1, %v828_v47 }
 0x132   :  { %1166 = vst [vmem:[%s1788_s3 + $0x20] sm:$0xff] %v1146_v6   ;;  %vm881_vm11 = vcmp.ge.f32.partialorder %v839_v48, 0.0  ;;  %v897_v19 = vmul.f32 0.1, %v839_v48  ;;  %v862_v50 = vpop.f32.mrf.mxu1  ;;  %v871_v58 = vadd.f32 %v1333_v9, %v774_v13  ;;  %v831_v60 = vadd.f32 %v830_v45, %v734_v15 }
 0x133   :  { %vm886_vm13 = vcmp.ge.f32.partialorder %v860_v46, 0.0  ;;  %v902_v54 = vmul.f32 0.1, %v860_v46  ;;  %v863_v34 = vadd.f32 %v862_v50, %v766_v16  ;;  %v920_v0 = vsel %vm888_vm10, %v868_v63, %v904_v7 }
 0x134   :  { %v913_v30 = vsel %vm881_vm11, %v839_v48, %v897_v19  ;;  %vm889_vm14 = vcmp.ge.f32.partialorder %v871_v58, 0.0  ;;  %v905_v10 = vmul.f32 0.1, %v871_v58  ;;  %vm879_vm15 = vcmp.ge.f32.partialorder %v831_v60, 0.0 }
 0x135   :  { %v1141_v56 = vpack.c.bf16 %v913_v30, %v912_v12  ;;  %v895_v17 = vmul.f32 0.1, %v831_v60  ;;  %vm887_vm0 = vcmp.ge.f32.partialorder %v863_v34, 0.0  ;;  %v903_v62 = vmul.f32 0.1, %v863_v34 }
 0x136   :  { %v910_v2 = vsel %vm878_vm12, %v828_v47, %v894_v52  ;;  %v921_v8 = vsel %vm889_vm14, %v871_v58, %v905_v10  ;;  %v918_v20 = vsel %vm886_vm13, %v860_v46, %v902_v54 }
 0x137   :  { %1165 = vst [vmem:[%s1788_s3 + $0x18] sm:$0xff] %v1141_v56   ;;  %v1161_v18 = vpack.c.bf16 %v921_v8, %v920_v0  ;;  %v911_v24 = vsel %vm879_vm15, %v831_v60, %v895_v17  ;;  %v919_v22 = vsel %vm887_vm0, %v863_v34, %v903_v62 }
 0x138   :  { %v1136_v27 = vpack.c.bf16 %v911_v24, %v910_v2  ;;  %v1156_v29 = vpack.c.bf16 %v919_v22, %v918_v20 }
 0x139   :  { %1169 = vst [vmem:[%s1788_s3 + $0x38] sm:$0xff] %v1161_v18  }
 0x13a   :  { %1164 = vst [vmem:[%s1788_s3 + $0x10] sm:$0xff] %v1136_v27   ;;  %1168 = vst [vmem:[%s1788_s3 + $0x30] sm:$0xff] %v1156_v29  }

// kernel: translation_subnet_forward.5
= control target key start
LH: loop header
LB: loop body
LE: loop exit
PB: predicated region body
PF: predicated region fallthrough
CT: control target
= control target key end

     0   :  { %v206_v35 = vlaneseq  ;;  %v13720_v36 = vmov 1966171168   ;;  %s21245_s1 = inlined_call_operand.vmem [shape: bf16[1152,256], index: 1, kind: input, shape index: {}]   ;;  %s21246_s0 = inlined_call_operand.vmem [shape: bf16[9,2,1152], index: 0, kind: input, shape index: {}]   ;;  %s21247_s3 = inlined_call_operand.vmem [shape: bf16[9,256,512], index: 3, kind: input, shape index: {}]   ;;  %s21248_s2 = inlined_call_operand.vmem [shape: f32[1,256], index: 2, kind: input, shape index: {}]   ;;  %s21249_s4 = inlined_call_operand.vmem [shape: f32[1,512], index: 4, kind: input, shape index: {}]   ;;  %s21250_s5 = inlined_call_operand.vmem [shape: bf16[512,128], index: 5, kind: input, shape index: {}]   ;;  %s21251_s7 = inlined_call_operand.vmem [shape: bf16[128,1024], index: 7, kind: input, shape index: {}]   ;;  %s21252_s9 = inlined_call_operand.vmem [shape: bf16[1024,256], index: 9, kind: input, shape index: {}]   ;;  %s21253_s6 = inlined_call_operand.vmem [shape: f32[1,128], index: 6, kind: input, shape index: {}]   ;;  %s21254_s8 = inlined_call_operand.vmem [shape: f32[1,1024], index: 8, kind: input, shape index: {}]   ;;  %s21255_s11 = inlined_call_operand.vmem [shape: bf16[256,128], index: 11, kind: input, shape index: {}]   ;;  %s21256_s13 = inlined_call_operand.vmem [shape: bf16[128,128], index: 13, kind: input, shape index: {}]   ;;  %s21257_s10 = inlined_call_operand.vmem [shape: f32[1,256], index: 10, kind: input, shape index: {}]   ;;  %s21258_s15 = inlined_call_operand.vmem [shape: bf16[128,128], index: 15, kind: input, shape index: {}]   ;;  %s21259_s12 = inlined_call_operand.vmem [shape: f32[1,128], index: 12, kind: input, shape index: {}]   ;;  %s21260_s14 = inlined_call_operand.vmem [shape: f32[1,128], index: 14, kind: input, shape index: {}]   ;;  %s21261_s16 = inlined_call_operand.vmem [shape: f32[1,128], index: 16, kind: input, shape index: {}]   ;;  %s21262_s17 = inlined_call_operand.vmem [shape: f32[2,128], index: 17, kind: output, shape index: {}]  }
   0x1   :  { %21693 = sst [smem:[#allocation113_spill]] %s21245_s1  ;;  %v220_v37 = vunpack.c.l.s4 %v13720_v36 }
   0x2   :  { %21694 = sst [smem:[#allocation114_spill]] %s21246_s0  ;;  %v13931_v42 = vshrl.u32 %v206_v35, 7 }
   0x3   :  { %s21695_s26 = sld [smem:[#allocation113_spill]]  ;;  %v221_v43 = vunpack.c.0.s8 %v220_v37 }
   0x4   :  { %21696 = vst [vmem:[#allocation2_spill] sm:$0xff] %v13931_v42  ;;  %s21697_s20 = sld [smem:[#allocation114_spill]] }
   0x5   :  { %v13946_v48 = vsub.s32 %v221_v43, %v13931_v42 }
   0x9   :  { %v11797_v0 = vld [vmem:[%s21695_s26 + $0x74] ss:$8 sps:$4 sm:$0xff]   ;;  %v11799_v1 = vld [vmem:[%s21695_s26 + $0x70] ss:$8 sps:$4 sm:$0xff]   ;;  %v11803_v4 = vld [vmem:[%s21695_s26 + $0x64] ss:$8 sps:$4 sm:$0xff]  }
   0xa   :  { %1010 = vmatprep.subr.bf16.mxu0 %v11797_v0  ;;  %v11800_v2 = vld [vmem:[%s21695_s26 + $0x174] ss:$8 sps:$4 sm:$0xff]   ;;  %v11802_v3 = vld [vmem:[%s21695_s26 + $0x170] ss:$8 sps:$4 sm:$0xff]   ;;  %v11805_v5 = vld [vmem:[%s21695_s26 + $0x60] ss:$8 sps:$4 sm:$0xff]  }
   0xb   :  { %1011 = vmatpush1.bf16.msra.mxu0 %v11799_v1  ;;  %1051 = vmatprep.subr.bf16.mxu1 %v11800_v2  ;;  %v11806_v6 = vld [vmem:[%s21695_s26 + $0x164] ss:$8 sps:$4 sm:$0xff]   ;;  %v11808_v7 = vld [vmem:[%s21695_s26 + $0x160] ss:$8 sps:$4 sm:$0xff]   ;;  %v11809_v8 = vld [vmem:[%s21695_s26 + $0x54] ss:$8 sps:$4 sm:$0xff]  }
   0xc   :  { %1052 = vmatpush1.bf16.msra.mxu1 %v11802_v3  ;;  %1012 = vmatprep.subr.bf16.mxu0 %v11803_v4  ;;  %v11811_v9 = vld [vmem:[%s21695_s26 + $0x50] ss:$8 sps:$4 sm:$0xff]   ;;  %v11812_v10 = vld [vmem:[%s21695_s26 + $0x154] ss:$8 sps:$4 sm:$0xff]   ;;  %v11815_v11 = vld [vmem:[%s21695_s26 + $0x44] ss:$8 sps:$4 sm:$0xff]  }
   0xd   :  { %1053 = vmatprep.subr.bf16.mxu1 %v11806_v6  ;;  %v11814_v12 = vld [vmem:[%s21695_s26 + $0x150] ss:$8 sps:$4 sm:$0xff]   ;;  %v11818_v13 = vld [vmem:[%s21695_s26 + $0x144] ss:$8 sps:$4 sm:$0xff]   ;;  %v11817_v14 = vld [vmem:[%s21695_s26 + $0x40] ss:$8 sps:$4 sm:$0xff]  }
   0xe   :  { %v11821_v15 = vld [vmem:[%s21695_s26 + $0x34] ss:$8 sps:$4 sm:$0xff]   ;;  %v11820_v16 = vld [vmem:[%s21695_s26 + $0x140] ss:$8 sps:$4 sm:$0xff]   ;;  %v11823_v18 = vld [vmem:[%s21695_s26 + $0x30] ss:$8 sps:$4 sm:$0xff]  }
   0xf   :  { %1013 = vmatpush1.bf16.msra.mxu0 %v11805_v5  ;;  %v11824_v17 = vld [vmem:[%s21695_s26 + $0x134] ss:$8 sps:$4 sm:$0xff]   ;;  %v11827_v19 = vld [vmem:[%s21695_s26 + $0x24] ss:$8 sps:$4 sm:$0xff]   ;;  %v11826_v20 = vld [vmem:[%s21695_s26 + $0x130] ss:$8 sps:$4 sm:$0xff]  }
  0x10   :  { %1014 = vmatprep.subr.bf16.mxu0 %v11809_v8  ;;  %1054 = vmatpush1.bf16.msra.mxu1 %v11808_v7  ;;  %v11830_v21 = vld [vmem:[%s21695_s26 + $0x124] ss:$8 sps:$4 sm:$0xff]   ;;  %v11829_v22 = vld [vmem:[%s21695_s26 + $0x20] ss:$8 sps:$4 sm:$0xff]   ;;  %v11833_v23 = vld [vmem:[%s21695_s26 + $0x14] ss:$8 sps:$4 sm:$0xff]  }
  0x11   :  { %1055 = vmatprep.subr.bf16.mxu1 %v11812_v10  ;;  %v11832_v24 = vld [vmem:[%s21695_s26 + $0x120] ss:$8 sps:$4 sm:$0xff]   ;;  %v11836_v25 = vld [vmem:[%s21695_s26 + $0x114] ss:$8 sps:$4 sm:$0xff]   ;;  %v11835_v26 = vld [vmem:[%s21695_s26 + $0x10] ss:$8 sps:$4 sm:$0xff]  }
  0x12   :  { %v11839_v27 = vld [vmem:[%s21695_s26 + $0x4] ss:$8 sps:$4 sm:$0xff]   ;;  %v11838_v28 = vld [vmem:[%s21695_s26 + $0x110] ss:$8 sps:$4 sm:$0xff]   ;;  %v11841_v30 = vld [vmem:[%s21695_s26] ss:$8 sps:$4 sm:$0xff]  }
  0x13   :  { %1015 = vmatpush1.bf16.msra.mxu0 %v11811_v9  ;;  %v11842_v29 = vld [vmem:[%s21695_s26 + $0x104] ss:$8 sps:$4 sm:$0xff]   ;;  %v11845_v31 = vld [vmem:[%s21695_s26 + $0xf4] ss:$8 sps:$4 sm:$0xff]   ;;  %v11844_v32 = vld [vmem:[%s21695_s26 + $0x100] ss:$8 sps:$4 sm:$0xff]  }
  0x14   :  { %1016 = vmatprep.subr.bf16.mxu0 %v11815_v11  ;;  %1056 = vmatpush1.bf16.msra.mxu1 %v11814_v12  ;;  %v11848_v33 = vld [vmem:[%s21695_s26 + $0x1f4] ss:$8 sps:$4 sm:$0xff]   ;;  %v11847_v34 = vld [vmem:[%s21695_s26 + $0xf0] ss:$8 sps:$4 sm:$0xff]   ;;  %v11851_v38 = vld [vmem:[%s21695_s26 + $0xe4] ss:$8 sps:$4 sm:$0xff]  }
  0x15   :  { %1057 = vmatprep.subr.bf16.mxu1 %v11818_v13  ;;  %v11850_v39 = vld [vmem:[%s21695_s26 + $0x1f0] ss:$8 sps:$4 sm:$0xff]   ;;  %v11854_v40 = vld [vmem:[%s21695_s26 + $0x1e4] ss:$8 sps:$4 sm:$0xff]   ;;  %v11853_v41 = vld [vmem:[%s21695_s26 + $0xe0] ss:$8 sps:$4 sm:$0xff]  }
  0x16   :  { %v11857_v44 = vld [vmem:[%s21695_s26 + $0xd4] ss:$8 sps:$4 sm:$0xff]   ;;  %v11856_v45 = vld [vmem:[%s21695_s26 + $0x1e0] ss:$8 sps:$4 sm:$0xff]   ;;  %v11859_v47 = vld [vmem:[%s21695_s26 + $0xd0] ss:$8 sps:$4 sm:$0xff]  }
  0x17   :  { %1017 = vmatpush1.bf16.msra.mxu0 %v11817_v14  ;;  %v11860_v46 = vld [vmem:[%s21695_s26 + $0x1d4] ss:$8 sps:$4 sm:$0xff]   ;;  %v11863_v49 = vld [vmem:[%s21695_s26 + $0xc4] ss:$8 sps:$4 sm:$0xff]   ;;  %v11862_v50 = vld [vmem:[%s21695_s26 + $0x1d0] ss:$8 sps:$4 sm:$0xff]  }
  0x18   :  { %1018 = vmatprep.subr.bf16.mxu0 %v11821_v15  ;;  %1058 = vmatpush1.bf16.msra.mxu1 %v11820_v16  ;;  %v11866_v51 = vld [vmem:[%s21695_s26 + $0x1c4] ss:$8 sps:$4 sm:$0xff]   ;;  %v11865_v53 = vld [vmem:[%s21695_s26 + $0xc0] ss:$8 sps:$4 sm:$0xff]   ;;  %v11869_v55 = vld [vmem:[%s21695_s26 + $0xb4] ss:$8 sps:$4 sm:$0xff]  }
  0x19   :  { %1059 = vmatprep.subr.bf16.mxu1 %v11824_v17  ;;  %v58_v52 = vld [vmem:[%s21697_s20] sm:$0xff]  ;;  %v11872_v58 = vld [vmem:[%s21695_s26 + $0x1b4] ss:$8 sps:$4 sm:$0xff]   ;;  %v11871_v59 = vld [vmem:[%s21695_s26 + $0xb0] ss:$8 sps:$4 sm:$0xff]  }
  0x1a   :  { %v225_v54 = vrot.slane %v58_v52, %v13946_v48  ;;  %v11868_v56 = vld [vmem:[%s21695_s26 + $0x1c0] ss:$8 sps:$4 sm:$0xff]   ;;  %v11875_v61 = vld [vmem:[%s21695_s26 + $0xa4] ss:$8 sps:$4 sm:$0xff]   ;;  %v11874_v62 = vld [vmem:[%s21695_s26 + $0x1b0] ss:$8 sps:$4 sm:$0xff]   ;;  %v218_v63 = vcombine.high %v58_v52, %v58_v52 }
  0x1b   :  { %1019 = vmatpush1.bf16.msra.mxu0 %v11823_v18  ;;  %v11878_v1 = vld [vmem:[%s21695_s26 + $0x1a4] ss:$8 sps:$4 sm:$0xff]   ;;  %v11877_v2 = vld [vmem:[%s21695_s26 + $0xa0] ss:$8 sps:$4 sm:$0xff]   ;;  %v11881_v3 = vld [vmem:[%s21695_s26 + $0x94] ss:$8 sps:$4 sm:$0xff]  }
  0x1c   :  { %1020 = vmatprep.subr.bf16.mxu0 %v11827_v19  ;;  %1060 = vmatpush1.bf16.msra.mxu1 %v11826_v20  ;;  %v233_v57 = vcombine.high %v225_v54, %v225_v54  ;;  %v11880_v4 = vld [vmem:[%s21695_s26 + $0x1a0] ss:$8 sps:$4 sm:$0xff]   ;;  %v13996_v5 = vrot.slane %v218_v63, %v13946_v48  ;;  %v11884_v6 = vld [vmem:[%s21695_s26 + $0x194] ss:$8 sps:$4 sm:$0xff]   ;;  %v11883_v7 = vld [vmem:[%s21695_s26 + $0x90] ss:$8 sps:$4 sm:$0xff]   ;;  %v241_v13 = vrot.slane %v225_v54, %v13946_v48 }
  0x1d   :  { %1061 = vmatprep.subr.bf16.mxu1 %v11830_v21  ;;  %v11887_v8 = vld [vmem:[%s21695_s26 + $0x84] ss:$8 sps:$4 sm:$0xff]   ;;  %v11886_v9 = vld [vmem:[%s21695_s26 + $0x190] ss:$8 sps:$4 sm:$0xff]   ;;  %v11889_v12 = vld [vmem:[%s21695_s26 + $0x80] ss:$8 sps:$4 sm:$0xff]  }
  0x1e   :  { %v255_v60 = vrot.slane %v233_v57, %v13946_v48  ;;  %v234_v10 = vcombine.high %v13996_v5, %v13996_v5  ;;  %v11890_v11 = vld [vmem:[%s21695_s26 + $0x184] ss:$8 sps:$4 sm:$0xff]   ;;  %v11894_v14 = vld [vmem:[%s21695_s26 + $0x274] ss:$8 sps:$4 sm:$0xff]   ;;  %v11893_v15 = vld [vmem:[%s21695_s26 + $0x180] ss:$8 sps:$4 sm:$0xff]   ;;  %v263_v19 = vcombine.high %v241_v13, %v241_v13 }
  0x1f   :  { %1021 = vmatpush1.bf16.msra.mxu0 %v11829_v22  ;;  %v11897_v17 = vld [vmem:[%s21695_s26 + $0x374] ss:$8 sps:$4 sm:$0xff]   ;;  %v11896_v18 = vld [vmem:[%s21695_s26 + $0x270] ss:$8 sps:$4 sm:$0xff]   ;;  %v11900_v20 = vld [vmem:[%s21695_s26 + $0x264] ss:$8 sps:$4 sm:$0xff]  }
  0x20   :  { %1022 = vmatprep.subr.bf16.mxu0 %v11833_v23  ;;  %1062 = vmatpush1.bf16.msra.mxu1 %v11832_v24  ;;  %v265_v0 = vcombine.high %v255_v60, %v255_v60  ;;  %v262_v16 = vrot.slane %v234_v10, %v13946_v48  ;;  %v11899_v21 = vld [vmem:[%s21695_s26 + $0x370] ss:$8 sps:$4 sm:$0xff]   ;;  %v11903_v23 = vld [vmem:[%s21695_s26 + $0x364] ss:$8 sps:$4 sm:$0xff]   ;;  %v11902_v24 = vld [vmem:[%s21695_s26 + $0x260] ss:$8 sps:$4 sm:$0xff]  }
  0x21   :  { %1063 = vmatprep.subr.bf16.mxu1 %v11836_v25  ;;  %1042 = vmatprep.mubr.bf16.mxu0 %v255_v60  ;;  %v11906_v25 = vld [vmem:[%s21695_s26 + $0x254] ss:$8 sps:$4 sm:$0xff]   ;;  %v11920_v36 = vld [vmem:[%s21695_s26 + $0x230] ss:$8 sps:$4 sm:$0xff]   ;;  %v11924_v37 = vld [vmem:[%s21695_s26 + $0x224] ss:$8 sps:$4 sm:$0xff]  }
  0x22   :  { %1083 = vmatprep.mubr.bf16.mxu1 %v265_v0  ;;  %v266_v22 = vcombine.high %v262_v16, %v262_v16  ;;  %v11921_v35 = vld [vmem:[%s21695_s26 + $0x334] ss:$8 sps:$4 sm:$0xff]   ;;  %v11929_v43 = vld [vmem:[%s21695_s26 + $0x320] ss:$8 sps:$4 sm:$0xff]   ;;  %v11944_v54 = vld [vmem:[%s21695_s26 + $0x2f0] ss:$8 sps:$4 sm:$0xff]  }
  0x23   :  { %1023 = vmatpush1.bf16.msra.mxu0 %v11835_v26  ;;  %v11905_v26 = vld [vmem:[%s21695_s26 + $0x360] ss:$8 sps:$4 sm:$0xff]   ;;  %v11951_v57 = vld [vmem:[%s21695_s26 + $0x3e4] ss:$8 sps:$4 sm:$0xff]   ;;  %v11959_v0 = vld [vmem:[%s21695_s26 + $0x3d0] ss:$8 sps:$4 sm:$0xff]  }
  0x24   :  { %1024 = vmatprep.subr.bf16.mxu0 %v11839_v27  ;;  %1064 = vmatpush1.bf16.msra.mxu1 %v11838_v28  ;;  %v11909_v27 = vld [vmem:[%s21695_s26 + $0x354] ss:$8 sps:$4 sm:$0xff]   ;;  %v11908_v28 = vld [vmem:[%s21695_s26 + $0x250] ss:$8 sps:$4 sm:$0xff]   ;;  %v11941_v52 = vld [vmem:[%s21695_s26 + $0x300] ss:$8 sps:$4 sm:$0xff]  }
  0x25   :  { %1065 = vmatprep.subr.bf16.mxu1 %v11842_v29  ;;  %v11912_v29 = vld [vmem:[%s21695_s26 + $0x244] ss:$8 sps:$4 sm:$0xff]   ;;  %v11953_v60 = vld [vmem:[%s21695_s26 + $0x3e0] ss:$8 sps:$4 sm:$0xff]  }
  0x26   :  { %v11960_v63 = vld [vmem:[%s21695_s26 + $0x2c4] ss:$8 sps:$4 sm:$0xff]  }
  0x27   :  { %1025 = vmatpush1.bf16.msra.mxu0 %v11841_v30  ;;  %v11911_v30 = vld [vmem:[%s21695_s26 + $0x350] ss:$8 sps:$4 sm:$0xff]   ;;  %v11975_v10 = vld [vmem:[%s21695_s26 + $0x3a4] ss:$8 sps:$4 sm:$0xff]  }
  0x28   :  { %1026 = vmatprep.subr.bf16.mxu0 %v11845_v31  ;;  %1066 = vmatpush1.bf16.msra.mxu1 %v11844_v32  ;;  %v11915_v31 = vld [vmem:[%s21695_s26 + $0x344] ss:$8 sps:$4 sm:$0xff]   ;;  %v11914_v32 = vld [vmem:[%s21695_s26 + $0x240] ss:$8 sps:$4 sm:$0xff]  }
  0x29   :  { %1067 = vmatprep.subr.bf16.mxu1 %v11848_v33  ;;  %v11918_v33 = vld [vmem:[%s21695_s26 + $0x234] ss:$8 sps:$4 sm:$0xff]  }
  0x2b   :  { %1027 = vmatpush2.bf16.msra.mxu0 %v11847_v34  ;;  %v11917_v34 = vld [vmem:[%s21695_s26 + $0x340] ss:$8 sps:$4 sm:$0xff]  }
  0x2c   :  { %1028 = vmatprep.subr.bf16.mxu0 %v11851_v38  ;;  %1068 = vmatpush2.bf16.msra.mxu1 %v11850_v39  ;;  %v11923_v38 = vld [vmem:[%s21695_s26 + $0x330] ss:$8 sps:$4 sm:$0xff]   ;;  %v11927_v39 = vld [vmem:[%s21695_s26 + $0x324] ss:$8 sps:$4 sm:$0xff]  }
  0x2d   :  { %1069 = vmatprep.subr.bf16.mxu1 %v11854_v40  ;;  %v11926_v40 = vld [vmem:[%s21695_s26 + $0x220] ss:$8 sps:$4 sm:$0xff]  }
  0x2f   :  { %1029 = vmatpush2.bf16.msra.mxu0 %v11853_v41  ;;  %v11930_v41 = vld [vmem:[%s21695_s26 + $0x214] ss:$8 sps:$4 sm:$0xff]  }
  0x30   :  { %1030 = vmatprep.subr.bf16.mxu0 %v11857_v44  ;;  %1070 = vmatpush2.bf16.msra.mxu1 %v11856_v45  ;;  %v11933_v44 = vld [vmem:[%s21695_s26 + $0x314] ss:$8 sps:$4 sm:$0xff]   ;;  %v11932_v45 = vld [vmem:[%s21695_s26 + $0x210] ss:$8 sps:$4 sm:$0xff]  }
  0x31   :  { %1071 = vmatprep.subr.bf16.mxu1 %v11860_v46  ;;  %v11936_v46 = vld [vmem:[%s21695_s26 + $0x204] ss:$8 sps:$4 sm:$0xff]  }
  0x33   :  { %1031 = vmatpush2.bf16.msra.mxu0 %v11859_v47  ;;  %v11935_v47 = vld [vmem:[%s21695_s26 + $0x310] ss:$8 sps:$4 sm:$0xff]  }
  0x34   :  { %1032 = vmatprep.subr.bf16.mxu0 %v11863_v49  ;;  %1072 = vmatpush2.bf16.msra.mxu1 %v11862_v50  ;;  %v11939_v49 = vld [vmem:[%s21695_s26 + $0x304] ss:$8 sps:$4 sm:$0xff]   ;;  %v11938_v50 = vld [vmem:[%s21695_s26 + $0x200] ss:$8 sps:$4 sm:$0xff]  }
  0x35   :  { %1073 = vmatprep.subr.bf16.mxu1 %v11866_v51  ;;  %v11942_v51 = vld [vmem:[%s21695_s26 + $0x2f4] ss:$8 sps:$4 sm:$0xff]  }
  0x37   :  { %1033 = vmatpush2.bf16.msra.mxu0 %v11865_v53  ;;  %v11945_v53 = vld [vmem:[%s21695_s26 + $0x3f4] ss:$8 sps:$4 sm:$0xff]  }
  0x38   :  { %1034 = vmatprep.subr.bf16.mxu0 %v11869_v55  ;;  %1074 = vmatpush2.bf16.msra.mxu1 %v11868_v56  ;;  %v11948_v55 = vld [vmem:[%s21695_s26 + $0x2e4] ss:$8 sps:$4 sm:$0xff]   ;;  %v11947_v56 = vld [vmem:[%s21695_s26 + $0x3f0] ss:$8 sps:$4 sm:$0xff]  }
  0x39   :  { %1075 = vmatprep.subr.bf16.mxu1 %v11872_v58  ;;  %v11950_v58 = vld [vmem:[%s21695_s26 + $0x2e0] ss:$8 sps:$4 sm:$0xff]  }
  0x3b   :  { %1035 = vmatpush2.bf16.msra.mxu0 %v11871_v59  ;;  %v11954_v59 = vld [vmem:[%s21695_s26 + $0x2d4] ss:$8 sps:$4 sm:$0xff]  }
  0x3c   :  { %1036 = vmatprep.subr.bf16.mxu0 %v11875_v61  ;;  %1076 = vmatpush2.bf16.msra.mxu1 %v11874_v62  ;;  %v11957_v61 = vld [vmem:[%s21695_s26 + $0x3d4] ss:$8 sps:$4 sm:$0xff]   ;;  %v11956_v62 = vld [vmem:[%s21695_s26 + $0x2d0] ss:$8 sps:$4 sm:$0xff]  }
  0x3d   :  { %1077 = vmatprep.subr.bf16.mxu1 %v11878_v1  ;;  %v11963_v1 = vld [vmem:[%s21695_s26 + $0x3c4] ss:$8 sps:$4 sm:$0xff]  }
  0x3f   :  { %1037 = vmatpush2.bf16.msra.mxu0 %v11877_v2  ;;  %v11962_v2 = vld [vmem:[%s21695_s26 + $0x2c0] ss:$8 sps:$4 sm:$0xff]  }
  0x40   :  { %1038 = vmatprep.subr.bf16.mxu0 %v11881_v3  ;;  %1078 = vmatpush2.bf16.msra.mxu1 %v11880_v4  ;;  %v11966_v3 = vld [vmem:[%s21695_s26 + $0x2b4] ss:$8 sps:$4 sm:$0xff]   ;;  %v11965_v4 = vld [vmem:[%s21695_s26 + $0x3c0] ss:$8 sps:$4 sm:$0xff]  }
  0x41   :  { %1079 = vmatprep.subr.bf16.mxu1 %v11884_v6  ;;  %v11969_v6 = vld [vmem:[%s21695_s26 + $0x3b4] ss:$8 sps:$4 sm:$0xff]  }
  0x43   :  { %1039 = vmatpush2.bf16.msra.mxu0 %v11883_v7  ;;  %v11968_v7 = vld [vmem:[%s21695_s26 + $0x2b0] ss:$8 sps:$4 sm:$0xff]  }
  0x44   :  { %1040 = vmatprep.subr.bf16.mxu0 %v11887_v8  ;;  %1080 = vmatpush2.bf16.msra.mxu1 %v11886_v9  ;;  %v11972_v8 = vld [vmem:[%s21695_s26 + $0x2a4] ss:$8 sps:$4 sm:$0xff]   ;;  %v11971_v9 = vld [vmem:[%s21695_s26 + $0x3b0] ss:$8 sps:$4 sm:$0xff]  }
  0x45   :  { %1081 = vmatprep.subr.bf16.mxu1 %v11890_v11  ;;  %v11974_v11 = vld [vmem:[%s21695_s26 + $0x2a0] ss:$8 sps:$4 sm:$0xff]  }
  0x47   :  { %1041 = vmatpush2.bf16.msra.mxu0 %v11889_v12  ;;  %v11978_v12 = vld [vmem:[%s21695_s26 + $0x294] ss:$8 sps:$4 sm:$0xff]  }
  0x48   :  { %1092 = vmatprep.subr.bf16.mxu0 %v11894_v14  ;;  %1082 = vmatpush2.bf16.msra.mxu1 %v11893_v15  ;;  %v11981_v14 = vld [vmem:[%s21695_s26 + $0x394] ss:$8 sps:$4 sm:$0xff]   ;;  %v11980_v15 = vld [vmem:[%s21695_s26 + $0x290] ss:$8 sps:$4 sm:$0xff]  }
  0x49   :  { %1133 = vmatprep.subr.bf16.mxu1 %v11897_v17  ;;  %v11983_v17 = vld [vmem:[%s21695_s26 + $0x390] ss:$8 sps:$4 sm:$0xff]  }
  0x4a   :  { %1043 = vmatmul.mubr.bf16.vlgmr.msra.gmra.mxu0 %v241_v13  ;;  %v11977_v13 = vld [vmem:[%s21695_s26 + $0x3a0] ss:$8 sps:$4 sm:$0xff]  }
  0x4b   :  { %1093 = vmatpush1.bf16.msra.mxu0 %v11896_v18  ;;  %1124 = vmatprep.mubr.bf16.mxu0 %v262_v16  ;;  %v11984_v16 = vld [vmem:[%s21695_s26 + $0x284] ss:$8 sps:$4 sm:$0xff]  }
  0x4c   :  { %1084 = vmatmul.mubr.bf16.vlgmr.msra.gmra.mxu1 %v263_v19  ;;  %1094 = vmatprep.subr.bf16.mxu0 %v11900_v20  ;;  %v11987_v18 = vld [vmem:[%s21695_s26 + $0x384] ss:$8 sps:$4 sm:$0xff]   ;;  %v11986_v19 = vld [vmem:[%s21695_s26 + $0x280] ss:$8 sps:$4 sm:$0xff]   ;;  %v248_v20 = vrot.slane %v13996_v5, %v13946_v48 }
  0x4d   :  { %1134 = vmatpush1.bf16.msra.mxu1 %v11899_v21  ;;  %1165 = vmatprep.mubr.bf16.mxu1 %v266_v22  ;;  %v11990_v21 = vld [vmem:[%s21695_s26 + $0x474] ss:$8 sps:$4 sm:$0xff]   ;;  %v11989_v22 = vld [vmem:[%s21695_s26 + $0x380] ss:$8 sps:$4 sm:$0xff]   ;;  %v11993_v5 = vld [vmem:[%s21695_s26 + $0x464] ss:$8 sps:$4 sm:$0xff]  }
  0x4e   :  { %1135 = vmatprep.subr.bf16.mxu1 %v11903_v23  ;;  %v11992_v23 = vld [vmem:[%s21695_s26 + $0x470] ss:$8 sps:$4 sm:$0xff]  }
  0x4f   :  { %1095 = vmatpush1.bf16.msra.mxu0 %v11902_v24  ;;  %v264_v24 = vcombine.high %v248_v20, %v248_v20 }
  0x50   :  { %1096 = vmatprep.subr.bf16.mxu0 %v11906_v25  ;;  %v11995_v25 = vld [vmem:[%s21695_s26 + $0x460] ss:$8 sps:$4 sm:$0xff]  }
  0x51   :  { %1136 = vmatpush1.bf16.msra.mxu1 %v11905_v26  ;;  %v21265_v26 = vmov 0  }
  0x52   :  { %1137 = vmatprep.subr.bf16.mxu1 %v11909_v27  ;;  %v11996_v27 = vld [vmem:[%s21695_s26 + $0x454] ss:$8 sps:$4 sm:$0xff]  }
  0x53   :  { %1097 = vmatpush1.bf16.msra.mxu0 %v11908_v28  ;;  %v11998_v28 = vld [vmem:[%s21695_s26 + $0x450] ss:$8 sps:$4 sm:$0xff]  }
  0x54   :  { %1098 = vmatprep.subr.bf16.mxu0 %v11912_v29  ;;  %v11999_v29 = vld [vmem:[%s21695_s26 + $0x444] ss:$8 sps:$4 sm:$0xff]  }
  0x55   :  { %1138 = vmatpush1.bf16.msra.mxu1 %v11911_v30  ;;  %v12001_v30 = vld [vmem:[%s21695_s26 + $0x440] ss:$8 sps:$4 sm:$0xff]  }
  0x56   :  { %1139 = vmatprep.subr.bf16.mxu1 %v11915_v31  ;;  %v12002_v31 = vld [vmem:[%s21695_s26 + $0x434] ss:$8 sps:$4 sm:$0xff]  }
  0x57   :  { %1099 = vmatpush1.bf16.msra.mxu0 %v11914_v32  ;;  %v12014_v32 = vld [vmem:[%s21247_s3 + $0xe0] ss:$16 sps:$4 sm:$0xff]  }
  0x58   :  { %1100 = vmatprep.subr.bf16.mxu0 %v11918_v33  ;;  %v12016_v33 = vld [vmem:[%s21247_s3 + $0xe4] ss:$16 sps:$4 sm:$0xff]  }
  0x59   :  { %1140 = vmatpush1.bf16.msra.mxu1 %v11917_v34  ;;  %v12004_v34 = vld [vmem:[%s21695_s26 + $0x430] ss:$8 sps:$4 sm:$0xff]  }
  0x5a   :  { %1141 = vmatprep.subr.bf16.mxu1 %v11921_v35  ;;  %v12022_v35 = vld [vmem:[%s21247_s3 + $0xc4] ss:$16 sps:$4 sm:$0xff]  }
  0x5b   :  { %1101 = vmatpush1.bf16.msra.mxu0 %v11920_v36  ;;  %v12020_v36 = vld [vmem:[%s21247_s3 + $0xc0] ss:$16 sps:$4 sm:$0xff]  }
  0x5c   :  { %1102 = vmatprep.subr.bf16.mxu0 %v11924_v37  ;;  %v12005_v37 = vld [vmem:[%s21695_s26 + $0x424] ss:$8 sps:$4 sm:$0xff]  }
  0x5d   :  { %1142 = vmatpush1.bf16.msra.mxu1 %v11923_v38  ;;  %v12028_v38 = vld [vmem:[%s21247_s3 + $0xa4] ss:$16 sps:$4 sm:$0xff]  }
  0x5e   :  { %1143 = vmatprep.subr.bf16.mxu1 %v11927_v39  ;;  %v12007_v39 = vld [vmem:[%s21695_s26 + $0x420] ss:$8 sps:$4 sm:$0xff]  }
  0x5f   :  { %1103 = vmatpush1.bf16.msra.mxu0 %v11926_v40  ;;  %v12008_v40 = vld [vmem:[%s21695_s26 + $0x414] ss:$8 sps:$4 sm:$0xff]  }
  0x60   :  { %1104 = vmatprep.subr.bf16.mxu0 %v11930_v41  ;;  %v12026_v41 = vld [vmem:[%s21247_s3 + $0xa0] ss:$16 sps:$4 sm:$0xff]  }
  0x61   :  { %1144 = vmatpush1.bf16.msra.mxu1 %v11929_v43  ;;  %v12034_v43 = vld [vmem:[%s21247_s3 + $0x84] ss:$16 sps:$4 sm:$0xff]  }
  0x62   :  { %1145 = vmatprep.subr.bf16.mxu1 %v11933_v44  ;;  %v12010_v44 = vld [vmem:[%s21695_s26 + $0x410] ss:$8 sps:$4 sm:$0xff]  }
  0x63   :  { %1105 = vmatpush1.bf16.msra.mxu0 %v11932_v45  ;;  %v12011_v45 = vld [vmem:[%s21695_s26 + $0x404] ss:$8 sps:$4 sm:$0xff]  }
  0x64   :  { %1106 = vmatprep.subr.bf16.mxu0 %v11936_v46  ;;  %v12032_v46 = vld [vmem:[%s21247_s3 + $0x80] ss:$16 sps:$4 sm:$0xff]  }
  0x65   :  { %1146 = vmatpush1.bf16.msra.mxu1 %v11935_v47  ;;  %v12040_v47 = vld [vmem:[%s21247_s3 + $0x64] ss:$16 sps:$4 sm:$0xff]  }
  0x66   :  { %1147 = vmatprep.subr.bf16.mxu1 %v11939_v49  ;;  %v12013_v49 = vld [vmem:[%s21695_s26 + $0x400] ss:$8 sps:$4 sm:$0xff]  }
  0x67   :  { %1107 = vmatpush1.bf16.msra.mxu0 %v11938_v50  ;;  %v10152_v50 = vld.sshfl [vmem:[%s21697_s20 + $0x8] sm:$0x1 pattern:$0x75316420] }
  0x68   :  { %1108 = vmatprep.subr.bf16.mxu0 %v11942_v51  ;;  %v12019_v51 = vld [vmem:[%s21247_s3 + $0xec] ss:$16 sps:$4 sm:$0xff]  }
  0x69   :  { %1148 = vmatpush1.bf16.msra.mxu1 %v11941_v52  ;;  %v12038_v52 = vld [vmem:[%s21247_s3 + $0x60] ss:$16 sps:$4 sm:$0xff]  }
  0x6a   :  { %1149 = vmatprep.subr.bf16.mxu1 %v11945_v53  ;;  %v12046_v53 = vld [vmem:[%s21247_s3 + $0x44] ss:$16 sps:$4 sm:$0xff]  }
  0x6b   :  { %1109 = vmatpush2.bf16.msra.mxu0 %v11944_v54  ;;  %v12017_v54 = vld [vmem:[%s21247_s3 + $0xe8] ss:$16 sps:$4 sm:$0xff]  }
  0x6c   :  { %1110 = vmatprep.subr.bf16.mxu0 %v11948_v55  ;;  %v12044_v55 = vld [vmem:[%s21247_s3 + $0x40] ss:$16 sps:$4 sm:$0xff]  }
  0x6d   :  { %1150 = vmatpush2.bf16.msra.mxu1 %v11947_v56  ;;  %v280_v56 = vrot.slane %v10152_v50, %v13946_v48  ;;  %v14475_v50 = vsub.s32 1, %v13931_v42 }
  0x6e   :  { %1151 = vmatprep.subr.bf16.mxu1 %v11951_v57  ;;  %v12025_v57 = vld [vmem:[%s21247_s3 + $0xcc] ss:$16 sps:$4 sm:$0xff]  }
  0x6f   :  { %1111 = vmatpush2.bf16.msra.mxu0 %v11950_v58  ;;  %v12023_v58 = vld [vmem:[%s21247_s3 + $0xc8] ss:$16 sps:$4 sm:$0xff]   ;;  %21699 = vst [vmem:[#allocation4_spill] sm:$0xff] %v14475_v50 }
  0x70   :  { %1112 = vmatprep.subr.bf16.mxu0 %v11954_v59  ;;  %v12031_v59 = vld [vmem:[%s21247_s3 + $0xac] ss:$16 sps:$4 sm:$0xff]  }
  0x71   :  { %1152 = vmatpush2.bf16.msra.mxu1 %v11953_v60  ;;  %v12029_v60 = vld [vmem:[%s21247_s3 + $0xa8] ss:$16 sps:$4 sm:$0xff]  }
  0x72   :  { %1153 = vmatprep.subr.bf16.mxu1 %v11957_v61  ;;  %v12037_v61 = vld [vmem:[%s21247_s3 + $0x8c] ss:$16 sps:$4 sm:$0xff]  }
  0x73   :  { %1113 = vmatpush2.bf16.msra.mxu0 %v11956_v62  ;;  %v12035_v62 = vld [vmem:[%s21247_s3 + $0x88] ss:$16 sps:$4 sm:$0xff]  }
  0x74   :  { %1114 = vmatprep.subr.bf16.mxu0 %v11960_v63  ;;  %v12043_v63 = vld [vmem:[%s21247_s3 + $0x6c] ss:$16 sps:$4 sm:$0xff]  }
  0x75   :  { %1154 = vmatpush2.bf16.msra.mxu1 %v11959_v0  ;;  %v12041_v0 = vld [vmem:[%s21247_s3 + $0x68] ss:$16 sps:$4 sm:$0xff]  }
  0x76   :  { %1155 = vmatprep.subr.bf16.mxu1 %v11963_v1  ;;  %v12049_v1 = vld [vmem:[%s21247_s3 + $0x4c] ss:$16 sps:$4 sm:$0xff]  }
  0x77   :  { %1115 = vmatpush2.bf16.msra.mxu0 %v11962_v2  ;;  %v12047_v2 = vld [vmem:[%s21247_s3 + $0x48] ss:$16 sps:$4 sm:$0xff]  }
  0x78   :  { %1116 = vmatprep.subr.bf16.mxu0 %v11966_v3  ;;  %v12052_v3 = vld [vmem:[%s21247_s3 + $0x24] ss:$16 sps:$4 sm:$0xff]  }
  0x79   :  { %1156 = vmatpush2.bf16.msra.mxu1 %v11965_v4  ;;  %v12050_v4 = vld [vmem:[%s21247_s3 + $0x20] ss:$16 sps:$4 sm:$0xff]  }
  0x7a   :  { %1157 = vmatprep.subr.bf16.mxu1 %v11969_v6  ;;  %v12055_v6 = vld [vmem:[%s21247_s3 + $0x2c] ss:$16 sps:$4 sm:$0xff]  }
  0x7b   :  { %1117 = vmatpush2.bf16.msra.mxu0 %v11968_v7  ;;  %v12053_v7 = vld [vmem:[%s21247_s3 + $0x28] ss:$16 sps:$4 sm:$0xff]  }
  0x7c   :  { %1118 = vmatprep.subr.bf16.mxu0 %v11972_v8  ;;  %v12058_v8 = vld [vmem:[%s21247_s3 + $0x4] ss:$16 sps:$4 sm:$0xff]  }
  0x7d   :  { %1158 = vmatpush2.bf16.msra.mxu1 %v11971_v9  ;;  %v12056_v9 = vld [vmem:[%s21247_s3] ss:$16 sps:$4 sm:$0xff]  }
  0x7e   :  { %1159 = vmatprep.subr.bf16.mxu1 %v11975_v10  ;;  %v12061_v10 = vld [vmem:[%s21247_s3 + $0xc] ss:$16 sps:$4 sm:$0xff]  }
  0x7f   :  { %1119 = vmatpush2.bf16.msra.mxu0 %v11974_v11  ;;  %v12059_v11 = vld [vmem:[%s21247_s3 + $0x8] ss:$16 sps:$4 sm:$0xff]  }
  0x80   :  { %1120 = vmatprep.subr.bf16.mxu0 %v11978_v12  ;;  %v12064_v12 = vld [vmem:[%s21247_s3 + $0x1e4] ss:$16 sps:$4 sm:$0xff]  }
  0x81   :  { %1160 = vmatpush2.bf16.msra.mxu1 %v11977_v13  ;;  %v12062_v13 = vld [vmem:[%s21247_s3 + $0x1e0] ss:$16 sps:$4 sm:$0xff]  }
  0x82   :  { %1161 = vmatprep.subr.bf16.mxu1 %v11981_v14  ;;  %v12067_v14 = vld [vmem:[%s21247_s3 + $0x1ec] ss:$16 sps:$4 sm:$0xff]  }
  0x83   :  { %1121 = vmatpush2.bf16.msra.mxu0 %v11980_v15  ;;  %v12065_v15 = vld [vmem:[%s21247_s3 + $0x1e8] ss:$16 sps:$4 sm:$0xff]  }
  0x84   :  { %1122 = vmatprep.subr.bf16.mxu0 %v11984_v16  ;;  %v12070_v16 = vld [vmem:[%s21247_s3 + $0x1c4] ss:$16 sps:$4 sm:$0xff]  }
  0x85   :  { %1162 = vmatpush2.bf16.msra.mxu1 %v11983_v17  ;;  %v12073_v17 = vld [vmem:[%s21247_s3 + $0x1cc] ss:$16 sps:$4 sm:$0xff]  }
  0x86   :  { %1163 = vmatprep.subr.bf16.mxu1 %v11987_v18  ;;  %v12068_v18 = vld [vmem:[%s21247_s3 + $0x1c0] ss:$16 sps:$4 sm:$0xff]  }
  0x87   :  { %1123 = vmatpush2.bf16.msra.mxu0 %v11986_v19  ;;  %v12071_v19 = vld [vmem:[%s21247_s3 + $0x1c8] ss:$16 sps:$4 sm:$0xff]  }
  0x88   :  { %1174 = vmatprep.subr.bf16.mxu0 %v11990_v21  ;;  %v12074_v21 = vld [vmem:[%s21247_s3 + $0x1a0] ss:$16 sps:$4 sm:$0xff]  }
  0x89   :  { %1164 = vmatpush2.bf16.msra.mxu1 %v11989_v22  ;;  %v12079_v22 = vld [vmem:[%s21247_s3 + $0x1ac] ss:$16 sps:$4 sm:$0xff]  }
  0x8a   :  { %1125 = vmatmul.mubr.bf16.vlgmr.msra.gmra.mxu0 %v248_v20  ;;  %1607 = vmatprep.subr.bf16.mxu1 %v12016_v33  ;;  %v12076_v20 = vld [vmem:[%s21247_s3 + $0x1a4] ss:$16 sps:$4 sm:$0xff]   ;;  %v12097_v33 = vld [vmem:[%s21247_s3 + $0x14c] ss:$16 sps:$4 sm:$0xff]  }
  0x8b   :  { %1175 = vmatpush1.bf16.msra.mxu0 %v11992_v23  ;;  %1206 = vmatprep.mubr.bf16.mxu0 %v21265_v26  ;;  %v12077_v23 = vld [vmem:[%s21247_s3 + $0x1a8] ss:$16 sps:$4 sm:$0xff]   ;;  %v14829_v26 = vld [vmem:[%s21695_s26 + $0x94] ss:$8 sps:$4 sm:$0xff]  }
  0x8c   :  { %1166 = vmatmul.mubr.bf16.vlgmr.msra.gmra.mxu1 %v264_v24  ;;  %1176 = vmatprep.subr.bf16.mxu0 %v11993_v5  ;;  %v12082_v24 = vld [vmem:[%s21247_s3 + $0x184] ss:$16 sps:$4 sm:$0xff]   ;;  %v12085_v5 = vld [vmem:[%s21247_s3 + $0x18c] ss:$16 sps:$4 sm:$0xff]   ;;  %21714 = vst [vmem:[#allocation19_spill] sm:$0xff] %v14829_v26 }
  0x8d   :  { %1608 = vmatpush1.bf16.msra.mxu1 %v12014_v32  ;;  %v12094_v32 = vld [vmem:[%s21247_s3 + $0x144] ss:$16 sps:$4 sm:$0xff]  }
  0x8e   :  { %1609 = vmatprep.subr.bf16.mxu1 %v12022_v35  ;;  %v12095_v35 = vld [vmem:[%s21247_s3 + $0x148] ss:$16 sps:$4 sm:$0xff]  }
  0x8f   :  { %1177 = vmatpush1.bf16.msra.mxu0 %v11995_v25  ;;  %v12080_v25 = vld [vmem:[%s21247_s3 + $0x180] ss:$16 sps:$4 sm:$0xff]  }
  0x90   :  { %1178 = vmatprep.subr.bf16.mxu0 %v11996_v27  ;;  %v12083_v27 = vld [vmem:[%s21247_s3 + $0x188] ss:$16 sps:$4 sm:$0xff]  }
  0x91   :  { %1610 = vmatpush1.bf16.msra.mxu1 %v12020_v36  ;;  %v12100_v36 = vld [vmem:[%s21247_s3 + $0x124] ss:$16 sps:$4 sm:$0xff]  }
  0x92   :  { %1611 = vmatprep.subr.bf16.mxu1 %v12028_v38  ;;  %v12103_v38 = vld [vmem:[%s21247_s3 + $0x12c] ss:$16 sps:$4 sm:$0xff]  }
  0x93   :  { %1179 = vmatpush1.bf16.msra.mxu0 %v11998_v28  ;;  %v12088_v28 = vld [vmem:[%s21247_s3 + $0x164] ss:$16 sps:$4 sm:$0xff]  }
  0x94   :  { %1180 = vmatprep.subr.bf16.mxu0 %v11999_v29  ;;  %v12091_v29 = vld [vmem:[%s21247_s3 + $0x16c] ss:$16 sps:$4 sm:$0xff]  }
  0x95   :  { %1612 = vmatpush1.bf16.msra.mxu1 %v12026_v41  ;;  %v12104_v41 = vld [vmem:[%s21247_s3 + $0x100] ss:$16 sps:$4 sm:$0xff]  }
  0x96   :  { %1613 = vmatprep.subr.bf16.mxu1 %v12034_v43  ;;  %v12109_v43 = vld [vmem:[%s21247_s3 + $0x10c] ss:$16 sps:$4 sm:$0xff]  }
  0x97   :  { %1181 = vmatpush1.bf16.msra.mxu0 %v12001_v30  ;;  %v12086_v30 = vld [vmem:[%s21247_s3 + $0x160] ss:$16 sps:$4 sm:$0xff]  }
  0x98   :  { %1182 = vmatprep.subr.bf16.mxu0 %v12002_v31  ;;  %v12089_v31 = vld [vmem:[%s21247_s3 + $0x168] ss:$16 sps:$4 sm:$0xff]  }
  0x99   :  { %1614 = vmatpush1.bf16.msra.mxu1 %v12032_v46  ;;  %v13143_v46 = vld [vmem:[%s21695_s26 + $0x174] ss:$8 sps:$4 sm:$0xff]  }
  0x9a   :  { %1615 = vmatprep.subr.bf16.mxu1 %v12040_v47  ;;  %v204_v47 = vld [vmem:[%s21248_s2] sm:$0x3] }
  0x9b   :  { %1183 = vmatpush1.bf16.msra.mxu0 %v12004_v34  ;;  %v12092_v34 = vld [vmem:[%s21247_s3 + $0x140] ss:$16 sps:$4 sm:$0xff]  }
  0x9c   :  { %1184 = vmatprep.subr.bf16.mxu0 %v12005_v37  ;;  %v12098_v37 = vld [vmem:[%s21247_s3 + $0x120] ss:$16 sps:$4 sm:$0xff]  }
  0x9d   :  { %1616 = vmatpush1.bf16.msra.mxu1 %v12038_v52  ;;  %v14481_v52 = vrot.slane %v204_v47, %v14475_v50 }
  0x9e   :  { %1617 = vmatprep.subr.bf16.mxu1 %v12046_v53 }
  0x9f   :  { %1185 = vmatpush1.bf16.msra.mxu0 %v12007_v39  ;;  %v12101_v39 = vld [vmem:[%s21247_s3 + $0x128] ss:$16 sps:$4 sm:$0xff]  }
  0xa0   :  { %1186 = vmatprep.subr.bf16.mxu0 %v12008_v40  ;;  %v12106_v40 = vld [vmem:[%s21247_s3 + $0x104] ss:$16 sps:$4 sm:$0xff]  }
  0xa1   :  { %1618 = vmatpush1.bf16.msra.mxu1 %v12044_v55 }
  0xa2   :  { %1619 = vmatprep.subr.bf16.mxu1 %v12052_v3 }
  0xa3   :  { %1187 = vmatpush1.bf16.msra.mxu0 %v12010_v44  ;;  %v12107_v44 = vld [vmem:[%s21247_s3 + $0x108] ss:$16 sps:$4 sm:$0xff]  }
  0xa4   :  { %1188 = vmatprep.subr.bf16.mxu0 %v12011_v45  ;;  %v13142_v45 = vld [vmem:[%s21695_s26 + $0x74] ss:$8 sps:$4 sm:$0xff]  }
  0xa5   :  { %1620 = vmatpush1.bf16.msra.mxu1 %v12050_v4 }
  0xa6   :  { %1621 = vmatprep.subr.bf16.mxu1 %v12058_v8 }
  0xa7   :  { %1189 = vmatpush1.bf16.msra.mxu0 %v12013_v49  ;;  %v14472_v49 = vsub.s32 0, %v13931_v42  ;;  %v14845_v42 = vld [vmem:[%s21695_s26 + $0x90] ss:$8 sps:$4 sm:$0xff]  }
  0xa8   :  { %1648 = vmatprep.subr.bf16.mxu0 %v12019_v51  ;;  %21716 = vst [vmem:[#allocation21_spill] sm:$0xff] %v14845_v42 }
  0xa9   :  { %1622 = vmatpush1.bf16.msra.mxu1 %v12056_v9  ;;  %21698 = vst [vmem:[#allocation3_spill] sm:$0xff] %v14472_v49  ;;  %v14478_v51 = vrot.slane %v204_v47, %v14472_v49  ;;  %v14590_v47 = vld [vmem:[%s21695_s26 + $0x134] ss:$8 sps:$4 sm:$0xff]  }
  0xaa   :  { %1207 = vmatmul.mubr.bf16.vlgmr.msra.gmra.mxu0 %v280_v56  ;;  %1623 = vmatprep.subr.bf16.mxu1 %v12064_v12 }
  0xab   :  { %1649 = vmatpush1.bf16.msra.mxu0 %v12017_v54 }
  0xac   :  { %1650 = vmatprep.subr.bf16.mxu0 %v12025_v57 }
  0xad   :  { %1624 = vmatpush2.bf16.msra.mxu1 %v12062_v13 }
  0xae   :  { %1625 = vmatprep.subr.bf16.mxu1 %v12070_v16 }
  0xaf   :  { %1651 = vmatpush1.bf16.msra.mxu0 %v12023_v58 }
  0xb0   :  { %1652 = vmatprep.subr.bf16.mxu0 %v12031_v59 }
  0xb1   :  { %1626 = vmatpush2.bf16.msra.mxu1 %v12068_v18 }
  0xb2   :  { %1627 = vmatprep.subr.bf16.mxu1 %v12076_v20 }
  0xb3   :  { %1653 = vmatpush1.bf16.msra.mxu0 %v12029_v60 }
  0xb4   :  { %1654 = vmatprep.subr.bf16.mxu0 %v12037_v61 }
  0xb5   :  { %1628 = vmatpush2.bf16.msra.mxu1 %v12074_v21 }
  0xb6   :  { %1629 = vmatprep.subr.bf16.mxu1 %v12082_v24 }
  0xb7   :  { %1655 = vmatpush1.bf16.msra.mxu0 %v12035_v62 }
  0xb8   :  { %1656 = vmatprep.subr.bf16.mxu0 %v12043_v63 }
  0xb9   :  { %1630 = vmatpush2.bf16.msra.mxu1 %v12080_v25 }
  0xba   :  { %1631 = vmatprep.subr.bf16.mxu1 %v12088_v28 }
  0xbb   :  { %1657 = vmatpush1.bf16.msra.mxu0 %v12041_v0 }
  0xbc   :  { %1658 = vmatprep.subr.bf16.mxu0 %v12049_v1 }
  0xbd   :  { %1632 = vmatpush2.bf16.msra.mxu1 %v12086_v30 }
  0xbe   :  { %1633 = vmatprep.subr.bf16.mxu1 %v12094_v32  ;;  %v14506_v32 = vld [vmem:[%s21695_s26 + $0x170] ss:$8 sps:$4 sm:$0xff]  }
  0xbf   :  { %1659 = vmatpush1.bf16.msra.mxu0 %v12047_v2 }
  0xc0   :  { %1660 = vmatprep.subr.bf16.mxu0 %v12055_v6 }
  0xc1   :  { %1634 = vmatpush2.bf16.msra.mxu1 %v12092_v34  ;;  %v14518_v34 = vld [vmem:[%s21695_s26 + $0x164] ss:$8 sps:$4 sm:$0xff]  }
  0xc2   :  { %1635 = vmatprep.subr.bf16.mxu1 %v12100_v36  ;;  %v14530_v36 = vld [vmem:[%s21695_s26 + $0x160] ss:$8 sps:$4 sm:$0xff]  }
  0xc3   :  { %1661 = vmatpush1.bf16.msra.mxu0 %v12053_v7 }
  0xc4   :  { %1662 = vmatprep.subr.bf16.mxu0 %v12061_v10  ;;  %v14488_v10 = vld [vmem:[%s21697_s20 + $0x9] sm:$0xff] }
  0xc5   :  { %1636 = vmatpush2.bf16.msra.mxu1 %v12098_v37  ;;  %v14492_v13 = vrot.slane %v14488_v10, %v13946_v48  ;;  %v14536_v37 = vld [vmem:[%s21695_s26 + $0x54] ss:$8 sps:$4 sm:$0xff]  }
  0xc6   :  { %1637 = vmatprep.subr.bf16.mxu1 %v12106_v40  ;;  %v14554_v40 = vld [vmem:[%s21695_s26 + $0x150] ss:$8 sps:$4 sm:$0xff]  }
  0xc7   :  { %1663 = vmatpush1.bf16.msra.mxu0 %v12059_v11  ;;  %v1742_v49 = vrot.slane %v14492_v13, %v13946_v48 }
  0xc8   :  { %1664 = vmatprep.subr.bf16.mxu0 %v12067_v14 }
  0xc9   :  { %1638 = vmatpush2.bf16.msra.mxu1 %v12104_v41  ;;  %v14560_v41 = vld [vmem:[%s21695_s26 + $0x44] ss:$8 sps:$4 sm:$0xff]  }
  0xca   :  { %1791 = vmatprep.subr.bf16.mxu1 %v13142_v45  ;;  %v14578_v45 = vld [vmem:[%s21695_s26 + $0x140] ss:$8 sps:$4 sm:$0xff]  }
  0xcb   :  { %1665 = vmatpush2.bf16.msra.mxu0 %v12065_v15 }
  0xcc   :  { %1666 = vmatprep.subr.bf16.mxu0 %v12073_v17 }
  0xcf   :  { %1667 = vmatpush2.bf16.msra.mxu0 %v12071_v19  ;;  %v1734_v19 = vcombine.high %v14492_v13, %v14492_v13  ;;  %v14863_v13 = vld [vmem:[%s21695_s26 + $0x184] ss:$8 sps:$4 sm:$0xff]  }
  0xd0   :  { %1668 = vmatprep.subr.bf16.mxu0 %v12079_v22  ;;  %21719 = vst [vmem:[#allocation24_spill] sm:$0xff] %v14863_v13 }
  0xd1   :  { %v1756_v25 = vrot.slane %v1734_v19, %v13946_v48  ;;  %v14758_v19 = vld [vmem:[%s21695_s26 + $0x1c4] ss:$8 sps:$4 sm:$0xff]  }
  0xd2   :  { %21703 = vst [vmem:[#allocation8_spill] sm:$0xff] %v14758_v19 }
  0xd3   :  { %1669 = vmatpush2.bf16.msra.mxu0 %v12077_v23  ;;  %v1766_v30 = vcombine.high %v1756_v25, %v1756_v25 }
  0xd4   :  { %1670 = vmatprep.subr.bf16.mxu0 %v12085_v5 }
  0xd7   :  { %1671 = vmatpush2.bf16.msra.mxu0 %v12083_v27 }
  0xd8   :  { %1672 = vmatprep.subr.bf16.mxu0 %v12091_v29 }
  0xdb   :  { %1673 = vmatpush2.bf16.msra.mxu0 %v12089_v31  ;;  %v14500_v31 = vld [vmem:[%s21695_s26 + $0x70] ss:$8 sps:$4 sm:$0xff]  }
  0xdc   :  { %1674 = vmatprep.subr.bf16.mxu0 %v12097_v33  ;;  %v14512_v33 = vld [vmem:[%s21695_s26 + $0x64] ss:$8 sps:$4 sm:$0xff]  }
  0xdf   :  { %1675 = vmatpush2.bf16.msra.mxu0 %v12095_v35  ;;  %v14524_v35 = vld [vmem:[%s21695_s26 + $0x60] ss:$8 sps:$4 sm:$0xff]  }
  0xe0   :  { %1676 = vmatprep.subr.bf16.mxu0 %v12103_v38  ;;  %v14542_v38 = vld [vmem:[%s21695_s26 + $0x154] ss:$8 sps:$4 sm:$0xff]  }
  0xe3   :  { %1677 = vmatpush2.bf16.msra.mxu0 %v12101_v39  ;;  %v14548_v39 = vld [vmem:[%s21695_s26 + $0x50] ss:$8 sps:$4 sm:$0xff]  }
  0xe4   :  { %1678 = vmatprep.subr.bf16.mxu0 %v12109_v43  ;;  %v14566_v43 = vld [vmem:[%s21695_s26 + $0x144] ss:$8 sps:$4 sm:$0xff]  }
  0xe7   :  { %1679 = vmatpush2.bf16.msra.mxu0 %v12107_v44  ;;  %v14572_v44 = vld [vmem:[%s21695_s26 + $0x40] ss:$8 sps:$4 sm:$0xff]  }
  0xe8   :  { %1832 = vmatprep.subr.bf16.mxu0 %v13143_v46  ;;  %v14584_v46 = vld [vmem:[%s21695_s26 + $0x34] ss:$8 sps:$4 sm:$0xff]  }
 0x10a   :  { %v1044_v53 = vpop.f32.mrf.mxu0 }
 0x10b   :  { %v1045_v54 = vadd.f32 %v1044_v53, %v14478_v51  ;;  %v14596_v53 = vld [vmem:[%s21695_s26 + $0x30] ss:$8 sps:$4 sm:$0xff]  }
 0x10c   :  { %v1046_v55 = vpop.f32.mrf.mxu0  ;;  %v1085_v56 = vpop.f32.mrf.mxu1 }
 0x10d   :  { %v1047_v57 = vadd.f32 %v1046_v55, %v14481_v52  ;;  %v1086_v58 = vadd.f32 %v1085_v56, %v1045_v54  ;;  %v14602_v54 = vld [vmem:[%s21695_s26 + $0x130] ss:$8 sps:$4 sm:$0xff]   ;;  %v14608_v55 = vld [vmem:[%s21695_s26 + $0x24] ss:$8 sps:$4 sm:$0xff]  }
 0x10e   :  { %v1048_v59 = vpop.f32.mrf.mxu0  ;;  %v1087_v60 = vpop.f32.mrf.mxu1  ;;  %v14614_v56 = vld [vmem:[%s21695_s26 + $0x124] ss:$8 sps:$4 sm:$0xff]  }
 0x10f   :  { %v1088_v61 = vadd.f32 %v1087_v60, %v1047_v57  ;;  %v14620_v57 = vld [vmem:[%s21695_s26 + $0x20] ss:$8 sps:$4 sm:$0xff]   ;;  %v14632_v59 = vld [vmem:[%s21695_s26 + $0x14] ss:$8 sps:$4 sm:$0xff]  }
 0x110   :  { %v1049_v62 = vpop.f32.mrf.mxu0  ;;  %v1089_v63 = vpop.f32.mrf.mxu1  ;;  %v14638_v60 = vld [vmem:[%s21695_s26 + $0x114] ss:$8 sps:$4 sm:$0xff]  }
 0x111   :  { %v14650_v62 = vld [vmem:[%s21695_s26 + $0x110] ss:$8 sps:$4 sm:$0xff]   ;;  %v14656_v63 = vld [vmem:[%s21695_s26 + $0x4] ss:$8 sps:$4 sm:$0xff]  }
 0x112   :  { %v1090_v0 = vpop.f32.mrf.mxu1 }
 0x113   :  { %v14662_v0 = vld [vmem:[%s21695_s26 + $0x104] ss:$8 sps:$4 sm:$0xff]  }
 0x14a   :  { %v1126_v1 = vpop.f32.mrf.mxu0 }
 0x14b   :  { %v1127_v11 = vadd.f32 %v1126_v1, %v1086_v58  ;;  %v14626_v58 = vld [vmem:[%s21695_s26 + $0x120] ss:$8 sps:$4 sm:$0xff]  }
 0x14c   :  { %v1128_v2 = vpop.f32.mrf.mxu0  ;;  %v1167_v3 = vpop.f32.mrf.mxu1  ;;  %v14668_v1 = vld [vmem:[%s21695_s26] ss:$8 sps:$4 sm:$0xff]  }
 0x14d   :  { %v1129_v12 = vadd.f32 %v1128_v2, %v1088_v61  ;;  %v1168_v14 = vadd.f32 %v1167_v3, %v1127_v11  ;;  %v14644_v61 = vld [vmem:[%s21695_s26 + $0x10] ss:$8 sps:$4 sm:$0xff]   ;;  %v14674_v2 = vld [vmem:[%s21695_s26 + $0x100] ss:$8 sps:$4 sm:$0xff]   ;;  %v14680_v3 = vld [vmem:[%s21695_s26 + $0xf4] ss:$8 sps:$4 sm:$0xff]  }
 0x14e   :  { %v1130_v4 = vpop.f32.mrf.mxu0  ;;  %v1169_v6 = vpop.f32.mrf.mxu1  ;;  %v14716_v11 = vld [vmem:[%s21695_s26 + $0xe0] ss:$8 sps:$4 sm:$0xff]  }
 0x14f   :  { %v1170_v16 = vadd.f32 %v1169_v6, %v1129_v12  ;;  %v14686_v4 = vld [vmem:[%s21695_s26 + $0x1f4] ss:$8 sps:$4 sm:$0xff]   ;;  %v14692_v6 = vld [vmem:[%s21695_s26 + $0xf0] ss:$8 sps:$4 sm:$0xff]   ;;  %v14722_v12 = vld [vmem:[%s21695_s26 + $0x1e0] ss:$8 sps:$4 sm:$0xff]  }
 0x150   :  { %v1131_v7 = vpop.f32.mrf.mxu0  ;;  %v1171_v8 = vpop.f32.mrf.mxu1 }
 0x151   :  { %v14698_v7 = vld [vmem:[%s21695_s26 + $0x1f0] ss:$8 sps:$4 sm:$0xff]   ;;  %v14704_v8 = vld [vmem:[%s21695_s26 + $0xe4] ss:$8 sps:$4 sm:$0xff]  }
 0x152   :  { %v1172_v9 = vpop.f32.mrf.mxu1 }
 0x153   :  { %v14710_v9 = vld [vmem:[%s21695_s26 + $0x1e4] ss:$8 sps:$4 sm:$0xff]  }
 0x16a   :  { %v1208_v15 = vpop.f32.mrf.mxu0 }
 0x16b   :  { %v1209_v17 = vadd.f32 %v1208_v15, %v1168_v14  ;;  %v14728_v14 = vld [vmem:[%s21695_s26 + $0xd4] ss:$8 sps:$4 sm:$0xff]  }
 0x16c   :  { %v1210_v18 = vpop.f32.mrf.mxu0  ;;  %v14734_v15 = vld [vmem:[%s21695_s26 + $0x1d4] ss:$8 sps:$4 sm:$0xff]  }
 0x16d   :  { %vm1215_vm0 = vcmp.ge.f32.partialorder %v1209_v17, 0.0  ;;  %v1217_v20 = vmul.f32 0.1, %v1209_v17  ;;  %v1211_v21 = vadd.f32 %v1210_v18, %v1170_v16  ;;  %v14740_v16 = vld [vmem:[%s21695_s26 + $0xd0] ss:$8 sps:$4 sm:$0xff]  }
 0x16e   :  { %v1212_v22 = vpop.f32.mrf.mxu0  ;;  %21700 = vst [vmem:[#allocation5_spill] sm:$0xff] %v14740_v16  ;;  %v14752_v18 = vld [vmem:[%s21695_s26 + $0xc4] ss:$8 sps:$4 sm:$0xff]  }
 0x16f   :  { %vm1216_vm1 = vcmp.ge.f32.partialorder %v1211_v21, 0.0  ;;  %v1218_v23 = vmul.f32 0.1, %v1211_v21  ;;  %v1219_v24 = vsel %vm1215_vm0, %v1209_v17, %v1217_v20  ;;  %v14746_v17 = vld [vmem:[%s21695_s26 + $0x1d0] ss:$8 sps:$4 sm:$0xff]   ;;  %21702 = vst [vmem:[#allocation7_spill] sm:$0xff] %v14752_v18 }
 0x170   :  { %v1213_v5 = vpop.f32.mrf.mxu0  ;;  %v1221_v29 = vpack.c.bf16 %v1219_v24, %v1219_v24  ;;  %21701 = vst [vmem:[#allocation6_spill] sm:$0xff] %v14746_v17  ;;  %v14764_v20 = vld [vmem:[%s21695_s26 + $0xc0] ss:$8 sps:$4 sm:$0xff]   ;;  %v14776_v22 = vld [vmem:[%s21695_s26 + $0xb4] ss:$8 sps:$4 sm:$0xff]   ;;  %v1719_v24 = vcombine.high %v14488_v10, %v14488_v10 }
 0x171   :  { %v1220_v27 = vsel %vm1216_vm1, %v1211_v21, %v1218_v23  ;;  %21704 = vst [vmem:[#allocation9_spill] sm:$0xff] %v14764_v20  ;;  %v14770_v21 = vld [vmem:[%s21695_s26 + $0x1c0] ss:$8 sps:$4 sm:$0xff]   ;;  %21706 = vst [vmem:[#allocation11_spill] sm:$0xff] %v14776_v22  ;;  %v14782_v23 = vld [vmem:[%s21695_s26 + $0x1b4] ss:$8 sps:$4 sm:$0xff]  }
 0x172   :  { %v1222_v28 = vpack.c.bf16 %v1220_v27, %v1220_v27  ;;  %21705 = vst [vmem:[#allocation10_spill] sm:$0xff] %v14770_v21  ;;  %21707 = vst [vmem:[#allocation12_spill] sm:$0xff] %v14782_v23  ;;  %v14790_v5 = vld [vmem:[%s21695_s26 + $0xb0] ss:$8 sps:$4 sm:$0xff]   ;;  %v14802_v27 = vld [vmem:[%s21695_s26 + $0xa4] ss:$8 sps:$4 sm:$0xff]  }
 0x173   :  { %21708 = vst [vmem:[#allocation13_spill] sm:$0xff] %v14790_v5  ;;  %21710 = vst [vmem:[#allocation15_spill] sm:$0xff] %v14802_v27  ;;  %v14808_v10 = vld [vmem:[%s21695_s26 + $0x1a4] ss:$8 sps:$4 sm:$0xff]  }
 0x174   :  { %1639 = vmatprep.mubr.bf16.mxu1 %v1222_v28  ;;  %1680 = vmatprep.mubr.bf16.mxu0 %v1222_v28  ;;  %21711 = vst [vmem:[#allocation16_spill] sm:$0xff] %v14808_v10  ;;  %v14812_v28 = vrot.slane %v1719_v24, %v13946_v48  ;;  %v14835_v24 = vld [vmem:[%s21695_s26 + $0x194] ss:$8 sps:$4 sm:$0xff]  }
 0x175   :  { %1640 = vmatmul.mubr.bf16.vlgmr.msra.gmra.mxu1 %v1221_v29  ;;  %1681 = vmatmul.mubr.bf16.vlgmr.msra.gmra.mxu0 %v1221_v29  ;;  %v14817_v29 = vld [vmem:[%s21695_s26 + $0xa0] ss:$8 sps:$4 sm:$0xff]   ;;  %21715 = vst [vmem:[#allocation20_spill] sm:$0xff] %v14835_v24 }
 0x176   :  { %1792 = vmatpush1.bf16.msra.mxu1 %v14500_v31  ;;  %1833 = vmatpush1.bf16.msra.mxu0 %v14506_v32  ;;  %21712 = vst [vmem:[#allocation17_spill] sm:$0xff] %v14817_v29  ;;  %v1735_v50 = vcombine.high %v14812_v28, %v14812_v28 }
 0x177   :  { %1793 = vmatprep.subr.bf16.mxu1 %v14512_v33  ;;  %1834 = vmatprep.subr.bf16.mxu0 %v14518_v34 }
 0x178   :  { %1823 = vmatprep.mubr.bf16.mxu1 %v1756_v25  ;;  %1864 = vmatprep.mubr.bf16.mxu0 %v1766_v30  ;;  %v14796_v25 = vld [vmem:[%s21695_s26 + $0x1b0] ss:$8 sps:$4 sm:$0xff]   ;;  %v14823_v30 = vld [vmem:[%s21695_s26 + $0x1a0] ss:$8 sps:$4 sm:$0xff]  }
 0x179   :  { %21709 = vst [vmem:[#allocation14_spill] sm:$0xff] %v14796_v25  ;;  %21713 = vst [vmem:[#allocation18_spill] sm:$0xff] %v14823_v30 }
 0x17a   :  { %1794 = vmatpush1.bf16.msra.mxu1 %v14524_v35  ;;  %1835 = vmatpush1.bf16.msra.mxu0 %v14530_v36 }
 0x17b   :  { %1795 = vmatprep.subr.bf16.mxu1 %v14536_v37  ;;  %1836 = vmatprep.subr.bf16.mxu0 %v14542_v38 }
 0x17e   :  { %1796 = vmatpush1.bf16.msra.mxu1 %v14548_v39  ;;  %1837 = vmatpush1.bf16.msra.mxu0 %v14554_v40 }
 0x17f   :  { %1797 = vmatprep.subr.bf16.mxu1 %v14560_v41  ;;  %1838 = vmatprep.subr.bf16.mxu0 %v14566_v43 }
 0x182   :  { %1798 = vmatpush1.bf16.msra.mxu1 %v14572_v44  ;;  %1839 = vmatpush1.bf16.msra.mxu0 %v14578_v45 }
 0x183   :  { %1799 = vmatprep.subr.bf16.mxu1 %v14584_v46  ;;  %1840 = vmatprep.subr.bf16.mxu0 %v14590_v47 }
 0x186   :  { %1800 = vmatpush1.bf16.msra.mxu1 %v14596_v53  ;;  %1841 = vmatpush1.bf16.msra.mxu0 %v14602_v54 }
 0x187   :  { %1801 = vmatprep.subr.bf16.mxu1 %v14608_v55  ;;  %1842 = vmatprep.subr.bf16.mxu0 %v14614_v56 }
 0x18a   :  { %1802 = vmatpush1.bf16.msra.mxu1 %v14620_v57  ;;  %1843 = vmatpush1.bf16.msra.mxu0 %v14626_v58 }
 0x18b   :  { %1803 = vmatprep.subr.bf16.mxu1 %v14632_v59  ;;  %1844 = vmatprep.subr.bf16.mxu0 %v14638_v60 }
 0x18e   :  { %1804 = vmatpush1.bf16.msra.mxu1 %v14644_v61  ;;  %1845 = vmatpush1.bf16.msra.mxu0 %v14650_v62 }
 0x18f   :  { %1805 = vmatprep.subr.bf16.mxu1 %v14656_v63  ;;  %1846 = vmatprep.subr.bf16.mxu0 %v14662_v0 }
 0x192   :  { %1806 = vmatpush1.bf16.msra.mxu1 %v14668_v1  ;;  %1847 = vmatpush1.bf16.msra.mxu0 %v14674_v2 }
 0x193   :  { %1807 = vmatprep.subr.bf16.mxu1 %v14680_v3  ;;  %1848 = vmatprep.subr.bf16.mxu0 %v14686_v4 }
 0x196   :  { %1808 = vmatpush2.bf16.msra.mxu1 %v14692_v6  ;;  %1849 = vmatpush2.bf16.msra.mxu0 %v14698_v7 }
 0x197   :  { %1809 = vmatprep.subr.bf16.mxu1 %v14704_v8  ;;  %1850 = vmatprep.subr.bf16.mxu0 %v14710_v9 }
 0x19a   :  { %1810 = vmatpush2.bf16.msra.mxu1 %v14716_v11  ;;  %1851 = vmatpush2.bf16.msra.mxu0 %v14722_v12 }
 0x19b   :  { %1811 = vmatprep.subr.bf16.mxu1 %v14728_v14  ;;  %1852 = vmatprep.subr.bf16.mxu0 %v14734_v15 }
 0x19e   :  { %1812 = vmatpush2.bf16.msra.mxu1 %v14740_v16  ;;  %1853 = vmatpush2.bf16.msra.mxu0 %v14746_v17 }
 0x19f   :  { %1813 = vmatprep.subr.bf16.mxu1 %v14752_v18  ;;  %1854 = vmatprep.subr.bf16.mxu0 %v14758_v19 }
 0x1a2   :  { %1814 = vmatpush2.bf16.msra.mxu1 %v14764_v20  ;;  %1855 = vmatpush2.bf16.msra.mxu0 %v14770_v21 }
 0x1a3   :  { %1815 = vmatprep.subr.bf16.mxu1 %v14776_v22  ;;  %1856 = vmatprep.subr.bf16.mxu0 %v14782_v23 }
 0x1a6   :  { %1816 = vmatpush2.bf16.msra.mxu1 %v14790_v5  ;;  %1857 = vmatpush2.bf16.msra.mxu0 %v14796_v25 }
 0x1a7   :  { %1817 = vmatprep.subr.bf16.mxu1 %v14802_v27  ;;  %1858 = vmatprep.subr.bf16.mxu0 %v14808_v10 }
 0x1aa   :  { %1818 = vmatpush2.bf16.msra.mxu1 %v14817_v29  ;;  %1859 = vmatpush2.bf16.msra.mxu0 %v14823_v30  ;;  %v1764_v30 = vcombine.high %v1742_v49, %v1742_v49  ;;  %v12155_v29 = vld [vmem:[%s21247_s3 + $0x204] ss:$16 sps:$4 sm:$0xff]  }
 0x1ab   :  { %1819 = vmatprep.subr.bf16.mxu1 %v14829_v26  ;;  %1860 = vmatprep.subr.bf16.mxu0 %v14835_v24  ;;  %v14851_v26 = vld [vmem:[%s21695_s26 + $0x190] ss:$8 sps:$4 sm:$0xff]   ;;  %v14857_v24 = vld [vmem:[%s21695_s26 + $0x84] ss:$8 sps:$4 sm:$0xff]  }
 0x1ac   :  { %21717 = vst [vmem:[#allocation22_spill] sm:$0xff] %v14851_v26  ;;  %21718 = vst [vmem:[#allocation23_spill] sm:$0xff] %v14857_v24 }
 0x1ae   :  { %1820 = vmatpush2.bf16.msra.mxu1 %v14845_v42  ;;  %1861 = vmatpush2.bf16.msra.mxu0 %v14851_v26  ;;  %v1763_v42 = vrot.slane %v1735_v50, %v13946_v48  ;;  %v14870_v26 = vld [vmem:[%s21695_s26 + $0x80] ss:$8 sps:$4 sm:$0xff]   ;;  %v14888_v50 = vld [vmem:[%s21695_s26 + $0x374] ss:$8 sps:$4 sm:$0xff]  }
 0x1af   :  { %1821 = vmatprep.subr.bf16.mxu1 %v14857_v24  ;;  %1862 = vmatprep.subr.bf16.mxu0 %v14863_v13  ;;  %21720 = vst [vmem:[#allocation25_spill] sm:$0xff] %v14870_v26  ;;  %v14876_v24 = vld [vmem:[%s21695_s26 + $0x180] ss:$8 sps:$4 sm:$0xff]   ;;  %v14882_v13 = vld [vmem:[%s21695_s26 + $0x274] ss:$8 sps:$4 sm:$0xff]   ;;  %21723 = vst [vmem:[#allocation28_spill] sm:$0xff] %v14888_v50 }
 0x1b0   :  { %21721 = vst [vmem:[#allocation26_spill] sm:$0xff] %v14876_v24  ;;  %21722 = vst [vmem:[#allocation27_spill] sm:$0xff] %v14882_v13 }
 0x1b2   :  { %1822 = vmatpush2.bf16.msra.mxu1 %v14870_v26  ;;  %1863 = vmatpush2.bf16.msra.mxu0 %v14876_v24  ;;  %v1767_v26 = vcombine.high %v1763_v42, %v1763_v42  ;;  %v14894_v24 = vld [vmem:[%s21695_s26 + $0x270] ss:$8 sps:$4 sm:$0xff]  }
 0x1b3   :  { %1873 = vmatprep.subr.bf16.mxu1 %v14882_v13  ;;  %1914 = vmatprep.subr.bf16.mxu0 %v14888_v50  ;;  %21724 = vst [vmem:[#allocation29_spill] sm:$0xff] %v14894_v24  ;;  %v14900_v13 = vld [vmem:[%s21695_s26 + $0x370] ss:$8 sps:$4 sm:$0xff]   ;;  %v14906_v50 = vld [vmem:[%s21695_s26 + $0x264] ss:$8 sps:$4 sm:$0xff]  }
 0x1b4   :  { %21725 = vst [vmem:[#allocation30_spill] sm:$0xff] %v14900_v13  ;;  %21726 = vst [vmem:[#allocation31_spill] sm:$0xff] %v14906_v50 }
 0x1b5   :  { %1824 = vmatmul.mubr.bf16.vlgmr.msra.gmra.mxu1 %v1742_v49  ;;  %1865 = vmatmul.mubr.bf16.vlgmr.msra.gmra.mxu0 %v1764_v30  ;;  %v14912_v49 = vld [vmem:[%s21695_s26 + $0x364] ss:$8 sps:$4 sm:$0xff]   ;;  %v14918_v30 = vld [vmem:[%s21695_s26 + $0x260] ss:$8 sps:$4 sm:$0xff]  }
 0x1b6   :  { %1874 = vmatpush1.bf16.msra.mxu1 %v14894_v24  ;;  %1915 = vmatpush1.bf16.msra.mxu0 %v14900_v13  ;;  %21727 = vst [vmem:[#allocation32_spill] sm:$0xff] %v14912_v49  ;;  %21728 = vst [vmem:[#allocation33_spill] sm:$0xff] %v14918_v30  ;;  %v12114_v24 = vld [vmem:[%s21247_s3 + $0x2e8] ss:$16 sps:$4 sm:$0xff]  }
 0x1b7   :  { %1875 = vmatprep.subr.bf16.mxu1 %v14906_v50  ;;  %1916 = vmatprep.subr.bf16.mxu0 %v14912_v49  ;;  %v14924_v50 = vld [vmem:[%s21695_s26 + $0x360] ss:$8 sps:$4 sm:$0xff]   ;;  %v14930_v49 = vld [vmem:[%s21695_s26 + $0x254] ss:$8 sps:$4 sm:$0xff]  }
 0x1b8   :  { %1905 = vmatprep.mubr.bf16.mxu1 %v1763_v42  ;;  %1946 = vmatprep.mubr.bf16.mxu0 %v1767_v26  ;;  %21729 = vst [vmem:[#allocation34_spill] sm:$0xff] %v14924_v50  ;;  %21730 = vst [vmem:[#allocation35_spill] sm:$0xff] %v14930_v49  ;;  %v14936_v42 = vld [vmem:[%s21695_s26 + $0x354] ss:$8 sps:$4 sm:$0xff]   ;;  %v14942_v26 = vld [vmem:[%s21695_s26 + $0x250] ss:$8 sps:$4 sm:$0xff]  }
 0x1b9   :  { %21731 = vst [vmem:[#allocation36_spill] sm:$0xff] %v14936_v42  ;;  %21732 = vst [vmem:[#allocation37_spill] sm:$0xff] %v14942_v26 }
 0x1ba   :  { %1876 = vmatpush1.bf16.msra.mxu1 %v14918_v30  ;;  %1917 = vmatpush1.bf16.msra.mxu0 %v14924_v50  ;;  %v14948_v50 = vld [vmem:[%s21695_s26 + $0x350] ss:$8 sps:$4 sm:$0xff]   ;;  %v15256_v30 = vld [vmem:[%s21695_s26 + $0x280] ss:$8 sps:$4 sm:$0xff]  }
 0x1bb   :  { %1877 = vmatprep.subr.bf16.mxu1 %v14930_v49  ;;  %1918 = vmatprep.subr.bf16.mxu0 %v14936_v42  ;;  %21733 = vst [vmem:[#allocation38_spill] sm:$0xff] %v14948_v50  ;;  %v14954_v49 = vld [vmem:[%s21695_s26 + $0x244] ss:$8 sps:$4 sm:$0xff]   ;;  %21784 = vst [vmem:[#allocation89_spill] sm:$0xff] %v15256_v30 }
 0x1bc   :  { %21734 = vst [vmem:[#allocation39_spill] sm:$0xff] %v14954_v49  ;;  %v14960_v42 = vld [vmem:[%s21695_s26 + $0x344] ss:$8 sps:$4 sm:$0xff]  }
 0x1bd   :  { %21735 = vst [vmem:[#allocation40_spill] sm:$0xff] %v14960_v42 }
 0x1be   :  { %1878 = vmatpush1.bf16.msra.mxu1 %v14942_v26  ;;  %1919 = vmatpush1.bf16.msra.mxu0 %v14948_v50  ;;  %v14966_v26 = vld [vmem:[%s21695_s26 + $0x240] ss:$8 sps:$4 sm:$0xff]  }
 0x1bf   :  { %1879 = vmatprep.subr.bf16.mxu1 %v14954_v49  ;;  %1920 = vmatprep.subr.bf16.mxu0 %v14960_v42  ;;  %21736 = vst [vmem:[#allocation41_spill] sm:$0xff] %v14966_v26  ;;  %v14972_v50 = vld [vmem:[%s21695_s26 + $0x340] ss:$8 sps:$4 sm:$0xff]   ;;  %v14978_v49 = vld [vmem:[%s21695_s26 + $0x234] ss:$8 sps:$4 sm:$0xff]  }
 0x1c0   :  { %21737 = vst [vmem:[#allocation42_spill] sm:$0xff] %v14972_v50  ;;  %21738 = vst [vmem:[#allocation43_spill] sm:$0xff] %v14978_v49  ;;  %v14984_v42 = vld [vmem:[%s21695_s26 + $0x334] ss:$8 sps:$4 sm:$0xff]  }
 0x1c1   :  { %21739 = vst [vmem:[#allocation44_spill] sm:$0xff] %v14984_v42 }
 0x1c2   :  { %1880 = vmatpush1.bf16.msra.mxu1 %v14966_v26  ;;  %1921 = vmatpush1.bf16.msra.mxu0 %v14972_v50  ;;  %v14990_v26 = vld [vmem:[%s21695_s26 + $0x230] ss:$8 sps:$4 sm:$0xff]  }
 0x1c3   :  { %1881 = vmatprep.subr.bf16.mxu1 %v14978_v49  ;;  %1922 = vmatprep.subr.bf16.mxu0 %v14984_v42  ;;  %21740 = vst [vmem:[#allocation45_spill] sm:$0xff] %v14990_v26  ;;  %v14996_v50 = vld [vmem:[%s21695_s26 + $0x330] ss:$8 sps:$4 sm:$0xff]   ;;  %v15002_v49 = vld [vmem:[%s21695_s26 + $0x224] ss:$8 sps:$4 sm:$0xff]  }
 0x1c4   :  { %21741 = vst [vmem:[#allocation46_spill] sm:$0xff] %v14996_v50  ;;  %21742 = vst [vmem:[#allocation47_spill] sm:$0xff] %v15002_v49  ;;  %v15008_v42 = vld [vmem:[%s21695_s26 + $0x324] ss:$8 sps:$4 sm:$0xff]  }
 0x1c5   :  { %21743 = vst [vmem:[#allocation48_spill] sm:$0xff] %v15008_v42 }
 0x1c6   :  { %1882 = vmatpush1.bf16.msra.mxu1 %v14990_v26  ;;  %1923 = vmatpush1.bf16.msra.mxu0 %v14996_v50  ;;  %v15014_v26 = vld [vmem:[%s21695_s26 + $0x220] ss:$8 sps:$4 sm:$0xff]  }
 0x1c7   :  { %1883 = vmatprep.subr.bf16.mxu1 %v15002_v49  ;;  %1924 = vmatprep.subr.bf16.mxu0 %v15008_v42  ;;  %21744 = vst [vmem:[#allocation49_spill] sm:$0xff] %v15014_v26  ;;  %v15020_v50 = vld [vmem:[%s21695_s26 + $0x320] ss:$8 sps:$4 sm:$0xff]   ;;  %v15026_v49 = vld [vmem:[%s21695_s26 + $0x214] ss:$8 sps:$4 sm:$0xff]  }
 0x1c8   :  { %21745 = vst [vmem:[#allocation50_spill] sm:$0xff] %v15020_v50  ;;  %21746 = vst [vmem:[#allocation51_spill] sm:$0xff] %v15026_v49  ;;  %v15032_v42 = vld [vmem:[%s21695_s26 + $0x314] ss:$8 sps:$4 sm:$0xff]  }
 0x1c9   :  { %21747 = vst [vmem:[#allocation52_spill] sm:$0xff] %v15032_v42 }
 0x1ca   :  { %1884 = vmatpush1.bf16.msra.mxu1 %v15014_v26  ;;  %1925 = vmatpush1.bf16.msra.mxu0 %v15020_v50  ;;  %v15038_v26 = vld [vmem:[%s21695_s26 + $0x210] ss:$8 sps:$4 sm:$0xff]  }
 0x1cb   :  { %1885 = vmatprep.subr.bf16.mxu1 %v15026_v49  ;;  %1926 = vmatprep.subr.bf16.mxu0 %v15032_v42  ;;  %21748 = vst [vmem:[#allocation53_spill] sm:$0xff] %v15038_v26  ;;  %v15044_v50 = vld [vmem:[%s21695_s26 + $0x310] ss:$8 sps:$4 sm:$0xff]   ;;  %v15050_v49 = vld [vmem:[%s21695_s26 + $0x204] ss:$8 sps:$4 sm:$0xff]  }
 0x1cc   :  { %21749 = vst [vmem:[#allocation54_spill] sm:$0xff] %v15044_v50  ;;  %21750 = vst [vmem:[#allocation55_spill] sm:$0xff] %v15050_v49  ;;  %v15056_v42 = vld [vmem:[%s21695_s26 + $0x304] ss:$8 sps:$4 sm:$0xff]  }
 0x1cd   :  { %21751 = vst [vmem:[#allocation56_spill] sm:$0xff] %v15056_v42 }
 0x1ce   :  { %1886 = vmatpush1.bf16.msra.mxu1 %v15038_v26  ;;  %1927 = vmatpush1.bf16.msra.mxu0 %v15044_v50  ;;  %v15062_v26 = vld [vmem:[%s21695_s26 + $0x200] ss:$8 sps:$4 sm:$0xff]  }
 0x1cf   :  { %1887 = vmatprep.subr.bf16.mxu1 %v15050_v49  ;;  %1928 = vmatprep.subr.bf16.mxu0 %v15056_v42  ;;  %21752 = vst [vmem:[#allocation57_spill] sm:$0xff] %v15062_v26  ;;  %v15068_v50 = vld [vmem:[%s21695_s26 + $0x300] ss:$8 sps:$4 sm:$0xff]   ;;  %v15074_v49 = vld [vmem:[%s21695_s26 + $0x2f4] ss:$8 sps:$4 sm:$0xff]  }
 0x1d0   :  { %21753 = vst [vmem:[#allocation58_spill] sm:$0xff] %v15068_v50  ;;  %21754 = vst [vmem:[#allocation59_spill] sm:$0xff] %v15074_v49  ;;  %v15080_v42 = vld [vmem:[%s21695_s26 + $0x3f4] ss:$8 sps:$4 sm:$0xff]  }
 0x1d1   :  { %21755 = vst [vmem:[#allocation60_spill] sm:$0xff] %v15080_v42 }
 0x1d2   :  { %1888 = vmatpush1.bf16.msra.mxu1 %v15062_v26  ;;  %1929 = vmatpush1.bf16.msra.mxu0 %v15068_v50  ;;  %v15086_v26 = vld [vmem:[%s21695_s26 + $0x2f0] ss:$8 sps:$4 sm:$0xff]  }
 0x1d3   :  { %1889 = vmatprep.subr.bf16.mxu1 %v15074_v49  ;;  %1930 = vmatprep.subr.bf16.mxu0 %v15080_v42  ;;  %21756 = vst [vmem:[#allocation61_spill] sm:$0xff] %v15086_v26  ;;  %v15092_v50 = vld [vmem:[%s21695_s26 + $0x3f0] ss:$8 sps:$4 sm:$0xff]   ;;  %v15098_v49 = vld [vmem:[%s21695_s26 + $0x2e4] ss:$8 sps:$4 sm:$0xff]  }
 0x1d4   :  { %21757 = vst [vmem:[#allocation62_spill] sm:$0xff] %v15092_v50  ;;  %21758 = vst [vmem:[#allocation63_spill] sm:$0xff] %v15098_v49  ;;  %v15104_v42 = vld [vmem:[%s21695_s26 + $0x3e4] ss:$8 sps:$4 sm:$0xff]  }
 0x1d5   :  { %21759 = vst [vmem:[#allocation64_spill] sm:$0xff] %v15104_v42 }
 0x1d6   :  { %1890 = vmatpush2.bf16.msra.mxu1 %v15086_v26  ;;  %1931 = vmatpush2.bf16.msra.mxu0 %v15092_v50  ;;  %v15110_v26 = vld [vmem:[%s21695_s26 + $0x2e0] ss:$8 sps:$4 sm:$0xff]  }
 0x1d7   :  { %1891 = vmatprep.subr.bf16.mxu1 %v15098_v49  ;;  %1932 = vmatprep.subr.bf16.mxu0 %v15104_v42  ;;  %21760 = vst [vmem:[#allocation65_spill] sm:$0xff] %v15110_v26  ;;  %v15116_v50 = vld [vmem:[%s21695_s26 + $0x3e0] ss:$8 sps:$4 sm:$0xff]   ;;  %v15122_v49 = vld [vmem:[%s21695_s26 + $0x2d4] ss:$8 sps:$4 sm:$0xff]  }
 0x1d8   :  { %21761 = vst [vmem:[#allocation66_spill] sm:$0xff] %v15116_v50  ;;  %21762 = vst [vmem:[#allocation67_spill] sm:$0xff] %v15122_v49  ;;  %v15128_v42 = vld [vmem:[%s21695_s26 + $0x3d4] ss:$8 sps:$4 sm:$0xff]  }
 0x1d9   :  { %21763 = vst [vmem:[#allocation68_spill] sm:$0xff] %v15128_v42 }
 0x1da   :  { %1892 = vmatpush2.bf16.msra.mxu1 %v15110_v26  ;;  %1933 = vmatpush2.bf16.msra.mxu0 %v15116_v50  ;;  %v15134_v26 = vld [vmem:[%s21695_s26 + $0x2d0] ss:$8 sps:$4 sm:$0xff]  }
 0x1db   :  { %1893 = vmatprep.subr.bf16.mxu1 %v15122_v49  ;;  %1934 = vmatprep.subr.bf16.mxu0 %v15128_v42  ;;  %21764 = vst [vmem:[#allocation69_spill] sm:$0xff] %v15134_v26  ;;  %v15140_v50 = vld [vmem:[%s21695_s26 + $0x3d0] ss:$8 sps:$4 sm:$0xff]   ;;  %v15146_v49 = vld [vmem:[%s21695_s26 + $0x2c4] ss:$8 sps:$4 sm:$0xff]  }
 0x1dc   :  { %21765 = vst [vmem:[#allocation70_spill] sm:$0xff] %v15140_v50  ;;  %21766 = vst [vmem:[#allocation71_spill] sm:$0xff] %v15146_v49  ;;  %v15152_v42 = vld [vmem:[%s21695_s26 + $0x3c4] ss:$8 sps:$4 sm:$0xff]  }
 0x1dd   :  { %21767 = vst [vmem:[#allocation72_spill] sm:$0xff] %v15152_v42 }
 0x1de   :  { %1894 = vmatpush2.bf16.msra.mxu1 %v15134_v26  ;;  %1935 = vmatpush2.bf16.msra.mxu0 %v15140_v50  ;;  %v15158_v26 = vld [vmem:[%s21695_s26 + $0x2c0] ss:$8 sps:$4 sm:$0xff]  }
 0x1df   :  { %1895 = vmatprep.subr.bf16.mxu1 %v15146_v49  ;;  %1936 = vmatprep.subr.bf16.mxu0 %v15152_v42  ;;  %21768 = vst [vmem:[#allocation73_spill] sm:$0xff] %v15158_v26  ;;  %v15164_v50 = vld [vmem:[%s21695_s26 + $0x3c0] ss:$8 sps:$4 sm:$0xff]   ;;  %v15170_v49 = vld [vmem:[%s21695_s26 + $0x2b4] ss:$8 sps:$4 sm:$0xff]  }
 0x1e0   :  { %21769 = vst [vmem:[#allocation74_spill] sm:$0xff] %v15164_v50  ;;  %21770 = vst [vmem:[#allocation75_spill] sm:$0xff] %v15170_v49  ;;  %v15176_v42 = vld [vmem:[%s21695_s26 + $0x3b4] ss:$8 sps:$4 sm:$0xff]  }
 0x1e1   :  { %21771 = vst [vmem:[#allocation76_spill] sm:$0xff] %v15176_v42 }
 0x1e2   :  { %1896 = vmatpush2.bf16.msra.mxu1 %v15158_v26  ;;  %1937 = vmatpush2.bf16.msra.mxu0 %v15164_v50  ;;  %v15182_v26 = vld [vmem:[%s21695_s26 + $0x2b0] ss:$8 sps:$4 sm:$0xff]  }
 0x1e3   :  { %1897 = vmatprep.subr.bf16.mxu1 %v15170_v49  ;;  %1938 = vmatprep.subr.bf16.mxu0 %v15176_v42  ;;  %21772 = vst [vmem:[#allocation77_spill] sm:$0xff] %v15182_v26  ;;  %v15188_v50 = vld [vmem:[%s21695_s26 + $0x3b0] ss:$8 sps:$4 sm:$0xff]   ;;  %v15194_v49 = vld [vmem:[%s21695_s26 + $0x2a4] ss:$8 sps:$4 sm:$0xff]  }
 0x1e4   :  { %21773 = vst [vmem:[#allocation78_spill] sm:$0xff] %v15188_v50  ;;  %21774 = vst [vmem:[#allocation79_spill] sm:$0xff] %v15194_v49  ;;  %v15200_v42 = vld [vmem:[%s21695_s26 + $0x3a4] ss:$8 sps:$4 sm:$0xff]  }
 0x1e5   :  { %21775 = vst [vmem:[#allocation80_spill] sm:$0xff] %v15200_v42 }
 0x1e6   :  { %1898 = vmatpush2.bf16.msra.mxu1 %v15182_v26  ;;  %1939 = vmatpush2.bf16.msra.mxu0 %v15188_v50  ;;  %v15206_v26 = vld [vmem:[%s21695_s26 + $0x2a0] ss:$8 sps:$4 sm:$0xff]  }
 0x1e7   :  { %1899 = vmatprep.subr.bf16.mxu1 %v15194_v49  ;;  %1940 = vmatprep.subr.bf16.mxu0 %v15200_v42  ;;  %21776 = vst [vmem:[#allocation81_spill] sm:$0xff] %v15206_v26  ;;  %v15212_v50 = vld [vmem:[%s21695_s26 + $0x3a0] ss:$8 sps:$4 sm:$0xff]   ;;  %v15218_v49 = vld [vmem:[%s21695_s26 + $0x294] ss:$8 sps:$4 sm:$0xff]  }
 0x1e8   :  { %21777 = vst [vmem:[#allocation82_spill] sm:$0xff] %v15212_v50  ;;  %21778 = vst [vmem:[#allocation83_spill] sm:$0xff] %v15218_v49  ;;  %v15224_v42 = vld [vmem:[%s21695_s26 + $0x394] ss:$8 sps:$4 sm:$0xff]  }
 0x1e9   :  { %21779 = vst [vmem:[#allocation84_spill] sm:$0xff] %v15224_v42 }
 0x1ea   :  { %1900 = vmatpush2.bf16.msra.mxu1 %v15206_v26  ;;  %1941 = vmatpush2.bf16.msra.mxu0 %v15212_v50  ;;  %v1749_v26 = vrot.slane %v14812_v28, %v13946_v48  ;;  %v15232_v50 = vld [vmem:[%s21695_s26 + $0x290] ss:$8 sps:$4 sm:$0xff]   ;;  %v15250_v28 = vld [vmem:[%s21695_s26 + $0x384] ss:$8 sps:$4 sm:$0xff]  }
 0x1eb   :  { %1901 = vmatprep.subr.bf16.mxu1 %v15218_v49  ;;  %1942 = vmatprep.subr.bf16.mxu0 %v15224_v42  ;;  %21780 = vst [vmem:[#allocation85_spill] sm:$0xff] %v15232_v50  ;;  %v15238_v49 = vld [vmem:[%s21695_s26 + $0x390] ss:$8 sps:$4 sm:$0xff]   ;;  %v15244_v42 = vld [vmem:[%s21695_s26 + $0x284] ss:$8 sps:$4 sm:$0xff]   ;;  %21783 = vst [vmem:[#allocation88_spill] sm:$0xff] %v15250_v28 }
 0x1ec   :  { %21781 = vst [vmem:[#allocation86_spill] sm:$0xff] %v15238_v49  ;;  %21782 = vst [vmem:[#allocation87_spill] sm:$0xff] %v15244_v42 }
 0x1ee   :  { %1902 = vmatpush2.bf16.msra.mxu1 %v15232_v50  ;;  %1943 = vmatpush2.bf16.msra.mxu0 %v15238_v49  ;;  %v1765_v50 = vcombine.high %v1749_v26, %v1749_v26  ;;  %v15262_v49 = vld [vmem:[%s21695_s26 + $0x380] ss:$8 sps:$4 sm:$0xff]  }
 0x1ef   :  { %1903 = vmatprep.subr.bf16.mxu1 %v15244_v42  ;;  %1944 = vmatprep.subr.bf16.mxu0 %v15250_v28  ;;  %21785 = vst [vmem:[#allocation90_spill] sm:$0xff] %v15262_v49  ;;  %v15268_v42 = vld [vmem:[%s21695_s26 + $0x474] ss:$8 sps:$4 sm:$0xff]   ;;  %v21788_v28 = vmov 0  }
 0x1f0   :  { %21786 = vst [vmem:[#allocation91_spill] sm:$0xff] %v15268_v42 }
 0x1f2   :  { %1904 = vmatpush2.bf16.msra.mxu1 %v15256_v30  ;;  %1945 = vmatpush2.bf16.msra.mxu0 %v15262_v49  ;;  %v15274_v30 = vld [vmem:[%s21695_s26 + $0x470] ss:$8 sps:$4 sm:$0xff]   ;;  %v15281_v49 = vld [vmem:[%s21695_s26 + $0x464] ss:$8 sps:$4 sm:$0xff]  }
 0x1f3   :  { %1955 = vmatprep.subr.bf16.mxu1 %v15268_v42  ;;  %21787 = vst [vmem:[#allocation92_spill] sm:$0xff] %v15274_v30  ;;  %21789 = vst [vmem:[#allocation93_spill] sm:$0xff] %v15281_v49  ;;  %v15317_v42 = vld [vmem:[%s21695_s26 + $0x444] ss:$8 sps:$4 sm:$0xff]  }
 0x1f4   :  { %21793 = vst [vmem:[#allocation97_spill] sm:$0xff] %v15317_v42 }
 0x1f5   :  { %1906 = vmatmul.mubr.bf16.vlgmr.msra.gmra.mxu1 %v1749_v26  ;;  %1947 = vmatmul.mubr.bf16.vlgmr.msra.gmra.mxu0 %v1765_v50  ;;  %v15287_v50 = vld [vmem:[%s21695_s26 + $0x460] ss:$8 sps:$4 sm:$0xff]   ;;  %v15293_v26 = vld [vmem:[%s21695_s26 + $0x454] ss:$8 sps:$4 sm:$0xff]  }
 0x1f6   :  { %1956 = vmatpush1.bf16.msra.mxu1 %v15274_v30  ;;  %1987 = vmatprep.mubr.bf16.mxu1 %v21788_v28  ;;  %21790 = vst [vmem:[#allocation94_spill] sm:$0xff] %v15287_v50  ;;  %21791 = vst [vmem:[#allocation95_spill] sm:$0xff] %v15293_v26  ;;  %v12111_v28 = vld [vmem:[%s21247_s3 + $0x2e0] ss:$16 sps:$4 sm:$0xff]   ;;  %v12119_v30 = vld [vmem:[%s21247_s3 + $0x2c4] ss:$16 sps:$4 sm:$0xff]  }
 0x1f7   :  { %1957 = vmatprep.subr.bf16.mxu1 %v15281_v49  ;;  %v12113_v49 = vld [vmem:[%s21247_s3 + $0x2e4] ss:$16 sps:$4 sm:$0xff]  }
 0x1f8   :  { %2389 = vmatprep.subr.bf16.mxu0 %v12113_v49  ;;  %v12125_v49 = vld [vmem:[%s21247_s3 + $0x2a4] ss:$16 sps:$4 sm:$0xff]  }
 0x1f9   :  { %2390 = vmatpush1.bf16.msra.mxu0 %v12111_v28  ;;  %v15326_v28 = vld [vmem:[%s21695_s26 + $0x440] ss:$8 sps:$4 sm:$0xff]  }
 0x1fa   :  { %1958 = vmatpush1.bf16.msra.mxu1 %v15287_v50  ;;  %v15308_v50 = vld [vmem:[%s21695_s26 + $0x450] ss:$8 sps:$4 sm:$0xff]   ;;  %2391 = vmatprep.subr.bf16.mxu0 %v12119_v30  ;;  %21794 = vst [vmem:[#allocation98_spill] sm:$0xff] %v15326_v28  ;;  %v15335_v30 = vld [vmem:[%s21695_s26 + $0x434] ss:$8 sps:$4 sm:$0xff]  }
 0x1fb   :  { %1959 = vmatprep.subr.bf16.mxu1 %v15293_v26  ;;  %21792 = vst [vmem:[#allocation96_spill] sm:$0xff] %v15308_v50  ;;  %v12117_v26 = vld [vmem:[%s21247_s3 + $0x2c0] ss:$16 sps:$4 sm:$0xff]   ;;  %21795 = vst [vmem:[#allocation99_spill] sm:$0xff] %v15335_v30 }
 0x1fd   :  { %2392 = vmatpush1.bf16.msra.mxu0 %v12117_v26  ;;  %v15344_v26 = vld [vmem:[%s21695_s26 + $0x430] ss:$8 sps:$4 sm:$0xff]  }
 0x1fe   :  { %1960 = vmatpush1.bf16.msra.mxu1 %v15308_v50  ;;  %v12123_v50 = vld [vmem:[%s21247_s3 + $0x2a0] ss:$16 sps:$4 sm:$0xff]   ;;  %2393 = vmatprep.subr.bf16.mxu0 %v12125_v49  ;;  %21796 = vst [vmem:[#allocation100_spill] sm:$0xff] %v15344_v26  ;;  %v15353_v49 = vld [vmem:[%s21695_s26 + $0x424] ss:$8 sps:$4 sm:$0xff]  }
 0x1ff   :  { %1961 = vmatprep.subr.bf16.mxu1 %v15317_v42  ;;  %v12131_v42 = vld [vmem:[%s21247_s3 + $0x284] ss:$16 sps:$4 sm:$0xff]   ;;  %21797 = vst [vmem:[#allocation101_spill] sm:$0xff] %v15353_v49 }
 0x201   :  { %2394 = vmatpush1.bf16.msra.mxu0 %v12123_v50  ;;  %v15362_v50 = vld [vmem:[%s21695_s26 + $0x420] ss:$8 sps:$4 sm:$0xff]  }
 0x202   :  { %1962 = vmatpush1.bf16.msra.mxu1 %v15326_v28  ;;  %v12129_v28 = vld [vmem:[%s21247_s3 + $0x280] ss:$16 sps:$4 sm:$0xff]   ;;  %2395 = vmatprep.subr.bf16.mxu0 %v12131_v42  ;;  %21798 = vst [vmem:[#allocation102_spill] sm:$0xff] %v15362_v50  ;;  %v15371_v42 = vld [vmem:[%s21695_s26 + $0x414] ss:$8 sps:$4 sm:$0xff]  }
 0x203   :  { %1963 = vmatprep.subr.bf16.mxu1 %v15335_v30  ;;  %v12137_v30 = vld [vmem:[%s21247_s3 + $0x264] ss:$16 sps:$4 sm:$0xff]   ;;  %21799 = vst [vmem:[#allocation103_spill] sm:$0xff] %v15371_v42 }
 0x205   :  { %2396 = vmatpush1.bf16.msra.mxu0 %v12129_v28  ;;  %v15380_v28 = vld [vmem:[%s21695_s26 + $0x410] ss:$8 sps:$4 sm:$0xff]  }
 0x206   :  { %1964 = vmatpush1.bf16.msra.mxu1 %v15344_v26  ;;  %v12135_v26 = vld [vmem:[%s21247_s3 + $0x260] ss:$16 sps:$4 sm:$0xff]   ;;  %2397 = vmatprep.subr.bf16.mxu0 %v12137_v30  ;;  %21800 = vst [vmem:[#allocation104_spill] sm:$0xff] %v15380_v28 }
 0x207   :  { %1965 = vmatprep.subr.bf16.mxu1 %v15353_v49  ;;  %v12143_v49 = vld [vmem:[%s21247_s3 + $0x244] ss:$16 sps:$4 sm:$0xff]   ;;  %v12141_v30 = vld [vmem:[%s21247_s3 + $0x240] ss:$16 sps:$4 sm:$0xff]  }
 0x209   :  { %2398 = vmatpush1.bf16.msra.mxu0 %v12135_v26  ;;  %v15402_v26 = vld [vmem:[%s21695_s26 + $0x400] ss:$8 sps:$4 sm:$0xff]  }
 0x20a   :  { %1966 = vmatpush1.bf16.msra.mxu1 %v15362_v50  ;;  %v10363_v50 = vld.sshfl [vmem:[%s21697_s20 + $0x11] sm:$0x1 pattern:$0x75316420]  ;;  %2399 = vmatprep.subr.bf16.mxu0 %v12143_v49  ;;  %21802 = vst [vmem:[#allocation106_spill] sm:$0xff] %v15402_v26 }
 0x20b   :  { %1967 = vmatprep.subr.bf16.mxu1 %v15371_v42  ;;  %v15392_v42 = vld [vmem:[%s21695_s26 + $0x404] ss:$8 sps:$4 sm:$0xff]   ;;  %v1781_v13 = vrot.slane %v10363_v50, %v13946_v48  ;;  %v12120_v49 = vld [vmem:[%s21247_s3 + $0x2c8] ss:$16 sps:$4 sm:$0xff]  }
 0x20c   :  { %21801 = vst [vmem:[#allocation105_spill] sm:$0xff] %v15392_v42  ;;  %v12128_v50 = vld [vmem:[%s21247_s3 + $0x2ac] ss:$16 sps:$4 sm:$0xff]  }
 0x20d   :  { %2400 = vmatpush1.bf16.msra.mxu0 %v12141_v30  ;;  %v12138_v30 = vld [vmem:[%s21247_s3 + $0x268] ss:$16 sps:$4 sm:$0xff]  }
 0x20e   :  { %1968 = vmatpush1.bf16.msra.mxu1 %v15380_v28  ;;  %v12116_v28 = vld [vmem:[%s21247_s3 + $0x2ec] ss:$16 sps:$4 sm:$0xff]  }
 0x20f   :  { %1969 = vmatprep.subr.bf16.mxu1 %v15392_v42  ;;  %v12122_v42 = vld [vmem:[%s21247_s3 + $0x2cc] ss:$16 sps:$4 sm:$0xff]  }
 0x212   :  { %1970 = vmatpush1.bf16.msra.mxu1 %v15402_v26 }
 0x213   :  { %2430 = vmatprep.subr.bf16.mxu1 %v12116_v28  ;;  %v12126_v28 = vld [vmem:[%s21247_s3 + $0x2a8] ss:$16 sps:$4 sm:$0xff]  }
 0x215   :  { %1988 = vmatmul.mubr.bf16.vlgmr.msra.gmra.mxu1 %v1781_v13  ;;  %v12134_v13 = vld [vmem:[%s21247_s3 + $0x28c] ss:$16 sps:$4 sm:$0xff]  }
 0x216   :  { %2431 = vmatpush1.bf16.msra.mxu1 %v12114_v24  ;;  %v12132_v24 = vld [vmem:[%s21247_s3 + $0x288] ss:$16 sps:$4 sm:$0xff]  }
 0x217   :  { %2432 = vmatprep.subr.bf16.mxu1 %v12122_v42  ;;  %v12140_v42 = vld [vmem:[%s21247_s3 + $0x26c] ss:$16 sps:$4 sm:$0xff]  }
 0x21a   :  { %2433 = vmatpush1.bf16.msra.mxu1 %v12120_v49  ;;  %v12146_v49 = vld [vmem:[%s21247_s3 + $0x24c] ss:$16 sps:$4 sm:$0xff]  }
 0x21b   :  { %2434 = vmatprep.subr.bf16.mxu1 %v12128_v50  ;;  %v12144_v50 = vld [vmem:[%s21247_s3 + $0x248] ss:$16 sps:$4 sm:$0xff]  }
 0x21e   :  { %2435 = vmatpush1.bf16.msra.mxu1 %v12126_v28 }
 0x21f   :  { %2436 = vmatprep.subr.bf16.mxu1 %v12134_v13 }
 0x222   :  { %2437 = vmatpush1.bf16.msra.mxu1 %v12132_v24  ;;  %v12149_v24 = vld [vmem:[%s21247_s3 + $0x224] ss:$16 sps:$4 sm:$0xff]  }
 0x223   :  { %2438 = vmatprep.subr.bf16.mxu1 %v12140_v42  ;;  %v12147_v42 = vld [vmem:[%s21247_s3 + $0x220] ss:$16 sps:$4 sm:$0xff]   ;;  %2401 = vmatprep.subr.bf16.mxu0 %v12149_v24  ;;  %v12158_v24 = vld [vmem:[%s21247_s3 + $0x20c] ss:$16 sps:$4 sm:$0xff]  }
 0x224   :  { %2402 = vmatpush1.bf16.msra.mxu0 %v12147_v42  ;;  %v12159_v42 = vld [vmem:[%s21247_s3 + $0x3e0] ss:$16 sps:$4 sm:$0xff]  }
 0x225   :  { %2403 = vmatprep.subr.bf16.mxu0 %v12155_v29  ;;  %v12167_v29 = vld [vmem:[%s21247_s3 + $0x3c4] ss:$16 sps:$4 sm:$0xff]  }
 0x226   :  { %2439 = vmatpush1.bf16.msra.mxu1 %v12138_v30  ;;  %v12152_v30 = vld [vmem:[%s21247_s3 + $0x22c] ss:$16 sps:$4 sm:$0xff]  }
 0x227   :  { %2440 = vmatprep.subr.bf16.mxu1 %v12146_v49 }
 0x22a   :  { %2441 = vmatpush1.bf16.msra.mxu1 %v12144_v50  ;;  %v12150_v50 = vld [vmem:[%s21247_s3 + $0x228] ss:$16 sps:$4 sm:$0xff]  }
 0x22b   :  { %2442 = vmatprep.subr.bf16.mxu1 %v12152_v30  ;;  %v12164_v30 = vld [vmem:[%s21247_s3 + $0x3ec] ss:$16 sps:$4 sm:$0xff]  }
 0x22e   :  { %2443 = vmatpush1.bf16.msra.mxu1 %v12150_v50  ;;  %v12168_v50 = vld [vmem:[%s21247_s3 + $0x3c8] ss:$16 sps:$4 sm:$0xff]  }
 0x22f   :  { %2444 = vmatprep.subr.bf16.mxu1 %v12158_v24  ;;  %v12173_v24 = vld [vmem:[%s21247_s3 + $0x3a4] ss:$16 sps:$4 sm:$0xff]  }
 0x235   :  { %v15438_v28 = vpop.f32.mrf.mxu1  ;;  %v15440_v13 = vpop.f32.mrf.mxu0 }
 0x236   :  { %21803 = vst [vmem:[#allocation107_spill] sm:$0xff] %v15438_v28  ;;  %21804 = vst [vmem:[#allocation108_spill] sm:$0xff] %v15440_v13 }
 0x237   :  { %v15451_v26 = vpop.f32.mrf.mxu1  ;;  %v15453_v49 = vpop.f32.mrf.mxu0 }
 0x238   :  { %21805 = vst [vmem:[#allocation109_spill] sm:$0xff] %v15451_v26  ;;  %21806 = vst [vmem:[#allocation110_spill] sm:$0xff] %v15453_v49  ;;  %v12153_v26 = vld [vmem:[%s21247_s3 + $0x200] ss:$16 sps:$4 sm:$0xff]  }
 0x239   :  { %v1645_v13 = vpop.f32.mrf.mxu1  ;;  %v1686_v28 = vpop.f32.mrf.mxu0  ;;  %2404 = vmatpush1.bf16.msra.mxu0 %v12153_v26  ;;  %v12170_v26 = vld [vmem:[%s21247_s3 + $0x3cc] ss:$16 sps:$4 sm:$0xff]  }
 0x23a   :  { %v12156_v28 = vld [vmem:[%s21247_s3 + $0x208] ss:$16 sps:$4 sm:$0xff]   ;;  %v12161_v13 = vld [vmem:[%s21247_s3 + $0x3e4] ss:$16 sps:$4 sm:$0xff]  }
 0x23b   :  { %v1646_v49 = vpop.f32.mrf.mxu1  ;;  %v1687_v10 = vpop.f32.mrf.mxu0  ;;  %2445 = vmatpush1.bf16.msra.mxu1 %v12156_v28  ;;  %2405 = vmatprep.subr.bf16.mxu0 %v12161_v13  ;;  %v12176_v28 = vld [vmem:[%s21247_s3 + $0x3ac] ss:$16 sps:$4 sm:$0xff]   ;;  %v12171_v13 = vld [vmem:[%s21247_s3 + $0x3a0] ss:$16 sps:$4 sm:$0xff]  }
 0x23c   :  { %v12162_v10 = vld [vmem:[%s21247_s3 + $0x3e8] ss:$16 sps:$4 sm:$0xff]   ;;  %2446 = vmatprep.subr.bf16.mxu1 %v12164_v30  ;;  %v12165_v49 = vld [vmem:[%s21247_s3 + $0x3c0] ss:$16 sps:$4 sm:$0xff]   ;;  %v12179_v30 = vld [vmem:[%s21247_s3 + $0x384] ss:$16 sps:$4 sm:$0xff]  }
 0x23d   :  { %2406 = vmatpush2.bf16.msra.mxu0 %v12159_v42  ;;  %v12174_v42 = vld [vmem:[%s21247_s3 + $0x3a8] ss:$16 sps:$4 sm:$0xff]  }
 0x23e   :  { %2407 = vmatprep.subr.bf16.mxu0 %v12167_v29  ;;  %v12177_v29 = vld [vmem:[%s21247_s3 + $0x380] ss:$16 sps:$4 sm:$0xff]  }
 0x23f   :  { %2447 = vmatpush2.bf16.msra.mxu1 %v12162_v10  ;;  %v12182_v10 = vld [vmem:[%s21247_s3 + $0x38c] ss:$16 sps:$4 sm:$0xff]  }
 0x240   :  { %2448 = vmatprep.subr.bf16.mxu1 %v12170_v26  ;;  %v12180_v26 = vld [vmem:[%s21247_s3 + $0x388] ss:$16 sps:$4 sm:$0xff]  }
 0x241   :  { %2408 = vmatpush2.bf16.msra.mxu0 %v12165_v49  ;;  %v12185_v49 = vld [vmem:[%s21247_s3 + $0x364] ss:$16 sps:$4 sm:$0xff]  }
 0x242   :  { %2409 = vmatprep.subr.bf16.mxu0 %v12173_v24  ;;  %v12183_v24 = vld [vmem:[%s21247_s3 + $0x360] ss:$16 sps:$4 sm:$0xff]  }
 0x243   :  { %2449 = vmatpush2.bf16.msra.mxu1 %v12168_v50  ;;  %v12188_v50 = vld [vmem:[%s21247_s3 + $0x36c] ss:$16 sps:$4 sm:$0xff]  }
 0x244   :  { %2450 = vmatprep.subr.bf16.mxu1 %v12176_v28  ;;  %v12186_v28 = vld [vmem:[%s21247_s3 + $0x368] ss:$16 sps:$4 sm:$0xff]  }
 0x245   :  { %2410 = vmatpush2.bf16.msra.mxu0 %v12171_v13  ;;  %v12191_v13 = vld [vmem:[%s21247_s3 + $0x344] ss:$16 sps:$4 sm:$0xff]  }
 0x246   :  { %2411 = vmatprep.subr.bf16.mxu0 %v12179_v30  ;;  %v12189_v30 = vld [vmem:[%s21247_s3 + $0x340] ss:$16 sps:$4 sm:$0xff]  }
 0x247   :  { %2451 = vmatpush2.bf16.msra.mxu1 %v12174_v42  ;;  %v12194_v42 = vld [vmem:[%s21247_s3 + $0x34c] ss:$16 sps:$4 sm:$0xff]  }
 0x248   :  { %2452 = vmatprep.subr.bf16.mxu1 %v12182_v10  ;;  %v12192_v10 = vld [vmem:[%s21247_s3 + $0x348] ss:$16 sps:$4 sm:$0xff]  }
 0x249   :  { %2412 = vmatpush2.bf16.msra.mxu0 %v12177_v29  ;;  %v12197_v29 = vld [vmem:[%s21247_s3 + $0x324] ss:$16 sps:$4 sm:$0xff]  }
 0x24a   :  { %2413 = vmatprep.subr.bf16.mxu0 %v12185_v49  ;;  %v12200_v49 = vld [vmem:[%s21247_s3 + $0x32c] ss:$16 sps:$4 sm:$0xff]  }
 0x24b   :  { %2453 = vmatpush2.bf16.msra.mxu1 %v12180_v26  ;;  %v12195_v26 = vld [vmem:[%s21247_s3 + $0x320] ss:$16 sps:$4 sm:$0xff]  }
 0x24c   :  { %2454 = vmatprep.subr.bf16.mxu1 %v12188_v50  ;;  %v12198_v50 = vld [vmem:[%s21247_s3 + $0x328] ss:$16 sps:$4 sm:$0xff]  }
 0x24d   :  { %2414 = vmatpush2.bf16.msra.mxu0 %v12183_v24  ;;  %v12203_v24 = vld [vmem:[%s21247_s3 + $0x304] ss:$16 sps:$4 sm:$0xff]  }
 0x24e   :  { %2415 = vmatprep.subr.bf16.mxu0 %v12191_v13  ;;  %v12206_v13 = vld [vmem:[%s21247_s3 + $0x30c] ss:$16 sps:$4 sm:$0xff]  }
 0x24f   :  { %2455 = vmatpush2.bf16.msra.mxu1 %v12186_v28  ;;  %v12201_v28 = vld [vmem:[%s21247_s3 + $0x300] ss:$16 sps:$4 sm:$0xff]  }
 0x250   :  { %2456 = vmatprep.subr.bf16.mxu1 %v12194_v42  ;;  %v12204_v42 = vld [vmem:[%s21247_s3 + $0x308] ss:$16 sps:$4 sm:$0xff]  }
 0x251   :  { %2416 = vmatpush2.bf16.msra.mxu0 %v12189_v30  ;;  %v15569_v30 = vld [vmem:[%s21695_s26 + $0x74] ss:$8 sps:$4 sm:$0xff]  }
 0x252   :  { %2417 = vmatprep.subr.bf16.mxu0 %v12197_v29  ;;  %21807 = vst [vmem:[#allocation111_spill] sm:$0xff] %v15569_v30 }
 0x253   :  { %2457 = vmatpush2.bf16.msra.mxu1 %v12192_v10  ;;  %v15575_v10 = vld [vmem:[%s21695_s26 + $0x174] ss:$8 sps:$4 sm:$0xff]  }
 0x254   :  { %2458 = vmatprep.subr.bf16.mxu1 %v12200_v49  ;;  %21808 = vst [vmem:[#allocation112_spill] sm:$0xff] %v15575_v10 }
 0x255   :  { %2418 = vmatpush2.bf16.msra.mxu0 %v12195_v26 }
 0x256   :  { %2419 = vmatprep.subr.bf16.mxu0 %v12203_v24 }
 0x257   :  { %2459 = vmatpush2.bf16.msra.mxu1 %v12198_v50 }
 0x258   :  { %2460 = vmatprep.subr.bf16.mxu1 %v12206_v13 }
 0x259   :  { %2420 = vmatpush2.bf16.msra.mxu0 %v12201_v28 }
 0x25a   :  { %2552 = vmatprep.subr.bf16.mxu0 %v15569_v30 }
 0x25b   :  { %2461 = vmatpush2.bf16.msra.mxu1 %v12204_v42 }
 0x25c   :  { %2593 = vmatprep.subr.bf16.mxu1 %v15575_v10 }
 0x275   :  { %v1825_v29 = vpop.f32.mrf.mxu1  ;;  %v1866_v26 = vpop.f32.mrf.mxu0 }
 0x276   :  { %v1826_v49 = vadd.f32 %v1825_v29, %v14478_v51  ;;  %v15583_v29 = vld [vmem:[%s21697_s20 + $0x12] sm:$0xff] }
 0x277   :  { %v1827_v50 = vpop.f32.mrf.mxu1  ;;  %v1868_v24 = vpop.f32.mrf.mxu0 }
 0x278   :  { %v1828_v28 = vadd.f32 %v1827_v50, %v14481_v52  ;;  %v1867_v13 = vadd.f32 %v1866_v26, %v1826_v49 }
 0x279   :  { %v1829_v42 = vpop.f32.mrf.mxu1  ;;  %v1870_v27 = vpop.f32.mrf.mxu0 }
 0x27a   :  { %v1869_v25 = vadd.f32 %v1868_v24, %v1828_v28  ;;  %v15587_v27 = vrot.slane %v15583_v29, %v13946_v48 }
 0x27b   :  { %v1830_v30 = vpop.f32.mrf.mxu1  ;;  %v1871_v5 = vpop.f32.mrf.mxu0 }
 0x2b5   :  { %v1907_v23 = vpop.f32.mrf.mxu1  ;;  %v1948_v22 = vpop.f32.mrf.mxu0 }
 0x2b6   :  { %v1908_v16 = vadd.f32 %v1907_v23, %v1867_v13 }
 0x2b7   :  { %v1909_v21 = vpop.f32.mrf.mxu1  ;;  %v1950_v20 = vpop.f32.mrf.mxu0 }
 0x2b8   :  { %v1910_v26 = vadd.f32 %v1909_v21, %v1869_v25  ;;  %v1949_v5 = vadd.f32 %v1948_v22, %v1908_v16  ;;  %v21842_v22 = vld [vmem:[#allocation38_spill] sm:$0xff] }
 0x2b9   :  { %v1911_v19 = vpop.f32.mrf.mxu1  ;;  %v1952_v10 = vpop.f32.mrf.mxu0 }
 0x2ba   :  { %v1951_v49 = vadd.f32 %v1950_v20, %v1910_v26  ;;  %v21844_v26 = vld [vmem:[#allocation40_spill] sm:$0xff] }
 0x2bb   :  { %v1912_v18 = vpop.f32.mrf.mxu1  ;;  %v1953_v17 = vpop.f32.mrf.mxu0 }
 0x2bc   :  { %v2495_v18 = vcombine.high %v15587_v27, %v15587_v27 }
 0x2be   :  { %v2517_v25 = vrot.slane %v2495_v18, %v13946_v48  ;;  %v21851_v18 = vld [vmem:[#allocation47_spill] sm:$0xff] }
 0x2c0   :  { %v2527_v20 = vcombine.high %v2517_v25, %v2517_v25 }
 0x2d5   :  { %v1989_v30 = vpop.f32.mrf.mxu1 }
 0x2d6   :  { %v1990_v50 = vadd.f32 %v1989_v30, %v1949_v5  ;;  %v21846_v5 = vld [vmem:[#allocation42_spill] sm:$0xff]  ;;  %v21847_v30 = vld [vmem:[#allocation43_spill] sm:$0xff] }
 0x2d7   :  { %v1991_v24 = vpop.f32.mrf.mxu1 }
 0x2d8   :  { %vm1996_vm2 = vcmp.ge.f32.partialorder %v1990_v50, 0.0  ;;  %v1998_v17 = vmul.f32 0.1, %v1990_v50  ;;  %v1992_v19 = vadd.f32 %v1991_v24, %v1951_v49  ;;  %v21848_v49 = vld [vmem:[#allocation44_spill] sm:$0xff]  ;;  %v21850_v24 = vld [vmem:[#allocation46_spill] sm:$0xff] }
 0x2d9   :  { %v1993_v23 = vpop.f32.mrf.mxu1 }
 0x2da   :  { %vm1997_vm3 = vcmp.ge.f32.partialorder %v1992_v19, 0.0  ;;  %v1999_v10 = vmul.f32 0.1, %v1992_v19  ;;  %v2000_v28 = vsel %vm1996_vm2, %v1990_v50, %v1998_v17  ;;  %v21849_v50 = vld [vmem:[#allocation45_spill] sm:$0xff]  ;;  %v21852_v17 = vld [vmem:[#allocation48_spill] sm:$0xff]  ;;  %v21854_v23 = vld [vmem:[#allocation50_spill] sm:$0xff] }
 0x2db   :  { %v1994_v21 = vpop.f32.mrf.mxu1  ;;  %v2002_v16 = vpack.c.bf16 %v2000_v28, %v2000_v28  ;;  %v21856_v28 = vld [vmem:[#allocation52_spill] sm:$0xff] }
 0x2dc   :  { %v2001_v13 = vsel %vm1997_vm3, %v1992_v19, %v1999_v10  ;;  %v21853_v19 = vld [vmem:[#allocation49_spill] sm:$0xff]  ;;  %v21855_v10 = vld [vmem:[#allocation51_spill] sm:$0xff] }
 0x2dd   :  { %v2003_v42 = vpack.c.bf16 %v2001_v13, %v2001_v13  ;;  %v21857_v21 = vld [vmem:[#allocation53_spill] sm:$0xff]  ;;  %v21859_v13 = vld [vmem:[#allocation55_spill] sm:$0xff] }
 0x2df   :  { %2421 = vmatprep.mubr.bf16.mxu0 %v2003_v42  ;;  %2462 = vmatprep.mubr.bf16.mxu1 %v2003_v42  ;;  %v21860_v42 = vld [vmem:[#allocation56_spill] sm:$0xff] }
 0x2e0   :  { %2422 = vmatmul.mubr.bf16.vlgmr.msra.gmra.mxu0 %v2002_v16  ;;  %2463 = vmatmul.mubr.bf16.vlgmr.msra.gmra.mxu1 %v2002_v16  ;;  %v21861_v16 = vld [vmem:[#allocation57_spill] sm:$0xff] }
 0x2e1   :  { %2553 = vmatpush1.bf16.msra.mxu0 %v14500_v31  ;;  %2594 = vmatpush1.bf16.msra.mxu1 %v14506_v32  ;;  %v21809_v31 = vld [vmem:[#allocation5_spill] sm:$0xff]  ;;  %v21810_v32 = vld [vmem:[#allocation6_spill] sm:$0xff] }
 0x2e2   :  { %2554 = vmatprep.subr.bf16.mxu0 %v14512_v33  ;;  %2595 = vmatprep.subr.bf16.mxu1 %v14518_v34  ;;  %v21811_v33 = vld [vmem:[#allocation7_spill] sm:$0xff]  ;;  %v21812_v34 = vld [vmem:[#allocation8_spill] sm:$0xff] }
 0x2e3   :  { %2584 = vmatprep.mubr.bf16.mxu0 %v2517_v25  ;;  %2625 = vmatprep.mubr.bf16.mxu1 %v2527_v20  ;;  %v21858_v25 = vld [vmem:[#allocation54_spill] sm:$0xff] }
 0x2e4   :  { %v21862_v20 = vld [vmem:[#allocation58_spill] sm:$0xff] }
 0x2e5   :  { %2555 = vmatpush1.bf16.msra.mxu0 %v14524_v35  ;;  %2596 = vmatpush1.bf16.msra.mxu1 %v14530_v36  ;;  %v21813_v35 = vld [vmem:[#allocation9_spill] sm:$0xff]  ;;  %v21814_v36 = vld [vmem:[#allocation10_spill] sm:$0xff] }
 0x2e6   :  { %2556 = vmatprep.subr.bf16.mxu0 %v14536_v37  ;;  %2597 = vmatprep.subr.bf16.mxu1 %v14542_v38  ;;  %v21815_v37 = vld [vmem:[#allocation11_spill] sm:$0xff]  ;;  %v21816_v38 = vld [vmem:[#allocation12_spill] sm:$0xff] }
 0x2e9   :  { %2557 = vmatpush1.bf16.msra.mxu0 %v14548_v39  ;;  %2598 = vmatpush1.bf16.msra.mxu1 %v14554_v40  ;;  %v2480_v39 = vcombine.high %v15583_v29, %v15583_v29  ;;  %v21817_v40 = vld [vmem:[#allocation13_spill] sm:$0xff]  ;;  %v21843_v29 = vld [vmem:[#allocation39_spill] sm:$0xff] }
 0x2ea   :  { %2558 = vmatprep.subr.bf16.mxu0 %v14560_v41  ;;  %2599 = vmatprep.subr.bf16.mxu1 %v14566_v43  ;;  %v21818_v41 = vld [vmem:[#allocation14_spill] sm:$0xff]  ;;  %v21819_v43 = vld [vmem:[#allocation15_spill] sm:$0xff] }
 0x2ed   :  { %2559 = vmatpush1.bf16.msra.mxu0 %v14572_v44  ;;  %2600 = vmatpush1.bf16.msra.mxu1 %v14578_v45  ;;  %v21820_v44 = vld [vmem:[#allocation16_spill] sm:$0xff]  ;;  %v15647_v45 = vrot.slane %v2480_v39, %v13946_v48  ;;  %v21871_v39 = vld [vmem:[#allocation67_spill] sm:$0xff] }
 0x2ee   :  { %2560 = vmatprep.subr.bf16.mxu0 %v14584_v46  ;;  %2601 = vmatprep.subr.bf16.mxu1 %v14590_v47  ;;  %v21821_v46 = vld [vmem:[#allocation17_spill] sm:$0xff]  ;;  %v21822_v47 = vld [vmem:[#allocation18_spill] sm:$0xff] }
 0x2f1   :  { %2561 = vmatpush1.bf16.msra.mxu0 %v14596_v53  ;;  %2602 = vmatpush1.bf16.msra.mxu1 %v14602_v54  ;;  %v21823_v53 = vld [vmem:[#allocation19_spill] sm:$0xff]  ;;  %v21824_v54 = vld [vmem:[#allocation20_spill] sm:$0xff] }
 0x2f2   :  { %2562 = vmatprep.subr.bf16.mxu0 %v14608_v55  ;;  %2603 = vmatprep.subr.bf16.mxu1 %v14614_v56  ;;  %v2496_v55 = vcombine.high %v15647_v45, %v15647_v45  ;;  %v2503_v56 = vrot.slane %v15587_v27, %v13946_v48  ;;  %v21845_v27 = vld [vmem:[#allocation41_spill] sm:$0xff] }
 0x2f5   :  { %2563 = vmatpush1.bf16.msra.mxu0 %v14620_v57  ;;  %2604 = vmatpush1.bf16.msra.mxu1 %v14626_v58  ;;  %v21825_v57 = vld [vmem:[#allocation21_spill] sm:$0xff]  ;;  %v21826_v58 = vld [vmem:[#allocation22_spill] sm:$0xff] }
 0x2f6   :  { %2564 = vmatprep.subr.bf16.mxu0 %v14632_v59  ;;  %2605 = vmatprep.subr.bf16.mxu1 %v14638_v60  ;;  %v21827_v59 = vld [vmem:[#allocation23_spill] sm:$0xff]  ;;  %v21828_v60 = vld [vmem:[#allocation24_spill] sm:$0xff] }
 0x2f9   :  { %2565 = vmatpush1.bf16.msra.mxu0 %v14644_v61  ;;  %2606 = vmatpush1.bf16.msra.mxu1 %v14650_v62  ;;  %v2524_v61 = vrot.slane %v2496_v55, %v13946_v48  ;;  %v2525_v62 = vcombine.high %v2503_v56, %v2503_v56  ;;  %v21880_v55 = vld [vmem:[#allocation76_spill] sm:$0xff] }
 0x2fa   :  { %2566 = vmatprep.subr.bf16.mxu0 %v14656_v63  ;;  %2607 = vmatprep.subr.bf16.mxu1 %v14662_v0  ;;  %v21829_v63 = vld [vmem:[#allocation25_spill] sm:$0xff]  ;;  %v21830_v0 = vld [vmem:[#allocation26_spill] sm:$0xff] }
 0x2fd   :  { %2567 = vmatpush1.bf16.msra.mxu0 %v14668_v1  ;;  %2608 = vmatpush1.bf16.msra.mxu1 %v14674_v2  ;;  %v21831_v1 = vld [vmem:[#allocation27_spill] sm:$0xff]  ;;  %v21832_v2 = vld [vmem:[#allocation28_spill] sm:$0xff] }
 0x2fe   :  { %2568 = vmatprep.subr.bf16.mxu0 %v14680_v3  ;;  %2609 = vmatprep.subr.bf16.mxu1 %v14686_v4  ;;  %v2528_v3 = vcombine.high %v2524_v61, %v2524_v61  ;;  %v21833_v4 = vld [vmem:[#allocation29_spill] sm:$0xff] }
 0x301   :  { %2569 = vmatpush2.bf16.msra.mxu0 %v14692_v6  ;;  %2610 = vmatpush2.bf16.msra.mxu1 %v14698_v7  ;;  %v21834_v6 = vld [vmem:[#allocation30_spill] sm:$0xff]  ;;  %v21835_v7 = vld [vmem:[#allocation31_spill] sm:$0xff] }
 0x302   :  { %2570 = vmatprep.subr.bf16.mxu0 %v14704_v8  ;;  %2611 = vmatprep.subr.bf16.mxu1 %v14710_v9  ;;  %v21836_v8 = vld [vmem:[#allocation32_spill] sm:$0xff]  ;;  %v21837_v9 = vld [vmem:[#allocation33_spill] sm:$0xff] }
 0x305   :  { %2571 = vmatpush2.bf16.msra.mxu0 %v14716_v11  ;;  %2612 = vmatpush2.bf16.msra.mxu1 %v14722_v12  ;;  %v21838_v11 = vld [vmem:[#allocation34_spill] sm:$0xff]  ;;  %v21839_v12 = vld [vmem:[#allocation35_spill] sm:$0xff] }
 0x306   :  { %2572 = vmatprep.subr.bf16.mxu0 %v14728_v14  ;;  %2613 = vmatprep.subr.bf16.mxu1 %v14734_v15  ;;  %v21840_v14 = vld [vmem:[#allocation36_spill] sm:$0xff]  ;;  %v21841_v15 = vld [vmem:[#allocation37_spill] sm:$0xff] }
 0x309   :  { %2573 = vmatpush2.bf16.msra.mxu0 %v21809_v31  ;;  %2614 = vmatpush2.bf16.msra.mxu1 %v21810_v32  ;;  %v21863_v31 = vld [vmem:[#allocation59_spill] sm:$0xff]  ;;  %v21864_v32 = vld [vmem:[#allocation60_spill] sm:$0xff] }
 0x30a   :  { %2574 = vmatprep.subr.bf16.mxu0 %v21811_v33  ;;  %2615 = vmatprep.subr.bf16.mxu1 %v21812_v34  ;;  %v21865_v33 = vld [vmem:[#allocation61_spill] sm:$0xff]  ;;  %v21866_v34 = vld [vmem:[#allocation62_spill] sm:$0xff] }
 0x30d   :  { %2575 = vmatpush2.bf16.msra.mxu0 %v21813_v35  ;;  %2616 = vmatpush2.bf16.msra.mxu1 %v21814_v36  ;;  %v21867_v35 = vld [vmem:[#allocation63_spill] sm:$0xff]  ;;  %v21868_v36 = vld [vmem:[#allocation64_spill] sm:$0xff] }
 0x30e   :  { %2576 = vmatprep.subr.bf16.mxu0 %v21815_v37  ;;  %2617 = vmatprep.subr.bf16.mxu1 %v21816_v38  ;;  %v21869_v37 = vld [vmem:[#allocation65_spill] sm:$0xff]  ;;  %v21870_v38 = vld [vmem:[#allocation66_spill] sm:$0xff] }
 0x311   :  { %2577 = vmatpush2.bf16.msra.mxu0 %v21817_v40  ;;  %2618 = vmatpush2.bf16.msra.mxu1 %v21818_v41  ;;  %v21872_v40 = vld [vmem:[#allocation68_spill] sm:$0xff]  ;;  %v21873_v41 = vld [vmem:[#allocation69_spill] sm:$0xff] }
 0x312   :  { %2578 = vmatprep.subr.bf16.mxu0 %v21819_v43  ;;  %2619 = vmatprep.subr.bf16.mxu1 %v21820_v44  ;;  %v21874_v43 = vld [vmem:[#allocation70_spill] sm:$0xff]  ;;  %v21875_v44 = vld [vmem:[#allocation71_spill] sm:$0xff] }
 0x315   :  { %2579 = vmatpush2.bf16.msra.mxu0 %v21821_v46  ;;  %2620 = vmatpush2.bf16.msra.mxu1 %v21822_v47  ;;  %v21876_v46 = vld [vmem:[#allocation72_spill] sm:$0xff]  ;;  %v21877_v47 = vld [vmem:[#allocation73_spill] sm:$0xff] }
 0x316   :  { %2580 = vmatprep.subr.bf16.mxu0 %v21823_v53  ;;  %2621 = vmatprep.subr.bf16.mxu1 %v21824_v54  ;;  %v21878_v53 = vld [vmem:[#allocation74_spill] sm:$0xff]  ;;  %v21879_v54 = vld [vmem:[#allocation75_spill] sm:$0xff] }
 0x319   :  { %2581 = vmatpush2.bf16.msra.mxu0 %v21825_v57  ;;  %2622 = vmatpush2.bf16.msra.mxu1 %v21826_v58  ;;  %v21882_v57 = vld [vmem:[#allocation78_spill] sm:$0xff]  ;;  %v21883_v58 = vld [vmem:[#allocation79_spill] sm:$0xff] }
 0x31a   :  { %2582 = vmatprep.subr.bf16.mxu0 %v21827_v59  ;;  %2623 = vmatprep.subr.bf16.mxu1 %v21828_v60  ;;  %v21884_v59 = vld [vmem:[#allocation80_spill] sm:$0xff]  ;;  %v21885_v60 = vld [vmem:[#allocation81_spill] sm:$0xff] }
 0x31d   :  { %2583 = vmatpush2.bf16.msra.mxu0 %v21829_v63  ;;  %2624 = vmatpush2.bf16.msra.mxu1 %v21830_v0  ;;  %v21888_v63 = vld [vmem:[#allocation84_spill] sm:$0xff]  ;;  %v2510_v0 = vrot.slane %v15647_v45, %v13946_v48  ;;  %v21897_v45 = vmov 0  }
 0x31e   :  { %2634 = vmatprep.subr.bf16.mxu0 %v21831_v1  ;;  %2675 = vmatprep.subr.bf16.mxu1 %v21832_v2  ;;  %v21889_v1 = vld [vmem:[#allocation85_spill] sm:$0xff]  ;;  %v21890_v2 = vld [vmem:[#allocation86_spill] sm:$0xff] }
 0x320   :  { %2585 = vmatmul.mubr.bf16.vlgmr.msra.gmra.mxu0 %v2503_v56  ;;  %2626 = vmatmul.mubr.bf16.vlgmr.msra.gmra.mxu1 %v2525_v62  ;;  %v21881_v56 = vld [vmem:[#allocation77_spill] sm:$0xff]  ;;  %v21887_v62 = vld [vmem:[#allocation83_spill] sm:$0xff] }
 0x321   :  { %2635 = vmatpush1.bf16.msra.mxu0 %v21833_v4  ;;  %2676 = vmatpush1.bf16.msra.mxu1 %v21834_v6  ;;  %v21892_v4 = vld [vmem:[#allocation88_spill] sm:$0xff]  ;;  %v2526_v6 = vcombine.high %v2510_v0, %v2510_v0 }
 0x322   :  { %2636 = vmatprep.subr.bf16.mxu0 %v21835_v7  ;;  %2677 = vmatprep.subr.bf16.mxu1 %v21836_v8  ;;  %v21893_v7 = vld [vmem:[#allocation89_spill] sm:$0xff]  ;;  %v21894_v8 = vld [vmem:[#allocation90_spill] sm:$0xff] }
 0x323   :  { %2666 = vmatprep.mubr.bf16.mxu0 %v2524_v61  ;;  %2707 = vmatprep.mubr.bf16.mxu1 %v2528_v3  ;;  %v21886_v61 = vld [vmem:[#allocation82_spill] sm:$0xff]  ;;  %v21891_v3 = vld [vmem:[#allocation87_spill] sm:$0xff] }
 0x325   :  { %2637 = vmatpush1.bf16.msra.mxu0 %v21837_v9  ;;  %2678 = vmatpush1.bf16.msra.mxu1 %v21838_v11  ;;  %v21895_v9 = vld [vmem:[#allocation91_spill] sm:$0xff]  ;;  %v21896_v11 = vld [vmem:[#allocation92_spill] sm:$0xff] }
 0x326   :  { %2638 = vmatprep.subr.bf16.mxu0 %v21839_v12  ;;  %2679 = vmatprep.subr.bf16.mxu1 %v21840_v14  ;;  %v21898_v12 = vld [vmem:[#allocation93_spill] sm:$0xff]  ;;  %v21899_v14 = vld [vmem:[#allocation94_spill] sm:$0xff] }
 0x329   :  { %2639 = vmatpush1.bf16.msra.mxu0 %v21841_v15  ;;  %2680 = vmatpush1.bf16.msra.mxu1 %v21842_v22  ;;  %v21900_v15 = vld [vmem:[#allocation95_spill] sm:$0xff]  ;;  %v12208_v22 = vld [vmem:[%s21247_s3 + $0x4e0] ss:$16 sps:$4 sm:$0xff]  }
 0x32a   :  { %2640 = vmatprep.subr.bf16.mxu0 %v21843_v29  ;;  %2681 = vmatprep.subr.bf16.mxu1 %v21844_v26  ;;  %v12210_v29 = vld [vmem:[%s21247_s3 + $0x4e4] ss:$16 sps:$4 sm:$0xff]  }
 0x32b   :  { %v12216_v26 = vld [vmem:[%s21247_s3 + $0x4c4] ss:$16 sps:$4 sm:$0xff]  }
 0x32d   :  { %2641 = vmatpush1.bf16.msra.mxu0 %v21845_v27  ;;  %2682 = vmatpush1.bf16.msra.mxu1 %v21846_v5  ;;  %v21901_v27 = vld [vmem:[#allocation96_spill] sm:$0xff] }
 0x32e   :  { %2642 = vmatprep.subr.bf16.mxu0 %v21847_v30  ;;  %2683 = vmatprep.subr.bf16.mxu1 %v21848_v49  ;;  %v12214_v5 = vld [vmem:[%s21247_s3 + $0x4c0] ss:$16 sps:$4 sm:$0xff]   ;;  %v21902_v30 = vld [vmem:[#allocation97_spill] sm:$0xff]  ;;  %v12222_v49 = vld [vmem:[%s21247_s3 + $0x4a4] ss:$16 sps:$4 sm:$0xff]  }
 0x331   :  { %2643 = vmatpush1.bf16.msra.mxu0 %v21849_v50  ;;  %2684 = vmatpush1.bf16.msra.mxu1 %v21850_v24  ;;  %v21903_v50 = vld [vmem:[#allocation98_spill] sm:$0xff] }
 0x332   :  { %2644 = vmatprep.subr.bf16.mxu0 %v21851_v18  ;;  %2685 = vmatprep.subr.bf16.mxu1 %v21852_v17  ;;  %v12220_v24 = vld [vmem:[%s21247_s3 + $0x4a0] ss:$16 sps:$4 sm:$0xff]   ;;  %v21904_v18 = vld [vmem:[#allocation99_spill] sm:$0xff]  ;;  %v12228_v17 = vld [vmem:[%s21247_s3 + $0x484] ss:$16 sps:$4 sm:$0xff]  }
 0x335   :  { %2645 = vmatpush1.bf16.msra.mxu0 %v21853_v19  ;;  %2686 = vmatpush1.bf16.msra.mxu1 %v21854_v23  ;;  %v21905_v19 = vld [vmem:[#allocation100_spill] sm:$0xff] }
 0x336   :  { %2646 = vmatprep.subr.bf16.mxu0 %v21855_v10  ;;  %2687 = vmatprep.subr.bf16.mxu1 %v21856_v28  ;;  %v12226_v23 = vld [vmem:[%s21247_s3 + $0x480] ss:$16 sps:$4 sm:$0xff]   ;;  %v21906_v10 = vld [vmem:[#allocation101_spill] sm:$0xff]  ;;  %v12234_v28 = vld [vmem:[%s21247_s3 + $0x464] ss:$16 sps:$4 sm:$0xff]  }
 0x339   :  { %2647 = vmatpush1.bf16.msra.mxu0 %v21857_v21  ;;  %2688 = vmatpush1.bf16.msra.mxu1 %v21858_v25  ;;  %v21907_v21 = vld [vmem:[#allocation102_spill] sm:$0xff] }
 0x33a   :  { %2648 = vmatprep.subr.bf16.mxu0 %v21859_v13  ;;  %2689 = vmatprep.subr.bf16.mxu1 %v21860_v42  ;;  %v12232_v25 = vld [vmem:[%s21247_s3 + $0x460] ss:$16 sps:$4 sm:$0xff]   ;;  %v21908_v13 = vld [vmem:[#allocation103_spill] sm:$0xff]  ;;  %v12240_v42 = vld [vmem:[%s21247_s3 + $0x444] ss:$16 sps:$4 sm:$0xff]  }
 0x33d   :  { %2649 = vmatpush1.bf16.msra.mxu0 %v21861_v16  ;;  %2690 = vmatpush1.bf16.msra.mxu1 %v21862_v20  ;;  %v21909_v16 = vld [vmem:[#allocation104_spill] sm:$0xff]  ;;  %v10494_v20 = vld.sshfl [vmem:[%s21697_s20 + $0x1a] sm:$0x1 pattern:$0x75316420] }
 0x33e   :  { %2650 = vmatprep.subr.bf16.mxu0 %v21863_v31  ;;  %2691 = vmatprep.subr.bf16.mxu1 %v21864_v32  ;;  %v12238_v31 = vld [vmem:[%s21247_s3 + $0x440] ss:$16 sps:$4 sm:$0xff]   ;;  %v21910_v32 = vld [vmem:[#allocation105_spill] sm:$0xff] }
 0x341   :  { %2651 = vmatpush2.bf16.msra.mxu0 %v21865_v33  ;;  %2692 = vmatpush2.bf16.msra.mxu1 %v21866_v34  ;;  %v12213_v33 = vld [vmem:[%s21247_s3 + $0x4ec] ss:$16 sps:$4 sm:$0xff]   ;;  %v2542_v34 = vrot.slane %v10494_v20, %v13946_v48 }
 0x342   :  { %2652 = vmatprep.subr.bf16.mxu0 %v21867_v35  ;;  %2693 = vmatprep.subr.bf16.mxu1 %v21868_v36  ;;  %v21911_v35 = vld [vmem:[#allocation106_spill] sm:$0xff]  ;;  %v12211_v36 = vld [vmem:[%s21247_s3 + $0x4e8] ss:$16 sps:$4 sm:$0xff]   ;;  %v12267_v20 = vld [vmem:[%s21247_s3 + $0x5cc] ss:$16 sps:$4 sm:$0xff]  }
 0x345   :  { %2653 = vmatpush2.bf16.msra.mxu0 %v21869_v37  ;;  %2694 = vmatpush2.bf16.msra.mxu1 %v21870_v38  ;;  %v12219_v37 = vld [vmem:[%s21247_s3 + $0x4cc] ss:$16 sps:$4 sm:$0xff]   ;;  %v12217_v38 = vld [vmem:[%s21247_s3 + $0x4c8] ss:$16 sps:$4 sm:$0xff]  }
 0x346   :  { %2654 = vmatprep.subr.bf16.mxu0 %v21871_v39  ;;  %2695 = vmatprep.subr.bf16.mxu1 %v21872_v40  ;;  %v12225_v39 = vld [vmem:[%s21247_s3 + $0x4ac] ss:$16 sps:$4 sm:$0xff]   ;;  %v12223_v40 = vld [vmem:[%s21247_s3 + $0x4a8] ss:$16 sps:$4 sm:$0xff]  }
 0x349   :  { %2655 = vmatpush2.bf16.msra.mxu0 %v21873_v41  ;;  %2696 = vmatpush2.bf16.msra.mxu1 %v21874_v43  ;;  %v12231_v41 = vld [vmem:[%s21247_s3 + $0x48c] ss:$16 sps:$4 sm:$0xff]   ;;  %v12229_v43 = vld [vmem:[%s21247_s3 + $0x488] ss:$16 sps:$4 sm:$0xff]  }
 0x34a   :  { %2656 = vmatprep.subr.bf16.mxu0 %v21875_v44  ;;  %2697 = vmatprep.subr.bf16.mxu1 %v21876_v46  ;;  %v12237_v44 = vld [vmem:[%s21247_s3 + $0x46c] ss:$16 sps:$4 sm:$0xff]   ;;  %v12235_v46 = vld [vmem:[%s21247_s3 + $0x468] ss:$16 sps:$4 sm:$0xff]  }
 0x34d   :  { %2657 = vmatpush2.bf16.msra.mxu0 %v21877_v47  ;;  %2698 = vmatpush2.bf16.msra.mxu1 %v21878_v53  ;;  %v12243_v47 = vld [vmem:[%s21247_s3 + $0x44c] ss:$16 sps:$4 sm:$0xff]   ;;  %v12241_v53 = vld [vmem:[%s21247_s3 + $0x448] ss:$16 sps:$4 sm:$0xff]  }
 0x34e   :  { %2658 = vmatprep.subr.bf16.mxu0 %v21879_v54  ;;  %2699 = vmatprep.subr.bf16.mxu1 %v21880_v55  ;;  %v21912_v54 = vld [vmem:[#allocation2_spill] sm:$0xff] }
 0x34f   :  { %v21378_v55 = vsub.s32 2, %v21912_v54 }
 0x351   :  { %2659 = vmatpush2.bf16.msra.mxu0 %v21881_v56  ;;  %2700 = vmatpush2.bf16.msra.mxu1 %v21882_v57  ;;  %v57_v56 = vld [vmem:[%s21249_s4] sm:$0xf]  ;;  %v21377_v57 = vsub.s32 3, %v21912_v54 }
 0x352   :  { %2660 = vmatprep.subr.bf16.mxu0 %v21883_v58  ;;  %2701 = vmatprep.subr.bf16.mxu1 %v21884_v59  ;;  %v21913_v58 = vld [vmem:[#allocation3_spill] sm:$0xff] }
 0x353   :  { %v1693_v59 = vrot.slane %v57_v56, %v21913_v58  ;;  %v16302_v58 = vld [vmem:[%s21695_s26 + $0xa0] ss:$8 sps:$4 sm:$0xff]  }
 0x354   :  { %21933 = vst [vmem:[#allocation17_spill] sm:$0xff] %v16302_v58 }
 0x355   :  { %2661 = vmatpush2.bf16.msra.mxu0 %v21885_v60  ;;  %2702 = vmatpush2.bf16.msra.mxu1 %v21886_v61  ;;  %v1701_v60 = vrot.slane %v57_v56, %v21378_v55  ;;  %v21914_v61 = vld [vmem:[#allocation4_spill] sm:$0xff] }
 0x356   :  { %2662 = vmatprep.subr.bf16.mxu0 %v21887_v62  ;;  %2703 = vmatprep.subr.bf16.mxu1 %v21888_v63  ;;  %v1697_v62 = vrot.slane %v57_v56, %v21914_v61  ;;  %v1705_v63 = vrot.slane %v57_v56, %v21377_v57  ;;  %v12286_v56 = vld [vmem:[%s21247_s3 + $0x540] ss:$16 sps:$4 sm:$0xff]   ;;  %v16287_v61 = vld [vmem:[%s21695_s26 + $0xa4] ss:$8 sps:$4 sm:$0xff]  }
 0x357   :  { %v16275_v57 = vld [vmem:[%s21695_s26 + $0xb0] ss:$8 sps:$4 sm:$0xff]   ;;  %21931 = vst [vmem:[#allocation15_spill] sm:$0xff] %v16287_v61 }
 0x358   :  { %21929 = vst [vmem:[#allocation13_spill] sm:$0xff] %v16275_v57  ;;  %v16281_v55 = vld [vmem:[%s21695_s26 + $0x1b0] ss:$8 sps:$4 sm:$0xff]  }
 0x359   :  { %2663 = vmatpush2.bf16.msra.mxu0 %v21889_v1  ;;  %2704 = vmatpush2.bf16.msra.mxu1 %v21890_v2  ;;  %v21916_v2 = vld [vmem:[#allocation108_spill] sm:$0xff]  ;;  %21930 = vst [vmem:[#allocation14_spill] sm:$0xff] %v16281_v55 }
 0x35a   :  { %2664 = vmatprep.subr.bf16.mxu0 %v21891_v3  ;;  %2705 = vmatprep.subr.bf16.mxu1 %v21892_v4  ;;  %v1712_v3 = vadd.f32 %v1701_v60, %v21916_v2  ;;  %v12294_v60 = vld [vmem:[%s21247_s3 + $0x524] ss:$16 sps:$4 sm:$0xff]   ;;  %v12298_v2 = vld [vmem:[%s21247_s3 + $0x500] ss:$16 sps:$4 sm:$0xff]  }
 0x35d   :  { %2665 = vmatpush2.bf16.msra.mxu0 %v21893_v7  ;;  %2706 = vmatpush2.bf16.msra.mxu1 %v21894_v8  ;;  %v12246_v7 = vld [vmem:[%s21247_s3 + $0x424] ss:$16 sps:$4 sm:$0xff]   ;;  %v21917_v8 = vld [vmem:[#allocation109_spill] sm:$0xff] }
 0x35e   :  { %2716 = vmatprep.subr.bf16.mxu0 %v21895_v9  ;;  %3150 = vmatprep.subr.bf16.mxu1 %v12210_v29  ;;  %v1711_v9 = vadd.f32 %v1697_v62, %v21917_v8  ;;  %v12249_v29 = vld [vmem:[%s21247_s3 + $0x42c] ss:$16 sps:$4 sm:$0xff]   ;;  %v12292_v62 = vld [vmem:[%s21247_s3 + $0x520] ss:$16 sps:$4 sm:$0xff]  }
 0x360   :  { %2667 = vmatmul.mubr.bf16.vlgmr.msra.gmra.mxu0 %v2510_v0  ;;  %2708 = vmatmul.mubr.bf16.vlgmr.msra.gmra.mxu1 %v2526_v6  ;;  %v21915_v0 = vld [vmem:[#allocation107_spill] sm:$0xff] }
 0x361   :  { %2717 = vmatpush1.bf16.msra.mxu0 %v21896_v11  ;;  %2748 = vmatprep.mubr.bf16.mxu0 %v21897_v45  ;;  %v1710_v1 = vadd.f32 %v1693_v59, %v21915_v0  ;;  %v21918_v11 = vld [vmem:[#allocation110_spill] sm:$0xff]  ;;  %v12289_v59 = vld [vmem:[%s21247_s3 + $0x548] ss:$16 sps:$4 sm:$0xff]  }
 0x362   :  { %2718 = vmatprep.subr.bf16.mxu0 %v21898_v12  ;;  %3151 = vmatpush1.bf16.msra.mxu1 %v12208_v22  ;;  %v1713_v12 = vadd.f32 %v1705_v63, %v21918_v11  ;;  %v12244_v22 = vld [vmem:[%s21247_s3 + $0x420] ss:$16 sps:$4 sm:$0xff]   ;;  %v12297_v63 = vld [vmem:[%s21247_s3 + $0x52c] ss:$16 sps:$4 sm:$0xff]   ;;  %v12295_v0 = vld [vmem:[%s21247_s3 + $0x528] ss:$16 sps:$4 sm:$0xff]  }
 0x363   :  { %3152 = vmatprep.subr.bf16.mxu1 %v12216_v26 }
 0x365   :  { %2719 = vmatpush1.bf16.msra.mxu0 %v21899_v14 }
 0x366   :  { %2720 = vmatprep.subr.bf16.mxu0 %v21900_v15  ;;  %3153 = vmatpush1.bf16.msra.mxu1 %v12214_v5  ;;  %v12247_v5 = vld [vmem:[%s21247_s3 + $0x428] ss:$16 sps:$4 sm:$0xff]  }
 0x367   :  { %3154 = vmatprep.subr.bf16.mxu1 %v12222_v49 }
 0x369   :  { %2721 = vmatpush1.bf16.msra.mxu0 %v21901_v27 }
 0x36a   :  { %2722 = vmatprep.subr.bf16.mxu0 %v21902_v30  ;;  %3155 = vmatpush1.bf16.msra.mxu1 %v12220_v24 }
 0x36b   :  { %3156 = vmatprep.subr.bf16.mxu1 %v12228_v17  ;;  %v12250_v17 = vld [vmem:[%s21247_s3 + $0x400] ss:$16 sps:$4 sm:$0xff]  }
 0x36d   :  { %2723 = vmatpush1.bf16.msra.mxu0 %v21903_v50 }
 0x36e   :  { %2724 = vmatprep.subr.bf16.mxu0 %v21904_v18  ;;  %3157 = vmatpush1.bf16.msra.mxu1 %v12226_v23  ;;  %v12252_v18 = vld [vmem:[%s21247_s3 + $0x404] ss:$16 sps:$4 sm:$0xff]  }
 0x36f   :  { %3158 = vmatprep.subr.bf16.mxu1 %v12234_v28  ;;  %v12253_v28 = vld [vmem:[%s21247_s3 + $0x408] ss:$16 sps:$4 sm:$0xff]  }
 0x371   :  { %2725 = vmatpush1.bf16.msra.mxu0 %v21905_v19  ;;  %v12255_v19 = vld [vmem:[%s21247_s3 + $0x40c] ss:$16 sps:$4 sm:$0xff]  }
 0x372   :  { %2726 = vmatprep.subr.bf16.mxu0 %v21906_v10  ;;  %3159 = vmatpush1.bf16.msra.mxu1 %v12232_v25  ;;  %v12256_v25 = vld [vmem:[%s21247_s3 + $0x5e0] ss:$16 sps:$4 sm:$0xff]  }
 0x373   :  { %3160 = vmatprep.subr.bf16.mxu1 %v12240_v42  ;;  %v12259_v42 = vld [vmem:[%s21247_s3 + $0x5e8] ss:$16 sps:$4 sm:$0xff]  }
 0x375   :  { %2727 = vmatpush1.bf16.msra.mxu0 %v21907_v21  ;;  %v12258_v21 = vld [vmem:[%s21247_s3 + $0x5e4] ss:$16 sps:$4 sm:$0xff]  }
 0x376   :  { %2728 = vmatprep.subr.bf16.mxu0 %v21908_v13  ;;  %3161 = vmatpush1.bf16.msra.mxu1 %v12238_v31  ;;  %v12261_v13 = vld [vmem:[%s21247_s3 + $0x5ec] ss:$16 sps:$4 sm:$0xff]   ;;  %v12262_v31 = vld [vmem:[%s21247_s3 + $0x5c0] ss:$16 sps:$4 sm:$0xff]  }
 0x377   :  { %3162 = vmatprep.subr.bf16.mxu1 %v12246_v7  ;;  %v21920_v7 = vld [vmem:[#allocation112_spill] sm:$0xff] }
 0x379   :  { %2729 = vmatpush1.bf16.msra.mxu0 %v21909_v16  ;;  %v12264_v16 = vld [vmem:[%s21247_s3 + $0x5c4] ss:$16 sps:$4 sm:$0xff]  }
 0x37a   :  { %2730 = vmatprep.subr.bf16.mxu0 %v21910_v32  ;;  %3163 = vmatpush1.bf16.msra.mxu1 %v12244_v22  ;;  %v12265_v32 = vld [vmem:[%s21247_s3 + $0x5c8] ss:$16 sps:$4 sm:$0xff]  }
 0x37b   :  { %3164 = vmatprep.subr.bf16.mxu1 %v12252_v18 }
 0x37d   :  { %2731 = vmatpush1.bf16.msra.mxu0 %v21911_v35  ;;  %v12268_v35 = vld [vmem:[%s21247_s3 + $0x5a0] ss:$16 sps:$4 sm:$0xff]  }
 0x37e   :  { %3191 = vmatprep.subr.bf16.mxu0 %v12213_v33  ;;  %3165 = vmatpush1.bf16.msra.mxu1 %v12250_v17  ;;  %v12270_v33 = vld [vmem:[%s21247_s3 + $0x5a4] ss:$16 sps:$4 sm:$0xff]  }
 0x37f   :  { %3166 = vmatprep.subr.bf16.mxu1 %v12258_v21 }
 0x380   :  { %2749 = vmatmul.mubr.bf16.vlgmr.msra.gmra.mxu0 %v2542_v34  ;;  %v12273_v34 = vld [vmem:[%s21247_s3 + $0x5ac] ss:$16 sps:$4 sm:$0xff]  }
 0x381   :  { %3192 = vmatpush1.bf16.msra.mxu0 %v12211_v36  ;;  %v12271_v36 = vld [vmem:[%s21247_s3 + $0x5a8] ss:$16 sps:$4 sm:$0xff]  }
 0x382   :  { %3193 = vmatprep.subr.bf16.mxu0 %v12219_v37  ;;  %3167 = vmatpush2.bf16.msra.mxu1 %v12256_v25  ;;  %v12276_v37 = vld [vmem:[%s21247_s3 + $0x584] ss:$16 sps:$4 sm:$0xff]  }
 0x383   :  { %3168 = vmatprep.subr.bf16.mxu1 %v12264_v16  ;;  %v15973_v16 = vld [vmem:[%s21697_s20 + $0x1b] sm:$0xff] }
 0x385   :  { %3194 = vmatpush1.bf16.msra.mxu0 %v12217_v38  ;;  %v12279_v38 = vld [vmem:[%s21247_s3 + $0x58c] ss:$16 sps:$4 sm:$0xff]  }
 0x386   :  { %3195 = vmatprep.subr.bf16.mxu0 %v12225_v39  ;;  %3169 = vmatpush2.bf16.msra.mxu1 %v12262_v31  ;;  %v12274_v39 = vld [vmem:[%s21247_s3 + $0x580] ss:$16 sps:$4 sm:$0xff]   ;;  %v15977_v31 = vrot.slane %v15973_v16, %v13946_v48 }
 0x387   :  { %3170 = vmatprep.subr.bf16.mxu1 %v12270_v33 }
 0x389   :  { %3196 = vmatpush1.bf16.msra.mxu0 %v12223_v40  ;;  %v12277_v40 = vld [vmem:[%s21247_s3 + $0x588] ss:$16 sps:$4 sm:$0xff]  }
 0x38a   :  { %3197 = vmatprep.subr.bf16.mxu0 %v12231_v41  ;;  %3171 = vmatpush2.bf16.msra.mxu1 %v12268_v35  ;;  %v12282_v41 = vld [vmem:[%s21247_s3 + $0x564] ss:$16 sps:$4 sm:$0xff]  }
 0x38b   :  { %3172 = vmatprep.subr.bf16.mxu1 %v12276_v37  ;;  %v3256_v37 = vcombine.high %v15977_v31, %v15977_v31 }
 0x38d   :  { %3198 = vmatpush1.bf16.msra.mxu0 %v12229_v43  ;;  %v12285_v43 = vld [vmem:[%s21247_s3 + $0x56c] ss:$16 sps:$4 sm:$0xff]  }
 0x38e   :  { %3199 = vmatprep.subr.bf16.mxu0 %v12237_v44  ;;  %3173 = vmatpush2.bf16.msra.mxu1 %v12274_v39  ;;  %v12280_v44 = vld [vmem:[%s21247_s3 + $0x560] ss:$16 sps:$4 sm:$0xff]  }
 0x38f   :  { %3174 = vmatprep.subr.bf16.mxu1 %v12282_v41 }
 0x391   :  { %3200 = vmatpush1.bf16.msra.mxu0 %v12235_v46  ;;  %v12283_v46 = vld [vmem:[%s21247_s3 + $0x568] ss:$16 sps:$4 sm:$0xff]  }
 0x392   :  { %3201 = vmatprep.subr.bf16.mxu0 %v12243_v47  ;;  %v12288_v47 = vld [vmem:[%s21247_s3 + $0x544] ss:$16 sps:$4 sm:$0xff]   ;;  %3175 = vmatpush2.bf16.msra.mxu1 %v12280_v44 }
 0x393   :  { %3176 = vmatprep.subr.bf16.mxu1 %v12288_v47 }
 0x395   :  { %3202 = vmatpush1.bf16.msra.mxu0 %v12241_v53  ;;  %v12291_v53 = vld [vmem:[%s21247_s3 + $0x54c] ss:$16 sps:$4 sm:$0xff]  }
 0x396   :  { %3203 = vmatprep.subr.bf16.mxu0 %v12249_v29  ;;  %3177 = vmatpush2.bf16.msra.mxu1 %v12286_v56 }
 0x397   :  { %3178 = vmatprep.subr.bf16.mxu1 %v12294_v60  ;;  %v15985_v60 = vld [vmem:[%s21695_s26 + $0x70] ss:$8 sps:$4 sm:$0xff]  }
 0x399   :  { %3204 = vmatpush1.bf16.msra.mxu0 %v12247_v5 }
 0x39a   :  { %3205 = vmatprep.subr.bf16.mxu0 %v12255_v19  ;;  %3179 = vmatpush2.bf16.msra.mxu1 %v12292_v62  ;;  %v15991_v62 = vld [vmem:[%s21695_s26 + $0x170] ss:$8 sps:$4 sm:$0xff]  }
 0x39d   :  { %3206 = vmatpush1.bf16.msra.mxu0 %v12253_v28 }
 0x39e   :  { %3207 = vmatprep.subr.bf16.mxu0 %v12261_v13 }
 0x3a0   :  { %v2423_v4 = vpop.f32.mrf.mxu0  ;;  %v2464_v6 = vpop.f32.mrf.mxu1 }
 0x3a1   :  { %v15841_v14 = vadd.f32 %v2423_v4, %v1710_v1  ;;  %v15843_v15 = vadd.f32 %v2464_v6, %v1712_v3  ;;  %3208 = vmatpush2.bf16.msra.mxu0 %v12259_v42  ;;  %v12300_v1 = vld [vmem:[%s21247_s3 + $0x504] ss:$16 sps:$4 sm:$0xff]   ;;  %v12303_v3 = vld [vmem:[%s21247_s3 + $0x50c] ss:$16 sps:$4 sm:$0xff]   ;;  %v12301_v4 = vld [vmem:[%s21247_s3 + $0x508] ss:$16 sps:$4 sm:$0xff]  }
 0x3a2   :  { %v2425_v26 = vpop.f32.mrf.mxu0  ;;  %v2466_v27 = vpop.f32.mrf.mxu1  ;;  %3209 = vmatprep.subr.bf16.mxu0 %v12267_v20  ;;  %3180 = vmatprep.subr.bf16.mxu1 %v12300_v1  ;;  %v21919_v6 = vld [vmem:[#allocation111_spill] sm:$0xff] }
 0x3a3   :  { %v15854_v30 = vadd.f32 %v2425_v26, %v1711_v9  ;;  %v15856_v49 = vadd.f32 %v2466_v27, %v1713_v12  ;;  %3181 = vmatpush2.bf16.msra.mxu1 %v12298_v2  ;;  %v16009_v1 = vld [vmem:[%s21695_s26 + $0x60] ss:$8 sps:$4 sm:$0xff]  }
 0x3a4   :  { %v2427_v50 = vpop.f32.mrf.mxu0  ;;  %v2468_v24 = vpop.f32.mrf.mxu1  ;;  %3313 = vmatprep.subr.bf16.mxu1 %v21919_v6  ;;  %v16015_v2 = vld [vmem:[%s21695_s26 + $0x160] ss:$8 sps:$4 sm:$0xff]   ;;  %v16033_v6 = vld [vmem:[%s21695_s26 + $0x50] ss:$8 sps:$4 sm:$0xff]  }
 0x3a5   :  { %3210 = vmatpush2.bf16.msra.mxu0 %v12265_v32 }
 0x3a6   :  { %v2428_v23 = vpop.f32.mrf.mxu0  ;;  %v2469_v10 = vpop.f32.mrf.mxu1  ;;  %3211 = vmatprep.subr.bf16.mxu0 %v12273_v34 }
 0x3a9   :  { %3212 = vmatpush2.bf16.msra.mxu0 %v12271_v36 }
 0x3aa   :  { %3213 = vmatprep.subr.bf16.mxu0 %v12279_v38 }
 0x3ad   :  { %3214 = vmatpush2.bf16.msra.mxu0 %v12277_v40 }
 0x3ae   :  { %3215 = vmatprep.subr.bf16.mxu0 %v12285_v43 }
 0x3b1   :  { %3216 = vmatpush2.bf16.msra.mxu0 %v12283_v46  ;;  %v3278_v46 = vrot.slane %v3256_v37, %v13946_v48  ;;  %v16207_v37 = vld [vmem:[%s21695_s26 + $0x1e0] ss:$8 sps:$4 sm:$0xff]  }
 0x3b2   :  { %3217 = vmatprep.subr.bf16.mxu0 %v12291_v53 }
 0x3b5   :  { %3218 = vmatpush2.bf16.msra.mxu0 %v12289_v59  ;;  %v3288_v59 = vcombine.high %v3278_v46, %v3278_v46 }
 0x3b6   :  { %3219 = vmatprep.subr.bf16.mxu0 %v12297_v63  ;;  %v15997_v63 = vld [vmem:[%s21695_s26 + $0x64] ss:$8 sps:$4 sm:$0xff]  }
 0x3b9   :  { %3220 = vmatpush2.bf16.msra.mxu0 %v12295_v0  ;;  %v16003_v0 = vld [vmem:[%s21695_s26 + $0x164] ss:$8 sps:$4 sm:$0xff]  }
 0x3ba   :  { %3221 = vmatprep.subr.bf16.mxu0 %v12303_v3  ;;  %v16021_v3 = vld [vmem:[%s21695_s26 + $0x54] ss:$8 sps:$4 sm:$0xff]  }
 0x3bd   :  { %3222 = vmatpush2.bf16.msra.mxu0 %v12301_v4  ;;  %v16027_v4 = vld [vmem:[%s21695_s26 + $0x154] ss:$8 sps:$4 sm:$0xff]  }
 0x3be   :  { %3354 = vmatprep.subr.bf16.mxu0 %v21920_v7  ;;  %v16039_v7 = vld [vmem:[%s21695_s26 + $0x150] ss:$8 sps:$4 sm:$0xff]  }
 0x3e0   :  { %v2586_v8 = vpop.f32.mrf.mxu0  ;;  %v2627_v9 = vpop.f32.mrf.mxu1 }
 0x3e1   :  { %v2587_v11 = vadd.f32 %v2586_v8, %v14478_v51  ;;  %v16045_v8 = vld [vmem:[%s21695_s26 + $0x44] ss:$8 sps:$4 sm:$0xff]  }
 0x3e2   :  { %v2588_v12 = vpop.f32.mrf.mxu0  ;;  %v2629_v22 = vpop.f32.mrf.mxu1 }
 0x3e3   :  { %v2589_v29 = vadd.f32 %v2588_v12, %v14481_v52  ;;  %v2628_v26 = vadd.f32 %v2627_v9, %v2587_v11  ;;  %v16051_v9 = vld [vmem:[%s21695_s26 + $0x144] ss:$8 sps:$4 sm:$0xff]   ;;  %v16057_v11 = vld [vmem:[%s21695_s26 + $0x40] ss:$8 sps:$4 sm:$0xff]  }
 0x3e4   :  { %v2590_v27 = vpop.f32.mrf.mxu0  ;;  %v2631_v5 = vpop.f32.mrf.mxu1  ;;  %v16063_v12 = vld [vmem:[%s21695_s26 + $0x140] ss:$8 sps:$4 sm:$0xff]  }
 0x3e5   :  { %v2630_v50 = vadd.f32 %v2629_v22, %v2589_v29  ;;  %v16069_v22 = vld [vmem:[%s21695_s26 + $0x34] ss:$8 sps:$4 sm:$0xff]   ;;  %v16087_v27 = vld [vmem:[%s21695_s26 + $0x130] ss:$8 sps:$4 sm:$0xff]   ;;  %v16093_v5 = vld [vmem:[%s21695_s26 + $0x24] ss:$8 sps:$4 sm:$0xff]  }
 0x3e6   :  { %v2591_v24 = vpop.f32.mrf.mxu0  ;;  %v2632_v18 = vpop.f32.mrf.mxu1  ;;  %v16075_v29 = vld [vmem:[%s21695_s26 + $0x134] ss:$8 sps:$4 sm:$0xff]  }
 0x3e7   :  { %v16105_v24 = vld [vmem:[%s21695_s26 + $0x20] ss:$8 sps:$4 sm:$0xff]  }
 0x3e8   :  { %v16111_v18 = vld [vmem:[%s21695_s26 + $0x120] ss:$8 sps:$4 sm:$0xff]  }
 0x420   :  { %v2668_v17 = vpop.f32.mrf.mxu0  ;;  %v2709_v19 = vpop.f32.mrf.mxu1 }
 0x421   :  { %v2669_v42 = vadd.f32 %v2668_v17, %v2628_v26  ;;  %v16081_v26 = vld [vmem:[%s21695_s26 + $0x30] ss:$8 sps:$4 sm:$0xff]   ;;  %v16117_v17 = vld [vmem:[%s21695_s26 + $0x14] ss:$8 sps:$4 sm:$0xff]  }
 0x422   :  { %v2670_v23 = vpop.f32.mrf.mxu0  ;;  %v2711_v10 = vpop.f32.mrf.mxu1 }
 0x423   :  { %v2671_v20 = vadd.f32 %v2670_v23, %v2630_v50  ;;  %v2710_v32 = vadd.f32 %v2709_v19, %v2669_v42  ;;  %v16099_v50 = vld [vmem:[%s21695_s26 + $0x124] ss:$8 sps:$4 sm:$0xff]   ;;  %v16123_v19 = vld [vmem:[%s21695_s26 + $0x114] ss:$8 sps:$4 sm:$0xff]   ;;  %v16129_v23 = vld [vmem:[%s21695_s26 + $0x10] ss:$8 sps:$4 sm:$0xff]  }
 0x424   :  { %v2672_v28 = vpop.f32.mrf.mxu0  ;;  %v2713_v21 = vpop.f32.mrf.mxu1  ;;  %v16165_v42 = vld [vmem:[%s21695_s26 + $0xf4] ss:$8 sps:$4 sm:$0xff]  }
 0x425   :  { %v2712_v34 = vadd.f32 %v2711_v10, %v2671_v20  ;;  %v16135_v10 = vld [vmem:[%s21695_s26 + $0x110] ss:$8 sps:$4 sm:$0xff]   ;;  %v16141_v28 = vld [vmem:[%s21695_s26 + $0x4] ss:$8 sps:$4 sm:$0xff]   ;;  %v16171_v20 = vld [vmem:[%s21695_s26 + $0x1f4] ss:$8 sps:$4 sm:$0xff]  }
 0x426   :  { %v2673_v25 = vpop.f32.mrf.mxu0  ;;  %v2714_v13 = vpop.f32.mrf.mxu1  ;;  %v16147_v21 = vld [vmem:[%s21695_s26 + $0x104] ss:$8 sps:$4 sm:$0xff]  }
 0x427   :  { %v16153_v25 = vld [vmem:[%s21695_s26] ss:$8 sps:$4 sm:$0xff]  }
 0x428   :  { %v16159_v13 = vld [vmem:[%s21695_s26 + $0x100] ss:$8 sps:$4 sm:$0xff]  }
 0x440   :  { %v2750_v33 = vpop.f32.mrf.mxu0 }
 0x441   :  { %v2751_v35 = vadd.f32 %v2750_v33, %v2710_v32  ;;  %v16177_v32 = vld [vmem:[%s21695_s26 + $0xf0] ss:$8 sps:$4 sm:$0xff]  }
 0x442   :  { %v2752_v36 = vpop.f32.mrf.mxu0  ;;  %v16183_v33 = vld [vmem:[%s21695_s26 + $0x1f0] ss:$8 sps:$4 sm:$0xff]  }
 0x443   :  { %vm2757_vm4 = vcmp.ge.f32.partialorder %v2751_v35, 0.0  ;;  %v2759_v38 = vmul.f32 0.1, %v2751_v35  ;;  %v2753_v39 = vadd.f32 %v2752_v36, %v2712_v34  ;;  %v16189_v34 = vld [vmem:[%s21695_s26 + $0xe4] ss:$8 sps:$4 sm:$0xff]  }
 0x444   :  { %v2754_v40 = vpop.f32.mrf.mxu0  ;;  %v16201_v36 = vld [vmem:[%s21695_s26 + $0xe0] ss:$8 sps:$4 sm:$0xff]  }
 0x445   :  { %vm2758_vm5 = vcmp.ge.f32.partialorder %v2753_v39, 0.0  ;;  %v2760_v41 = vmul.f32 0.1, %v2753_v39  ;;  %v2761_v43 = vsel %vm2757_vm4, %v2751_v35, %v2759_v38  ;;  %v16195_v35 = vld [vmem:[%s21695_s26 + $0x1e4] ss:$8 sps:$4 sm:$0xff]  }
 0x446   :  { %v2755_v44 = vpop.f32.mrf.mxu0  ;;  %v2763_v56 = vpack.c.bf16 %v2761_v43, %v2761_v43  ;;  %v16213_v38 = vld [vmem:[%s21695_s26 + $0xd4] ss:$8 sps:$4 sm:$0xff]   ;;  %v16225_v40 = vld [vmem:[%s21695_s26 + $0xd0] ss:$8 sps:$4 sm:$0xff]   ;;  %v16237_v43 = vld [vmem:[%s21695_s26 + $0xc4] ss:$8 sps:$4 sm:$0xff]  }
 0x447   :  { %v2762_v47 = vsel %vm2758_vm5, %v2753_v39, %v2760_v41  ;;  %v16219_v39 = vld [vmem:[%s21695_s26 + $0x1d4] ss:$8 sps:$4 sm:$0xff]   ;;  %21921 = vst [vmem:[#allocation5_spill] sm:$0xff] %v16225_v40  ;;  %v16231_v41 = vld [vmem:[%s21695_s26 + $0x1d0] ss:$8 sps:$4 sm:$0xff]   ;;  %21923 = vst [vmem:[#allocation7_spill] sm:$0xff] %v16237_v43 }
 0x448   :  { %v2764_v53 = vpack.c.bf16 %v2762_v47, %v2762_v47  ;;  %21922 = vst [vmem:[#allocation6_spill] sm:$0xff] %v16231_v41  ;;  %v16243_v44 = vld [vmem:[%s21695_s26 + $0x1c4] ss:$8 sps:$4 sm:$0xff]   ;;  %v16255_v47 = vld [vmem:[%s21695_s26 + $0x1c0] ss:$8 sps:$4 sm:$0xff]  }
 0x449   :  { %21924 = vst [vmem:[#allocation8_spill] sm:$0xff] %v16243_v44  ;;  %21926 = vst [vmem:[#allocation10_spill] sm:$0xff] %v16255_v47 }
 0x44a   :  { %3182 = vmatprep.mubr.bf16.mxu1 %v2764_v53  ;;  %3223 = vmatprep.mubr.bf16.mxu0 %v2764_v53  ;;  %v16261_v53 = vld [vmem:[%s21695_s26 + $0xb4] ss:$8 sps:$4 sm:$0xff]  }
 0x44b   :  { %3183 = vmatmul.mubr.bf16.vlgmr.msra.gmra.mxu1 %v2763_v56  ;;  %3224 = vmatmul.mubr.bf16.vlgmr.msra.gmra.mxu0 %v2763_v56  ;;  %21927 = vst [vmem:[#allocation11_spill] sm:$0xff] %v16261_v53  ;;  %v16267_v56 = vld [vmem:[%s21695_s26 + $0x1b4] ss:$8 sps:$4 sm:$0xff]  }
 0x44c   :  { %3314 = vmatpush1.bf16.msra.mxu1 %v15985_v60  ;;  %3355 = vmatpush1.bf16.msra.mxu0 %v15991_v62  ;;  %21928 = vst [vmem:[#allocation12_spill] sm:$0xff] %v16267_v56 }
 0x44d   :  { %3315 = vmatprep.subr.bf16.mxu1 %v15997_v63  ;;  %3356 = vmatprep.subr.bf16.mxu0 %v16003_v0 }
 0x44e   :  { %3345 = vmatprep.mubr.bf16.mxu1 %v3278_v46  ;;  %3386 = vmatprep.mubr.bf16.mxu0 %v3288_v59  ;;  %v16249_v46 = vld [vmem:[%s21695_s26 + $0xc0] ss:$8 sps:$4 sm:$0xff]   ;;  %v3241_v59 = vcombine.high %v15973_v16, %v15973_v16  ;;  %v16293_v16 = vld [vmem:[%s21695_s26 + $0x1a4] ss:$8 sps:$4 sm:$0xff]  }
 0x44f   :  { %21925 = vst [vmem:[#allocation9_spill] sm:$0xff] %v16249_v46  ;;  %21932 = vst [vmem:[#allocation16_spill] sm:$0xff] %v16293_v16 }
 0x450   :  { %3316 = vmatpush1.bf16.msra.mxu1 %v16009_v1  ;;  %3357 = vmatpush1.bf16.msra.mxu0 %v16015_v2  ;;  %v16297_v54 = vrot.slane %v3241_v59, %v13946_v48  ;;  %v16320_v59 = vld [vmem:[%s21695_s26 + $0x194] ss:$8 sps:$4 sm:$0xff]  }
 0x451   :  { %3317 = vmatprep.subr.bf16.mxu1 %v16021_v3  ;;  %3358 = vmatprep.subr.bf16.mxu0 %v16027_v4  ;;  %21936 = vst [vmem:[#allocation20_spill] sm:$0xff] %v16320_v59 }
 0x454   :  { %3318 = vmatpush1.bf16.msra.mxu1 %v16033_v6  ;;  %3359 = vmatpush1.bf16.msra.mxu0 %v16039_v7 }
 0x455   :  { %3319 = vmatprep.subr.bf16.mxu1 %v16045_v8  ;;  %3360 = vmatprep.subr.bf16.mxu0 %v16051_v9 }
 0x458   :  { %3320 = vmatpush1.bf16.msra.mxu1 %v16057_v11  ;;  %3361 = vmatpush1.bf16.msra.mxu0 %v16063_v12 }
 0x459   :  { %3321 = vmatprep.subr.bf16.mxu1 %v16069_v22  ;;  %3362 = vmatprep.subr.bf16.mxu0 %v16075_v29 }
 0x45c   :  { %3322 = vmatpush1.bf16.msra.mxu1 %v16081_v26  ;;  %3363 = vmatpush1.bf16.msra.mxu0 %v16087_v27 }
 0x45d   :  { %3323 = vmatprep.subr.bf16.mxu1 %v16093_v5  ;;  %3364 = vmatprep.subr.bf16.mxu0 %v16099_v50 }
 0x460   :  { %3324 = vmatpush1.bf16.msra.mxu1 %v16105_v24  ;;  %3365 = vmatpush1.bf16.msra.mxu0 %v16111_v18 }
 0x461   :  { %3325 = vmatprep.subr.bf16.mxu1 %v16117_v17  ;;  %3366 = vmatprep.subr.bf16.mxu0 %v16123_v19 }
 0x464   :  { %3326 = vmatpush1.bf16.msra.mxu1 %v16129_v23  ;;  %3367 = vmatpush1.bf16.msra.mxu0 %v16135_v10 }
 0x465   :  { %3327 = vmatprep.subr.bf16.mxu1 %v16141_v28  ;;  %3368 = vmatprep.subr.bf16.mxu0 %v16147_v21 }
 0x468   :  { %3328 = vmatpush1.bf16.msra.mxu1 %v16153_v25  ;;  %3369 = vmatpush1.bf16.msra.mxu0 %v16159_v13 }
 0x469   :  { %3329 = vmatprep.subr.bf16.mxu1 %v16165_v42  ;;  %3370 = vmatprep.subr.bf16.mxu0 %v16171_v20 }
 0x46c   :  { %3330 = vmatpush2.bf16.msra.mxu1 %v16177_v32  ;;  %3371 = vmatpush2.bf16.msra.mxu0 %v16183_v33 }
 0x46d   :  { %3331 = vmatprep.subr.bf16.mxu1 %v16189_v34  ;;  %3372 = vmatprep.subr.bf16.mxu0 %v16195_v35 }
 0x470   :  { %3332 = vmatpush2.bf16.msra.mxu1 %v16201_v36  ;;  %3373 = vmatpush2.bf16.msra.mxu0 %v16207_v37 }
 0x471   :  { %3333 = vmatprep.subr.bf16.mxu1 %v16213_v38  ;;  %3374 = vmatprep.subr.bf16.mxu0 %v16219_v39 }
 0x474   :  { %3334 = vmatpush2.bf16.msra.mxu1 %v16225_v40  ;;  %3375 = vmatpush2.bf16.msra.mxu0 %v16231_v41 }
 0x475   :  { %3335 = vmatprep.subr.bf16.mxu1 %v16237_v43  ;;  %3376 = vmatprep.subr.bf16.mxu0 %v16243_v44 }
 0x478   :  { %3336 = vmatpush2.bf16.msra.mxu1 %v16249_v46  ;;  %3377 = vmatpush2.bf16.msra.mxu0 %v16255_v47 }
 0x479   :  { %3337 = vmatprep.subr.bf16.mxu1 %v16261_v53  ;;  %3378 = vmatprep.subr.bf16.mxu0 %v16267_v56  ;;  %v12344_v56 = vld [vmem:[%s21247_s3 + $0x628] ss:$16 sps:$4 sm:$0xff]  }
 0x47c   :  { %3338 = vmatpush2.bf16.msra.mxu1 %v16275_v57  ;;  %3379 = vmatpush2.bf16.msra.mxu0 %v16281_v55  ;;  %v16330_v55 = vld [vmem:[%s21695_s26 + $0x90] ss:$8 sps:$4 sm:$0xff]  }
 0x47d   :  { %3339 = vmatprep.subr.bf16.mxu1 %v16287_v61  ;;  %3380 = vmatprep.subr.bf16.mxu0 %v16293_v16  ;;  %v16308_v61 = vld [vmem:[%s21695_s26 + $0x1a0] ss:$8 sps:$4 sm:$0xff]   ;;  %v16314_v16 = vld [vmem:[%s21695_s26 + $0x94] ss:$8 sps:$4 sm:$0xff]   ;;  %21937 = vst [vmem:[#allocation21_spill] sm:$0xff] %v16330_v55 }
 0x47e   :  { %21934 = vst [vmem:[#allocation18_spill] sm:$0xff] %v16308_v61  ;;  %21935 = vst [vmem:[#allocation19_spill] sm:$0xff] %v16314_v16 }
 0x480   :  { %3340 = vmatpush2.bf16.msra.mxu1 %v16302_v58  ;;  %3381 = vmatpush2.bf16.msra.mxu0 %v16308_v61  ;;  %v3257_v58 = vcombine.high %v16297_v54, %v16297_v54  ;;  %v3264_v61 = vrot.slane %v15977_v31, %v13946_v48  ;;  %v16348_v31 = vld [vmem:[%s21695_s26 + $0x184] ss:$8 sps:$4 sm:$0xff]  }
 0x481   :  { %3341 = vmatprep.subr.bf16.mxu1 %v16314_v16  ;;  %3382 = vmatprep.subr.bf16.mxu0 %v16320_v59  ;;  %v16336_v16 = vld [vmem:[%s21695_s26 + $0x190] ss:$8 sps:$4 sm:$0xff]   ;;  %v16342_v59 = vld [vmem:[%s21695_s26 + $0x84] ss:$8 sps:$4 sm:$0xff]   ;;  %21940 = vst [vmem:[#allocation24_spill] sm:$0xff] %v16348_v31 }
 0x482   :  { %21938 = vst [vmem:[#allocation22_spill] sm:$0xff] %v16336_v16  ;;  %21939 = vst [vmem:[#allocation23_spill] sm:$0xff] %v16342_v59  ;;  %v3286_v57 = vcombine.high %v3264_v61, %v3264_v61 }
 0x484   :  { %3342 = vmatpush2.bf16.msra.mxu1 %v16330_v55  ;;  %3383 = vmatpush2.bf16.msra.mxu0 %v16336_v16  ;;  %v3285_v55 = vrot.slane %v3257_v58, %v13946_v48  ;;  %v16355_v16 = vld [vmem:[%s21695_s26 + $0x80] ss:$8 sps:$4 sm:$0xff]   ;;  %v16373_v58 = vld [vmem:[%s21695_s26 + $0x374] ss:$8 sps:$4 sm:$0xff]  }
 0x485   :  { %3343 = vmatprep.subr.bf16.mxu1 %v16342_v59  ;;  %3384 = vmatprep.subr.bf16.mxu0 %v16348_v31  ;;  %21941 = vst [vmem:[#allocation25_spill] sm:$0xff] %v16355_v16  ;;  %v16361_v59 = vld [vmem:[%s21695_s26 + $0x180] ss:$8 sps:$4 sm:$0xff]   ;;  %v16367_v31 = vld [vmem:[%s21695_s26 + $0x274] ss:$8 sps:$4 sm:$0xff]   ;;  %21944 = vst [vmem:[#allocation28_spill] sm:$0xff] %v16373_v58 }
 0x486   :  { %21942 = vst [vmem:[#allocation26_spill] sm:$0xff] %v16361_v59  ;;  %21943 = vst [vmem:[#allocation27_spill] sm:$0xff] %v16367_v31 }
 0x488   :  { %3344 = vmatpush2.bf16.msra.mxu1 %v16355_v16  ;;  %3385 = vmatpush2.bf16.msra.mxu0 %v16361_v59  ;;  %v3289_v16 = vcombine.high %v3285_v55, %v3285_v55  ;;  %v16379_v59 = vld [vmem:[%s21695_s26 + $0x270] ss:$8 sps:$4 sm:$0xff]  }
 0x489   :  { %3395 = vmatprep.subr.bf16.mxu1 %v16367_v31  ;;  %3436 = vmatprep.subr.bf16.mxu0 %v16373_v58  ;;  %21945 = vst [vmem:[#allocation29_spill] sm:$0xff] %v16379_v59  ;;  %v16385_v31 = vld [vmem:[%s21695_s26 + $0x370] ss:$8 sps:$4 sm:$0xff]   ;;  %v16391_v58 = vld [vmem:[%s21695_s26 + $0x264] ss:$8 sps:$4 sm:$0xff]  }
 0x48a   :  { %21946 = vst [vmem:[#allocation30_spill] sm:$0xff] %v16385_v31  ;;  %21947 = vst [vmem:[#allocation31_spill] sm:$0xff] %v16391_v58 }
 0x48b   :  { %3346 = vmatmul.mubr.bf16.vlgmr.msra.gmra.mxu1 %v3264_v61  ;;  %3387 = vmatmul.mubr.bf16.vlgmr.msra.gmra.mxu0 %v3286_v57  ;;  %v16397_v57 = vld [vmem:[%s21695_s26 + $0x364] ss:$8 sps:$4 sm:$0xff]   ;;  %v16403_v61 = vld [vmem:[%s21695_s26 + $0x260] ss:$8 sps:$4 sm:$0xff]  }
 0x48c   :  { %3396 = vmatpush1.bf16.msra.mxu1 %v16379_v59  ;;  %3437 = vmatpush1.bf16.msra.mxu0 %v16385_v31  ;;  %21948 = vst [vmem:[#allocation32_spill] sm:$0xff] %v16397_v57  ;;  %21949 = vst [vmem:[#allocation33_spill] sm:$0xff] %v16403_v61  ;;  %v12308_v31 = vld [vmem:[%s21247_s3 + $0x6e8] ss:$16 sps:$4 sm:$0xff]  }
 0x48d   :  { %3397 = vmatprep.subr.bf16.mxu1 %v16391_v58  ;;  %3438 = vmatprep.subr.bf16.mxu0 %v16397_v57  ;;  %v16409_v58 = vld [vmem:[%s21695_s26 + $0x360] ss:$8 sps:$4 sm:$0xff]   ;;  %v16415_v57 = vld [vmem:[%s21695_s26 + $0x254] ss:$8 sps:$4 sm:$0xff]  }
 0x48e   :  { %3427 = vmatprep.mubr.bf16.mxu1 %v3285_v55  ;;  %3468 = vmatprep.mubr.bf16.mxu0 %v3289_v16  ;;  %21950 = vst [vmem:[#allocation34_spill] sm:$0xff] %v16409_v58  ;;  %21951 = vst [vmem:[#allocation35_spill] sm:$0xff] %v16415_v57  ;;  %v16421_v55 = vld [vmem:[%s21695_s26 + $0x354] ss:$8 sps:$4 sm:$0xff]   ;;  %v16427_v16 = vld [vmem:[%s21695_s26 + $0x250] ss:$8 sps:$4 sm:$0xff]  }
 0x48f   :  { %21952 = vst [vmem:[#allocation36_spill] sm:$0xff] %v16421_v55  ;;  %21953 = vst [vmem:[#allocation37_spill] sm:$0xff] %v16427_v16 }
 0x490   :  { %3398 = vmatpush1.bf16.msra.mxu1 %v16403_v61  ;;  %3439 = vmatpush1.bf16.msra.mxu0 %v16409_v58  ;;  %v16433_v58 = vld [vmem:[%s21695_s26 + $0x350] ss:$8 sps:$4 sm:$0xff]   ;;  %v16741_v61 = vld [vmem:[%s21695_s26 + $0x280] ss:$8 sps:$4 sm:$0xff]  }
 0x491   :  { %3399 = vmatprep.subr.bf16.mxu1 %v16415_v57  ;;  %3440 = vmatprep.subr.bf16.mxu0 %v16421_v55  ;;  %21954 = vst [vmem:[#allocation38_spill] sm:$0xff] %v16433_v58  ;;  %v16439_v57 = vld [vmem:[%s21695_s26 + $0x244] ss:$8 sps:$4 sm:$0xff]   ;;  %22005 = vst [vmem:[#allocation89_spill] sm:$0xff] %v16741_v61 }
 0x492   :  { %21955 = vst [vmem:[#allocation39_spill] sm:$0xff] %v16439_v57  ;;  %v16445_v55 = vld [vmem:[%s21695_s26 + $0x344] ss:$8 sps:$4 sm:$0xff]  }
 0x493   :  { %21956 = vst [vmem:[#allocation40_spill] sm:$0xff] %v16445_v55 }
 0x494   :  { %3400 = vmatpush1.bf16.msra.mxu1 %v16427_v16  ;;  %3441 = vmatpush1.bf16.msra.mxu0 %v16433_v58  ;;  %v16451_v16 = vld [vmem:[%s21695_s26 + $0x240] ss:$8 sps:$4 sm:$0xff]  }
 0x495   :  { %3401 = vmatprep.subr.bf16.mxu1 %v16439_v57  ;;  %3442 = vmatprep.subr.bf16.mxu0 %v16445_v55  ;;  %21957 = vst [vmem:[#allocation41_spill] sm:$0xff] %v16451_v16  ;;  %v16457_v58 = vld [vmem:[%s21695_s26 + $0x340] ss:$8 sps:$4 sm:$0xff]   ;;  %v16463_v57 = vld [vmem:[%s21695_s26 + $0x234] ss:$8 sps:$4 sm:$0xff]  }
 0x496   :  { %21958 = vst [vmem:[#allocation42_spill] sm:$0xff] %v16457_v58  ;;  %21959 = vst [vmem:[#allocation43_spill] sm:$0xff] %v16463_v57  ;;  %v16469_v55 = vld [vmem:[%s21695_s26 + $0x334] ss:$8 sps:$4 sm:$0xff]  }
 0x497   :  { %21960 = vst [vmem:[#allocation44_spill] sm:$0xff] %v16469_v55 }
 0x498   :  { %3402 = vmatpush1.bf16.msra.mxu1 %v16451_v16  ;;  %3443 = vmatpush1.bf16.msra.mxu0 %v16457_v58  ;;  %v16475_v16 = vld [vmem:[%s21695_s26 + $0x230] ss:$8 sps:$4 sm:$0xff]  }
 0x499   :  { %3403 = vmatprep.subr.bf16.mxu1 %v16463_v57  ;;  %3444 = vmatprep.subr.bf16.mxu0 %v16469_v55  ;;  %21961 = vst [vmem:[#allocation45_spill] sm:$0xff] %v16475_v16  ;;  %v16481_v58 = vld [vmem:[%s21695_s26 + $0x330] ss:$8 sps:$4 sm:$0xff]   ;;  %v16487_v57 = vld [vmem:[%s21695_s26 + $0x224] ss:$8 sps:$4 sm:$0xff]  }
 0x49a   :  { %21962 = vst [vmem:[#allocation46_spill] sm:$0xff] %v16481_v58  ;;  %21963 = vst [vmem:[#allocation47_spill] sm:$0xff] %v16487_v57  ;;  %v16493_v55 = vld [vmem:[%s21695_s26 + $0x324] ss:$8 sps:$4 sm:$0xff]  }
 0x49b   :  { %21964 = vst [vmem:[#allocation48_spill] sm:$0xff] %v16493_v55 }
 0x49c   :  { %3404 = vmatpush1.bf16.msra.mxu1 %v16475_v16  ;;  %3445 = vmatpush1.bf16.msra.mxu0 %v16481_v58  ;;  %v16499_v16 = vld [vmem:[%s21695_s26 + $0x220] ss:$8 sps:$4 sm:$0xff]  }
 0x49d   :  { %3405 = vmatprep.subr.bf16.mxu1 %v16487_v57  ;;  %3446 = vmatprep.subr.bf16.mxu0 %v16493_v55  ;;  %21965 = vst [vmem:[#allocation49_spill] sm:$0xff] %v16499_v16  ;;  %v16505_v58 = vld [vmem:[%s21695_s26 + $0x320] ss:$8 sps:$4 sm:$0xff]   ;;  %v16511_v57 = vld [vmem:[%s21695_s26 + $0x214] ss:$8 sps:$4 sm:$0xff]  }
 0x49e   :  { %21966 = vst [vmem:[#allocation50_spill] sm:$0xff] %v16505_v58  ;;  %21967 = vst [vmem:[#allocation51_spill] sm:$0xff] %v16511_v57  ;;  %v16517_v55 = vld [vmem:[%s21695_s26 + $0x314] ss:$8 sps:$4 sm:$0xff]  }
 0x49f   :  { %21968 = vst [vmem:[#allocation52_spill] sm:$0xff] %v16517_v55 }
 0x4a0   :  { %3406 = vmatpush1.bf16.msra.mxu1 %v16499_v16  ;;  %3447 = vmatpush1.bf16.msra.mxu0 %v16505_v58  ;;  %v16523_v16 = vld [vmem:[%s21695_s26 + $0x210] ss:$8 sps:$4 sm:$0xff]  }
 0x4a1   :  { %3407 = vmatprep.subr.bf16.mxu1 %v16511_v57  ;;  %3448 = vmatprep.subr.bf16.mxu0 %v16517_v55  ;;  %21969 = vst [vmem:[#allocation53_spill] sm:$0xff] %v16523_v16  ;;  %v16529_v58 = vld [vmem:[%s21695_s26 + $0x310] ss:$8 sps:$4 sm:$0xff]   ;;  %v16535_v57 = vld [vmem:[%s21695_s26 + $0x204] ss:$8 sps:$4 sm:$0xff]  }
 0x4a2   :  { %21970 = vst [vmem:[#allocation54_spill] sm:$0xff] %v16529_v58  ;;  %21971 = vst [vmem:[#allocation55_spill] sm:$0xff] %v16535_v57  ;;  %v16541_v55 = vld [vmem:[%s21695_s26 + $0x304] ss:$8 sps:$4 sm:$0xff]  }
 0x4a3   :  { %21972 = vst [vmem:[#allocation56_spill] sm:$0xff] %v16541_v55 }
 0x4a4   :  { %3408 = vmatpush1.bf16.msra.mxu1 %v16523_v16  ;;  %3449 = vmatpush1.bf16.msra.mxu0 %v16529_v58  ;;  %v16547_v16 = vld [vmem:[%s21695_s26 + $0x200] ss:$8 sps:$4 sm:$0xff]  }
 0x4a5   :  { %3409 = vmatprep.subr.bf16.mxu1 %v16535_v57  ;;  %3450 = vmatprep.subr.bf16.mxu0 %v16541_v55  ;;  %21973 = vst [vmem:[#allocation57_spill] sm:$0xff] %v16547_v16  ;;  %v16553_v58 = vld [vmem:[%s21695_s26 + $0x300] ss:$8 sps:$4 sm:$0xff]   ;;  %v16559_v57 = vld [vmem:[%s21695_s26 + $0x2f4] ss:$8 sps:$4 sm:$0xff]  }
 0x4a6   :  { %21974 = vst [vmem:[#allocation58_spill] sm:$0xff] %v16553_v58  ;;  %21975 = vst [vmem:[#allocation59_spill] sm:$0xff] %v16559_v57  ;;  %v16565_v55 = vld [vmem:[%s21695_s26 + $0x3f4] ss:$8 sps:$4 sm:$0xff]  }
 0x4a7   :  { %21976 = vst [vmem:[#allocation60_spill] sm:$0xff] %v16565_v55 }
 0x4a8   :  { %3410 = vmatpush1.bf16.msra.mxu1 %v16547_v16  ;;  %3451 = vmatpush1.bf16.msra.mxu0 %v16553_v58  ;;  %v16571_v16 = vld [vmem:[%s21695_s26 + $0x2f0] ss:$8 sps:$4 sm:$0xff]  }
 0x4a9   :  { %3411 = vmatprep.subr.bf16.mxu1 %v16559_v57  ;;  %3452 = vmatprep.subr.bf16.mxu0 %v16565_v55  ;;  %21977 = vst [vmem:[#allocation61_spill] sm:$0xff] %v16571_v16  ;;  %v16577_v58 = vld [vmem:[%s21695_s26 + $0x3f0] ss:$8 sps:$4 sm:$0xff]   ;;  %v16583_v57 = vld [vmem:[%s21695_s26 + $0x2e4] ss:$8 sps:$4 sm:$0xff]  }
 0x4aa   :  { %21978 = vst [vmem:[#allocation62_spill] sm:$0xff] %v16577_v58  ;;  %21979 = vst [vmem:[#allocation63_spill] sm:$0xff] %v16583_v57  ;;  %v16589_v55 = vld [vmem:[%s21695_s26 + $0x3e4] ss:$8 sps:$4 sm:$0xff]  }
 0x4ab   :  { %21980 = vst [vmem:[#allocation64_spill] sm:$0xff] %v16589_v55 }
 0x4ac   :  { %3412 = vmatpush2.bf16.msra.mxu1 %v16571_v16  ;;  %3453 = vmatpush2.bf16.msra.mxu0 %v16577_v58  ;;  %v16595_v16 = vld [vmem:[%s21695_s26 + $0x2e0] ss:$8 sps:$4 sm:$0xff]  }
 0x4ad   :  { %3413 = vmatprep.subr.bf16.mxu1 %v16583_v57  ;;  %3454 = vmatprep.subr.bf16.mxu0 %v16589_v55  ;;  %21981 = vst [vmem:[#allocation65_spill] sm:$0xff] %v16595_v16  ;;  %v16601_v58 = vld [vmem:[%s21695_s26 + $0x3e0] ss:$8 sps:$4 sm:$0xff]   ;;  %v16607_v57 = vld [vmem:[%s21695_s26 + $0x2d4] ss:$8 sps:$4 sm:$0xff]  }
 0x4ae   :  { %21982 = vst [vmem:[#allocation66_spill] sm:$0xff] %v16601_v58  ;;  %21983 = vst [vmem:[#allocation67_spill] sm:$0xff] %v16607_v57  ;;  %v16613_v55 = vld [vmem:[%s21695_s26 + $0x3d4] ss:$8 sps:$4 sm:$0xff]  }
 0x4af   :  { %21984 = vst [vmem:[#allocation68_spill] sm:$0xff] %v16613_v55 }
 0x4b0   :  { %3414 = vmatpush2.bf16.msra.mxu1 %v16595_v16  ;;  %3455 = vmatpush2.bf16.msra.mxu0 %v16601_v58  ;;  %v16619_v16 = vld [vmem:[%s21695_s26 + $0x2d0] ss:$8 sps:$4 sm:$0xff]  }
 0x4b1   :  { %3415 = vmatprep.subr.bf16.mxu1 %v16607_v57  ;;  %3456 = vmatprep.subr.bf16.mxu0 %v16613_v55  ;;  %21985 = vst [vmem:[#allocation69_spill] sm:$0xff] %v16619_v16  ;;  %v16625_v58 = vld [vmem:[%s21695_s26 + $0x3d0] ss:$8 sps:$4 sm:$0xff]   ;;  %v16631_v57 = vld [vmem:[%s21695_s26 + $0x2c4] ss:$8 sps:$4 sm:$0xff]  }
 0x4b2   :  { %21986 = vst [vmem:[#allocation70_spill] sm:$0xff] %v16625_v58  ;;  %21987 = vst [vmem:[#allocation71_spill] sm:$0xff] %v16631_v57  ;;  %v16637_v55 = vld [vmem:[%s21695_s26 + $0x3c4] ss:$8 sps:$4 sm:$0xff]  }
 0x4b3   :  { %21988 = vst [vmem:[#allocation72_spill] sm:$0xff] %v16637_v55 }
 0x4b4   :  { %3416 = vmatpush2.bf16.msra.mxu1 %v16619_v16  ;;  %3457 = vmatpush2.bf16.msra.mxu0 %v16625_v58  ;;  %v16643_v16 = vld [vmem:[%s21695_s26 + $0x2c0] ss:$8 sps:$4 sm:$0xff]  }
 0x4b5   :  { %3417 = vmatprep.subr.bf16.mxu1 %v16631_v57  ;;  %3458 = vmatprep.subr.bf16.mxu0 %v16637_v55  ;;  %21989 = vst [vmem:[#allocation73_spill] sm:$0xff] %v16643_v16  ;;  %v16649_v58 = vld [vmem:[%s21695_s26 + $0x3c0] ss:$8 sps:$4 sm:$0xff]   ;;  %v16655_v57 = vld [vmem:[%s21695_s26 + $0x2b4] ss:$8 sps:$4 sm:$0xff]  }
 0x4b6   :  { %21990 = vst [vmem:[#allocation74_spill] sm:$0xff] %v16649_v58  ;;  %21991 = vst [vmem:[#allocation75_spill] sm:$0xff] %v16655_v57  ;;  %v16661_v55 = vld [vmem:[%s21695_s26 + $0x3b4] ss:$8 sps:$4 sm:$0xff]  }
 0x4b7   :  { %21992 = vst [vmem:[#allocation76_spill] sm:$0xff] %v16661_v55 }
 0x4b8   :  { %3418 = vmatpush2.bf16.msra.mxu1 %v16643_v16  ;;  %3459 = vmatpush2.bf16.msra.mxu0 %v16649_v58  ;;  %v16667_v16 = vld [vmem:[%s21695_s26 + $0x2b0] ss:$8 sps:$4 sm:$0xff]  }
 0x4b9   :  { %3419 = vmatprep.subr.bf16.mxu1 %v16655_v57  ;;  %3460 = vmatprep.subr.bf16.mxu0 %v16661_v55  ;;  %21993 = vst [vmem:[#allocation77_spill] sm:$0xff] %v16667_v16  ;;  %v16673_v58 = vld [vmem:[%s21695_s26 + $0x3b0] ss:$8 sps:$4 sm:$0xff]   ;;  %v16679_v57 = vld [vmem:[%s21695_s26 + $0x2a4] ss:$8 sps:$4 sm:$0xff]  }
 0x4ba   :  { %21994 = vst [vmem:[#allocation78_spill] sm:$0xff] %v16673_v58  ;;  %21995 = vst [vmem:[#allocation79_spill] sm:$0xff] %v16679_v57  ;;  %v16685_v55 = vld [vmem:[%s21695_s26 + $0x3a4] ss:$8 sps:$4 sm:$0xff]  }
 0x4bb   :  { %21996 = vst [vmem:[#allocation80_spill] sm:$0xff] %v16685_v55 }
 0x4bc   :  { %3420 = vmatpush2.bf16.msra.mxu1 %v16667_v16  ;;  %3461 = vmatpush2.bf16.msra.mxu0 %v16673_v58  ;;  %v16691_v16 = vld [vmem:[%s21695_s26 + $0x2a0] ss:$8 sps:$4 sm:$0xff]  }
 0x4bd   :  { %3421 = vmatprep.subr.bf16.mxu1 %v16679_v57  ;;  %3462 = vmatprep.subr.bf16.mxu0 %v16685_v55  ;;  %21997 = vst [vmem:[#allocation81_spill] sm:$0xff] %v16691_v16  ;;  %v16697_v58 = vld [vmem:[%s21695_s26 + $0x3a0] ss:$8 sps:$4 sm:$0xff]   ;;  %v16703_v57 = vld [vmem:[%s21695_s26 + $0x294] ss:$8 sps:$4 sm:$0xff]  }
 0x4be   :  { %21998 = vst [vmem:[#allocation82_spill] sm:$0xff] %v16697_v58  ;;  %21999 = vst [vmem:[#allocation83_spill] sm:$0xff] %v16703_v57  ;;  %v16709_v55 = vld [vmem:[%s21695_s26 + $0x394] ss:$8 sps:$4 sm:$0xff]  }
 0x4bf   :  { %22000 = vst [vmem:[#allocation84_spill] sm:$0xff] %v16709_v55 }
 0x4c0   :  { %3422 = vmatpush2.bf16.msra.mxu1 %v16691_v16  ;;  %3463 = vmatpush2.bf16.msra.mxu0 %v16697_v58  ;;  %v3271_v16 = vrot.slane %v16297_v54, %v13946_v48  ;;  %v16717_v58 = vld [vmem:[%s21695_s26 + $0x290] ss:$8 sps:$4 sm:$0xff]   ;;  %v16735_v54 = vld [vmem:[%s21695_s26 + $0x384] ss:$8 sps:$4 sm:$0xff]  }
 0x4c1   :  { %3423 = vmatprep.subr.bf16.mxu1 %v16703_v57  ;;  %3464 = vmatprep.subr.bf16.mxu0 %v16709_v55  ;;  %22001 = vst [vmem:[#allocation85_spill] sm:$0xff] %v16717_v58  ;;  %v16723_v57 = vld [vmem:[%s21695_s26 + $0x390] ss:$8 sps:$4 sm:$0xff]   ;;  %v16729_v55 = vld [vmem:[%s21695_s26 + $0x284] ss:$8 sps:$4 sm:$0xff]   ;;  %22004 = vst [vmem:[#allocation88_spill] sm:$0xff] %v16735_v54 }
 0x4c2   :  { %22002 = vst [vmem:[#allocation86_spill] sm:$0xff] %v16723_v57  ;;  %22003 = vst [vmem:[#allocation87_spill] sm:$0xff] %v16729_v55 }
 0x4c4   :  { %3424 = vmatpush2.bf16.msra.mxu1 %v16717_v58  ;;  %3465 = vmatpush2.bf16.msra.mxu0 %v16723_v57  ;;  %v3287_v58 = vcombine.high %v3271_v16, %v3271_v16  ;;  %v16747_v57 = vld [vmem:[%s21695_s26 + $0x380] ss:$8 sps:$4 sm:$0xff]  }
 0x4c5   :  { %3425 = vmatprep.subr.bf16.mxu1 %v16729_v55  ;;  %3466 = vmatprep.subr.bf16.mxu0 %v16735_v54  ;;  %22006 = vst [vmem:[#allocation90_spill] sm:$0xff] %v16747_v57  ;;  %v16753_v55 = vld [vmem:[%s21695_s26 + $0x474] ss:$8 sps:$4 sm:$0xff]  }
 0x4c6   :  { %22007 = vst [vmem:[#allocation91_spill] sm:$0xff] %v16753_v55 }
 0x4c8   :  { %3426 = vmatpush2.bf16.msra.mxu1 %v16741_v61  ;;  %3467 = vmatpush2.bf16.msra.mxu0 %v16747_v57  ;;  %v16759_v61 = vld [vmem:[%s21695_s26 + $0x470] ss:$8 sps:$4 sm:$0xff]   ;;  %v16766_v57 = vld [vmem:[%s21695_s26 + $0x464] ss:$8 sps:$4 sm:$0xff]  }
 0x4c9   :  { %3477 = vmatprep.subr.bf16.mxu1 %v16753_v55  ;;  %22008 = vst [vmem:[#allocation92_spill] sm:$0xff] %v16759_v61  ;;  %22009 = vst [vmem:[#allocation93_spill] sm:$0xff] %v16766_v57  ;;  %v16802_v55 = vld [vmem:[%s21695_s26 + $0x444] ss:$8 sps:$4 sm:$0xff]  }
 0x4ca   :  { %22013 = vst [vmem:[#allocation97_spill] sm:$0xff] %v16802_v55 }
 0x4cb   :  { %3428 = vmatmul.mubr.bf16.vlgmr.msra.gmra.mxu1 %v3271_v16  ;;  %3469 = vmatmul.mubr.bf16.vlgmr.msra.gmra.mxu0 %v3287_v58  ;;  %v16772_v58 = vld [vmem:[%s21695_s26 + $0x460] ss:$8 sps:$4 sm:$0xff]   ;;  %v16778_v16 = vld [vmem:[%s21695_s26 + $0x454] ss:$8 sps:$4 sm:$0xff]  }
 0x4cc   :  { %3478 = vmatpush1.bf16.msra.mxu1 %v16759_v61  ;;  %3509 = vmatprep.mubr.bf16.mxu1 %v21897_v45  ;;  %22010 = vst [vmem:[#allocation94_spill] sm:$0xff] %v16772_v58  ;;  %22011 = vst [vmem:[#allocation95_spill] sm:$0xff] %v16778_v16  ;;  %v12305_v45 = vld [vmem:[%s21247_s3 + $0x6e0] ss:$16 sps:$4 sm:$0xff]   ;;  %v12313_v61 = vld [vmem:[%s21247_s3 + $0x6c4] ss:$16 sps:$4 sm:$0xff]  }
 0x4cd   :  { %3479 = vmatprep.subr.bf16.mxu1 %v16766_v57  ;;  %v12307_v57 = vld [vmem:[%s21247_s3 + $0x6e4] ss:$16 sps:$4 sm:$0xff]  }
 0x4ce   :  { %3911 = vmatprep.subr.bf16.mxu0 %v12307_v57  ;;  %v12319_v57 = vld [vmem:[%s21247_s3 + $0x6a4] ss:$16 sps:$4 sm:$0xff]  }
 0x4cf   :  { %3912 = vmatpush1.bf16.msra.mxu0 %v12305_v45  ;;  %v16811_v45 = vld [vmem:[%s21695_s26 + $0x440] ss:$8 sps:$4 sm:$0xff]  }
 0x4d0   :  { %3480 = vmatpush1.bf16.msra.mxu1 %v16772_v58  ;;  %v16793_v58 = vld [vmem:[%s21695_s26 + $0x450] ss:$8 sps:$4 sm:$0xff]   ;;  %3913 = vmatprep.subr.bf16.mxu0 %v12313_v61  ;;  %22014 = vst [vmem:[#allocation98_spill] sm:$0xff] %v16811_v45  ;;  %v16820_v61 = vld [vmem:[%s21695_s26 + $0x434] ss:$8 sps:$4 sm:$0xff]  }
 0x4d1   :  { %3481 = vmatprep.subr.bf16.mxu1 %v16778_v16  ;;  %22012 = vst [vmem:[#allocation96_spill] sm:$0xff] %v16793_v58  ;;  %v12311_v16 = vld [vmem:[%s21247_s3 + $0x6c0] ss:$16 sps:$4 sm:$0xff]   ;;  %22015 = vst [vmem:[#allocation99_spill] sm:$0xff] %v16820_v61 }
 0x4d3   :  { %3914 = vmatpush1.bf16.msra.mxu0 %v12311_v16  ;;  %v16829_v16 = vld [vmem:[%s21695_s26 + $0x430] ss:$8 sps:$4 sm:$0xff]  }
 0x4d4   :  { %3482 = vmatpush1.bf16.msra.mxu1 %v16793_v58  ;;  %v12317_v58 = vld [vmem:[%s21247_s3 + $0x6a0] ss:$16 sps:$4 sm:$0xff]   ;;  %3915 = vmatprep.subr.bf16.mxu0 %v12319_v57  ;;  %22016 = vst [vmem:[#allocation100_spill] sm:$0xff] %v16829_v16  ;;  %v16838_v57 = vld [vmem:[%s21695_s26 + $0x424] ss:$8 sps:$4 sm:$0xff]  }
 0x4d5   :  { %3483 = vmatprep.subr.bf16.mxu1 %v16802_v55  ;;  %v12325_v55 = vld [vmem:[%s21247_s3 + $0x684] ss:$16 sps:$4 sm:$0xff]   ;;  %22017 = vst [vmem:[#allocation101_spill] sm:$0xff] %v16838_v57 }
 0x4d7   :  { %3916 = vmatpush1.bf16.msra.mxu0 %v12317_v58  ;;  %v16847_v58 = vld [vmem:[%s21695_s26 + $0x420] ss:$8 sps:$4 sm:$0xff]  }
 0x4d8   :  { %3484 = vmatpush1.bf16.msra.mxu1 %v16811_v45  ;;  %v12323_v45 = vld [vmem:[%s21247_s3 + $0x680] ss:$16 sps:$4 sm:$0xff]   ;;  %3917 = vmatprep.subr.bf16.mxu0 %v12325_v55  ;;  %22018 = vst [vmem:[#allocation102_spill] sm:$0xff] %v16847_v58  ;;  %v16856_v55 = vld [vmem:[%s21695_s26 + $0x414] ss:$8 sps:$4 sm:$0xff]  }
 0x4d9   :  { %3485 = vmatprep.subr.bf16.mxu1 %v16820_v61  ;;  %v12331_v61 = vld [vmem:[%s21247_s3 + $0x664] ss:$16 sps:$4 sm:$0xff]   ;;  %22019 = vst [vmem:[#allocation103_spill] sm:$0xff] %v16856_v55 }
 0x4db   :  { %3918 = vmatpush1.bf16.msra.mxu0 %v12323_v45  ;;  %v16865_v45 = vld [vmem:[%s21695_s26 + $0x410] ss:$8 sps:$4 sm:$0xff]  }
 0x4dc   :  { %3486 = vmatpush1.bf16.msra.mxu1 %v16829_v16  ;;  %v12329_v16 = vld [vmem:[%s21247_s3 + $0x660] ss:$16 sps:$4 sm:$0xff]   ;;  %3919 = vmatprep.subr.bf16.mxu0 %v12331_v61  ;;  %22020 = vst [vmem:[#allocation104_spill] sm:$0xff] %v16865_v45 }
 0x4dd   :  { %3487 = vmatprep.subr.bf16.mxu1 %v16838_v57  ;;  %v12337_v57 = vld [vmem:[%s21247_s3 + $0x644] ss:$16 sps:$4 sm:$0xff]   ;;  %v12335_v61 = vld [vmem:[%s21247_s3 + $0x640] ss:$16 sps:$4 sm:$0xff]  }
 0x4df   :  { %3920 = vmatpush1.bf16.msra.mxu0 %v12329_v16  ;;  %v16887_v16 = vld [vmem:[%s21695_s26 + $0x400] ss:$8 sps:$4 sm:$0xff]  }
 0x4e0   :  { %3488 = vmatpush1.bf16.msra.mxu1 %v16847_v58  ;;  %v10625_v58 = vld.sshfl [vmem:[%s21697_s20 + $0x23] sm:$0x1 pattern:$0x75316420]  ;;  %3921 = vmatprep.subr.bf16.mxu0 %v12337_v57  ;;  %22022 = vst [vmem:[#allocation106_spill] sm:$0xff] %v16887_v16 }
 0x4e1   :  { %3489 = vmatprep.subr.bf16.mxu1 %v16856_v55  ;;  %v16877_v55 = vld [vmem:[%s21695_s26 + $0x404] ss:$8 sps:$4 sm:$0xff]   ;;  %v3303_v54 = vrot.slane %v10625_v58, %v13946_v48  ;;  %v12314_v57 = vld [vmem:[%s21247_s3 + $0x6c8] ss:$16 sps:$4 sm:$0xff]  }
 0x4e2   :  { %22021 = vst [vmem:[#allocation105_spill] sm:$0xff] %v16877_v55  ;;  %v12322_v58 = vld [vmem:[%s21247_s3 + $0x6ac] ss:$16 sps:$4 sm:$0xff]  }
 0x4e3   :  { %3922 = vmatpush1.bf16.msra.mxu0 %v12335_v61  ;;  %v12332_v61 = vld [vmem:[%s21247_s3 + $0x668] ss:$16 sps:$4 sm:$0xff]  }
 0x4e4   :  { %3490 = vmatpush1.bf16.msra.mxu1 %v16865_v45  ;;  %v12310_v45 = vld [vmem:[%s21247_s3 + $0x6ec] ss:$16 sps:$4 sm:$0xff]  }
 0x4e5   :  { %3491 = vmatprep.subr.bf16.mxu1 %v16877_v55  ;;  %v12316_v55 = vld [vmem:[%s21247_s3 + $0x6cc] ss:$16 sps:$4 sm:$0xff]  }
 0x4e8   :  { %3492 = vmatpush1.bf16.msra.mxu1 %v16887_v16 }
 0x4e9   :  { %3952 = vmatprep.subr.bf16.mxu1 %v12310_v45  ;;  %v12320_v45 = vld [vmem:[%s21247_s3 + $0x6a8] ss:$16 sps:$4 sm:$0xff]  }
 0x4eb   :  { %3510 = vmatmul.mubr.bf16.vlgmr.msra.gmra.mxu1 %v3303_v54  ;;  %v12328_v54 = vld [vmem:[%s21247_s3 + $0x68c] ss:$16 sps:$4 sm:$0xff]  }
 0x4ec   :  { %3953 = vmatpush1.bf16.msra.mxu1 %v12308_v31  ;;  %v12326_v31 = vld [vmem:[%s21247_s3 + $0x688] ss:$16 sps:$4 sm:$0xff]  }
 0x4ed   :  { %3954 = vmatprep.subr.bf16.mxu1 %v12316_v55  ;;  %v12334_v55 = vld [vmem:[%s21247_s3 + $0x66c] ss:$16 sps:$4 sm:$0xff]  }
 0x4f0   :  { %3955 = vmatpush1.bf16.msra.mxu1 %v12314_v57  ;;  %v12340_v57 = vld [vmem:[%s21247_s3 + $0x64c] ss:$16 sps:$4 sm:$0xff]  }
 0x4f1   :  { %3956 = vmatprep.subr.bf16.mxu1 %v12322_v58  ;;  %v12338_v58 = vld [vmem:[%s21247_s3 + $0x648] ss:$16 sps:$4 sm:$0xff]  }
 0x4f4   :  { %3957 = vmatpush1.bf16.msra.mxu1 %v12320_v45 }
 0x4f5   :  { %3958 = vmatprep.subr.bf16.mxu1 %v12328_v54 }
 0x4f8   :  { %3959 = vmatpush1.bf16.msra.mxu1 %v12326_v31  ;;  %v12343_v31 = vld [vmem:[%s21247_s3 + $0x624] ss:$16 sps:$4 sm:$0xff]  }
 0x4f9   :  { %3960 = vmatprep.subr.bf16.mxu1 %v12334_v55  ;;  %3923 = vmatprep.subr.bf16.mxu0 %v12343_v31  ;;  %v12347_v31 = vld [vmem:[%s21247_s3 + $0x600] ss:$16 sps:$4 sm:$0xff]  }
 0x4fc   :  { %3961 = vmatpush1.bf16.msra.mxu1 %v12332_v61  ;;  %v12341_v61 = vld [vmem:[%s21247_s3 + $0x620] ss:$16 sps:$4 sm:$0xff]  }
 0x4fd   :  { %3962 = vmatprep.subr.bf16.mxu1 %v12340_v57  ;;  %v12346_v57 = vld [vmem:[%s21247_s3 + $0x62c] ss:$16 sps:$4 sm:$0xff]   ;;  %3924 = vmatpush1.bf16.msra.mxu0 %v12341_v61  ;;  %v12353_v61 = vld [vmem:[%s21247_s3 + $0x7e0] ss:$16 sps:$4 sm:$0xff]  }
 0x500   :  { %3963 = vmatpush1.bf16.msra.mxu1 %v12338_v58 }
 0x501   :  { %3964 = vmatprep.subr.bf16.mxu1 %v12346_v57  ;;  %v12358_v57 = vld [vmem:[%s21247_s3 + $0x7ec] ss:$16 sps:$4 sm:$0xff]  }
 0x504   :  { %3965 = vmatpush1.bf16.msra.mxu1 %v12344_v56  ;;  %v12355_v56 = vld [vmem:[%s21247_s3 + $0x7e4] ss:$16 sps:$4 sm:$0xff]  }
 0x50b   :  { %v3184_v45 = vpop.f32.mrf.mxu1  ;;  %v3225_v54 = vpop.f32.mrf.mxu0 }
 0x50c   :  { %v16927_v16 = vadd.f32 %v3184_v45, %v15841_v14  ;;  %v16930_v55 = vadd.f32 %v3225_v54, %v15843_v15 }
 0x50d   :  { %v3186_v58 = vpop.f32.mrf.mxu1  ;;  %v3227_v59 = vpop.f32.mrf.mxu0 }
 0x50e   :  { %22023 = vst [vmem:[#allocation107_spill] sm:$0xff] %v16927_v16  ;;  %22024 = vst [vmem:[#allocation108_spill] sm:$0xff] %v16930_v55  ;;  %v16942_v14 = vadd.f32 %v3186_v58, %v15854_v30  ;;  %v16945_v15 = vadd.f32 %v3227_v59, %v15856_v49  ;;  %v12349_v55 = vld [vmem:[%s21247_s3 + $0x604] ss:$16 sps:$4 sm:$0xff]   ;;  %v12352_v30 = vld [vmem:[%s21247_s3 + $0x60c] ss:$16 sps:$4 sm:$0xff]  }
 0x50f   :  { %v3188_v45 = vpop.f32.mrf.mxu1  ;;  %v3229_v54 = vpop.f32.mrf.mxu0  ;;  %3925 = vmatprep.subr.bf16.mxu0 %v12349_v55  ;;  %v12350_v59 = vld [vmem:[%s21247_s3 + $0x608] ss:$16 sps:$4 sm:$0xff]   ;;  %3966 = vmatprep.subr.bf16.mxu1 %v12352_v30 }
 0x510   :  { %22025 = vst [vmem:[#allocation109_spill] sm:$0xff] %v16942_v14  ;;  %22026 = vst [vmem:[#allocation110_spill] sm:$0xff] %v16945_v15  ;;  %3926 = vmatpush1.bf16.msra.mxu0 %v12347_v31  ;;  %3967 = vmatpush1.bf16.msra.mxu1 %v12350_v59  ;;  %v12356_v55 = vld [vmem:[%s21247_s3 + $0x7e8] ss:$16 sps:$4 sm:$0xff]   ;;  %v12361_v45 = vld [vmem:[%s21247_s3 + $0x7c4] ss:$16 sps:$4 sm:$0xff]  }
 0x511   :  { %v3189_v58 = vpop.f32.mrf.mxu1  ;;  %v3230_v49 = vpop.f32.mrf.mxu0  ;;  %3927 = vmatprep.subr.bf16.mxu0 %v12355_v56  ;;  %3968 = vmatprep.subr.bf16.mxu1 %v12358_v57  ;;  %v12364_v54 = vld [vmem:[%s21247_s3 + $0x7cc] ss:$16 sps:$4 sm:$0xff]   ;;  %v12359_v31 = vld [vmem:[%s21247_s3 + $0x7c0] ss:$16 sps:$4 sm:$0xff]   ;;  %v12362_v30 = vld [vmem:[%s21247_s3 + $0x7c8] ss:$16 sps:$4 sm:$0xff]  }
 0x512   :  { %v12367_v58 = vld [vmem:[%s21247_s3 + $0x7a4] ss:$16 sps:$4 sm:$0xff]   ;;  %v12370_v49 = vld [vmem:[%s21247_s3 + $0x7ac] ss:$16 sps:$4 sm:$0xff]   ;;  %v12365_v59 = vld [vmem:[%s21247_s3 + $0x7a0] ss:$16 sps:$4 sm:$0xff]  }
 0x513   :  { %v12368_v56 = vld [vmem:[%s21247_s3 + $0x7a8] ss:$16 sps:$4 sm:$0xff]   ;;  %v12376_v57 = vld [vmem:[%s21247_s3 + $0x78c] ss:$16 sps:$4 sm:$0xff]  }
 0x514   :  { %3928 = vmatpush2.bf16.msra.mxu0 %v12353_v61  ;;  %3969 = vmatpush2.bf16.msra.mxu1 %v12356_v55  ;;  %v12373_v61 = vld [vmem:[%s21247_s3 + $0x784] ss:$16 sps:$4 sm:$0xff]   ;;  %v12371_v55 = vld [vmem:[%s21247_s3 + $0x780] ss:$16 sps:$4 sm:$0xff]  }
 0x515   :  { %3929 = vmatprep.subr.bf16.mxu0 %v12361_v45  ;;  %3970 = vmatprep.subr.bf16.mxu1 %v12364_v54  ;;  %v12374_v45 = vld [vmem:[%s21247_s3 + $0x788] ss:$16 sps:$4 sm:$0xff]   ;;  %v12379_v54 = vld [vmem:[%s21247_s3 + $0x764] ss:$16 sps:$4 sm:$0xff]  }
 0x518   :  { %3930 = vmatpush2.bf16.msra.mxu0 %v12359_v31  ;;  %3971 = vmatpush2.bf16.msra.mxu1 %v12362_v30  ;;  %v12382_v31 = vld [vmem:[%s21247_s3 + $0x76c] ss:$16 sps:$4 sm:$0xff]   ;;  %v12377_v30 = vld [vmem:[%s21247_s3 + $0x760] ss:$16 sps:$4 sm:$0xff]  }
 0x519   :  { %3931 = vmatprep.subr.bf16.mxu0 %v12367_v58  ;;  %3972 = vmatprep.subr.bf16.mxu1 %v12370_v49  ;;  %v12380_v58 = vld [vmem:[%s21247_s3 + $0x768] ss:$16 sps:$4 sm:$0xff]   ;;  %v12385_v49 = vld [vmem:[%s21247_s3 + $0x744] ss:$16 sps:$4 sm:$0xff]  }
 0x51c   :  { %3932 = vmatpush2.bf16.msra.mxu0 %v12365_v59  ;;  %3973 = vmatpush2.bf16.msra.mxu1 %v12368_v56  ;;  %v12388_v59 = vld [vmem:[%s21247_s3 + $0x74c] ss:$16 sps:$4 sm:$0xff]   ;;  %v12383_v56 = vld [vmem:[%s21247_s3 + $0x740] ss:$16 sps:$4 sm:$0xff]  }
 0x51d   :  { %3933 = vmatprep.subr.bf16.mxu0 %v12373_v61  ;;  %3974 = vmatprep.subr.bf16.mxu1 %v12376_v57  ;;  %v12386_v61 = vld [vmem:[%s21247_s3 + $0x748] ss:$16 sps:$4 sm:$0xff]   ;;  %v12391_v57 = vld [vmem:[%s21247_s3 + $0x724] ss:$16 sps:$4 sm:$0xff]  }
 0x520   :  { %3934 = vmatpush2.bf16.msra.mxu0 %v12371_v55  ;;  %3975 = vmatpush2.bf16.msra.mxu1 %v12374_v45  ;;  %v12389_v55 = vld [vmem:[%s21247_s3 + $0x720] ss:$16 sps:$4 sm:$0xff]   ;;  %v12394_v45 = vld [vmem:[%s21247_s3 + $0x72c] ss:$16 sps:$4 sm:$0xff]  }
 0x521   :  { %3935 = vmatprep.subr.bf16.mxu0 %v12379_v54  ;;  %3976 = vmatprep.subr.bf16.mxu1 %v12382_v31  ;;  %v12392_v54 = vld [vmem:[%s21247_s3 + $0x728] ss:$16 sps:$4 sm:$0xff]   ;;  %v12397_v31 = vld [vmem:[%s21247_s3 + $0x704] ss:$16 sps:$4 sm:$0xff]  }
 0x524   :  { %3936 = vmatpush2.bf16.msra.mxu0 %v12377_v30  ;;  %3977 = vmatpush2.bf16.msra.mxu1 %v12380_v58  ;;  %v12395_v30 = vld [vmem:[%s21247_s3 + $0x700] ss:$16 sps:$4 sm:$0xff]   ;;  %v12400_v58 = vld [vmem:[%s21247_s3 + $0x70c] ss:$16 sps:$4 sm:$0xff]  }
 0x525   :  { %3937 = vmatprep.subr.bf16.mxu0 %v12385_v49  ;;  %3978 = vmatprep.subr.bf16.mxu1 %v12388_v59  ;;  %v12398_v49 = vld [vmem:[%s21247_s3 + $0x708] ss:$16 sps:$4 sm:$0xff]   ;;  %v17058_v59 = vld [vmem:[%s21695_s26 + $0x74] ss:$8 sps:$4 sm:$0xff]  }
 0x526   :  { %22027 = vst [vmem:[#allocation111_spill] sm:$0xff] %v17058_v59 }
 0x528   :  { %3938 = vmatpush2.bf16.msra.mxu0 %v12383_v56  ;;  %3979 = vmatpush2.bf16.msra.mxu1 %v12386_v61  ;;  %v17064_v56 = vld [vmem:[%s21695_s26 + $0x174] ss:$8 sps:$4 sm:$0xff]  }
 0x529   :  { %3939 = vmatprep.subr.bf16.mxu0 %v12391_v57  ;;  %3980 = vmatprep.subr.bf16.mxu1 %v12394_v45  ;;  %22028 = vst [vmem:[#allocation112_spill] sm:$0xff] %v17064_v56 }
 0x52c   :  { %3940 = vmatpush2.bf16.msra.mxu0 %v12389_v55  ;;  %3981 = vmatpush2.bf16.msra.mxu1 %v12392_v54 }
 0x52d   :  { %3941 = vmatprep.subr.bf16.mxu0 %v12397_v31  ;;  %3982 = vmatprep.subr.bf16.mxu1 %v12400_v58 }
 0x530   :  { %3942 = vmatpush2.bf16.msra.mxu0 %v12395_v30  ;;  %3983 = vmatpush2.bf16.msra.mxu1 %v12398_v49 }
 0x531   :  { %4074 = vmatprep.subr.bf16.mxu0 %v17058_v59  ;;  %4115 = vmatprep.subr.bf16.mxu1 %v17064_v56 }
 0x54b   :  { %v3347_v61 = vpop.f32.mrf.mxu1  ;;  %v3388_v57 = vpop.f32.mrf.mxu0 }
 0x54c   :  { %v3348_v55 = vadd.f32 %v3347_v61, %v14478_v51  ;;  %v17072_v61 = vld [vmem:[%s21697_s20 + $0x24] sm:$0xff] }
 0x54d   :  { %v3349_v45 = vpop.f32.mrf.mxu1  ;;  %v3390_v54 = vpop.f32.mrf.mxu0 }
 0x54e   :  { %v3350_v31 = vadd.f32 %v3349_v45, %v14481_v52  ;;  %v3389_v30 = vadd.f32 %v3388_v57, %v3348_v55  ;;  %v17076_v55 = vrot.slane %v17072_v61, %v13946_v48 }
 0x54f   :  { %v3351_v58 = vpop.f32.mrf.mxu1  ;;  %v3392_v49 = vpop.f32.mrf.mxu0 }
 0x550   :  { %v3391_v15 = vadd.f32 %v3390_v54, %v3350_v31 }
 0x551   :  { %v3352_v59 = vpop.f32.mrf.mxu1  ;;  %v3393_v14 = vpop.f32.mrf.mxu0 }
 0x58b   :  { %v3429_v16 = vpop.f32.mrf.mxu1  ;;  %v3470_v53 = vpop.f32.mrf.mxu0 }
 0x58c   :  { %v3430_v40 = vadd.f32 %v3429_v16, %v3389_v30 }
 0x58d   :  { %v3431_v47 = vpop.f32.mrf.mxu1  ;;  %v3472_v46 = vpop.f32.mrf.mxu0 }
 0x58e   :  { %v3432_v57 = vadd.f32 %v3431_v47, %v3391_v15  ;;  %v3471_v14 = vadd.f32 %v3470_v53, %v3430_v40  ;;  %v22062_v53 = vld [vmem:[#allocation38_spill] sm:$0xff] }
 0x58f   :  { %v3433_v44 = vpop.f32.mrf.mxu1  ;;  %v3474_v56 = vpop.f32.mrf.mxu0 }
 0x590   :  { %v3473_v45 = vadd.f32 %v3472_v46, %v3432_v57  ;;  %v22064_v57 = vld [vmem:[#allocation40_spill] sm:$0xff] }
 0x591   :  { %v3434_v43 = vpop.f32.mrf.mxu1  ;;  %v3475_v41 = vpop.f32.mrf.mxu0 }
 0x592   :  { %v4017_v43 = vcombine.high %v17076_v55, %v17076_v55 }
 0x594   :  { %v4039_v15 = vrot.slane %v4017_v43, %v13946_v48  ;;  %v22071_v43 = vld [vmem:[#allocation47_spill] sm:$0xff] }
 0x596   :  { %v4049_v46 = vcombine.high %v4039_v15, %v4039_v15 }
 0x5ab   :  { %v3511_v59 = vpop.f32.mrf.mxu1 }
 0x5ac   :  { %v3512_v54 = vadd.f32 %v3511_v59, %v3471_v14  ;;  %v22066_v14 = vld [vmem:[#allocation42_spill] sm:$0xff]  ;;  %v22067_v59 = vld [vmem:[#allocation43_spill] sm:$0xff] }
 0x5ad   :  { %v3513_v31 = vpop.f32.mrf.mxu1 }
 0x5ae   :  { %vm3518_vm6 = vcmp.ge.f32.partialorder %v3512_v54, 0.0  ;;  %v3520_v41 = vmul.f32 0.1, %v3512_v54  ;;  %v3514_v44 = vadd.f32 %v3513_v31, %v3473_v45  ;;  %v22068_v45 = vld [vmem:[#allocation44_spill] sm:$0xff]  ;;  %v22070_v31 = vld [vmem:[#allocation46_spill] sm:$0xff] }
 0x5af   :  { %v3515_v16 = vpop.f32.mrf.mxu1 }
 0x5b0   :  { %vm3519_vm7 = vcmp.ge.f32.partialorder %v3514_v44, 0.0  ;;  %v3521_v56 = vmul.f32 0.1, %v3514_v44  ;;  %v3522_v30 = vsel %vm3518_vm6, %v3512_v54, %v3520_v41  ;;  %v22069_v54 = vld [vmem:[#allocation45_spill] sm:$0xff]  ;;  %v22072_v41 = vld [vmem:[#allocation48_spill] sm:$0xff]  ;;  %v22074_v16 = vld [vmem:[#allocation50_spill] sm:$0xff] }
 0x5b1   :  { %v3516_v47 = vpop.f32.mrf.mxu1  ;;  %v3524_v40 = vpack.c.bf16 %v3522_v30, %v3522_v30  ;;  %v22076_v30 = vld [vmem:[#allocation52_spill] sm:$0xff] }
 0x5b2   :  { %v3523_v58 = vsel %vm3519_vm7, %v3514_v44, %v3521_v56  ;;  %v22073_v44 = vld [vmem:[#allocation49_spill] sm:$0xff]  ;;  %v22075_v56 = vld [vmem:[#allocation51_spill] sm:$0xff] }
 0x5b3   :  { %v3525_v49 = vpack.c.bf16 %v3523_v58, %v3523_v58  ;;  %v22077_v47 = vld [vmem:[#allocation53_spill] sm:$0xff]  ;;  %v22079_v58 = vld [vmem:[#allocation55_spill] sm:$0xff] }
 0x5b5   :  { %3943 = vmatprep.mubr.bf16.mxu0 %v3525_v49  ;;  %3984 = vmatprep.mubr.bf16.mxu1 %v3525_v49  ;;  %v22080_v49 = vld [vmem:[#allocation56_spill] sm:$0xff] }
 0x5b6   :  { %3944 = vmatmul.mubr.bf16.vlgmr.msra.gmra.mxu0 %v3524_v40  ;;  %3985 = vmatmul.mubr.bf16.vlgmr.msra.gmra.mxu1 %v3524_v40  ;;  %v22081_v40 = vld [vmem:[#allocation57_spill] sm:$0xff] }
 0x5b7   :  { %4075 = vmatpush1.bf16.msra.mxu0 %v15985_v60  ;;  %4116 = vmatpush1.bf16.msra.mxu1 %v15991_v62  ;;  %v22029_v60 = vld [vmem:[#allocation5_spill] sm:$0xff]  ;;  %v22030_v62 = vld [vmem:[#allocation6_spill] sm:$0xff] }
 0x5b8   :  { %4076 = vmatprep.subr.bf16.mxu0 %v15997_v63  ;;  %4117 = vmatprep.subr.bf16.mxu1 %v16003_v0  ;;  %v22031_v63 = vld [vmem:[#allocation7_spill] sm:$0xff]  ;;  %v22032_v0 = vld [vmem:[#allocation8_spill] sm:$0xff] }
 0x5b9   :  { %4106 = vmatprep.mubr.bf16.mxu0 %v4039_v15  ;;  %4147 = vmatprep.mubr.bf16.mxu1 %v4049_v46  ;;  %v22078_v15 = vld [vmem:[#allocation54_spill] sm:$0xff] }
 0x5ba   :  { %v22082_v46 = vld [vmem:[#allocation58_spill] sm:$0xff] }
 0x5bb   :  { %4077 = vmatpush1.bf16.msra.mxu0 %v16009_v1  ;;  %4118 = vmatpush1.bf16.msra.mxu1 %v16015_v2  ;;  %v22033_v1 = vld [vmem:[#allocation9_spill] sm:$0xff]  ;;  %v22034_v2 = vld [vmem:[#allocation10_spill] sm:$0xff] }
 0x5bc   :  { %4078 = vmatprep.subr.bf16.mxu0 %v16021_v3  ;;  %4119 = vmatprep.subr.bf16.mxu1 %v16027_v4  ;;  %v22035_v3 = vld [vmem:[#allocation11_spill] sm:$0xff]  ;;  %v22036_v4 = vld [vmem:[#allocation12_spill] sm:$0xff] }
 0x5bf   :  { %4079 = vmatpush1.bf16.msra.mxu0 %v16033_v6  ;;  %4120 = vmatpush1.bf16.msra.mxu1 %v16039_v7  ;;  %v4002_v6 = vcombine.high %v17072_v61, %v17072_v61  ;;  %v22037_v7 = vld [vmem:[#allocation13_spill] sm:$0xff]  ;;  %v22063_v61 = vld [vmem:[#allocation39_spill] sm:$0xff] }
 0x5c0   :  { %4080 = vmatprep.subr.bf16.mxu0 %v16045_v8  ;;  %4121 = vmatprep.subr.bf16.mxu1 %v16051_v9  ;;  %v22038_v8 = vld [vmem:[#allocation14_spill] sm:$0xff]  ;;  %v22039_v9 = vld [vmem:[#allocation15_spill] sm:$0xff] }
 0x5c3   :  { %4081 = vmatpush1.bf16.msra.mxu0 %v16057_v11  ;;  %4122 = vmatpush1.bf16.msra.mxu1 %v16063_v12  ;;  %v22040_v11 = vld [vmem:[#allocation16_spill] sm:$0xff]  ;;  %v17136_v12 = vrot.slane %v4002_v6, %v13946_v48  ;;  %v22091_v6 = vld [vmem:[#allocation67_spill] sm:$0xff] }
 0x5c4   :  { %4082 = vmatprep.subr.bf16.mxu0 %v16069_v22  ;;  %4123 = vmatprep.subr.bf16.mxu1 %v16075_v29  ;;  %v22041_v22 = vld [vmem:[#allocation17_spill] sm:$0xff]  ;;  %v22042_v29 = vld [vmem:[#allocation18_spill] sm:$0xff] }
 0x5c7   :  { %4083 = vmatpush1.bf16.msra.mxu0 %v16081_v26  ;;  %4124 = vmatpush1.bf16.msra.mxu1 %v16087_v27  ;;  %v22043_v26 = vld [vmem:[#allocation19_spill] sm:$0xff]  ;;  %v22044_v27 = vld [vmem:[#allocation20_spill] sm:$0xff] }
 0x5c8   :  { %4084 = vmatprep.subr.bf16.mxu0 %v16093_v5  ;;  %4125 = vmatprep.subr.bf16.mxu1 %v16099_v50  ;;  %v4018_v5 = vcombine.high %v17136_v12, %v17136_v12  ;;  %v4025_v50 = vrot.slane %v17076_v55, %v13946_v48  ;;  %v22065_v55 = vld [vmem:[#allocation41_spill] sm:$0xff] }
 0x5cb   :  { %4085 = vmatpush1.bf16.msra.mxu0 %v16105_v24  ;;  %4126 = vmatpush1.bf16.msra.mxu1 %v16111_v18  ;;  %v22045_v24 = vld [vmem:[#allocation21_spill] sm:$0xff]  ;;  %v22046_v18 = vld [vmem:[#allocation22_spill] sm:$0xff] }
 0x5cc   :  { %4086 = vmatprep.subr.bf16.mxu0 %v16117_v17  ;;  %4127 = vmatprep.subr.bf16.mxu1 %v16123_v19  ;;  %v22047_v17 = vld [vmem:[#allocation23_spill] sm:$0xff]  ;;  %v22048_v19 = vld [vmem:[#allocation24_spill] sm:$0xff] }
 0x5cf   :  { %4087 = vmatpush1.bf16.msra.mxu0 %v16129_v23  ;;  %4128 = vmatpush1.bf16.msra.mxu1 %v16135_v10  ;;  %v4046_v23 = vrot.slane %v4018_v5, %v13946_v48  ;;  %v4047_v10 = vcombine.high %v4025_v50, %v4025_v50  ;;  %v22100_v5 = vld [vmem:[#allocation76_spill] sm:$0xff] }
 0x5d0   :  { %4088 = vmatprep.subr.bf16.mxu0 %v16141_v28  ;;  %4129 = vmatprep.subr.bf16.mxu1 %v16147_v21  ;;  %v22049_v28 = vld [vmem:[#allocation25_spill] sm:$0xff]  ;;  %v22050_v21 = vld [vmem:[#allocation26_spill] sm:$0xff] }
 0x5d3   :  { %4089 = vmatpush1.bf16.msra.mxu0 %v16153_v25  ;;  %4130 = vmatpush1.bf16.msra.mxu1 %v16159_v13  ;;  %v22051_v25 = vld [vmem:[#allocation27_spill] sm:$0xff]  ;;  %v22052_v13 = vld [vmem:[#allocation28_spill] sm:$0xff] }
 0x5d4   :  { %4090 = vmatprep.subr.bf16.mxu0 %v16165_v42  ;;  %4131 = vmatprep.subr.bf16.mxu1 %v16171_v20  ;;  %v4050_v42 = vcombine.high %v4046_v23, %v4046_v23  ;;  %v22053_v20 = vld [vmem:[#allocation29_spill] sm:$0xff] }
 0x5d7   :  { %4091 = vmatpush2.bf16.msra.mxu0 %v16177_v32  ;;  %4132 = vmatpush2.bf16.msra.mxu1 %v16183_v33  ;;  %v22054_v32 = vld [vmem:[#allocation30_spill] sm:$0xff]  ;;  %v22055_v33 = vld [vmem:[#allocation31_spill] sm:$0xff] }
 0x5d8   :  { %4092 = vmatprep.subr.bf16.mxu0 %v16189_v34  ;;  %4133 = vmatprep.subr.bf16.mxu1 %v16195_v35  ;;  %v22056_v34 = vld [vmem:[#allocation32_spill] sm:$0xff]  ;;  %v22057_v35 = vld [vmem:[#allocation33_spill] sm:$0xff] }
 0x5db   :  { %4093 = vmatpush2.bf16.msra.mxu0 %v16201_v36  ;;  %4134 = vmatpush2.bf16.msra.mxu1 %v16207_v37  ;;  %v22058_v36 = vld [vmem:[#allocation34_spill] sm:$0xff]  ;;  %v22059_v37 = vld [vmem:[#allocation35_spill] sm:$0xff] }
 0x5dc   :  { %4094 = vmatprep.subr.bf16.mxu0 %v16213_v38  ;;  %4135 = vmatprep.subr.bf16.mxu1 %v16219_v39  ;;  %v22060_v38 = vld [vmem:[#allocation36_spill] sm:$0xff]  ;;  %v22061_v39 = vld [vmem:[#allocation37_spill] sm:$0xff] }
 0x5df   :  { %4095 = vmatpush2.bf16.msra.mxu0 %v22029_v60  ;;  %4136 = vmatpush2.bf16.msra.mxu1 %v22030_v62  ;;  %v22083_v60 = vld [vmem:[#allocation59_spill] sm:$0xff]  ;;  %v22084_v62 = vld [vmem:[#allocation60_spill] sm:$0xff] }
 0x5e0   :  { %4096 = vmatprep.subr.bf16.mxu0 %v22031_v63  ;;  %4137 = vmatprep.subr.bf16.mxu1 %v22032_v0  ;;  %v22085_v63 = vld [vmem:[#allocation61_spill] sm:$0xff]  ;;  %v22086_v0 = vld [vmem:[#allocation62_spill] sm:$0xff] }
 0x5e3   :  { %4097 = vmatpush2.bf16.msra.mxu0 %v22033_v1  ;;  %4138 = vmatpush2.bf16.msra.mxu1 %v22034_v2  ;;  %v22087_v1 = vld [vmem:[#allocation63_spill] sm:$0xff]  ;;  %v22088_v2 = vld [vmem:[#allocation64_spill] sm:$0xff] }
 0x5e4   :  { %4098 = vmatprep.subr.bf16.mxu0 %v22035_v3  ;;  %4139 = vmatprep.subr.bf16.mxu1 %v22036_v4  ;;  %v22089_v3 = vld [vmem:[#allocation65_spill] sm:$0xff]  ;;  %v22090_v4 = vld [vmem:[#allocation66_spill] sm:$0xff] }
 0x5e7   :  { %4099 = vmatpush2.bf16.msra.mxu0 %v22037_v7  ;;  %4140 = vmatpush2.bf16.msra.mxu1 %v22038_v8  ;;  %v22092_v7 = vld [vmem:[#allocation68_spill] sm:$0xff]  ;;  %v22093_v8 = vld [vmem:[#allocation69_spill] sm:$0xff] }
 0x5e8   :  { %4100 = vmatprep.subr.bf16.mxu0 %v22039_v9  ;;  %4141 = vmatprep.subr.bf16.mxu1 %v22040_v11  ;;  %v22094_v9 = vld [vmem:[#allocation70_spill] sm:$0xff]  ;;  %v22095_v11 = vld [vmem:[#allocation71_spill] sm:$0xff] }
 0x5eb   :  { %4101 = vmatpush2.bf16.msra.mxu0 %v22041_v22  ;;  %4142 = vmatpush2.bf16.msra.mxu1 %v22042_v29  ;;  %v22096_v22 = vld [vmem:[#allocation72_spill] sm:$0xff]  ;;  %v22097_v29 = vld [vmem:[#allocation73_spill] sm:$0xff] }
 0x5ec   :  { %4102 = vmatprep.subr.bf16.mxu0 %v22043_v26  ;;  %4143 = vmatprep.subr.bf16.mxu1 %v22044_v27  ;;  %v22098_v26 = vld [vmem:[#allocation74_spill] sm:$0xff]  ;;  %v22099_v27 = vld [vmem:[#allocation75_spill] sm:$0xff] }
 0x5ef   :  { %4103 = vmatpush2.bf16.msra.mxu0 %v22045_v24  ;;  %4144 = vmatpush2.bf16.msra.mxu1 %v22046_v18  ;;  %v22102_v24 = vld [vmem:[#allocation78_spill] sm:$0xff]  ;;  %v22103_v18 = vld [vmem:[#allocation79_spill] sm:$0xff] }
 0x5f0   :  { %4104 = vmatprep.subr.bf16.mxu0 %v22047_v17  ;;  %4145 = vmatprep.subr.bf16.mxu1 %v22048_v19  ;;  %v22104_v17 = vld [vmem:[#allocation80_spill] sm:$0xff]  ;;  %v22105_v19 = vld [vmem:[#allocation81_spill] sm:$0xff] }
 0x5f3   :  { %4105 = vmatpush2.bf16.msra.mxu0 %v22049_v28  ;;  %4146 = vmatpush2.bf16.msra.mxu1 %v22050_v21  ;;  %v22108_v28 = vld [vmem:[#allocation84_spill] sm:$0xff]  ;;  %v4032_v21 = vrot.slane %v17136_v12, %v13946_v48  ;;  %v22117_v12 = vmov 0  }
 0x5f4   :  { %4156 = vmatprep.subr.bf16.mxu0 %v22051_v25  ;;  %4197 = vmatprep.subr.bf16.mxu1 %v22052_v13  ;;  %v22109_v25 = vld [vmem:[#allocation85_spill] sm:$0xff]  ;;  %v22110_v13 = vld [vmem:[#allocation86_spill] sm:$0xff] }
 0x5f6   :  { %4107 = vmatmul.mubr.bf16.vlgmr.msra.gmra.mxu0 %v4025_v50  ;;  %4148 = vmatmul.mubr.bf16.vlgmr.msra.gmra.mxu1 %v4047_v10  ;;  %v22101_v50 = vld [vmem:[#allocation77_spill] sm:$0xff]  ;;  %v22107_v10 = vld [vmem:[#allocation83_spill] sm:$0xff] }
 0x5f7   :  { %4157 = vmatpush1.bf16.msra.mxu0 %v22053_v20  ;;  %4198 = vmatpush1.bf16.msra.mxu1 %v22054_v32  ;;  %v22112_v20 = vld [vmem:[#allocation88_spill] sm:$0xff]  ;;  %v4048_v32 = vcombine.high %v4032_v21, %v4032_v21 }
 0x5f8   :  { %4158 = vmatprep.subr.bf16.mxu0 %v22055_v33  ;;  %4199 = vmatprep.subr.bf16.mxu1 %v22056_v34  ;;  %v22113_v33 = vld [vmem:[#allocation89_spill] sm:$0xff]  ;;  %v22114_v34 = vld [vmem:[#allocation90_spill] sm:$0xff] }
 0x5f9   :  { %4188 = vmatprep.mubr.bf16.mxu0 %v4046_v23  ;;  %4229 = vmatprep.mubr.bf16.mxu1 %v4050_v42  ;;  %v22106_v23 = vld [vmem:[#allocation82_spill] sm:$0xff]  ;;  %v22111_v42 = vld [vmem:[#allocation87_spill] sm:$0xff] }
 0x5fb   :  { %4159 = vmatpush1.bf16.msra.mxu0 %v22057_v35  ;;  %4200 = vmatpush1.bf16.msra.mxu1 %v22058_v36  ;;  %v22115_v35 = vld [vmem:[#allocation91_spill] sm:$0xff]  ;;  %v22116_v36 = vld [vmem:[#allocation92_spill] sm:$0xff] }
 0x5fc   :  { %4160 = vmatprep.subr.bf16.mxu0 %v22059_v37  ;;  %4201 = vmatprep.subr.bf16.mxu1 %v22060_v38  ;;  %v22118_v37 = vld [vmem:[#allocation93_spill] sm:$0xff]  ;;  %v22119_v38 = vld [vmem:[#allocation94_spill] sm:$0xff] }
 0x5ff   :  { %4161 = vmatpush1.bf16.msra.mxu0 %v22061_v39  ;;  %4202 = vmatpush1.bf16.msra.mxu1 %v22062_v53  ;;  %v22120_v39 = vld [vmem:[#allocation95_spill] sm:$0xff]  ;;  %v12402_v53 = vld [vmem:[%s21247_s3 + $0x8e0] ss:$16 sps:$4 sm:$0xff]  }
 0x600   :  { %4162 = vmatprep.subr.bf16.mxu0 %v22063_v61  ;;  %4203 = vmatprep.subr.bf16.mxu1 %v22064_v57  ;;  %v12404_v61 = vld [vmem:[%s21247_s3 + $0x8e4] ss:$16 sps:$4 sm:$0xff]  }
 0x601   :  { %v12410_v57 = vld [vmem:[%s21247_s3 + $0x8c4] ss:$16 sps:$4 sm:$0xff]  }
 0x603   :  { %4163 = vmatpush1.bf16.msra.mxu0 %v22065_v55  ;;  %4204 = vmatpush1.bf16.msra.mxu1 %v22066_v14  ;;  %v22121_v55 = vld [vmem:[#allocation96_spill] sm:$0xff] }
 0x604   :  { %4164 = vmatprep.subr.bf16.mxu0 %v22067_v59  ;;  %4205 = vmatprep.subr.bf16.mxu1 %v22068_v45  ;;  %v12408_v14 = vld [vmem:[%s21247_s3 + $0x8c0] ss:$16 sps:$4 sm:$0xff]   ;;  %v22122_v59 = vld [vmem:[#allocation97_spill] sm:$0xff]  ;;  %v12416_v45 = vld [vmem:[%s21247_s3 + $0x8a4] ss:$16 sps:$4 sm:$0xff]  }
 0x607   :  { %4165 = vmatpush1.bf16.msra.mxu0 %v22069_v54  ;;  %4206 = vmatpush1.bf16.msra.mxu1 %v22070_v31  ;;  %v22123_v54 = vld [vmem:[#allocation98_spill] sm:$0xff] }
 0x608   :  { %4166 = vmatprep.subr.bf16.mxu0 %v22071_v43  ;;  %4207 = vmatprep.subr.bf16.mxu1 %v22072_v41  ;;  %v12414_v31 = vld [vmem:[%s21247_s3 + $0x8a0] ss:$16 sps:$4 sm:$0xff]   ;;  %v22124_v43 = vld [vmem:[#allocation99_spill] sm:$0xff]  ;;  %v12422_v41 = vld [vmem:[%s21247_s3 + $0x884] ss:$16 sps:$4 sm:$0xff]  }
 0x60b   :  { %4167 = vmatpush1.bf16.msra.mxu0 %v22073_v44  ;;  %4208 = vmatpush1.bf16.msra.mxu1 %v22074_v16  ;;  %v22125_v44 = vld [vmem:[#allocation100_spill] sm:$0xff] }
 0x60c   :  { %4168 = vmatprep.subr.bf16.mxu0 %v22075_v56  ;;  %4209 = vmatprep.subr.bf16.mxu1 %v22076_v30  ;;  %v12420_v16 = vld [vmem:[%s21247_s3 + $0x880] ss:$16 sps:$4 sm:$0xff]   ;;  %v22126_v56 = vld [vmem:[#allocation101_spill] sm:$0xff]  ;;  %v12428_v30 = vld [vmem:[%s21247_s3 + $0x864] ss:$16 sps:$4 sm:$0xff]  }
 0x60f   :  { %4169 = vmatpush1.bf16.msra.mxu0 %v22077_v47  ;;  %4210 = vmatpush1.bf16.msra.mxu1 %v22078_v15  ;;  %v22127_v47 = vld [vmem:[#allocation102_spill] sm:$0xff] }
 0x610   :  { %4170 = vmatprep.subr.bf16.mxu0 %v22079_v58  ;;  %4211 = vmatprep.subr.bf16.mxu1 %v22080_v49  ;;  %v12426_v15 = vld [vmem:[%s21247_s3 + $0x860] ss:$16 sps:$4 sm:$0xff]   ;;  %v22128_v58 = vld [vmem:[#allocation103_spill] sm:$0xff]  ;;  %v12434_v49 = vld [vmem:[%s21247_s3 + $0x844] ss:$16 sps:$4 sm:$0xff]  }
 0x613   :  { %4171 = vmatpush1.bf16.msra.mxu0 %v22081_v40  ;;  %4212 = vmatpush1.bf16.msra.mxu1 %v22082_v46  ;;  %v22129_v40 = vld [vmem:[#allocation104_spill] sm:$0xff]  ;;  %v10756_v46 = vld.sshfl [vmem:[%s21697_s20 + $0x2c] sm:$0x1 pattern:$0x75316420] }
 0x614   :  { %4172 = vmatprep.subr.bf16.mxu0 %v22083_v60  ;;  %4213 = vmatprep.subr.bf16.mxu1 %v22084_v62  ;;  %v12432_v60 = vld [vmem:[%s21247_s3 + $0x840] ss:$16 sps:$4 sm:$0xff]   ;;  %v22130_v62 = vld [vmem:[#allocation105_spill] sm:$0xff] }
 0x617   :  { %4173 = vmatpush2.bf16.msra.mxu0 %v22085_v63  ;;  %4214 = vmatpush2.bf16.msra.mxu1 %v22086_v0  ;;  %v12407_v63 = vld [vmem:[%s21247_s3 + $0x8ec] ss:$16 sps:$4 sm:$0xff]   ;;  %v4064_v0 = vrot.slane %v10756_v46, %v13946_v48  ;;  %v12477_v46 = vld [vmem:[%s21247_s3 + $0x968] ss:$16 sps:$4 sm:$0xff]  }
 0x618   :  { %4174 = vmatprep.subr.bf16.mxu0 %v22087_v1  ;;  %4215 = vmatprep.subr.bf16.mxu1 %v22088_v2  ;;  %v22131_v1 = vld [vmem:[#allocation106_spill] sm:$0xff]  ;;  %v12405_v2 = vld [vmem:[%s21247_s3 + $0x8e8] ss:$16 sps:$4 sm:$0xff]  }
 0x61b   :  { %4175 = vmatpush2.bf16.msra.mxu0 %v22089_v3  ;;  %4216 = vmatpush2.bf16.msra.mxu1 %v22090_v4  ;;  %v12413_v3 = vld [vmem:[%s21247_s3 + $0x8cc] ss:$16 sps:$4 sm:$0xff]   ;;  %v12411_v4 = vld [vmem:[%s21247_s3 + $0x8c8] ss:$16 sps:$4 sm:$0xff]  }
 0x61c   :  { %4176 = vmatprep.subr.bf16.mxu0 %v22091_v6  ;;  %4217 = vmatprep.subr.bf16.mxu1 %v22092_v7  ;;  %v12419_v6 = vld [vmem:[%s21247_s3 + $0x8ac] ss:$16 sps:$4 sm:$0xff]   ;;  %v12417_v7 = vld [vmem:[%s21247_s3 + $0x8a8] ss:$16 sps:$4 sm:$0xff]  }
 0x61f   :  { %4177 = vmatpush2.bf16.msra.mxu0 %v22093_v8  ;;  %4218 = vmatpush2.bf16.msra.mxu1 %v22094_v9  ;;  %v12425_v8 = vld [vmem:[%s21247_s3 + $0x88c] ss:$16 sps:$4 sm:$0xff]   ;;  %v12423_v9 = vld [vmem:[%s21247_s3 + $0x888] ss:$16 sps:$4 sm:$0xff]  }
 0x620   :  { %4178 = vmatprep.subr.bf16.mxu0 %v22095_v11  ;;  %4219 = vmatprep.subr.bf16.mxu1 %v22096_v22  ;;  %v12431_v11 = vld [vmem:[%s21247_s3 + $0x86c] ss:$16 sps:$4 sm:$0xff]   ;;  %v12429_v22 = vld [vmem:[%s21247_s3 + $0x868] ss:$16 sps:$4 sm:$0xff]  }
 0x623   :  { %4179 = vmatpush2.bf16.msra.mxu0 %v22097_v29  ;;  %4220 = vmatpush2.bf16.msra.mxu1 %v22098_v26  ;;  %v12437_v29 = vld [vmem:[%s21247_s3 + $0x84c] ss:$16 sps:$4 sm:$0xff]   ;;  %v12435_v26 = vld [vmem:[%s21247_s3 + $0x848] ss:$16 sps:$4 sm:$0xff]  }
 0x624   :  { %4180 = vmatprep.subr.bf16.mxu0 %v22099_v27  ;;  %4221 = vmatprep.subr.bf16.mxu1 %v22100_v5 }
 0x627   :  { %4181 = vmatpush2.bf16.msra.mxu0 %v22101_v50  ;;  %4222 = vmatpush2.bf16.msra.mxu1 %v22102_v24  ;;  %v12440_v50 = vld [vmem:[%s21247_s3 + $0x824] ss:$16 sps:$4 sm:$0xff]   ;;  %v22132_v24 = vld [vmem:[#allocation107_spill] sm:$0xff] }
 0x628   :  { %4182 = vmatprep.subr.bf16.mxu0 %v22103_v18  ;;  %4223 = vmatprep.subr.bf16.mxu1 %v22104_v17  ;;  %v22133_v17 = vld [vmem:[#allocation108_spill] sm:$0xff] }
 0x62b   :  { %4183 = vmatpush2.bf16.msra.mxu0 %v22105_v19  ;;  %4224 = vmatpush2.bf16.msra.mxu1 %v22106_v23  ;;  %v12438_v23 = vld [vmem:[%s21247_s3 + $0x820] ss:$16 sps:$4 sm:$0xff]  }
 0x62c   :  { %4184 = vmatprep.subr.bf16.mxu0 %v22107_v10  ;;  %4225 = vmatprep.subr.bf16.mxu1 %v22108_v28  ;;  %v12443_v10 = vld [vmem:[%s21247_s3 + $0x82c] ss:$16 sps:$4 sm:$0xff]  }
 0x62f   :  { %4185 = vmatpush2.bf16.msra.mxu0 %v22109_v25  ;;  %4226 = vmatpush2.bf16.msra.mxu1 %v22110_v13  ;;  %v12441_v25 = vld [vmem:[%s21247_s3 + $0x828] ss:$16 sps:$4 sm:$0xff]  }
 0x630   :  { %4186 = vmatprep.subr.bf16.mxu0 %v22111_v42  ;;  %4227 = vmatprep.subr.bf16.mxu1 %v22112_v20  ;;  %v22134_v13 = vld [vmem:[#allocation109_spill] sm:$0xff]  ;;  %v22135_v20 = vld [vmem:[#allocation110_spill] sm:$0xff] }
 0x633   :  { %4187 = vmatpush2.bf16.msra.mxu0 %v22113_v33  ;;  %4228 = vmatpush2.bf16.msra.mxu1 %v22114_v34 }
 0x634   :  { %4238 = vmatprep.subr.bf16.mxu0 %v22115_v35  ;;  %4672 = vmatprep.subr.bf16.mxu1 %v12404_v61  ;;  %v12446_v35 = vld [vmem:[%s21247_s3 + $0x804] ss:$16 sps:$4 sm:$0xff]  }
 0x635   :  { %v12452_v61 = vld [vmem:[%s21247_s3 + $0x9e4] ss:$16 sps:$4 sm:$0xff]  }
 0x636   :  { %4189 = vmatmul.mubr.bf16.vlgmr.msra.gmra.mxu0 %v4032_v21  ;;  %4230 = vmatmul.mubr.bf16.vlgmr.msra.gmra.mxu1 %v4048_v32 }
 0x637   :  { %4239 = vmatpush1.bf16.msra.mxu0 %v22116_v36  ;;  %4270 = vmatprep.mubr.bf16.mxu0 %v22117_v12  ;;  %v12444_v36 = vld [vmem:[%s21247_s3 + $0x800] ss:$16 sps:$4 sm:$0xff]  }
 0x638   :  { %4240 = vmatprep.subr.bf16.mxu0 %v22118_v37  ;;  %4673 = vmatpush1.bf16.msra.mxu1 %v12402_v53  ;;  %v12449_v37 = vld [vmem:[%s21247_s3 + $0x80c] ss:$16 sps:$4 sm:$0xff]   ;;  %v12447_v53 = vld [vmem:[%s21247_s3 + $0x808] ss:$16 sps:$4 sm:$0xff]  }
 0x639   :  { %4674 = vmatprep.subr.bf16.mxu1 %v12410_v57  ;;  %v12450_v57 = vld [vmem:[%s21247_s3 + $0x9e0] ss:$16 sps:$4 sm:$0xff]  }
 0x63b   :  { %4241 = vmatpush1.bf16.msra.mxu0 %v22119_v38 }
 0x63c   :  { %4242 = vmatprep.subr.bf16.mxu0 %v22120_v39  ;;  %4675 = vmatpush1.bf16.msra.mxu1 %v12408_v14  ;;  %v12453_v14 = vld [vmem:[%s21247_s3 + $0x9e8] ss:$16 sps:$4 sm:$0xff]  }
 0x63d   :  { %4676 = vmatprep.subr.bf16.mxu1 %v12416_v45  ;;  %v12461_v45 = vld [vmem:[%s21247_s3 + $0x9cc] ss:$16 sps:$4 sm:$0xff]  }
 0x63f   :  { %4243 = vmatpush1.bf16.msra.mxu0 %v22121_v55  ;;  %v12455_v55 = vld [vmem:[%s21247_s3 + $0x9ec] ss:$16 sps:$4 sm:$0xff]  }
 0x640   :  { %4244 = vmatprep.subr.bf16.mxu0 %v22122_v59  ;;  %4677 = vmatpush1.bf16.msra.mxu1 %v12414_v31  ;;  %v12458_v59 = vld [vmem:[%s21247_s3 + $0x9c4] ss:$16 sps:$4 sm:$0xff]   ;;  %v12459_v31 = vld [vmem:[%s21247_s3 + $0x9c8] ss:$16 sps:$4 sm:$0xff]  }
 0x641   :  { %4678 = vmatprep.subr.bf16.mxu1 %v12422_v41  ;;  %v12467_v41 = vld [vmem:[%s21247_s3 + $0x9ac] ss:$16 sps:$4 sm:$0xff]  }
 0x643   :  { %4245 = vmatpush1.bf16.msra.mxu0 %v22123_v54  ;;  %v12456_v54 = vld [vmem:[%s21247_s3 + $0x9c0] ss:$16 sps:$4 sm:$0xff]  }
 0x644   :  { %4246 = vmatprep.subr.bf16.mxu0 %v22124_v43  ;;  %4679 = vmatpush1.bf16.msra.mxu1 %v12420_v16  ;;  %v12464_v43 = vld [vmem:[%s21247_s3 + $0x9a4] ss:$16 sps:$4 sm:$0xff]   ;;  %v12465_v16 = vld [vmem:[%s21247_s3 + $0x9a8] ss:$16 sps:$4 sm:$0xff]  }
 0x645   :  { %4680 = vmatprep.subr.bf16.mxu1 %v12428_v30  ;;  %v12473_v30 = vld [vmem:[%s21247_s3 + $0x98c] ss:$16 sps:$4 sm:$0xff]  }
 0x647   :  { %4247 = vmatpush1.bf16.msra.mxu0 %v22125_v44  ;;  %v12462_v44 = vld [vmem:[%s21247_s3 + $0x9a0] ss:$16 sps:$4 sm:$0xff]  }
 0x648   :  { %4248 = vmatprep.subr.bf16.mxu0 %v22126_v56  ;;  %4681 = vmatpush1.bf16.msra.mxu1 %v12426_v15  ;;  %v12470_v56 = vld [vmem:[%s21247_s3 + $0x984] ss:$16 sps:$4 sm:$0xff]   ;;  %v12471_v15 = vld [vmem:[%s21247_s3 + $0x988] ss:$16 sps:$4 sm:$0xff]  }
 0x649   :  { %4682 = vmatprep.subr.bf16.mxu1 %v12434_v49  ;;  %v12479_v49 = vld [vmem:[%s21247_s3 + $0x96c] ss:$16 sps:$4 sm:$0xff]  }
 0x64b   :  { %4249 = vmatpush1.bf16.msra.mxu0 %v22127_v47  ;;  %v12468_v47 = vld [vmem:[%s21247_s3 + $0x980] ss:$16 sps:$4 sm:$0xff]  }
 0x64c   :  { %4250 = vmatprep.subr.bf16.mxu0 %v22128_v58  ;;  %4683 = vmatpush1.bf16.msra.mxu1 %v12432_v60  ;;  %v12476_v58 = vld [vmem:[%s21247_s3 + $0x964] ss:$16 sps:$4 sm:$0xff]  }
 0x64d   :  { %4684 = vmatprep.subr.bf16.mxu1 %v12440_v50  ;;  %v12482_v60 = vld [vmem:[%s21247_s3 + $0x944] ss:$16 sps:$4 sm:$0xff]  }
 0x64f   :  { %4251 = vmatpush1.bf16.msra.mxu0 %v22129_v40  ;;  %v12474_v40 = vld [vmem:[%s21247_s3 + $0x960] ss:$16 sps:$4 sm:$0xff]  }
 0x650   :  { %4252 = vmatprep.subr.bf16.mxu0 %v22130_v62  ;;  %4685 = vmatpush1.bf16.msra.mxu1 %v12438_v23  ;;  %v12485_v62 = vld [vmem:[%s21247_s3 + $0x94c] ss:$16 sps:$4 sm:$0xff]  }
 0x651   :  { %4686 = vmatprep.subr.bf16.mxu1 %v12446_v35 }
 0x653   :  { %4253 = vmatpush1.bf16.msra.mxu0 %v22131_v1  ;;  %v12488_v1 = vld [vmem:[%s21247_s3 + $0x924] ss:$16 sps:$4 sm:$0xff]  }
 0x654   :  { %4713 = vmatprep.subr.bf16.mxu0 %v12407_v63  ;;  %4687 = vmatpush1.bf16.msra.mxu1 %v12444_v36  ;;  %v12480_v63 = vld [vmem:[%s21247_s3 + $0x940] ss:$16 sps:$4 sm:$0xff]  }
 0x655   :  { %4688 = vmatprep.subr.bf16.mxu1 %v12452_v61 }
 0x656   :  { %4271 = vmatmul.mubr.bf16.vlgmr.msra.gmra.mxu0 %v4064_v0  ;;  %v12483_v0 = vld [vmem:[%s21247_s3 + $0x948] ss:$16 sps:$4 sm:$0xff]  }
 0x657   :  { %4714 = vmatpush1.bf16.msra.mxu0 %v12405_v2  ;;  %v12486_v2 = vld [vmem:[%s21247_s3 + $0x920] ss:$16 sps:$4 sm:$0xff]  }
 0x658   :  { %4715 = vmatprep.subr.bf16.mxu0 %v12413_v3  ;;  %4689 = vmatpush2.bf16.msra.mxu1 %v12450_v57  ;;  %v12491_v3 = vld [vmem:[%s21247_s3 + $0x92c] ss:$16 sps:$4 sm:$0xff]  }
 0x659   :  { %4690 = vmatprep.subr.bf16.mxu1 %v12458_v59 }
 0x65b   :  { %4716 = vmatpush1.bf16.msra.mxu0 %v12411_v4  ;;  %v12489_v4 = vld [vmem:[%s21247_s3 + $0x928] ss:$16 sps:$4 sm:$0xff]  }
 0x65c   :  { %4717 = vmatprep.subr.bf16.mxu0 %v12419_v6  ;;  %4691 = vmatpush2.bf16.msra.mxu1 %v12456_v54  ;;  %v12494_v6 = vld [vmem:[%s21247_s3 + $0x904] ss:$16 sps:$4 sm:$0xff]  }
 0x65d   :  { %4692 = vmatprep.subr.bf16.mxu1 %v12464_v43 }
 0x65f   :  { %4718 = vmatpush1.bf16.msra.mxu0 %v12417_v7  ;;  %v12492_v7 = vld [vmem:[%s21247_s3 + $0x900] ss:$16 sps:$4 sm:$0xff]  }
 0x660   :  { %4719 = vmatprep.subr.bf16.mxu0 %v12425_v8  ;;  %4693 = vmatpush2.bf16.msra.mxu1 %v12462_v44  ;;  %v12497_v8 = vld [vmem:[%s21247_s3 + $0x90c] ss:$16 sps:$4 sm:$0xff]  }
 0x661   :  { %4694 = vmatprep.subr.bf16.mxu1 %v12470_v56 }
 0x663   :  { %4720 = vmatpush1.bf16.msra.mxu0 %v12423_v9  ;;  %v12495_v9 = vld [vmem:[%s21247_s3 + $0x908] ss:$16 sps:$4 sm:$0xff]  }
 0x664   :  { %4721 = vmatprep.subr.bf16.mxu0 %v12431_v11  ;;  %4695 = vmatpush2.bf16.msra.mxu1 %v12468_v47  ;;  %v22136_v11 = vld [vmem:[#allocation111_spill] sm:$0xff] }
 0x665   :  { %4696 = vmatprep.subr.bf16.mxu1 %v12476_v58 }
 0x667   :  { %4722 = vmatpush1.bf16.msra.mxu0 %v12429_v22  ;;  %v22137_v22 = vld [vmem:[#allocation112_spill] sm:$0xff] }
 0x668   :  { %4723 = vmatprep.subr.bf16.mxu0 %v12437_v29  ;;  %4697 = vmatpush2.bf16.msra.mxu1 %v12474_v40 }
 0x669   :  { %4698 = vmatprep.subr.bf16.mxu1 %v12482_v60  ;;  %v17469_v60 = vld [vmem:[%s21695_s26 + $0x170] ss:$8 sps:$4 sm:$0xff]  }
 0x66b   :  { %4724 = vmatpush1.bf16.msra.mxu0 %v12435_v26 }
 0x66c   :  { %4725 = vmatprep.subr.bf16.mxu0 %v12443_v10  ;;  %4699 = vmatpush2.bf16.msra.mxu1 %v12480_v63  ;;  %v17481_v63 = vld [vmem:[%s21695_s26 + $0x164] ss:$8 sps:$4 sm:$0xff]  }
 0x66d   :  { %4700 = vmatprep.subr.bf16.mxu1 %v12488_v1  ;;  %v17493_v1 = vld [vmem:[%s21695_s26 + $0x160] ss:$8 sps:$4 sm:$0xff]  }
 0x66f   :  { %4726 = vmatpush1.bf16.msra.mxu0 %v12441_v25 }
 0x670   :  { %4727 = vmatprep.subr.bf16.mxu0 %v12449_v37  ;;  %4701 = vmatpush2.bf16.msra.mxu1 %v12486_v2  ;;  %v17499_v2 = vld [vmem:[%s21695_s26 + $0x54] ss:$8 sps:$4 sm:$0xff]  }
 0x671   :  { %4702 = vmatprep.subr.bf16.mxu1 %v12494_v6  ;;  %v17517_v6 = vld [vmem:[%s21695_s26 + $0x150] ss:$8 sps:$4 sm:$0xff]  }
 0x673   :  { %4728 = vmatpush1.bf16.msra.mxu0 %v12447_v53  ;;  %v17451_v53 = vld [vmem:[%s21697_s20 + $0x2d] sm:$0xff] }
 0x674   :  { %4729 = vmatprep.subr.bf16.mxu0 %v12455_v55  ;;  %4703 = vmatpush2.bf16.msra.mxu1 %v12492_v7  ;;  %v17455_v57 = vrot.slane %v17451_v53, %v13946_v48  ;;  %v17523_v7 = vld [vmem:[%s21695_s26 + $0x44] ss:$8 sps:$4 sm:$0xff]  }
 0x675   :  { %4835 = vmatprep.subr.bf16.mxu1 %v22136_v11  ;;  %v17541_v11 = vld [vmem:[%s21695_s26 + $0x140] ss:$8 sps:$4 sm:$0xff]  }
 0x676   :  { %v3945_v27 = vpop.f32.mrf.mxu0  ;;  %v3986_v5 = vpop.f32.mrf.mxu1 }
 0x677   :  { %v17316_v18 = vadd.f32 %v3945_v27, %v22132_v24  ;;  %v17319_v19 = vadd.f32 %v3986_v5, %v22133_v17  ;;  %4730 = vmatpush2.bf16.msra.mxu0 %v12453_v14 }
 0x678   :  { %v3947_v28 = vpop.f32.mrf.mxu0  ;;  %v3988_v21 = vpop.f32.mrf.mxu1  ;;  %4731 = vmatprep.subr.bf16.mxu0 %v12461_v45 }
 0x679   :  { %v17331_v42 = vadd.f32 %v3947_v28, %v22134_v13  ;;  %v17334_v32 = vadd.f32 %v3988_v21, %v22135_v20 }
 0x67a   :  { %v3949_v33 = vpop.f32.mrf.mxu0  ;;  %v3990_v34 = vpop.f32.mrf.mxu1 }
 0x67b   :  { %4732 = vmatpush2.bf16.msra.mxu0 %v12459_v31  ;;  %v4778_v31 = vcombine.high %v17455_v57, %v17455_v57 }
 0x67c   :  { %v3950_v38 = vpop.f32.mrf.mxu0  ;;  %v3991_v39 = vpop.f32.mrf.mxu1  ;;  %4733 = vmatprep.subr.bf16.mxu0 %v12467_v41 }
 0x67d   :  { %v4800_v47 = vrot.slane %v4778_v31, %v13946_v48  ;;  %v17715_v31 = vld [vmem:[%s21695_s26 + $0xc4] ss:$8 sps:$4 sm:$0xff]  }
 0x67e   :  { %22140 = vst [vmem:[#allocation7_spill] sm:$0xff] %v17715_v31 }
 0x67f   :  { %4734 = vmatpush2.bf16.msra.mxu0 %v12465_v16  ;;  %v4810_v40 = vcombine.high %v4800_v47, %v4800_v47 }
 0x680   :  { %4735 = vmatprep.subr.bf16.mxu0 %v12473_v30 }
 0x683   :  { %4736 = vmatpush2.bf16.msra.mxu0 %v12471_v15 }
 0x684   :  { %4737 = vmatprep.subr.bf16.mxu0 %v12479_v49 }
 0x687   :  { %4738 = vmatpush2.bf16.msra.mxu0 %v12477_v46  ;;  %v17463_v46 = vld [vmem:[%s21695_s26 + $0x70] ss:$8 sps:$4 sm:$0xff]  }
 0x688   :  { %4739 = vmatprep.subr.bf16.mxu0 %v12485_v62  ;;  %v17475_v62 = vld [vmem:[%s21695_s26 + $0x64] ss:$8 sps:$4 sm:$0xff]  }
 0x68b   :  { %4740 = vmatpush2.bf16.msra.mxu0 %v12483_v0  ;;  %v17487_v0 = vld [vmem:[%s21695_s26 + $0x60] ss:$8 sps:$4 sm:$0xff]  }
 0x68c   :  { %4741 = vmatprep.subr.bf16.mxu0 %v12491_v3  ;;  %v17505_v3 = vld [vmem:[%s21695_s26 + $0x154] ss:$8 sps:$4 sm:$0xff]  }
 0x68f   :  { %4742 = vmatpush2.bf16.msra.mxu0 %v12489_v4  ;;  %v17511_v4 = vld [vmem:[%s21695_s26 + $0x50] ss:$8 sps:$4 sm:$0xff]  }
 0x690   :  { %4743 = vmatprep.subr.bf16.mxu0 %v12497_v8  ;;  %v17529_v8 = vld [vmem:[%s21695_s26 + $0x144] ss:$8 sps:$4 sm:$0xff]  }
 0x693   :  { %4744 = vmatpush2.bf16.msra.mxu0 %v12495_v9  ;;  %v17535_v9 = vld [vmem:[%s21695_s26 + $0x40] ss:$8 sps:$4 sm:$0xff]  }
 0x694   :  { %4876 = vmatprep.subr.bf16.mxu0 %v22137_v22  ;;  %v17547_v22 = vld [vmem:[%s21695_s26 + $0x34] ss:$8 sps:$4 sm:$0xff]  }
 0x6b6   :  { %v4108_v29 = vpop.f32.mrf.mxu0  ;;  %v4149_v26 = vpop.f32.mrf.mxu1 }
 0x6b7   :  { %v4109_v27 = vadd.f32 %v4108_v29, %v14478_v51  ;;  %v17553_v29 = vld [vmem:[%s21695_s26 + $0x134] ss:$8 sps:$4 sm:$0xff]  }
 0x6b8   :  { %v4110_v5 = vpop.f32.mrf.mxu0  ;;  %v4151_v50 = vpop.f32.mrf.mxu1 }
 0x6b9   :  { %v4111_v24 = vadd.f32 %v4110_v5, %v14481_v52  ;;  %v4150_v17 = vadd.f32 %v4149_v26, %v4109_v27  ;;  %v17559_v26 = vld [vmem:[%s21695_s26 + $0x30] ss:$8 sps:$4 sm:$0xff]   ;;  %v17571_v5 = vld [vmem:[%s21695_s26 + $0x24] ss:$8 sps:$4 sm:$0xff]  }
 0x6ba   :  { %v4112_v23 = vpop.f32.mrf.mxu0  ;;  %v4153_v10 = vpop.f32.mrf.mxu1  ;;  %v17565_v27 = vld [vmem:[%s21695_s26 + $0x130] ss:$8 sps:$4 sm:$0xff]  }
 0x6bb   :  { %v4152_v28 = vadd.f32 %v4151_v50, %v4111_v24  ;;  %v17577_v50 = vld [vmem:[%s21695_s26 + $0x124] ss:$8 sps:$4 sm:$0xff]   ;;  %v17583_v24 = vld [vmem:[%s21695_s26 + $0x20] ss:$8 sps:$4 sm:$0xff]   ;;  %v17595_v23 = vld [vmem:[%s21695_s26 + $0x14] ss:$8 sps:$4 sm:$0xff]  }
 0x6bc   :  { %v4113_v21 = vpop.f32.mrf.mxu0  ;;  %v4154_v25 = vpop.f32.mrf.mxu1  ;;  %v17601_v10 = vld [vmem:[%s21695_s26 + $0x114] ss:$8 sps:$4 sm:$0xff]  }
 0x6bd   :  { %v17613_v21 = vld [vmem:[%s21695_s26 + $0x110] ss:$8 sps:$4 sm:$0xff]   ;;  %v17619_v25 = vld [vmem:[%s21695_s26 + $0x4] ss:$8 sps:$4 sm:$0xff]  }
 0x6f6   :  { %v4190_v13 = vpop.f32.mrf.mxu0  ;;  %v4231_v20 = vpop.f32.mrf.mxu1 }
 0x6f7   :  { %v4191_v39 = vadd.f32 %v4190_v13, %v4150_v17  ;;  %v17589_v17 = vld [vmem:[%s21695_s26 + $0x120] ss:$8 sps:$4 sm:$0xff]   ;;  %v17625_v13 = vld [vmem:[%s21695_s26 + $0x104] ss:$8 sps:$4 sm:$0xff]  }
 0x6f8   :  { %v4192_v33 = vpop.f32.mrf.mxu0  ;;  %v4233_v34 = vpop.f32.mrf.mxu1 }
 0x6f9   :  { %v4193_v61 = vadd.f32 %v4192_v33, %v4152_v28  ;;  %v4232_v55 = vadd.f32 %v4231_v20, %v4191_v39  ;;  %v17607_v28 = vld [vmem:[%s21695_s26 + $0x10] ss:$8 sps:$4 sm:$0xff]   ;;  %v17631_v20 = vld [vmem:[%s21695_s26] ss:$8 sps:$4 sm:$0xff]   ;;  %v17673_v39 = vld [vmem:[%s21695_s26 + $0x1e4] ss:$8 sps:$4 sm:$0xff]  }
 0x6fa   :  { %v4194_v35 = vpop.f32.mrf.mxu0  ;;  %v4235_v36 = vpop.f32.mrf.mxu1  ;;  %v17637_v33 = vld [vmem:[%s21695_s26 + $0x100] ss:$8 sps:$4 sm:$0xff]  }
 0x6fb   :  { %v4234_v59 = vadd.f32 %v4233_v34, %v4193_v61  ;;  %v17643_v34 = vld [vmem:[%s21695_s26 + $0xf4] ss:$8 sps:$4 sm:$0xff]   ;;  %v17655_v36 = vld [vmem:[%s21695_s26 + $0xf0] ss:$8 sps:$4 sm:$0xff]   ;;  %v17679_v61 = vld [vmem:[%s21695_s26 + $0xe0] ss:$8 sps:$4 sm:$0xff]  }
 0x6fc   :  { %v4195_v37 = vpop.f32.mrf.mxu0  ;;  %v4236_v38 = vpop.f32.mrf.mxu1  ;;  %v17649_v35 = vld [vmem:[%s21695_s26 + $0x1f4] ss:$8 sps:$4 sm:$0xff]  }
 0x6fd   :  { %v17661_v37 = vld [vmem:[%s21695_s26 + $0x1f0] ss:$8 sps:$4 sm:$0xff]   ;;  %v17667_v38 = vld [vmem:[%s21695_s26 + $0xe4] ss:$8 sps:$4 sm:$0xff]  }
 0x716   :  { %v4272_v14 = vpop.f32.mrf.mxu0 }
 0x717   :  { %v4273_v45 = vadd.f32 %v4272_v14, %v4232_v55  ;;  %v17685_v55 = vld [vmem:[%s21695_s26 + $0x1e0] ss:$8 sps:$4 sm:$0xff]   ;;  %v17691_v14 = vld [vmem:[%s21695_s26 + $0xd4] ss:$8 sps:$4 sm:$0xff]  }
 0x718   :  { %v4274_v54 = vpop.f32.mrf.mxu0 }
 0x719   :  { %vm4279_vm8 = vcmp.ge.f32.partialorder %v4273_v45, 0.0  ;;  %v4281_v43 = vmul.f32 0.1, %v4273_v45  ;;  %v4275_v41 = vadd.f32 %v4274_v54, %v4234_v59  ;;  %v17697_v59 = vld [vmem:[%s21695_s26 + $0x1d4] ss:$8 sps:$4 sm:$0xff]  }
 0x71a   :  { %v4276_v44 = vpop.f32.mrf.mxu0  ;;  %v17709_v54 = vld [vmem:[%s21695_s26 + $0x1d0] ss:$8 sps:$4 sm:$0xff]  }
 0x71b   :  { %vm4280_vm9 = vcmp.ge.f32.partialorder %v4275_v41, 0.0  ;;  %v4282_v16 = vmul.f32 0.1, %v4275_v41  ;;  %v4283_v56 = vsel %vm4279_vm8, %v4273_v45, %v4281_v43  ;;  %v17703_v45 = vld [vmem:[%s21695_s26 + $0xd0] ss:$8 sps:$4 sm:$0xff]   ;;  %22139 = vst [vmem:[#allocation6_spill] sm:$0xff] %v17709_v54 }
 0x71c   :  { %v4277_v30 = vpop.f32.mrf.mxu0  ;;  %v4285_v49 = vpack.c.bf16 %v4283_v56, %v4283_v56  ;;  %22138 = vst [vmem:[#allocation5_spill] sm:$0xff] %v17703_v45  ;;  %v17721_v43 = vld [vmem:[%s21695_s26 + $0x1c4] ss:$8 sps:$4 sm:$0xff]   ;;  %v17733_v44 = vld [vmem:[%s21695_s26 + $0x1c0] ss:$8 sps:$4 sm:$0xff]  }
 0x71d   :  { %v4284_v15 = vsel %vm4280_vm9, %v4275_v41, %v4282_v16  ;;  %22141 = vst [vmem:[#allocation8_spill] sm:$0xff] %v17721_v43  ;;  %v17727_v41 = vld [vmem:[%s21695_s26 + $0xc0] ss:$8 sps:$4 sm:$0xff]   ;;  %22143 = vst [vmem:[#allocation10_spill] sm:$0xff] %v17733_v44  ;;  %v17739_v16 = vld [vmem:[%s21695_s26 + $0xb4] ss:$8 sps:$4 sm:$0xff]   ;;  %v4763_v30 = vcombine.high %v17451_v53, %v17451_v53 }
 0x71e   :  { %v4286_v58 = vpack.c.bf16 %v4284_v15, %v4284_v15  ;;  %22142 = vst [vmem:[#allocation9_spill] sm:$0xff] %v17727_v41  ;;  %22144 = vst [vmem:[#allocation11_spill] sm:$0xff] %v17739_v16  ;;  %v17745_v56 = vld [vmem:[%s21695_s26 + $0x1b4] ss:$8 sps:$4 sm:$0xff]   ;;  %v17759_v15 = vld [vmem:[%s21695_s26 + $0x1b0] ss:$8 sps:$4 sm:$0xff]  }
 0x71f   :  { %22145 = vst [vmem:[#allocation12_spill] sm:$0xff] %v17745_v56  ;;  %22147 = vst [vmem:[#allocation14_spill] sm:$0xff] %v17759_v15  ;;  %v17771_v53 = vld [vmem:[%s21695_s26 + $0x1a4] ss:$8 sps:$4 sm:$0xff]  }
 0x720   :  { %4704 = vmatprep.mubr.bf16.mxu1 %v4286_v58  ;;  %4745 = vmatprep.mubr.bf16.mxu0 %v4286_v58  ;;  %v17765_v58 = vld [vmem:[%s21695_s26 + $0xa4] ss:$8 sps:$4 sm:$0xff]   ;;  %22149 = vst [vmem:[#allocation16_spill] sm:$0xff] %v17771_v53 }
 0x721   :  { %4705 = vmatmul.mubr.bf16.vlgmr.msra.gmra.mxu1 %v4285_v49  ;;  %4746 = vmatmul.mubr.bf16.vlgmr.msra.gmra.mxu0 %v4285_v49  ;;  %22148 = vst [vmem:[#allocation15_spill] sm:$0xff] %v17765_v58  ;;  %v17775_v49 = vrot.slane %v4763_v30, %v13946_v48  ;;  %v17798_v30 = vld [vmem:[%s21695_s26 + $0x194] ss:$8 sps:$4 sm:$0xff]  }
 0x722   :  { %4836 = vmatpush1.bf16.msra.mxu1 %v17463_v46  ;;  %4877 = vmatpush1.bf16.msra.mxu0 %v17469_v60  ;;  %22153 = vst [vmem:[#allocation20_spill] sm:$0xff] %v17798_v30 }
 0x723   :  { %4837 = vmatprep.subr.bf16.mxu1 %v17475_v62  ;;  %4878 = vmatprep.subr.bf16.mxu0 %v17481_v63 }
 0x724   :  { %4867 = vmatprep.mubr.bf16.mxu1 %v4800_v47  ;;  %4908 = vmatprep.mubr.bf16.mxu0 %v4810_v40  ;;  %v17753_v47 = vld [vmem:[%s21695_s26 + $0xb0] ss:$8 sps:$4 sm:$0xff]   ;;  %v17780_v40 = vld [vmem:[%s21695_s26 + $0xa0] ss:$8 sps:$4 sm:$0xff]  }
 0x725   :  { %22146 = vst [vmem:[#allocation13_spill] sm:$0xff] %v17753_v47  ;;  %22150 = vst [vmem:[#allocation17_spill] sm:$0xff] %v17780_v40 }
 0x726   :  { %4838 = vmatpush1.bf16.msra.mxu1 %v17487_v0  ;;  %4879 = vmatpush1.bf16.msra.mxu0 %v17493_v1 }
 0x727   :  { %4839 = vmatprep.subr.bf16.mxu1 %v17499_v2  ;;  %4880 = vmatprep.subr.bf16.mxu0 %v17505_v3 }
 0x72a   :  { %4840 = vmatpush1.bf16.msra.mxu1 %v17511_v4  ;;  %4881 = vmatpush1.bf16.msra.mxu0 %v17517_v6 }
 0x72b   :  { %4841 = vmatprep.subr.bf16.mxu1 %v17523_v7  ;;  %4882 = vmatprep.subr.bf16.mxu0 %v17529_v8 }
 0x72e   :  { %4842 = vmatpush1.bf16.msra.mxu1 %v17535_v9  ;;  %4883 = vmatpush1.bf16.msra.mxu0 %v17541_v11 }
 0x72f   :  { %4843 = vmatprep.subr.bf16.mxu1 %v17547_v22  ;;  %4884 = vmatprep.subr.bf16.mxu0 %v17553_v29 }
 0x732   :  { %4844 = vmatpush1.bf16.msra.mxu1 %v17559_v26  ;;  %4885 = vmatpush1.bf16.msra.mxu0 %v17565_v27 }
 0x733   :  { %4845 = vmatprep.subr.bf16.mxu1 %v17571_v5  ;;  %4886 = vmatprep.subr.bf16.mxu0 %v17577_v50 }
 0x736   :  { %4846 = vmatpush1.bf16.msra.mxu1 %v17583_v24  ;;  %4887 = vmatpush1.bf16.msra.mxu0 %v17589_v17 }
 0x737   :  { %4847 = vmatprep.subr.bf16.mxu1 %v17595_v23  ;;  %4888 = vmatprep.subr.bf16.mxu0 %v17601_v10 }
 0x73a   :  { %4848 = vmatpush1.bf16.msra.mxu1 %v17607_v28  ;;  %4889 = vmatpush1.bf16.msra.mxu0 %v17613_v21 }
 0x73b   :  { %4849 = vmatprep.subr.bf16.mxu1 %v17619_v25  ;;  %4890 = vmatprep.subr.bf16.mxu0 %v17625_v13 }
 0x73e   :  { %4850 = vmatpush1.bf16.msra.mxu1 %v17631_v20  ;;  %4891 = vmatpush1.bf16.msra.mxu0 %v17637_v33 }
 0x73f   :  { %4851 = vmatprep.subr.bf16.mxu1 %v17643_v34  ;;  %4892 = vmatprep.subr.bf16.mxu0 %v17649_v35 }
 0x742   :  { %4852 = vmatpush2.bf16.msra.mxu1 %v17655_v36  ;;  %4893 = vmatpush2.bf16.msra.mxu0 %v17661_v37 }
 0x743   :  { %4853 = vmatprep.subr.bf16.mxu1 %v17667_v38  ;;  %4894 = vmatprep.subr.bf16.mxu0 %v17673_v39 }
 0x746   :  { %4854 = vmatpush2.bf16.msra.mxu1 %v17679_v61  ;;  %4895 = vmatpush2.bf16.msra.mxu0 %v17685_v55 }
 0x747   :  { %4855 = vmatprep.subr.bf16.mxu1 %v17691_v14  ;;  %4896 = vmatprep.subr.bf16.mxu0 %v17697_v59 }
 0x74a   :  { %4856 = vmatpush2.bf16.msra.mxu1 %v17703_v45  ;;  %4897 = vmatpush2.bf16.msra.mxu0 %v17709_v54 }
 0x74b   :  { %4857 = vmatprep.subr.bf16.mxu1 %v17715_v31  ;;  %4898 = vmatprep.subr.bf16.mxu0 %v17721_v43 }
 0x74e   :  { %4858 = vmatpush2.bf16.msra.mxu1 %v17727_v41  ;;  %4899 = vmatpush2.bf16.msra.mxu0 %v17733_v44 }
 0x74f   :  { %4859 = vmatprep.subr.bf16.mxu1 %v17739_v16  ;;  %4900 = vmatprep.subr.bf16.mxu0 %v17745_v56  ;;  %v12538_v56 = vld [vmem:[%s21247_s3 + $0xa28] ss:$16 sps:$4 sm:$0xff]  }
 0x752   :  { %4860 = vmatpush2.bf16.msra.mxu1 %v17753_v47  ;;  %4901 = vmatpush2.bf16.msra.mxu0 %v17759_v15  ;;  %v17808_v15 = vld [vmem:[%s21695_s26 + $0x90] ss:$8 sps:$4 sm:$0xff]  }
 0x753   :  { %4861 = vmatprep.subr.bf16.mxu1 %v17765_v58  ;;  %4902 = vmatprep.subr.bf16.mxu0 %v17771_v53  ;;  %v17786_v58 = vld [vmem:[%s21695_s26 + $0x1a0] ss:$8 sps:$4 sm:$0xff]   ;;  %v17792_v53 = vld [vmem:[%s21695_s26 + $0x94] ss:$8 sps:$4 sm:$0xff]   ;;  %22154 = vst [vmem:[#allocation21_spill] sm:$0xff] %v17808_v15 }
 0x754   :  { %22151 = vst [vmem:[#allocation18_spill] sm:$0xff] %v17786_v58  ;;  %22152 = vst [vmem:[#allocation19_spill] sm:$0xff] %v17792_v53 }
 0x756   :  { %4862 = vmatpush2.bf16.msra.mxu1 %v17780_v40  ;;  %4903 = vmatpush2.bf16.msra.mxu0 %v17786_v58  ;;  %v4779_v40 = vcombine.high %v17775_v49, %v17775_v49  ;;  %v4786_v58 = vrot.slane %v17455_v57, %v13946_v48  ;;  %v17826_v57 = vld [vmem:[%s21695_s26 + $0x184] ss:$8 sps:$4 sm:$0xff]  }
 0x757   :  { %4863 = vmatprep.subr.bf16.mxu1 %v17792_v53  ;;  %4904 = vmatprep.subr.bf16.mxu0 %v17798_v30  ;;  %v17814_v53 = vld [vmem:[%s21695_s26 + $0x190] ss:$8 sps:$4 sm:$0xff]   ;;  %v17820_v30 = vld [vmem:[%s21695_s26 + $0x84] ss:$8 sps:$4 sm:$0xff]   ;;  %22157 = vst [vmem:[#allocation24_spill] sm:$0xff] %v17826_v57 }
 0x758   :  { %22155 = vst [vmem:[#allocation22_spill] sm:$0xff] %v17814_v53  ;;  %22156 = vst [vmem:[#allocation23_spill] sm:$0xff] %v17820_v30  ;;  %v4808_v47 = vcombine.high %v4786_v58, %v4786_v58 }
 0x75a   :  { %4864 = vmatpush2.bf16.msra.mxu1 %v17808_v15  ;;  %4905 = vmatpush2.bf16.msra.mxu0 %v17814_v53  ;;  %v4807_v15 = vrot.slane %v4779_v40, %v13946_v48  ;;  %v17833_v53 = vld [vmem:[%s21695_s26 + $0x80] ss:$8 sps:$4 sm:$0xff]   ;;  %v17851_v40 = vld [vmem:[%s21695_s26 + $0x374] ss:$8 sps:$4 sm:$0xff]  }
 0x75b   :  { %4865 = vmatprep.subr.bf16.mxu1 %v17820_v30  ;;  %4906 = vmatprep.subr.bf16.mxu0 %v17826_v57  ;;  %22158 = vst [vmem:[#allocation25_spill] sm:$0xff] %v17833_v53  ;;  %v17839_v30 = vld [vmem:[%s21695_s26 + $0x180] ss:$8 sps:$4 sm:$0xff]   ;;  %v17845_v57 = vld [vmem:[%s21695_s26 + $0x274] ss:$8 sps:$4 sm:$0xff]   ;;  %22161 = vst [vmem:[#allocation28_spill] sm:$0xff] %v17851_v40 }
 0x75c   :  { %22159 = vst [vmem:[#allocation26_spill] sm:$0xff] %v17839_v30  ;;  %22160 = vst [vmem:[#allocation27_spill] sm:$0xff] %v17845_v57 }
 0x75e   :  { %4866 = vmatpush2.bf16.msra.mxu1 %v17833_v53  ;;  %4907 = vmatpush2.bf16.msra.mxu0 %v17839_v30  ;;  %v4811_v53 = vcombine.high %v4807_v15, %v4807_v15  ;;  %v17857_v30 = vld [vmem:[%s21695_s26 + $0x270] ss:$8 sps:$4 sm:$0xff]  }
 0x75f   :  { %4917 = vmatprep.subr.bf16.mxu1 %v17845_v57  ;;  %4958 = vmatprep.subr.bf16.mxu0 %v17851_v40  ;;  %22162 = vst [vmem:[#allocation29_spill] sm:$0xff] %v17857_v30  ;;  %v17863_v57 = vld [vmem:[%s21695_s26 + $0x370] ss:$8 sps:$4 sm:$0xff]   ;;  %v17869_v40 = vld [vmem:[%s21695_s26 + $0x264] ss:$8 sps:$4 sm:$0xff]  }
 0x760   :  { %22163 = vst [vmem:[#allocation30_spill] sm:$0xff] %v17863_v57  ;;  %22164 = vst [vmem:[#allocation31_spill] sm:$0xff] %v17869_v40 }
 0x761   :  { %4868 = vmatmul.mubr.bf16.vlgmr.msra.gmra.mxu1 %v4786_v58  ;;  %4909 = vmatmul.mubr.bf16.vlgmr.msra.gmra.mxu0 %v4808_v47  ;;  %v17875_v47 = vld [vmem:[%s21695_s26 + $0x364] ss:$8 sps:$4 sm:$0xff]   ;;  %v17881_v58 = vld [vmem:[%s21695_s26 + $0x260] ss:$8 sps:$4 sm:$0xff]  }
 0x762   :  { %4918 = vmatpush1.bf16.msra.mxu1 %v17857_v30  ;;  %4959 = vmatpush1.bf16.msra.mxu0 %v17863_v57  ;;  %22165 = vst [vmem:[#allocation32_spill] sm:$0xff] %v17875_v47  ;;  %22166 = vst [vmem:[#allocation33_spill] sm:$0xff] %v17881_v58  ;;  %v12502_v57 = vld [vmem:[%s21247_s3 + $0xae8] ss:$16 sps:$4 sm:$0xff]  }
 0x763   :  { %4919 = vmatprep.subr.bf16.mxu1 %v17869_v40  ;;  %4960 = vmatprep.subr.bf16.mxu0 %v17875_v47  ;;  %v17887_v40 = vld [vmem:[%s21695_s26 + $0x360] ss:$8 sps:$4 sm:$0xff]   ;;  %v17893_v47 = vld [vmem:[%s21695_s26 + $0x254] ss:$8 sps:$4 sm:$0xff]  }
 0x764   :  { %4949 = vmatprep.mubr.bf16.mxu1 %v4807_v15  ;;  %4990 = vmatprep.mubr.bf16.mxu0 %v4811_v53  ;;  %22167 = vst [vmem:[#allocation34_spill] sm:$0xff] %v17887_v40  ;;  %22168 = vst [vmem:[#allocation35_spill] sm:$0xff] %v17893_v47  ;;  %v17899_v15 = vld [vmem:[%s21695_s26 + $0x354] ss:$8 sps:$4 sm:$0xff]   ;;  %v17905_v53 = vld [vmem:[%s21695_s26 + $0x250] ss:$8 sps:$4 sm:$0xff]  }
 0x765   :  { %22169 = vst [vmem:[#allocation36_spill] sm:$0xff] %v17899_v15  ;;  %22170 = vst [vmem:[#allocation37_spill] sm:$0xff] %v17905_v53 }
 0x766   :  { %4920 = vmatpush1.bf16.msra.mxu1 %v17881_v58  ;;  %4961 = vmatpush1.bf16.msra.mxu0 %v17887_v40  ;;  %v17911_v40 = vld [vmem:[%s21695_s26 + $0x350] ss:$8 sps:$4 sm:$0xff]   ;;  %v18219_v58 = vld [vmem:[%s21695_s26 + $0x280] ss:$8 sps:$4 sm:$0xff]  }
 0x767   :  { %4921 = vmatprep.subr.bf16.mxu1 %v17893_v47  ;;  %4962 = vmatprep.subr.bf16.mxu0 %v17899_v15  ;;  %22171 = vst [vmem:[#allocation38_spill] sm:$0xff] %v17911_v40  ;;  %v17917_v47 = vld [vmem:[%s21695_s26 + $0x244] ss:$8 sps:$4 sm:$0xff]   ;;  %22222 = vst [vmem:[#allocation89_spill] sm:$0xff] %v18219_v58 }
 0x768   :  { %22172 = vst [vmem:[#allocation39_spill] sm:$0xff] %v17917_v47  ;;  %v17923_v15 = vld [vmem:[%s21695_s26 + $0x344] ss:$8 sps:$4 sm:$0xff]  }
 0x769   :  { %22173 = vst [vmem:[#allocation40_spill] sm:$0xff] %v17923_v15 }
 0x76a   :  { %4922 = vmatpush1.bf16.msra.mxu1 %v17905_v53  ;;  %4963 = vmatpush1.bf16.msra.mxu0 %v17911_v40  ;;  %v17929_v53 = vld [vmem:[%s21695_s26 + $0x240] ss:$8 sps:$4 sm:$0xff]  }
 0x76b   :  { %4923 = vmatprep.subr.bf16.mxu1 %v17917_v47  ;;  %4964 = vmatprep.subr.bf16.mxu0 %v17923_v15  ;;  %22174 = vst [vmem:[#allocation41_spill] sm:$0xff] %v17929_v53  ;;  %v17935_v40 = vld [vmem:[%s21695_s26 + $0x340] ss:$8 sps:$4 sm:$0xff]   ;;  %v17941_v47 = vld [vmem:[%s21695_s26 + $0x234] ss:$8 sps:$4 sm:$0xff]  }
 0x76c   :  { %22175 = vst [vmem:[#allocation42_spill] sm:$0xff] %v17935_v40  ;;  %22176 = vst [vmem:[#allocation43_spill] sm:$0xff] %v17941_v47  ;;  %v17947_v15 = vld [vmem:[%s21695_s26 + $0x334] ss:$8 sps:$4 sm:$0xff]  }
 0x76d   :  { %22177 = vst [vmem:[#allocation44_spill] sm:$0xff] %v17947_v15 }
 0x76e   :  { %4924 = vmatpush1.bf16.msra.mxu1 %v17929_v53  ;;  %4965 = vmatpush1.bf16.msra.mxu0 %v17935_v40  ;;  %v17953_v53 = vld [vmem:[%s21695_s26 + $0x230] ss:$8 sps:$4 sm:$0xff]  }
 0x76f   :  { %4925 = vmatprep.subr.bf16.mxu1 %v17941_v47  ;;  %4966 = vmatprep.subr.bf16.mxu0 %v17947_v15  ;;  %22178 = vst [vmem:[#allocation45_spill] sm:$0xff] %v17953_v53  ;;  %v17959_v40 = vld [vmem:[%s21695_s26 + $0x330] ss:$8 sps:$4 sm:$0xff]   ;;  %v17965_v47 = vld [vmem:[%s21695_s26 + $0x224] ss:$8 sps:$4 sm:$0xff]  }
 0x770   :  { %22179 = vst [vmem:[#allocation46_spill] sm:$0xff] %v17959_v40  ;;  %22180 = vst [vmem:[#allocation47_spill] sm:$0xff] %v17965_v47  ;;  %v17971_v15 = vld [vmem:[%s21695_s26 + $0x324] ss:$8 sps:$4 sm:$0xff]  }
 0x771   :  { %22181 = vst [vmem:[#allocation48_spill] sm:$0xff] %v17971_v15 }
 0x772   :  { %4926 = vmatpush1.bf16.msra.mxu1 %v17953_v53  ;;  %4967 = vmatpush1.bf16.msra.mxu0 %v17959_v40  ;;  %v17977_v53 = vld [vmem:[%s21695_s26 + $0x220] ss:$8 sps:$4 sm:$0xff]  }
 0x773   :  { %4927 = vmatprep.subr.bf16.mxu1 %v17965_v47  ;;  %4968 = vmatprep.subr.bf16.mxu0 %v17971_v15  ;;  %22182 = vst [vmem:[#allocation49_spill] sm:$0xff] %v17977_v53  ;;  %v17983_v40 = vld [vmem:[%s21695_s26 + $0x320] ss:$8 sps:$4 sm:$0xff]   ;;  %v17989_v47 = vld [vmem:[%s21695_s26 + $0x214] ss:$8 sps:$4 sm:$0xff]  }
 0x774   :  { %22183 = vst [vmem:[#allocation50_spill] sm:$0xff] %v17983_v40  ;;  %22184 = vst [vmem:[#allocation51_spill] sm:$0xff] %v17989_v47  ;;  %v17995_v15 = vld [vmem:[%s21695_s26 + $0x314] ss:$8 sps:$4 sm:$0xff]  }
 0x775   :  { %22185 = vst [vmem:[#allocation52_spill] sm:$0xff] %v17995_v15 }
 0x776   :  { %4928 = vmatpush1.bf16.msra.mxu1 %v17977_v53  ;;  %4969 = vmatpush1.bf16.msra.mxu0 %v17983_v40  ;;  %v18001_v53 = vld [vmem:[%s21695_s26 + $0x210] ss:$8 sps:$4 sm:$0xff]  }
 0x777   :  { %4929 = vmatprep.subr.bf16.mxu1 %v17989_v47  ;;  %4970 = vmatprep.subr.bf16.mxu0 %v17995_v15  ;;  %22186 = vst [vmem:[#allocation53_spill] sm:$0xff] %v18001_v53  ;;  %v18007_v40 = vld [vmem:[%s21695_s26 + $0x310] ss:$8 sps:$4 sm:$0xff]   ;;  %v18013_v47 = vld [vmem:[%s21695_s26 + $0x204] ss:$8 sps:$4 sm:$0xff]  }
 0x778   :  { %22187 = vst [vmem:[#allocation54_spill] sm:$0xff] %v18007_v40  ;;  %22188 = vst [vmem:[#allocation55_spill] sm:$0xff] %v18013_v47  ;;  %v18019_v15 = vld [vmem:[%s21695_s26 + $0x304] ss:$8 sps:$4 sm:$0xff]  }
 0x779   :  { %22189 = vst [vmem:[#allocation56_spill] sm:$0xff] %v18019_v15 }
 0x77a   :  { %4930 = vmatpush1.bf16.msra.mxu1 %v18001_v53  ;;  %4971 = vmatpush1.bf16.msra.mxu0 %v18007_v40  ;;  %v18025_v53 = vld [vmem:[%s21695_s26 + $0x200] ss:$8 sps:$4 sm:$0xff]  }
 0x77b   :  { %4931 = vmatprep.subr.bf16.mxu1 %v18013_v47  ;;  %4972 = vmatprep.subr.bf16.mxu0 %v18019_v15  ;;  %22190 = vst [vmem:[#allocation57_spill] sm:$0xff] %v18025_v53  ;;  %v18031_v40 = vld [vmem:[%s21695_s26 + $0x300] ss:$8 sps:$4 sm:$0xff]   ;;  %v18037_v47 = vld [vmem:[%s21695_s26 + $0x2f4] ss:$8 sps:$4 sm:$0xff]  }
 0x77c   :  { %22191 = vst [vmem:[#allocation58_spill] sm:$0xff] %v18031_v40  ;;  %22192 = vst [vmem:[#allocation59_spill] sm:$0xff] %v18037_v47  ;;  %v18043_v15 = vld [vmem:[%s21695_s26 + $0x3f4] ss:$8 sps:$4 sm:$0xff]  }
 0x77d   :  { %22193 = vst [vmem:[#allocation60_spill] sm:$0xff] %v18043_v15 }
 0x77e   :  { %4932 = vmatpush1.bf16.msra.mxu1 %v18025_v53  ;;  %4973 = vmatpush1.bf16.msra.mxu0 %v18031_v40  ;;  %v18049_v53 = vld [vmem:[%s21695_s26 + $0x2f0] ss:$8 sps:$4 sm:$0xff]  }
 0x77f   :  { %4933 = vmatprep.subr.bf16.mxu1 %v18037_v47  ;;  %4974 = vmatprep.subr.bf16.mxu0 %v18043_v15  ;;  %22194 = vst [vmem:[#allocation61_spill] sm:$0xff] %v18049_v53  ;;  %v18055_v40 = vld [vmem:[%s21695_s26 + $0x3f0] ss:$8 sps:$4 sm:$0xff]   ;;  %v18061_v47 = vld [vmem:[%s21695_s26 + $0x2e4] ss:$8 sps:$4 sm:$0xff]  }
 0x780   :  { %22195 = vst [vmem:[#allocation62_spill] sm:$0xff] %v18055_v40  ;;  %22196 = vst [vmem:[#allocation63_spill] sm:$0xff] %v18061_v47  ;;  %v18067_v15 = vld [vmem:[%s21695_s26 + $0x3e4] ss:$8 sps:$4 sm:$0xff]  }
 0x781   :  { %22197 = vst [vmem:[#allocation64_spill] sm:$0xff] %v18067_v15 }
 0x782   :  { %4934 = vmatpush2.bf16.msra.mxu1 %v18049_v53  ;;  %4975 = vmatpush2.bf16.msra.mxu0 %v18055_v40  ;;  %v18073_v53 = vld [vmem:[%s21695_s26 + $0x2e0] ss:$8 sps:$4 sm:$0xff]  }
 0x783   :  { %4935 = vmatprep.subr.bf16.mxu1 %v18061_v47  ;;  %4976 = vmatprep.subr.bf16.mxu0 %v18067_v15  ;;  %22198 = vst [vmem:[#allocation65_spill] sm:$0xff] %v18073_v53  ;;  %v18079_v40 = vld [vmem:[%s21695_s26 + $0x3e0] ss:$8 sps:$4 sm:$0xff]   ;;  %v18085_v47 = vld [vmem:[%s21695_s26 + $0x2d4] ss:$8 sps:$4 sm:$0xff]  }
 0x784   :  { %22199 = vst [vmem:[#allocation66_spill] sm:$0xff] %v18079_v40  ;;  %22200 = vst [vmem:[#allocation67_spill] sm:$0xff] %v18085_v47  ;;  %v18091_v15 = vld [vmem:[%s21695_s26 + $0x3d4] ss:$8 sps:$4 sm:$0xff]  }
 0x785   :  { %22201 = vst [vmem:[#allocation68_spill] sm:$0xff] %v18091_v15 }
 0x786   :  { %4936 = vmatpush2.bf16.msra.mxu1 %v18073_v53  ;;  %4977 = vmatpush2.bf16.msra.mxu0 %v18079_v40  ;;  %v18097_v53 = vld [vmem:[%s21695_s26 + $0x2d0] ss:$8 sps:$4 sm:$0xff]  }
 0x787   :  { %4937 = vmatprep.subr.bf16.mxu1 %v18085_v47  ;;  %4978 = vmatprep.subr.bf16.mxu0 %v18091_v15  ;;  %22202 = vst [vmem:[#allocation69_spill] sm:$0xff] %v18097_v53  ;;  %v18103_v40 = vld [vmem:[%s21695_s26 + $0x3d0] ss:$8 sps:$4 sm:$0xff]   ;;  %v18109_v47 = vld [vmem:[%s21695_s26 + $0x2c4] ss:$8 sps:$4 sm:$0xff]  }
 0x788   :  { %22203 = vst [vmem:[#allocation70_spill] sm:$0xff] %v18103_v40  ;;  %22204 = vst [vmem:[#allocation71_spill] sm:$0xff] %v18109_v47  ;;  %v18115_v15 = vld [vmem:[%s21695_s26 + $0x3c4] ss:$8 sps:$4 sm:$0xff]  }
 0x789   :  { %22205 = vst [vmem:[#allocation72_spill] sm:$0xff] %v18115_v15 }
 0x78a   :  { %4938 = vmatpush2.bf16.msra.mxu1 %v18097_v53  ;;  %4979 = vmatpush2.bf16.msra.mxu0 %v18103_v40  ;;  %v18121_v53 = vld [vmem:[%s21695_s26 + $0x2c0] ss:$8 sps:$4 sm:$0xff]  }
 0x78b   :  { %4939 = vmatprep.subr.bf16.mxu1 %v18109_v47  ;;  %4980 = vmatprep.subr.bf16.mxu0 %v18115_v15  ;;  %22206 = vst [vmem:[#allocation73_spill] sm:$0xff] %v18121_v53  ;;  %v18127_v40 = vld [vmem:[%s21695_s26 + $0x3c0] ss:$8 sps:$4 sm:$0xff]   ;;  %v18133_v47 = vld [vmem:[%s21695_s26 + $0x2b4] ss:$8 sps:$4 sm:$0xff]  }
 0x78c   :  { %22207 = vst [vmem:[#allocation74_spill] sm:$0xff] %v18127_v40  ;;  %22208 = vst [vmem:[#allocation75_spill] sm:$0xff] %v18133_v47  ;;  %v18139_v15 = vld [vmem:[%s21695_s26 + $0x3b4] ss:$8 sps:$4 sm:$0xff]  }
 0x78d   :  { %22209 = vst [vmem:[#allocation76_spill] sm:$0xff] %v18139_v15 }
 0x78e   :  { %4940 = vmatpush2.bf16.msra.mxu1 %v18121_v53  ;;  %4981 = vmatpush2.bf16.msra.mxu0 %v18127_v40  ;;  %v18145_v53 = vld [vmem:[%s21695_s26 + $0x2b0] ss:$8 sps:$4 sm:$0xff]  }
 0x78f   :  { %4941 = vmatprep.subr.bf16.mxu1 %v18133_v47  ;;  %4982 = vmatprep.subr.bf16.mxu0 %v18139_v15  ;;  %22210 = vst [vmem:[#allocation77_spill] sm:$0xff] %v18145_v53  ;;  %v18151_v40 = vld [vmem:[%s21695_s26 + $0x3b0] ss:$8 sps:$4 sm:$0xff]   ;;  %v18157_v47 = vld [vmem:[%s21695_s26 + $0x2a4] ss:$8 sps:$4 sm:$0xff]  }
 0x790   :  { %22211 = vst [vmem:[#allocation78_spill] sm:$0xff] %v18151_v40  ;;  %22212 = vst [vmem:[#allocation79_spill] sm:$0xff] %v18157_v47  ;;  %v18163_v15 = vld [vmem:[%s21695_s26 + $0x3a4] ss:$8 sps:$4 sm:$0xff]  }
 0x791   :  { %22213 = vst [vmem:[#allocation80_spill] sm:$0xff] %v18163_v15 }
 0x792   :  { %4942 = vmatpush2.bf16.msra.mxu1 %v18145_v53  ;;  %4983 = vmatpush2.bf16.msra.mxu0 %v18151_v40  ;;  %v18169_v53 = vld [vmem:[%s21695_s26 + $0x2a0] ss:$8 sps:$4 sm:$0xff]  }
 0x793   :  { %4943 = vmatprep.subr.bf16.mxu1 %v18157_v47  ;;  %4984 = vmatprep.subr.bf16.mxu0 %v18163_v15  ;;  %22214 = vst [vmem:[#allocation81_spill] sm:$0xff] %v18169_v53  ;;  %v18175_v40 = vld [vmem:[%s21695_s26 + $0x3a0] ss:$8 sps:$4 sm:$0xff]   ;;  %v18181_v47 = vld [vmem:[%s21695_s26 + $0x294] ss:$8 sps:$4 sm:$0xff]  }
 0x794   :  { %22215 = vst [vmem:[#allocation82_spill] sm:$0xff] %v18175_v40  ;;  %22216 = vst [vmem:[#allocation83_spill] sm:$0xff] %v18181_v47  ;;  %v18187_v15 = vld [vmem:[%s21695_s26 + $0x394] ss:$8 sps:$4 sm:$0xff]  }
 0x795   :  { %22217 = vst [vmem:[#allocation84_spill] sm:$0xff] %v18187_v15 }
 0x796   :  { %4944 = vmatpush2.bf16.msra.mxu1 %v18169_v53  ;;  %4985 = vmatpush2.bf16.msra.mxu0 %v18175_v40  ;;  %v4793_v53 = vrot.slane %v17775_v49, %v13946_v48  ;;  %v18195_v40 = vld [vmem:[%s21695_s26 + $0x290] ss:$8 sps:$4 sm:$0xff]   ;;  %v18213_v49 = vld [vmem:[%s21695_s26 + $0x384] ss:$8 sps:$4 sm:$0xff]  }
 0x797   :  { %4945 = vmatprep.subr.bf16.mxu1 %v18181_v47  ;;  %4986 = vmatprep.subr.bf16.mxu0 %v18187_v15  ;;  %22218 = vst [vmem:[#allocation85_spill] sm:$0xff] %v18195_v40  ;;  %v18201_v47 = vld [vmem:[%s21695_s26 + $0x390] ss:$8 sps:$4 sm:$0xff]   ;;  %v18207_v15 = vld [vmem:[%s21695_s26 + $0x284] ss:$8 sps:$4 sm:$0xff]   ;;  %22221 = vst [vmem:[#allocation88_spill] sm:$0xff] %v18213_v49 }
 0x798   :  { %22219 = vst [vmem:[#allocation86_spill] sm:$0xff] %v18201_v47  ;;  %22220 = vst [vmem:[#allocation87_spill] sm:$0xff] %v18207_v15 }
 0x79a   :  { %4946 = vmatpush2.bf16.msra.mxu1 %v18195_v40  ;;  %4987 = vmatpush2.bf16.msra.mxu0 %v18201_v47  ;;  %v4809_v40 = vcombine.high %v4793_v53, %v4793_v53  ;;  %v18225_v47 = vld [vmem:[%s21695_s26 + $0x380] ss:$8 sps:$4 sm:$0xff]  }
 0x79b   :  { %4947 = vmatprep.subr.bf16.mxu1 %v18207_v15  ;;  %4988 = vmatprep.subr.bf16.mxu0 %v18213_v49  ;;  %22223 = vst [vmem:[#allocation90_spill] sm:$0xff] %v18225_v47  ;;  %v18231_v15 = vld [vmem:[%s21695_s26 + $0x474] ss:$8 sps:$4 sm:$0xff]  }
 0x79c   :  { %22224 = vst [vmem:[#allocation91_spill] sm:$0xff] %v18231_v15 }
 0x79e   :  { %4948 = vmatpush2.bf16.msra.mxu1 %v18219_v58  ;;  %4989 = vmatpush2.bf16.msra.mxu0 %v18225_v47  ;;  %v18237_v58 = vld [vmem:[%s21695_s26 + $0x470] ss:$8 sps:$4 sm:$0xff]   ;;  %v18244_v47 = vld [vmem:[%s21695_s26 + $0x464] ss:$8 sps:$4 sm:$0xff]  }
 0x79f   :  { %4999 = vmatprep.subr.bf16.mxu1 %v18231_v15  ;;  %22225 = vst [vmem:[#allocation92_spill] sm:$0xff] %v18237_v58  ;;  %22226 = vst [vmem:[#allocation93_spill] sm:$0xff] %v18244_v47  ;;  %v18280_v15 = vld [vmem:[%s21695_s26 + $0x444] ss:$8 sps:$4 sm:$0xff]  }
 0x7a0   :  { %22230 = vst [vmem:[#allocation97_spill] sm:$0xff] %v18280_v15 }
 0x7a1   :  { %4950 = vmatmul.mubr.bf16.vlgmr.msra.gmra.mxu1 %v4793_v53  ;;  %4991 = vmatmul.mubr.bf16.vlgmr.msra.gmra.mxu0 %v4809_v40  ;;  %v18250_v40 = vld [vmem:[%s21695_s26 + $0x460] ss:$8 sps:$4 sm:$0xff]   ;;  %v18256_v53 = vld [vmem:[%s21695_s26 + $0x454] ss:$8 sps:$4 sm:$0xff]  }
 0x7a2   :  { %5000 = vmatpush1.bf16.msra.mxu1 %v18237_v58  ;;  %5031 = vmatprep.mubr.bf16.mxu1 %v22117_v12  ;;  %22227 = vst [vmem:[#allocation94_spill] sm:$0xff] %v18250_v40  ;;  %22228 = vst [vmem:[#allocation95_spill] sm:$0xff] %v18256_v53  ;;  %v12499_v12 = vld [vmem:[%s21247_s3 + $0xae0] ss:$16 sps:$4 sm:$0xff]   ;;  %v12507_v58 = vld [vmem:[%s21247_s3 + $0xac4] ss:$16 sps:$4 sm:$0xff]  }
 0x7a3   :  { %5001 = vmatprep.subr.bf16.mxu1 %v18244_v47  ;;  %v12501_v47 = vld [vmem:[%s21247_s3 + $0xae4] ss:$16 sps:$4 sm:$0xff]  }
 0x7a4   :  { %5433 = vmatprep.subr.bf16.mxu0 %v12501_v47  ;;  %v12513_v47 = vld [vmem:[%s21247_s3 + $0xaa4] ss:$16 sps:$4 sm:$0xff]  }
 0x7a5   :  { %5434 = vmatpush1.bf16.msra.mxu0 %v12499_v12  ;;  %v18289_v12 = vld [vmem:[%s21695_s26 + $0x440] ss:$8 sps:$4 sm:$0xff]  }
 0x7a6   :  { %5002 = vmatpush1.bf16.msra.mxu1 %v18250_v40  ;;  %v18271_v40 = vld [vmem:[%s21695_s26 + $0x450] ss:$8 sps:$4 sm:$0xff]   ;;  %5435 = vmatprep.subr.bf16.mxu0 %v12507_v58  ;;  %22231 = vst [vmem:[#allocation98_spill] sm:$0xff] %v18289_v12  ;;  %v18298_v58 = vld [vmem:[%s21695_s26 + $0x434] ss:$8 sps:$4 sm:$0xff]  }
 0x7a7   :  { %5003 = vmatprep.subr.bf16.mxu1 %v18256_v53  ;;  %22229 = vst [vmem:[#allocation96_spill] sm:$0xff] %v18271_v40  ;;  %v12505_v53 = vld [vmem:[%s21247_s3 + $0xac0] ss:$16 sps:$4 sm:$0xff]   ;;  %22232 = vst [vmem:[#allocation99_spill] sm:$0xff] %v18298_v58 }
 0x7a9   :  { %5436 = vmatpush1.bf16.msra.mxu0 %v12505_v53  ;;  %v18307_v53 = vld [vmem:[%s21695_s26 + $0x430] ss:$8 sps:$4 sm:$0xff]  }
 0x7aa   :  { %5004 = vmatpush1.bf16.msra.mxu1 %v18271_v40  ;;  %v12511_v40 = vld [vmem:[%s21247_s3 + $0xaa0] ss:$16 sps:$4 sm:$0xff]   ;;  %5437 = vmatprep.subr.bf16.mxu0 %v12513_v47  ;;  %22233 = vst [vmem:[#allocation100_spill] sm:$0xff] %v18307_v53  ;;  %v18316_v47 = vld [vmem:[%s21695_s26 + $0x424] ss:$8 sps:$4 sm:$0xff]  }
 0x7ab   :  { %5005 = vmatprep.subr.bf16.mxu1 %v18280_v15  ;;  %v12519_v15 = vld [vmem:[%s21247_s3 + $0xa84] ss:$16 sps:$4 sm:$0xff]   ;;  %22234 = vst [vmem:[#allocation101_spill] sm:$0xff] %v18316_v47 }
 0x7ad   :  { %5438 = vmatpush1.bf16.msra.mxu0 %v12511_v40  ;;  %v18325_v40 = vld [vmem:[%s21695_s26 + $0x420] ss:$8 sps:$4 sm:$0xff]  }
 0x7ae   :  { %5006 = vmatpush1.bf16.msra.mxu1 %v18289_v12  ;;  %v12517_v12 = vld [vmem:[%s21247_s3 + $0xa80] ss:$16 sps:$4 sm:$0xff]   ;;  %5439 = vmatprep.subr.bf16.mxu0 %v12519_v15  ;;  %22235 = vst [vmem:[#allocation102_spill] sm:$0xff] %v18325_v40  ;;  %v18334_v15 = vld [vmem:[%s21695_s26 + $0x414] ss:$8 sps:$4 sm:$0xff]  }
 0x7af   :  { %5007 = vmatprep.subr.bf16.mxu1 %v18298_v58  ;;  %v12525_v58 = vld [vmem:[%s21247_s3 + $0xa64] ss:$16 sps:$4 sm:$0xff]   ;;  %22236 = vst [vmem:[#allocation103_spill] sm:$0xff] %v18334_v15 }
 0x7b1   :  { %5440 = vmatpush1.bf16.msra.mxu0 %v12517_v12  ;;  %v18343_v12 = vld [vmem:[%s21695_s26 + $0x410] ss:$8 sps:$4 sm:$0xff]  }
 0x7b2   :  { %5008 = vmatpush1.bf16.msra.mxu1 %v18307_v53  ;;  %v12523_v53 = vld [vmem:[%s21247_s3 + $0xa60] ss:$16 sps:$4 sm:$0xff]   ;;  %5441 = vmatprep.subr.bf16.mxu0 %v12525_v58  ;;  %22237 = vst [vmem:[#allocation104_spill] sm:$0xff] %v18343_v12 }
 0x7b3   :  { %5009 = vmatprep.subr.bf16.mxu1 %v18316_v47  ;;  %v12531_v47 = vld [vmem:[%s21247_s3 + $0xa44] ss:$16 sps:$4 sm:$0xff]   ;;  %v12529_v58 = vld [vmem:[%s21247_s3 + $0xa40] ss:$16 sps:$4 sm:$0xff]  }
 0x7b5   :  { %5442 = vmatpush1.bf16.msra.mxu0 %v12523_v53  ;;  %v18365_v53 = vld [vmem:[%s21695_s26 + $0x400] ss:$8 sps:$4 sm:$0xff]  }
 0x7b6   :  { %5010 = vmatpush1.bf16.msra.mxu1 %v18325_v40  ;;  %v10887_v40 = vld.sshfl [vmem:[%s21697_s20 + $0x35] sm:$0x1 pattern:$0x75316420]  ;;  %5443 = vmatprep.subr.bf16.mxu0 %v12531_v47  ;;  %22239 = vst [vmem:[#allocation106_spill] sm:$0xff] %v18365_v53 }
 0x7b7   :  { %5011 = vmatprep.subr.bf16.mxu1 %v18334_v15  ;;  %v18355_v15 = vld [vmem:[%s21695_s26 + $0x404] ss:$8 sps:$4 sm:$0xff]   ;;  %v4825_v49 = vrot.slane %v10887_v40, %v13946_v48  ;;  %v12508_v47 = vld [vmem:[%s21247_s3 + $0xac8] ss:$16 sps:$4 sm:$0xff]  }
 0x7b8   :  { %22238 = vst [vmem:[#allocation105_spill] sm:$0xff] %v18355_v15  ;;  %v12516_v40 = vld [vmem:[%s21247_s3 + $0xaac] ss:$16 sps:$4 sm:$0xff]  }
 0x7b9   :  { %5444 = vmatpush1.bf16.msra.mxu0 %v12529_v58  ;;  %v12526_v58 = vld [vmem:[%s21247_s3 + $0xa68] ss:$16 sps:$4 sm:$0xff]  }
 0x7ba   :  { %5012 = vmatpush1.bf16.msra.mxu1 %v18343_v12  ;;  %v12504_v12 = vld [vmem:[%s21247_s3 + $0xaec] ss:$16 sps:$4 sm:$0xff]  }
 0x7bb   :  { %5013 = vmatprep.subr.bf16.mxu1 %v18355_v15  ;;  %v12510_v15 = vld [vmem:[%s21247_s3 + $0xacc] ss:$16 sps:$4 sm:$0xff]  }
 0x7be   :  { %5014 = vmatpush1.bf16.msra.mxu1 %v18365_v53 }
 0x7bf   :  { %5474 = vmatprep.subr.bf16.mxu1 %v12504_v12  ;;  %v12514_v12 = vld [vmem:[%s21247_s3 + $0xaa8] ss:$16 sps:$4 sm:$0xff]  }
 0x7c1   :  { %5032 = vmatmul.mubr.bf16.vlgmr.msra.gmra.mxu1 %v4825_v49  ;;  %v12522_v49 = vld [vmem:[%s21247_s3 + $0xa8c] ss:$16 sps:$4 sm:$0xff]  }
 0x7c2   :  { %5475 = vmatpush1.bf16.msra.mxu1 %v12502_v57  ;;  %v12520_v57 = vld [vmem:[%s21247_s3 + $0xa88] ss:$16 sps:$4 sm:$0xff]  }
 0x7c3   :  { %5476 = vmatprep.subr.bf16.mxu1 %v12510_v15  ;;  %v12528_v15 = vld [vmem:[%s21247_s3 + $0xa6c] ss:$16 sps:$4 sm:$0xff]  }
 0x7c6   :  { %5477 = vmatpush1.bf16.msra.mxu1 %v12508_v47  ;;  %v12534_v47 = vld [vmem:[%s21247_s3 + $0xa4c] ss:$16 sps:$4 sm:$0xff]  }
 0x7c7   :  { %5478 = vmatprep.subr.bf16.mxu1 %v12516_v40  ;;  %v12532_v40 = vld [vmem:[%s21247_s3 + $0xa48] ss:$16 sps:$4 sm:$0xff]  }
 0x7ca   :  { %5479 = vmatpush1.bf16.msra.mxu1 %v12514_v12 }
 0x7cb   :  { %5480 = vmatprep.subr.bf16.mxu1 %v12522_v49 }
 0x7ce   :  { %5481 = vmatpush1.bf16.msra.mxu1 %v12520_v57  ;;  %v12537_v57 = vld [vmem:[%s21247_s3 + $0xa24] ss:$16 sps:$4 sm:$0xff]  }
 0x7cf   :  { %5482 = vmatprep.subr.bf16.mxu1 %v12528_v15  ;;  %5445 = vmatprep.subr.bf16.mxu0 %v12537_v57  ;;  %v12541_v57 = vld [vmem:[%s21247_s3 + $0xa00] ss:$16 sps:$4 sm:$0xff]  }
 0x7d2   :  { %5483 = vmatpush1.bf16.msra.mxu1 %v12526_v58  ;;  %v12535_v58 = vld [vmem:[%s21247_s3 + $0xa20] ss:$16 sps:$4 sm:$0xff]  }
 0x7d3   :  { %5484 = vmatprep.subr.bf16.mxu1 %v12534_v47  ;;  %v12540_v47 = vld [vmem:[%s21247_s3 + $0xa2c] ss:$16 sps:$4 sm:$0xff]   ;;  %5446 = vmatpush1.bf16.msra.mxu0 %v12535_v58  ;;  %v12547_v58 = vld [vmem:[%s21247_s3 + $0xbe0] ss:$16 sps:$4 sm:$0xff]  }
 0x7d6   :  { %5485 = vmatpush1.bf16.msra.mxu1 %v12532_v40 }
 0x7d7   :  { %5486 = vmatprep.subr.bf16.mxu1 %v12540_v47  ;;  %v12552_v47 = vld [vmem:[%s21247_s3 + $0xbec] ss:$16 sps:$4 sm:$0xff]  }
 0x7da   :  { %5487 = vmatpush1.bf16.msra.mxu1 %v12538_v56  ;;  %v12549_v56 = vld [vmem:[%s21247_s3 + $0xbe4] ss:$16 sps:$4 sm:$0xff]  }
 0x7e1   :  { %v4706_v12 = vpop.f32.mrf.mxu1  ;;  %v4747_v49 = vpop.f32.mrf.mxu0 }
 0x7e2   :  { %v18405_v53 = vadd.f32 %v4706_v12, %v17316_v18  ;;  %v18408_v15 = vadd.f32 %v4747_v49, %v17319_v19 }
 0x7e3   :  { %v4708_v40 = vpop.f32.mrf.mxu1  ;;  %v4749_v30 = vpop.f32.mrf.mxu0 }
 0x7e4   :  { %22240 = vst [vmem:[#allocation107_spill] sm:$0xff] %v18405_v53  ;;  %22241 = vst [vmem:[#allocation108_spill] sm:$0xff] %v18408_v15  ;;  %v18420_v18 = vadd.f32 %v4708_v40, %v17331_v42  ;;  %v18423_v19 = vadd.f32 %v4749_v30, %v17334_v32  ;;  %v12543_v15 = vld [vmem:[%s21247_s3 + $0xa04] ss:$16 sps:$4 sm:$0xff]   ;;  %v12546_v42 = vld [vmem:[%s21247_s3 + $0xa0c] ss:$16 sps:$4 sm:$0xff]  }
 0x7e5   :  { %v4710_v12 = vpop.f32.mrf.mxu1  ;;  %v4751_v49 = vpop.f32.mrf.mxu0  ;;  %5447 = vmatprep.subr.bf16.mxu0 %v12543_v15  ;;  %v12544_v30 = vld [vmem:[%s21247_s3 + $0xa08] ss:$16 sps:$4 sm:$0xff]   ;;  %5488 = vmatprep.subr.bf16.mxu1 %v12546_v42 }
 0x7e6   :  { %22242 = vst [vmem:[#allocation109_spill] sm:$0xff] %v18420_v18  ;;  %22243 = vst [vmem:[#allocation110_spill] sm:$0xff] %v18423_v19  ;;  %5448 = vmatpush1.bf16.msra.mxu0 %v12541_v57  ;;  %5489 = vmatpush1.bf16.msra.mxu1 %v12544_v30  ;;  %v12550_v15 = vld [vmem:[%s21247_s3 + $0xbe8] ss:$16 sps:$4 sm:$0xff]   ;;  %v12555_v12 = vld [vmem:[%s21247_s3 + $0xbc4] ss:$16 sps:$4 sm:$0xff]  }
 0x7e7   :  { %v4711_v40 = vpop.f32.mrf.mxu1  ;;  %v4752_v32 = vpop.f32.mrf.mxu0  ;;  %5449 = vmatprep.subr.bf16.mxu0 %v12549_v56  ;;  %5490 = vmatprep.subr.bf16.mxu1 %v12552_v47  ;;  %v12558_v49 = vld [vmem:[%s21247_s3 + $0xbcc] ss:$16 sps:$4 sm:$0xff]   ;;  %v12553_v57 = vld [vmem:[%s21247_s3 + $0xbc0] ss:$16 sps:$4 sm:$0xff]   ;;  %v12556_v42 = vld [vmem:[%s21247_s3 + $0xbc8] ss:$16 sps:$4 sm:$0xff]  }
 0x7e8   :  { %v12561_v40 = vld [vmem:[%s21247_s3 + $0xba4] ss:$16 sps:$4 sm:$0xff]   ;;  %v12564_v32 = vld [vmem:[%s21247_s3 + $0xbac] ss:$16 sps:$4 sm:$0xff]   ;;  %v12559_v30 = vld [vmem:[%s21247_s3 + $0xba0] ss:$16 sps:$4 sm:$0xff]  }
 0x7e9   :  { %v12562_v56 = vld [vmem:[%s21247_s3 + $0xba8] ss:$16 sps:$4 sm:$0xff]   ;;  %v12570_v47 = vld [vmem:[%s21247_s3 + $0xb8c] ss:$16 sps:$4 sm:$0xff]  }
 0x7ea   :  { %5450 = vmatpush2.bf16.msra.mxu0 %v12547_v58  ;;  %5491 = vmatpush2.bf16.msra.mxu1 %v12550_v15  ;;  %v12567_v58 = vld [vmem:[%s21247_s3 + $0xb84] ss:$16 sps:$4 sm:$0xff]   ;;  %v12565_v15 = vld [vmem:[%s21247_s3 + $0xb80] ss:$16 sps:$4 sm:$0xff]  }
 0x7eb   :  { %5451 = vmatprep.subr.bf16.mxu0 %v12555_v12  ;;  %5492 = vmatprep.subr.bf16.mxu1 %v12558_v49  ;;  %v12568_v12 = vld [vmem:[%s21247_s3 + $0xb88] ss:$16 sps:$4 sm:$0xff]   ;;  %v12573_v49 = vld [vmem:[%s21247_s3 + $0xb64] ss:$16 sps:$4 sm:$0xff]  }
 0x7ee   :  { %5452 = vmatpush2.bf16.msra.mxu0 %v12553_v57  ;;  %5493 = vmatpush2.bf16.msra.mxu1 %v12556_v42  ;;  %v12576_v57 = vld [vmem:[%s21247_s3 + $0xb6c] ss:$16 sps:$4 sm:$0xff]   ;;  %v12571_v42 = vld [vmem:[%s21247_s3 + $0xb60] ss:$16 sps:$4 sm:$0xff]  }
 0x7ef   :  { %5453 = vmatprep.subr.bf16.mxu0 %v12561_v40  ;;  %5494 = vmatprep.subr.bf16.mxu1 %v12564_v32  ;;  %v12574_v40 = vld [vmem:[%s21247_s3 + $0xb68] ss:$16 sps:$4 sm:$0xff]   ;;  %v12579_v32 = vld [vmem:[%s21247_s3 + $0xb44] ss:$16 sps:$4 sm:$0xff]  }
 0x7f2   :  { %5454 = vmatpush2.bf16.msra.mxu0 %v12559_v30  ;;  %5495 = vmatpush2.bf16.msra.mxu1 %v12562_v56  ;;  %v12582_v30 = vld [vmem:[%s21247_s3 + $0xb4c] ss:$16 sps:$4 sm:$0xff]   ;;  %v12577_v56 = vld [vmem:[%s21247_s3 + $0xb40] ss:$16 sps:$4 sm:$0xff]  }
 0x7f3   :  { %5455 = vmatprep.subr.bf16.mxu0 %v12567_v58  ;;  %5496 = vmatprep.subr.bf16.mxu1 %v12570_v47  ;;  %v12580_v58 = vld [vmem:[%s21247_s3 + $0xb48] ss:$16 sps:$4 sm:$0xff]   ;;  %v12585_v47 = vld [vmem:[%s21247_s3 + $0xb24] ss:$16 sps:$4 sm:$0xff]  }
 0x7f6   :  { %5456 = vmatpush2.bf16.msra.mxu0 %v12565_v15  ;;  %5497 = vmatpush2.bf16.msra.mxu1 %v12568_v12  ;;  %v12583_v15 = vld [vmem:[%s21247_s3 + $0xb20] ss:$16 sps:$4 sm:$0xff]   ;;  %v12588_v12 = vld [vmem:[%s21247_s3 + $0xb2c] ss:$16 sps:$4 sm:$0xff]  }
 0x7f7   :  { %5457 = vmatprep.subr.bf16.mxu0 %v12573_v49  ;;  %5498 = vmatprep.subr.bf16.mxu1 %v12576_v57  ;;  %v12586_v49 = vld [vmem:[%s21247_s3 + $0xb28] ss:$16 sps:$4 sm:$0xff]   ;;  %v12591_v57 = vld [vmem:[%s21247_s3 + $0xb04] ss:$16 sps:$4 sm:$0xff]  }
 0x7fa   :  { %5458 = vmatpush2.bf16.msra.mxu0 %v12571_v42  ;;  %5499 = vmatpush2.bf16.msra.mxu1 %v12574_v40  ;;  %v12589_v42 = vld [vmem:[%s21247_s3 + $0xb00] ss:$16 sps:$4 sm:$0xff]   ;;  %v12594_v40 = vld [vmem:[%s21247_s3 + $0xb0c] ss:$16 sps:$4 sm:$0xff]  }
 0x7fb   :  { %5459 = vmatprep.subr.bf16.mxu0 %v12579_v32  ;;  %5500 = vmatprep.subr.bf16.mxu1 %v12582_v30  ;;  %v12592_v32 = vld [vmem:[%s21247_s3 + $0xb08] ss:$16 sps:$4 sm:$0xff]   ;;  %v18536_v30 = vld [vmem:[%s21695_s26 + $0x74] ss:$8 sps:$4 sm:$0xff]  }
 0x7fc   :  { %22244 = vst [vmem:[#allocation111_spill] sm:$0xff] %v18536_v30 }
 0x7fe   :  { %5460 = vmatpush2.bf16.msra.mxu0 %v12577_v56  ;;  %5501 = vmatpush2.bf16.msra.mxu1 %v12580_v58  ;;  %v18542_v56 = vld [vmem:[%s21695_s26 + $0x174] ss:$8 sps:$4 sm:$0xff]  }
 0x7ff   :  { %5461 = vmatprep.subr.bf16.mxu0 %v12585_v47  ;;  %5502 = vmatprep.subr.bf16.mxu1 %v12588_v12  ;;  %22245 = vst [vmem:[#allocation112_spill] sm:$0xff] %v18542_v56 }
 0x802   :  { %5462 = vmatpush2.bf16.msra.mxu0 %v12583_v15  ;;  %5503 = vmatpush2.bf16.msra.mxu1 %v12586_v49 }
 0x803   :  { %5463 = vmatprep.subr.bf16.mxu0 %v12591_v57  ;;  %5504 = vmatprep.subr.bf16.mxu1 %v12594_v40 }
 0x806   :  { %5464 = vmatpush2.bf16.msra.mxu0 %v12589_v42  ;;  %5505 = vmatpush2.bf16.msra.mxu1 %v12592_v32 }
 0x807   :  { %5596 = vmatprep.subr.bf16.mxu0 %v18536_v30  ;;  %5637 = vmatprep.subr.bf16.mxu1 %v18542_v56 }
 0x821   :  { %v4869_v58 = vpop.f32.mrf.mxu1  ;;  %v4910_v47 = vpop.f32.mrf.mxu0 }
 0x822   :  { %v4870_v15 = vadd.f32 %v4869_v58, %v14478_v51  ;;  %v18550_v58 = vld [vmem:[%s21697_s20 + $0x36] sm:$0xff] }
 0x823   :  { %v4871_v12 = vpop.f32.mrf.mxu1  ;;  %v4912_v49 = vpop.f32.mrf.mxu0 }
 0x824   :  { %v4872_v57 = vadd.f32 %v4871_v12, %v14481_v52  ;;  %v4911_v42 = vadd.f32 %v4910_v47, %v4870_v15  ;;  %v18554_v15 = vrot.slane %v18550_v58, %v13946_v48 }
 0x825   :  { %v4873_v40 = vpop.f32.mrf.mxu1  ;;  %v4914_v32 = vpop.f32.mrf.mxu0 }
 0x826   :  { %v4913_v19 = vadd.f32 %v4912_v49, %v4872_v57 }
 0x827   :  { %v4874_v30 = vpop.f32.mrf.mxu1  ;;  %v4915_v18 = vpop.f32.mrf.mxu0 }
 0x861   :  { %v4951_v53 = vpop.f32.mrf.mxu1  ;;  %v4992_v16 = vpop.f32.mrf.mxu0 }
 0x862   :  { %v4952_v45 = vadd.f32 %v4951_v53, %v4911_v42 }
 0x863   :  { %v4953_v44 = vpop.f32.mrf.mxu1  ;;  %v4994_v41 = vpop.f32.mrf.mxu0 }
 0x864   :  { %v4954_v47 = vadd.f32 %v4953_v44, %v4913_v19  ;;  %v4993_v18 = vadd.f32 %v4992_v16, %v4952_v45  ;;  %v22279_v16 = vld [vmem:[#allocation38_spill] sm:$0xff] }
 0x865   :  { %v4955_v43 = vpop.f32.mrf.mxu1  ;;  %v4996_v56 = vpop.f32.mrf.mxu0 }
 0x866   :  { %v4995_v12 = vadd.f32 %v4994_v41, %v4954_v47  ;;  %v22281_v47 = vld [vmem:[#allocation40_spill] sm:$0xff] }
 0x867   :  { %v4956_v31 = vpop.f32.mrf.mxu1  ;;  %v4997_v54 = vpop.f32.mrf.mxu0 }
 0x868   :  { %v5539_v31 = vcombine.high %v18554_v15, %v18554_v15 }
 0x86a   :  { %v5561_v19 = vrot.slane %v5539_v31, %v13946_v48  ;;  %v22288_v31 = vld [vmem:[#allocation47_spill] sm:$0xff] }
 0x86c   :  { %v5571_v41 = vcombine.high %v5561_v19, %v5561_v19 }
 0x881   :  { %v5033_v30 = vpop.f32.mrf.mxu1 }
 0x882   :  { %v5034_v49 = vadd.f32 %v5033_v30, %v4993_v18  ;;  %v22283_v18 = vld [vmem:[#allocation42_spill] sm:$0xff]  ;;  %v22284_v30 = vld [vmem:[#allocation43_spill] sm:$0xff] }
 0x883   :  { %v5035_v57 = vpop.f32.mrf.mxu1 }
 0x884   :  { %vm5040_vm10 = vcmp.ge.f32.partialorder %v5034_v49, 0.0  ;;  %v5042_v54 = vmul.f32 0.1, %v5034_v49  ;;  %v5036_v43 = vadd.f32 %v5035_v57, %v4995_v12  ;;  %v22285_v12 = vld [vmem:[#allocation44_spill] sm:$0xff]  ;;  %v22287_v57 = vld [vmem:[#allocation46_spill] sm:$0xff] }
 0x885   :  { %v5037_v53 = vpop.f32.mrf.mxu1 }
 0x886   :  { %vm5041_vm11 = vcmp.ge.f32.partialorder %v5036_v43, 0.0  ;;  %v5043_v56 = vmul.f32 0.1, %v5036_v43  ;;  %v5044_v42 = vsel %vm5040_vm10, %v5034_v49, %v5042_v54  ;;  %v22286_v49 = vld [vmem:[#allocation45_spill] sm:$0xff]  ;;  %v22289_v54 = vld [vmem:[#allocation48_spill] sm:$0xff]  ;;  %v22291_v53 = vld [vmem:[#allocation50_spill] sm:$0xff] }
 0x887   :  { %v5038_v44 = vpop.f32.mrf.mxu1  ;;  %v5046_v45 = vpack.c.bf16 %v5044_v42, %v5044_v42  ;;  %v22293_v42 = vld [vmem:[#allocation52_spill] sm:$0xff] }
 0x888   :  { %v5045_v40 = vsel %vm5041_vm11, %v5036_v43, %v5043_v56  ;;  %v22290_v43 = vld [vmem:[#allocation49_spill] sm:$0xff]  ;;  %v22292_v56 = vld [vmem:[#allocation51_spill] sm:$0xff] }
 0x889   :  { %v5047_v32 = vpack.c.bf16 %v5045_v40, %v5045_v40  ;;  %v22294_v44 = vld [vmem:[#allocation53_spill] sm:$0xff]  ;;  %v22296_v40 = vld [vmem:[#allocation55_spill] sm:$0xff] }
 0x88b   :  { %5465 = vmatprep.mubr.bf16.mxu0 %v5047_v32  ;;  %5506 = vmatprep.mubr.bf16.mxu1 %v5047_v32  ;;  %v22297_v32 = vld [vmem:[#allocation56_spill] sm:$0xff] }
 0x88c   :  { %5466 = vmatmul.mubr.bf16.vlgmr.msra.gmra.mxu0 %v5046_v45  ;;  %5507 = vmatmul.mubr.bf16.vlgmr.msra.gmra.mxu1 %v5046_v45  ;;  %v22298_v45 = vld [vmem:[#allocation57_spill] sm:$0xff] }
 0x88d   :  { %5597 = vmatpush1.bf16.msra.mxu0 %v17463_v46  ;;  %5638 = vmatpush1.bf16.msra.mxu1 %v17469_v60  ;;  %v22246_v46 = vld [vmem:[#allocation5_spill] sm:$0xff]  ;;  %v22247_v60 = vld [vmem:[#allocation6_spill] sm:$0xff] }
 0x88e   :  { %5598 = vmatprep.subr.bf16.mxu0 %v17475_v62  ;;  %5639 = vmatprep.subr.bf16.mxu1 %v17481_v63  ;;  %v22248_v62 = vld [vmem:[#allocation7_spill] sm:$0xff]  ;;  %v22249_v63 = vld [vmem:[#allocation8_spill] sm:$0xff] }
 0x88f   :  { %5628 = vmatprep.mubr.bf16.mxu0 %v5561_v19  ;;  %5669 = vmatprep.mubr.bf16.mxu1 %v5571_v41  ;;  %v22295_v19 = vld [vmem:[#allocation54_spill] sm:$0xff] }
 0x890   :  { %v22299_v41 = vld [vmem:[#allocation58_spill] sm:$0xff] }
 0x891   :  { %5599 = vmatpush1.bf16.msra.mxu0 %v17487_v0  ;;  %5640 = vmatpush1.bf16.msra.mxu1 %v17493_v1  ;;  %v22250_v0 = vld [vmem:[#allocation9_spill] sm:$0xff]  ;;  %v22251_v1 = vld [vmem:[#allocation10_spill] sm:$0xff] }
 0x892   :  { %5600 = vmatprep.subr.bf16.mxu0 %v17499_v2  ;;  %5641 = vmatprep.subr.bf16.mxu1 %v17505_v3  ;;  %v22252_v2 = vld [vmem:[#allocation11_spill] sm:$0xff]  ;;  %v22253_v3 = vld [vmem:[#allocation12_spill] sm:$0xff] }
 0x895   :  { %5601 = vmatpush1.bf16.msra.mxu0 %v17511_v4  ;;  %5642 = vmatpush1.bf16.msra.mxu1 %v17517_v6  ;;  %v5524_v4 = vcombine.high %v18550_v58, %v18550_v58  ;;  %v22254_v6 = vld [vmem:[#allocation13_spill] sm:$0xff]  ;;  %v22280_v58 = vld [vmem:[#allocation39_spill] sm:$0xff] }
 0x896   :  { %5602 = vmatprep.subr.bf16.mxu0 %v17523_v7  ;;  %5643 = vmatprep.subr.bf16.mxu1 %v17529_v8  ;;  %v22255_v7 = vld [vmem:[#allocation14_spill] sm:$0xff]  ;;  %v22256_v8 = vld [vmem:[#allocation15_spill] sm:$0xff] }
 0x899   :  { %5603 = vmatpush1.bf16.msra.mxu0 %v17535_v9  ;;  %5644 = vmatpush1.bf16.msra.mxu1 %v17541_v11  ;;  %v22257_v9 = vld [vmem:[#allocation16_spill] sm:$0xff]  ;;  %v18614_v11 = vrot.slane %v5524_v4, %v13946_v48  ;;  %v22308_v4 = vld [vmem:[#allocation67_spill] sm:$0xff] }
 0x89a   :  { %5604 = vmatprep.subr.bf16.mxu0 %v17547_v22  ;;  %5645 = vmatprep.subr.bf16.mxu1 %v17553_v29  ;;  %v22258_v22 = vld [vmem:[#allocation17_spill] sm:$0xff]  ;;  %v22259_v29 = vld [vmem:[#allocation18_spill] sm:$0xff] }
 0x89d   :  { %5605 = vmatpush1.bf16.msra.mxu0 %v17559_v26  ;;  %5646 = vmatpush1.bf16.msra.mxu1 %v17565_v27  ;;  %v22260_v26 = vld [vmem:[#allocation19_spill] sm:$0xff]  ;;  %v22261_v27 = vld [vmem:[#allocation20_spill] sm:$0xff] }
 0x89e   :  { %5606 = vmatprep.subr.bf16.mxu0 %v17571_v5  ;;  %5647 = vmatprep.subr.bf16.mxu1 %v17577_v50  ;;  %v5540_v5 = vcombine.high %v18614_v11, %v18614_v11  ;;  %v5547_v50 = vrot.slane %v18554_v15, %v13946_v48  ;;  %v22282_v15 = vld [vmem:[#allocation41_spill] sm:$0xff] }
 0x8a1   :  { %5607 = vmatpush1.bf16.msra.mxu0 %v17583_v24  ;;  %5648 = vmatpush1.bf16.msra.mxu1 %v17589_v17  ;;  %v22262_v24 = vld [vmem:[#allocation21_spill] sm:$0xff]  ;;  %v22263_v17 = vld [vmem:[#allocation22_spill] sm:$0xff] }
 0x8a2   :  { %5608 = vmatprep.subr.bf16.mxu0 %v17595_v23  ;;  %5649 = vmatprep.subr.bf16.mxu1 %v17601_v10  ;;  %v22264_v23 = vld [vmem:[#allocation23_spill] sm:$0xff]  ;;  %v22265_v10 = vld [vmem:[#allocation24_spill] sm:$0xff] }
 0x8a5   :  { %5609 = vmatpush1.bf16.msra.mxu0 %v17607_v28  ;;  %5650 = vmatpush1.bf16.msra.mxu1 %v17613_v21  ;;  %v5568_v28 = vrot.slane %v5540_v5, %v13946_v48  ;;  %v5569_v21 = vcombine.high %v5547_v50, %v5547_v50  ;;  %v22317_v5 = vld [vmem:[#allocation76_spill] sm:$0xff] }
 0x8a6   :  { %5610 = vmatprep.subr.bf16.mxu0 %v17619_v25  ;;  %5651 = vmatprep.subr.bf16.mxu1 %v17625_v13  ;;  %v22266_v25 = vld [vmem:[#allocation25_spill] sm:$0xff]  ;;  %v22267_v13 = vld [vmem:[#allocation26_spill] sm:$0xff] }
 0x8a9   :  { %5611 = vmatpush1.bf16.msra.mxu0 %v17631_v20  ;;  %5652 = vmatpush1.bf16.msra.mxu1 %v17637_v33  ;;  %v22268_v20 = vld [vmem:[#allocation27_spill] sm:$0xff]  ;;  %v22269_v33 = vld [vmem:[#allocation28_spill] sm:$0xff] }
 0x8aa   :  { %5612 = vmatprep.subr.bf16.mxu0 %v17643_v34  ;;  %5653 = vmatprep.subr.bf16.mxu1 %v17649_v35  ;;  %v5572_v34 = vcombine.high %v5568_v28, %v5568_v28  ;;  %v22270_v35 = vld [vmem:[#allocation29_spill] sm:$0xff] }
 0x8ad   :  { %5613 = vmatpush2.bf16.msra.mxu0 %v17655_v36  ;;  %5654 = vmatpush2.bf16.msra.mxu1 %v17661_v37  ;;  %v22271_v36 = vld [vmem:[#allocation30_spill] sm:$0xff]  ;;  %v22272_v37 = vld [vmem:[#allocation31_spill] sm:$0xff] }
 0x8ae   :  { %5614 = vmatprep.subr.bf16.mxu0 %v17667_v38  ;;  %5655 = vmatprep.subr.bf16.mxu1 %v17673_v39  ;;  %v22273_v38 = vld [vmem:[#allocation32_spill] sm:$0xff]  ;;  %v22274_v39 = vld [vmem:[#allocation33_spill] sm:$0xff] }
 0x8b1   :  { %5615 = vmatpush2.bf16.msra.mxu0 %v17679_v61  ;;  %5656 = vmatpush2.bf16.msra.mxu1 %v17685_v55  ;;  %v22275_v61 = vld [vmem:[#allocation34_spill] sm:$0xff]  ;;  %v22276_v55 = vld [vmem:[#allocation35_spill] sm:$0xff] }
 0x8b2   :  { %5616 = vmatprep.subr.bf16.mxu0 %v17691_v14  ;;  %5657 = vmatprep.subr.bf16.mxu1 %v17697_v59  ;;  %v22277_v14 = vld [vmem:[#allocation36_spill] sm:$0xff]  ;;  %v22278_v59 = vld [vmem:[#allocation37_spill] sm:$0xff] }
 0x8b5   :  { %5617 = vmatpush2.bf16.msra.mxu0 %v22246_v46  ;;  %5658 = vmatpush2.bf16.msra.mxu1 %v22247_v60  ;;  %v22300_v46 = vld [vmem:[#allocation59_spill] sm:$0xff]  ;;  %v22301_v60 = vld [vmem:[#allocation60_spill] sm:$0xff] }
 0x8b6   :  { %5618 = vmatprep.subr.bf16.mxu0 %v22248_v62  ;;  %5659 = vmatprep.subr.bf16.mxu1 %v22249_v63  ;;  %v22302_v62 = vld [vmem:[#allocation61_spill] sm:$0xff]  ;;  %v22303_v63 = vld [vmem:[#allocation62_spill] sm:$0xff] }
 0x8b9   :  { %5619 = vmatpush2.bf16.msra.mxu0 %v22250_v0  ;;  %5660 = vmatpush2.bf16.msra.mxu1 %v22251_v1  ;;  %v22304_v0 = vld [vmem:[#allocation63_spill] sm:$0xff]  ;;  %v22305_v1 = vld [vmem:[#allocation64_spill] sm:$0xff] }
 0x8ba   :  { %5620 = vmatprep.subr.bf16.mxu0 %v22252_v2  ;;  %5661 = vmatprep.subr.bf16.mxu1 %v22253_v3  ;;  %v22306_v2 = vld [vmem:[#allocation65_spill] sm:$0xff]  ;;  %v22307_v3 = vld [vmem:[#allocation66_spill] sm:$0xff] }
 0x8bd   :  { %5621 = vmatpush2.bf16.msra.mxu0 %v22254_v6  ;;  %5662 = vmatpush2.bf16.msra.mxu1 %v22255_v7  ;;  %v22309_v6 = vld [vmem:[#allocation68_spill] sm:$0xff]  ;;  %v22310_v7 = vld [vmem:[#allocation69_spill] sm:$0xff] }
 0x8be   :  { %5622 = vmatprep.subr.bf16.mxu0 %v22256_v8  ;;  %5663 = vmatprep.subr.bf16.mxu1 %v22257_v9  ;;  %v22311_v8 = vld [vmem:[#allocation70_spill] sm:$0xff]  ;;  %v22312_v9 = vld [vmem:[#allocation71_spill] sm:$0xff] }
 0x8c1   :  { %5623 = vmatpush2.bf16.msra.mxu0 %v22258_v22  ;;  %5664 = vmatpush2.bf16.msra.mxu1 %v22259_v29  ;;  %v22313_v22 = vld [vmem:[#allocation72_spill] sm:$0xff]  ;;  %v22314_v29 = vld [vmem:[#allocation73_spill] sm:$0xff] }
 0x8c2   :  { %5624 = vmatprep.subr.bf16.mxu0 %v22260_v26  ;;  %5665 = vmatprep.subr.bf16.mxu1 %v22261_v27  ;;  %v22315_v26 = vld [vmem:[#allocation74_spill] sm:$0xff]  ;;  %v22316_v27 = vld [vmem:[#allocation75_spill] sm:$0xff] }
 0x8c5   :  { %5625 = vmatpush2.bf16.msra.mxu0 %v22262_v24  ;;  %5666 = vmatpush2.bf16.msra.mxu1 %v22263_v17  ;;  %v22319_v24 = vld [vmem:[#allocation78_spill] sm:$0xff]  ;;  %v22320_v17 = vld [vmem:[#allocation79_spill] sm:$0xff] }
 0x8c6   :  { %5626 = vmatprep.subr.bf16.mxu0 %v22264_v23  ;;  %5667 = vmatprep.subr.bf16.mxu1 %v22265_v10  ;;  %v22321_v23 = vld [vmem:[#allocation80_spill] sm:$0xff]  ;;  %v22322_v10 = vld [vmem:[#allocation81_spill] sm:$0xff] }
 0x8c9   :  { %5627 = vmatpush2.bf16.msra.mxu0 %v22266_v25  ;;  %5668 = vmatpush2.bf16.msra.mxu1 %v22267_v13  ;;  %v22325_v25 = vld [vmem:[#allocation84_spill] sm:$0xff]  ;;  %v5554_v13 = vrot.slane %v18614_v11, %v13946_v48  ;;  %v22334_v11 = vmov 0  }
 0x8ca   :  { %5678 = vmatprep.subr.bf16.mxu0 %v22268_v20  ;;  %5719 = vmatprep.subr.bf16.mxu1 %v22269_v33  ;;  %v22326_v20 = vld [vmem:[#allocation85_spill] sm:$0xff]  ;;  %v22327_v33 = vld [vmem:[#allocation86_spill] sm:$0xff] }
 0x8cc   :  { %5629 = vmatmul.mubr.bf16.vlgmr.msra.gmra.mxu0 %v5547_v50  ;;  %5670 = vmatmul.mubr.bf16.vlgmr.msra.gmra.mxu1 %v5569_v21  ;;  %v22318_v50 = vld [vmem:[#allocation77_spill] sm:$0xff]  ;;  %v22324_v21 = vld [vmem:[#allocation83_spill] sm:$0xff] }
 0x8cd   :  { %5679 = vmatpush1.bf16.msra.mxu0 %v22270_v35  ;;  %5720 = vmatpush1.bf16.msra.mxu1 %v22271_v36  ;;  %v22329_v35 = vld [vmem:[#allocation88_spill] sm:$0xff]  ;;  %v5570_v36 = vcombine.high %v5554_v13, %v5554_v13 }
 0x8ce   :  { %5680 = vmatprep.subr.bf16.mxu0 %v22272_v37  ;;  %5721 = vmatprep.subr.bf16.mxu1 %v22273_v38  ;;  %v22330_v37 = vld [vmem:[#allocation89_spill] sm:$0xff]  ;;  %v22331_v38 = vld [vmem:[#allocation90_spill] sm:$0xff] }
 0x8cf   :  { %5710 = vmatprep.mubr.bf16.mxu0 %v5568_v28  ;;  %5751 = vmatprep.mubr.bf16.mxu1 %v5572_v34  ;;  %v22323_v28 = vld [vmem:[#allocation82_spill] sm:$0xff]  ;;  %v22328_v34 = vld [vmem:[#allocation87_spill] sm:$0xff] }
 0x8d1   :  { %5681 = vmatpush1.bf16.msra.mxu0 %v22274_v39  ;;  %5722 = vmatpush1.bf16.msra.mxu1 %v22275_v61  ;;  %v22332_v39 = vld [vmem:[#allocation91_spill] sm:$0xff]  ;;  %v22333_v61 = vld [vmem:[#allocation92_spill] sm:$0xff] }
 0x8d2   :  { %5682 = vmatprep.subr.bf16.mxu0 %v22276_v55  ;;  %5723 = vmatprep.subr.bf16.mxu1 %v22277_v14  ;;  %v22335_v55 = vld [vmem:[#allocation93_spill] sm:$0xff]  ;;  %v22336_v14 = vld [vmem:[#allocation94_spill] sm:$0xff] }
 0x8d5   :  { %5683 = vmatpush1.bf16.msra.mxu0 %v22278_v59  ;;  %5724 = vmatpush1.bf16.msra.mxu1 %v22279_v16  ;;  %v22337_v59 = vld [vmem:[#allocation95_spill] sm:$0xff]  ;;  %v12596_v16 = vld [vmem:[%s21247_s3 + $0xce0] ss:$16 sps:$4 sm:$0xff]  }
 0x8d6   :  { %5684 = vmatprep.subr.bf16.mxu0 %v22280_v58  ;;  %5725 = vmatprep.subr.bf16.mxu1 %v22281_v47  ;;  %v12598_v58 = vld [vmem:[%s21247_s3 + $0xce4] ss:$16 sps:$4 sm:$0xff]  }
 0x8d7   :  { %v12604_v47 = vld [vmem:[%s21247_s3 + $0xcc4] ss:$16 sps:$4 sm:$0xff]  }
 0x8d9   :  { %5685 = vmatpush1.bf16.msra.mxu0 %v22282_v15  ;;  %5726 = vmatpush1.bf16.msra.mxu1 %v22283_v18  ;;  %v22338_v15 = vld [vmem:[#allocation96_spill] sm:$0xff] }
 0x8da   :  { %5686 = vmatprep.subr.bf16.mxu0 %v22284_v30  ;;  %5727 = vmatprep.subr.bf16.mxu1 %v22285_v12  ;;  %v12602_v18 = vld [vmem:[%s21247_s3 + $0xcc0] ss:$16 sps:$4 sm:$0xff]   ;;  %v22339_v30 = vld [vmem:[#allocation97_spill] sm:$0xff]  ;;  %v12610_v12 = vld [vmem:[%s21247_s3 + $0xca4] ss:$16 sps:$4 sm:$0xff]  }
 0x8dd   :  { %5687 = vmatpush1.bf16.msra.mxu0 %v22286_v49  ;;  %5728 = vmatpush1.bf16.msra.mxu1 %v22287_v57  ;;  %v22340_v49 = vld [vmem:[#allocation98_spill] sm:$0xff] }
 0x8de   :  { %5688 = vmatprep.subr.bf16.mxu0 %v22288_v31  ;;  %5729 = vmatprep.subr.bf16.mxu1 %v22289_v54  ;;  %v12608_v57 = vld [vmem:[%s21247_s3 + $0xca0] ss:$16 sps:$4 sm:$0xff]   ;;  %v22341_v31 = vld [vmem:[#allocation99_spill] sm:$0xff]  ;;  %v12616_v54 = vld [vmem:[%s21247_s3 + $0xc84] ss:$16 sps:$4 sm:$0xff]  }
 0x8e1   :  { %5689 = vmatpush1.bf16.msra.mxu0 %v22290_v43  ;;  %5730 = vmatpush1.bf16.msra.mxu1 %v22291_v53  ;;  %v22342_v43 = vld [vmem:[#allocation100_spill] sm:$0xff] }
 0x8e2   :  { %5690 = vmatprep.subr.bf16.mxu0 %v22292_v56  ;;  %5731 = vmatprep.subr.bf16.mxu1 %v22293_v42  ;;  %v12614_v53 = vld [vmem:[%s21247_s3 + $0xc80] ss:$16 sps:$4 sm:$0xff]   ;;  %v22343_v56 = vld [vmem:[#allocation101_spill] sm:$0xff]  ;;  %v12622_v42 = vld [vmem:[%s21247_s3 + $0xc64] ss:$16 sps:$4 sm:$0xff]  }
 0x8e5   :  { %5691 = vmatpush1.bf16.msra.mxu0 %v22294_v44  ;;  %5732 = vmatpush1.bf16.msra.mxu1 %v22295_v19  ;;  %v22344_v44 = vld [vmem:[#allocation102_spill] sm:$0xff] }
 0x8e6   :  { %5692 = vmatprep.subr.bf16.mxu0 %v22296_v40  ;;  %5733 = vmatprep.subr.bf16.mxu1 %v22297_v32  ;;  %v12620_v19 = vld [vmem:[%s21247_s3 + $0xc60] ss:$16 sps:$4 sm:$0xff]   ;;  %v22345_v40 = vld [vmem:[#allocation103_spill] sm:$0xff]  ;;  %v12628_v32 = vld [vmem:[%s21247_s3 + $0xc44] ss:$16 sps:$4 sm:$0xff]  }
 0x8e9   :  { %5693 = vmatpush1.bf16.msra.mxu0 %v22298_v45  ;;  %5734 = vmatpush1.bf16.msra.mxu1 %v22299_v41  ;;  %v22346_v45 = vld [vmem:[#allocation104_spill] sm:$0xff]  ;;  %v11018_v41 = vld.sshfl [vmem:[%s21697_s20 + $0x3e] sm:$0x1 pattern:$0x75316420] }
 0x8ea   :  { %5694 = vmatprep.subr.bf16.mxu0 %v22300_v46  ;;  %5735 = vmatprep.subr.bf16.mxu1 %v22301_v60  ;;  %v12626_v46 = vld [vmem:[%s21247_s3 + $0xc40] ss:$16 sps:$4 sm:$0xff]   ;;  %v22347_v60 = vld [vmem:[#allocation105_spill] sm:$0xff] }
 0x8ed   :  { %5695 = vmatpush2.bf16.msra.mxu0 %v22302_v62  ;;  %5736 = vmatpush2.bf16.msra.mxu1 %v22303_v63  ;;  %v12601_v62 = vld [vmem:[%s21247_s3 + $0xcec] ss:$16 sps:$4 sm:$0xff]   ;;  %v5586_v63 = vrot.slane %v11018_v41, %v13946_v48  ;;  %v12671_v41 = vld [vmem:[%s21247_s3 + $0xd68] ss:$16 sps:$4 sm:$0xff]  }
 0x8ee   :  { %5696 = vmatprep.subr.bf16.mxu0 %v22304_v0  ;;  %5737 = vmatprep.subr.bf16.mxu1 %v22305_v1  ;;  %v22348_v0 = vld [vmem:[#allocation106_spill] sm:$0xff]  ;;  %v12599_v1 = vld [vmem:[%s21247_s3 + $0xce8] ss:$16 sps:$4 sm:$0xff]  }
 0x8f1   :  { %5697 = vmatpush2.bf16.msra.mxu0 %v22306_v2  ;;  %5738 = vmatpush2.bf16.msra.mxu1 %v22307_v3  ;;  %v12607_v2 = vld [vmem:[%s21247_s3 + $0xccc] ss:$16 sps:$4 sm:$0xff]   ;;  %v12605_v3 = vld [vmem:[%s21247_s3 + $0xcc8] ss:$16 sps:$4 sm:$0xff]  }
 0x8f2   :  { %5698 = vmatprep.subr.bf16.mxu0 %v22308_v4  ;;  %5739 = vmatprep.subr.bf16.mxu1 %v22309_v6  ;;  %v12613_v4 = vld [vmem:[%s21247_s3 + $0xcac] ss:$16 sps:$4 sm:$0xff]   ;;  %v12611_v6 = vld [vmem:[%s21247_s3 + $0xca8] ss:$16 sps:$4 sm:$0xff]  }
 0x8f5   :  { %5699 = vmatpush2.bf16.msra.mxu0 %v22310_v7  ;;  %5740 = vmatpush2.bf16.msra.mxu1 %v22311_v8  ;;  %v12619_v7 = vld [vmem:[%s21247_s3 + $0xc8c] ss:$16 sps:$4 sm:$0xff]   ;;  %v12617_v8 = vld [vmem:[%s21247_s3 + $0xc88] ss:$16 sps:$4 sm:$0xff]  }
 0x8f6   :  { %5700 = vmatprep.subr.bf16.mxu0 %v22312_v9  ;;  %5741 = vmatprep.subr.bf16.mxu1 %v22313_v22  ;;  %v12625_v9 = vld [vmem:[%s21247_s3 + $0xc6c] ss:$16 sps:$4 sm:$0xff]   ;;  %v12623_v22 = vld [vmem:[%s21247_s3 + $0xc68] ss:$16 sps:$4 sm:$0xff]  }
 0x8f9   :  { %5701 = vmatpush2.bf16.msra.mxu0 %v22314_v29  ;;  %5742 = vmatpush2.bf16.msra.mxu1 %v22315_v26  ;;  %v12631_v29 = vld [vmem:[%s21247_s3 + $0xc4c] ss:$16 sps:$4 sm:$0xff]   ;;  %v12629_v26 = vld [vmem:[%s21247_s3 + $0xc48] ss:$16 sps:$4 sm:$0xff]  }
 0x8fa   :  { %5702 = vmatprep.subr.bf16.mxu0 %v22316_v27  ;;  %5743 = vmatprep.subr.bf16.mxu1 %v22317_v5 }
 0x8fd   :  { %5703 = vmatpush2.bf16.msra.mxu0 %v22318_v50  ;;  %5744 = vmatpush2.bf16.msra.mxu1 %v22319_v24  ;;  %v12634_v50 = vld [vmem:[%s21247_s3 + $0xc24] ss:$16 sps:$4 sm:$0xff]   ;;  %v22349_v24 = vld [vmem:[#allocation107_spill] sm:$0xff] }
 0x8fe   :  { %5704 = vmatprep.subr.bf16.mxu0 %v22320_v17  ;;  %5745 = vmatprep.subr.bf16.mxu1 %v22321_v23  ;;  %v22350_v23 = vld [vmem:[#allocation108_spill] sm:$0xff] }
 0x901   :  { %5705 = vmatpush2.bf16.msra.mxu0 %v22322_v10  ;;  %5746 = vmatpush2.bf16.msra.mxu1 %v22323_v28  ;;  %v12632_v28 = vld [vmem:[%s21247_s3 + $0xc20] ss:$16 sps:$4 sm:$0xff]  }
 0x902   :  { %5706 = vmatprep.subr.bf16.mxu0 %v22324_v21  ;;  %5747 = vmatprep.subr.bf16.mxu1 %v22325_v25  ;;  %v12637_v21 = vld [vmem:[%s21247_s3 + $0xc2c] ss:$16 sps:$4 sm:$0xff]  }
 0x905   :  { %5707 = vmatpush2.bf16.msra.mxu0 %v22326_v20  ;;  %5748 = vmatpush2.bf16.msra.mxu1 %v22327_v33  ;;  %v12635_v20 = vld [vmem:[%s21247_s3 + $0xc28] ss:$16 sps:$4 sm:$0xff]  }
 0x906   :  { %5708 = vmatprep.subr.bf16.mxu0 %v22328_v34  ;;  %5749 = vmatprep.subr.bf16.mxu1 %v22329_v35  ;;  %v22351_v33 = vld [vmem:[#allocation109_spill] sm:$0xff]  ;;  %v22352_v35 = vld [vmem:[#allocation110_spill] sm:$0xff] }
 0x909   :  { %5709 = vmatpush2.bf16.msra.mxu0 %v22330_v37  ;;  %5750 = vmatpush2.bf16.msra.mxu1 %v22331_v38 }
 0x90a   :  { %5760 = vmatprep.subr.bf16.mxu0 %v22332_v39  ;;  %6194 = vmatprep.subr.bf16.mxu1 %v12598_v58  ;;  %v12640_v39 = vld [vmem:[%s21247_s3 + $0xc04] ss:$16 sps:$4 sm:$0xff]  }
 0x90b   :  { %v12646_v58 = vld [vmem:[%s21247_s3 + $0xde4] ss:$16 sps:$4 sm:$0xff]  }
 0x90c   :  { %5711 = vmatmul.mubr.bf16.vlgmr.msra.gmra.mxu0 %v5554_v13  ;;  %5752 = vmatmul.mubr.bf16.vlgmr.msra.gmra.mxu1 %v5570_v36 }
 0x90d   :  { %5761 = vmatpush1.bf16.msra.mxu0 %v22333_v61  ;;  %5792 = vmatprep.mubr.bf16.mxu0 %v22334_v11  ;;  %v12638_v61 = vld [vmem:[%s21247_s3 + $0xc00] ss:$16 sps:$4 sm:$0xff]  }
 0x90e   :  { %5762 = vmatprep.subr.bf16.mxu0 %v22335_v55  ;;  %6195 = vmatpush1.bf16.msra.mxu1 %v12596_v16  ;;  %v12643_v55 = vld [vmem:[%s21247_s3 + $0xc0c] ss:$16 sps:$4 sm:$0xff]   ;;  %v12641_v16 = vld [vmem:[%s21247_s3 + $0xc08] ss:$16 sps:$4 sm:$0xff]  }
 0x90f   :  { %6196 = vmatprep.subr.bf16.mxu1 %v12604_v47  ;;  %v12644_v47 = vld [vmem:[%s21247_s3 + $0xde0] ss:$16 sps:$4 sm:$0xff]  }
 0x911   :  { %5763 = vmatpush1.bf16.msra.mxu0 %v22336_v14 }
 0x912   :  { %5764 = vmatprep.subr.bf16.mxu0 %v22337_v59  ;;  %6197 = vmatpush1.bf16.msra.mxu1 %v12602_v18  ;;  %v12647_v18 = vld [vmem:[%s21247_s3 + $0xde8] ss:$16 sps:$4 sm:$0xff]  }
 0x913   :  { %6198 = vmatprep.subr.bf16.mxu1 %v12610_v12  ;;  %v12655_v12 = vld [vmem:[%s21247_s3 + $0xdcc] ss:$16 sps:$4 sm:$0xff]  }
 0x915   :  { %5765 = vmatpush1.bf16.msra.mxu0 %v22338_v15  ;;  %v12649_v15 = vld [vmem:[%s21247_s3 + $0xdec] ss:$16 sps:$4 sm:$0xff]  }
 0x916   :  { %5766 = vmatprep.subr.bf16.mxu0 %v22339_v30  ;;  %6199 = vmatpush1.bf16.msra.mxu1 %v12608_v57  ;;  %v12652_v30 = vld [vmem:[%s21247_s3 + $0xdc4] ss:$16 sps:$4 sm:$0xff]   ;;  %v12653_v57 = vld [vmem:[%s21247_s3 + $0xdc8] ss:$16 sps:$4 sm:$0xff]  }
 0x917   :  { %6200 = vmatprep.subr.bf16.mxu1 %v12616_v54  ;;  %v12661_v54 = vld [vmem:[%s21247_s3 + $0xdac] ss:$16 sps:$4 sm:$0xff]  }
 0x919   :  { %5767 = vmatpush1.bf16.msra.mxu0 %v22340_v49  ;;  %v12650_v49 = vld [vmem:[%s21247_s3 + $0xdc0] ss:$16 sps:$4 sm:$0xff]  }
 0x91a   :  { %5768 = vmatprep.subr.bf16.mxu0 %v22341_v31  ;;  %6201 = vmatpush1.bf16.msra.mxu1 %v12614_v53  ;;  %v12658_v31 = vld [vmem:[%s21247_s3 + $0xda4] ss:$16 sps:$4 sm:$0xff]   ;;  %v12659_v53 = vld [vmem:[%s21247_s3 + $0xda8] ss:$16 sps:$4 sm:$0xff]  }
 0x91b   :  { %6202 = vmatprep.subr.bf16.mxu1 %v12622_v42  ;;  %v12667_v42 = vld [vmem:[%s21247_s3 + $0xd8c] ss:$16 sps:$4 sm:$0xff]  }
 0x91d   :  { %5769 = vmatpush1.bf16.msra.mxu0 %v22342_v43  ;;  %v12656_v43 = vld [vmem:[%s21247_s3 + $0xda0] ss:$16 sps:$4 sm:$0xff]  }
 0x91e   :  { %5770 = vmatprep.subr.bf16.mxu0 %v22343_v56  ;;  %6203 = vmatpush1.bf16.msra.mxu1 %v12620_v19  ;;  %v12664_v56 = vld [vmem:[%s21247_s3 + $0xd84] ss:$16 sps:$4 sm:$0xff]   ;;  %v12665_v19 = vld [vmem:[%s21247_s3 + $0xd88] ss:$16 sps:$4 sm:$0xff]  }
 0x91f   :  { %6204 = vmatprep.subr.bf16.mxu1 %v12628_v32  ;;  %v12673_v32 = vld [vmem:[%s21247_s3 + $0xd6c] ss:$16 sps:$4 sm:$0xff]  }
 0x921   :  { %5771 = vmatpush1.bf16.msra.mxu0 %v22344_v44  ;;  %v12662_v44 = vld [vmem:[%s21247_s3 + $0xd80] ss:$16 sps:$4 sm:$0xff]  }
 0x922   :  { %5772 = vmatprep.subr.bf16.mxu0 %v22345_v40  ;;  %6205 = vmatpush1.bf16.msra.mxu1 %v12626_v46  ;;  %v12670_v40 = vld [vmem:[%s21247_s3 + $0xd64] ss:$16 sps:$4 sm:$0xff]  }
 0x923   :  { %6206 = vmatprep.subr.bf16.mxu1 %v12634_v50  ;;  %v12676_v46 = vld [vmem:[%s21247_s3 + $0xd44] ss:$16 sps:$4 sm:$0xff]  }
 0x925   :  { %5773 = vmatpush1.bf16.msra.mxu0 %v22346_v45  ;;  %v12668_v45 = vld [vmem:[%s21247_s3 + $0xd60] ss:$16 sps:$4 sm:$0xff]  }
 0x926   :  { %5774 = vmatprep.subr.bf16.mxu0 %v22347_v60  ;;  %6207 = vmatpush1.bf16.msra.mxu1 %v12632_v28  ;;  %v12679_v60 = vld [vmem:[%s21247_s3 + $0xd4c] ss:$16 sps:$4 sm:$0xff]  }
 0x927   :  { %6208 = vmatprep.subr.bf16.mxu1 %v12640_v39 }
 0x929   :  { %5775 = vmatpush1.bf16.msra.mxu0 %v22348_v0  ;;  %v12682_v0 = vld [vmem:[%s21247_s3 + $0xd24] ss:$16 sps:$4 sm:$0xff]  }
 0x92a   :  { %6235 = vmatprep.subr.bf16.mxu0 %v12601_v62  ;;  %6209 = vmatpush1.bf16.msra.mxu1 %v12638_v61  ;;  %v12674_v62 = vld [vmem:[%s21247_s3 + $0xd40] ss:$16 sps:$4 sm:$0xff]  }
 0x92b   :  { %6210 = vmatprep.subr.bf16.mxu1 %v12646_v58 }
 0x92c   :  { %5793 = vmatmul.mubr.bf16.vlgmr.msra.gmra.mxu0 %v5586_v63  ;;  %v12677_v63 = vld [vmem:[%s21247_s3 + $0xd48] ss:$16 sps:$4 sm:$0xff]  }
 0x92d   :  { %6236 = vmatpush1.bf16.msra.mxu0 %v12599_v1  ;;  %v12680_v1 = vld [vmem:[%s21247_s3 + $0xd20] ss:$16 sps:$4 sm:$0xff]  }
 0x92e   :  { %6237 = vmatprep.subr.bf16.mxu0 %v12607_v2  ;;  %6211 = vmatpush2.bf16.msra.mxu1 %v12644_v47  ;;  %v12685_v2 = vld [vmem:[%s21247_s3 + $0xd2c] ss:$16 sps:$4 sm:$0xff]  }
 0x92f   :  { %6212 = vmatprep.subr.bf16.mxu1 %v12652_v30 }
 0x931   :  { %6238 = vmatpush1.bf16.msra.mxu0 %v12605_v3  ;;  %v12683_v3 = vld [vmem:[%s21247_s3 + $0xd28] ss:$16 sps:$4 sm:$0xff]  }
 0x932   :  { %6239 = vmatprep.subr.bf16.mxu0 %v12613_v4  ;;  %6213 = vmatpush2.bf16.msra.mxu1 %v12650_v49  ;;  %v12688_v4 = vld [vmem:[%s21247_s3 + $0xd04] ss:$16 sps:$4 sm:$0xff]  }
 0x933   :  { %6214 = vmatprep.subr.bf16.mxu1 %v12658_v31 }
 0x935   :  { %6240 = vmatpush1.bf16.msra.mxu0 %v12611_v6  ;;  %v12686_v6 = vld [vmem:[%s21247_s3 + $0xd00] ss:$16 sps:$4 sm:$0xff]  }
 0x936   :  { %6241 = vmatprep.subr.bf16.mxu0 %v12619_v7  ;;  %6215 = vmatpush2.bf16.msra.mxu1 %v12656_v43  ;;  %v12691_v7 = vld [vmem:[%s21247_s3 + $0xd0c] ss:$16 sps:$4 sm:$0xff]  }
 0x937   :  { %6216 = vmatprep.subr.bf16.mxu1 %v12664_v56 }
 0x939   :  { %6242 = vmatpush1.bf16.msra.mxu0 %v12617_v8  ;;  %v12689_v8 = vld [vmem:[%s21247_s3 + $0xd08] ss:$16 sps:$4 sm:$0xff]  }
 0x93a   :  { %6243 = vmatprep.subr.bf16.mxu0 %v12625_v9  ;;  %6217 = vmatpush2.bf16.msra.mxu1 %v12662_v44  ;;  %v22353_v9 = vld [vmem:[#allocation111_spill] sm:$0xff] }
 0x93b   :  { %6218 = vmatprep.subr.bf16.mxu1 %v12670_v40 }
 0x93d   :  { %6244 = vmatpush1.bf16.msra.mxu0 %v12623_v22  ;;  %v22354_v22 = vld [vmem:[#allocation112_spill] sm:$0xff] }
 0x93e   :  { %6245 = vmatprep.subr.bf16.mxu0 %v12631_v29  ;;  %6219 = vmatpush2.bf16.msra.mxu1 %v12668_v45 }
 0x93f   :  { %6220 = vmatprep.subr.bf16.mxu1 %v12676_v46  ;;  %v18947_v46 = vld [vmem:[%s21695_s26 + $0x170] ss:$8 sps:$4 sm:$0xff]  }
 0x941   :  { %6246 = vmatpush1.bf16.msra.mxu0 %v12629_v26 }
 0x942   :  { %6247 = vmatprep.subr.bf16.mxu0 %v12637_v21  ;;  %6221 = vmatpush2.bf16.msra.mxu1 %v12674_v62  ;;  %v18959_v62 = vld [vmem:[%s21695_s26 + $0x164] ss:$8 sps:$4 sm:$0xff]  }
 0x943   :  { %6222 = vmatprep.subr.bf16.mxu1 %v12682_v0  ;;  %v18971_v0 = vld [vmem:[%s21695_s26 + $0x160] ss:$8 sps:$4 sm:$0xff]  }
 0x945   :  { %6248 = vmatpush1.bf16.msra.mxu0 %v12635_v20 }
 0x946   :  { %6249 = vmatprep.subr.bf16.mxu0 %v12643_v55  ;;  %6223 = vmatpush2.bf16.msra.mxu1 %v12680_v1  ;;  %v18977_v1 = vld [vmem:[%s21695_s26 + $0x54] ss:$8 sps:$4 sm:$0xff]  }
 0x947   :  { %6224 = vmatprep.subr.bf16.mxu1 %v12688_v4  ;;  %v18995_v4 = vld [vmem:[%s21695_s26 + $0x150] ss:$8 sps:$4 sm:$0xff]  }
 0x949   :  { %6250 = vmatpush1.bf16.msra.mxu0 %v12641_v16  ;;  %v18929_v16 = vld [vmem:[%s21697_s20 + $0x3f] sm:$0xff] }
 0x94a   :  { %6251 = vmatprep.subr.bf16.mxu0 %v12649_v15  ;;  %6225 = vmatpush2.bf16.msra.mxu1 %v12686_v6  ;;  %v18933_v47 = vrot.slane %v18929_v16, %v13946_v48  ;;  %v19001_v6 = vld [vmem:[%s21695_s26 + $0x44] ss:$8 sps:$4 sm:$0xff]  }
 0x94b   :  { %6357 = vmatprep.subr.bf16.mxu1 %v22353_v9  ;;  %v19019_v9 = vld [vmem:[%s21695_s26 + $0x140] ss:$8 sps:$4 sm:$0xff]  }
 0x94c   :  { %v5467_v27 = vpop.f32.mrf.mxu0  ;;  %v5508_v5 = vpop.f32.mrf.mxu1 }
 0x94d   :  { %v18794_v17 = vadd.f32 %v5467_v27, %v22349_v24  ;;  %v18797_v10 = vadd.f32 %v5508_v5, %v22350_v23  ;;  %6252 = vmatpush2.bf16.msra.mxu0 %v12647_v18 }
 0x94e   :  { %v5469_v25 = vpop.f32.mrf.mxu0  ;;  %v5510_v13 = vpop.f32.mrf.mxu1  ;;  %6253 = vmatprep.subr.bf16.mxu0 %v12655_v12 }
 0x94f   :  { %v18809_v34 = vadd.f32 %v5469_v25, %v22351_v33  ;;  %v18812_v36 = vadd.f32 %v5510_v13, %v22352_v35 }
 0x950   :  { %v5471_v37 = vpop.f32.mrf.mxu0  ;;  %v5512_v38 = vpop.f32.mrf.mxu1 }
 0x951   :  { %6254 = vmatpush2.bf16.msra.mxu0 %v12653_v57  ;;  %v6300_v57 = vcombine.high %v18933_v47, %v18933_v47 }
 0x952   :  { %v5472_v14 = vpop.f32.mrf.mxu0  ;;  %v5513_v59 = vpop.f32.mrf.mxu1  ;;  %6255 = vmatprep.subr.bf16.mxu0 %v12661_v54 }
 0x953   :  { %v6322_v44 = vrot.slane %v6300_v57, %v13946_v48  ;;  %v19193_v57 = vld [vmem:[%s21695_s26 + $0xc4] ss:$8 sps:$4 sm:$0xff]  }
 0x954   :  { %22357 = vst [vmem:[#allocation7_spill] sm:$0xff] %v19193_v57 }
 0x955   :  { %6256 = vmatpush2.bf16.msra.mxu0 %v12659_v53  ;;  %v6332_v45 = vcombine.high %v6322_v44, %v6322_v44 }
 0x956   :  { %6257 = vmatprep.subr.bf16.mxu0 %v12667_v42 }
 0x959   :  { %6258 = vmatpush2.bf16.msra.mxu0 %v12665_v19 }
 0x95a   :  { %6259 = vmatprep.subr.bf16.mxu0 %v12673_v32 }
 0x95d   :  { %6260 = vmatpush2.bf16.msra.mxu0 %v12671_v41  ;;  %v18941_v41 = vld [vmem:[%s21695_s26 + $0x70] ss:$8 sps:$4 sm:$0xff]  }
 0x95e   :  { %6261 = vmatprep.subr.bf16.mxu0 %v12679_v60  ;;  %v18953_v60 = vld [vmem:[%s21695_s26 + $0x64] ss:$8 sps:$4 sm:$0xff]  }
 0x961   :  { %6262 = vmatpush2.bf16.msra.mxu0 %v12677_v63  ;;  %v18965_v63 = vld [vmem:[%s21695_s26 + $0x60] ss:$8 sps:$4 sm:$0xff]  }
 0x962   :  { %6263 = vmatprep.subr.bf16.mxu0 %v12685_v2  ;;  %v18983_v2 = vld [vmem:[%s21695_s26 + $0x154] ss:$8 sps:$4 sm:$0xff]  }
 0x965   :  { %6264 = vmatpush2.bf16.msra.mxu0 %v12683_v3  ;;  %v18989_v3 = vld [vmem:[%s21695_s26 + $0x50] ss:$8 sps:$4 sm:$0xff]  }
 0x966   :  { %6265 = vmatprep.subr.bf16.mxu0 %v12691_v7  ;;  %v19007_v7 = vld [vmem:[%s21695_s26 + $0x144] ss:$8 sps:$4 sm:$0xff]  }
 0x969   :  { %6266 = vmatpush2.bf16.msra.mxu0 %v12689_v8  ;;  %v19013_v8 = vld [vmem:[%s21695_s26 + $0x40] ss:$8 sps:$4 sm:$0xff]  }
 0x96a   :  { %6398 = vmatprep.subr.bf16.mxu0 %v22354_v22  ;;  %v19025_v22 = vld [vmem:[%s21695_s26 + $0x34] ss:$8 sps:$4 sm:$0xff]  }
 0x98c   :  { %v5630_v29 = vpop.f32.mrf.mxu0  ;;  %v5671_v26 = vpop.f32.mrf.mxu1 }
 0x98d   :  { %v5631_v27 = vadd.f32 %v5630_v29, %v14478_v51  ;;  %v19031_v29 = vld [vmem:[%s21695_s26 + $0x134] ss:$8 sps:$4 sm:$0xff]  }
 0x98e   :  { %v5632_v5 = vpop.f32.mrf.mxu0  ;;  %v5673_v50 = vpop.f32.mrf.mxu1 }
 0x98f   :  { %v5633_v24 = vadd.f32 %v5632_v5, %v14481_v52  ;;  %v5672_v23 = vadd.f32 %v5671_v26, %v5631_v27  ;;  %v19037_v26 = vld [vmem:[%s21695_s26 + $0x30] ss:$8 sps:$4 sm:$0xff]   ;;  %v19049_v5 = vld [vmem:[%s21695_s26 + $0x24] ss:$8 sps:$4 sm:$0xff]  }
 0x990   :  { %v5634_v28 = vpop.f32.mrf.mxu0  ;;  %v5675_v21 = vpop.f32.mrf.mxu1  ;;  %v19043_v27 = vld [vmem:[%s21695_s26 + $0x130] ss:$8 sps:$4 sm:$0xff]  }
 0x991   :  { %v5674_v25 = vadd.f32 %v5673_v50, %v5633_v24  ;;  %v19055_v50 = vld [vmem:[%s21695_s26 + $0x124] ss:$8 sps:$4 sm:$0xff]   ;;  %v19061_v24 = vld [vmem:[%s21695_s26 + $0x20] ss:$8 sps:$4 sm:$0xff]   ;;  %v19073_v28 = vld [vmem:[%s21695_s26 + $0x14] ss:$8 sps:$4 sm:$0xff]  }
 0x992   :  { %v5635_v13 = vpop.f32.mrf.mxu0  ;;  %v5676_v20 = vpop.f32.mrf.mxu1  ;;  %v19079_v21 = vld [vmem:[%s21695_s26 + $0x114] ss:$8 sps:$4 sm:$0xff]  }
 0x993   :  { %v19091_v13 = vld [vmem:[%s21695_s26 + $0x110] ss:$8 sps:$4 sm:$0xff]   ;;  %v19097_v20 = vld [vmem:[%s21695_s26 + $0x4] ss:$8 sps:$4 sm:$0xff]  }
 0x9cc   :  { %v5712_v33 = vpop.f32.mrf.mxu0  ;;  %v5753_v35 = vpop.f32.mrf.mxu1 }
 0x9cd   :  { %v5713_v59 = vadd.f32 %v5712_v33, %v5672_v23  ;;  %v19067_v23 = vld [vmem:[%s21695_s26 + $0x120] ss:$8 sps:$4 sm:$0xff]   ;;  %v19103_v33 = vld [vmem:[%s21695_s26 + $0x104] ss:$8 sps:$4 sm:$0xff]  }
 0x9ce   :  { %v5714_v37 = vpop.f32.mrf.mxu0  ;;  %v5755_v38 = vpop.f32.mrf.mxu1 }
 0x9cf   :  { %v5715_v58 = vadd.f32 %v5714_v37, %v5674_v25  ;;  %v5754_v15 = vadd.f32 %v5753_v35, %v5713_v59  ;;  %v19085_v25 = vld [vmem:[%s21695_s26 + $0x10] ss:$8 sps:$4 sm:$0xff]   ;;  %v19109_v35 = vld [vmem:[%s21695_s26] ss:$8 sps:$4 sm:$0xff]   ;;  %v19151_v59 = vld [vmem:[%s21695_s26 + $0x1e4] ss:$8 sps:$4 sm:$0xff]  }
 0x9d0   :  { %v5716_v39 = vpop.f32.mrf.mxu0  ;;  %v5757_v61 = vpop.f32.mrf.mxu1  ;;  %v19115_v37 = vld [vmem:[%s21695_s26 + $0x100] ss:$8 sps:$4 sm:$0xff]  }
 0x9d1   :  { %v5756_v30 = vadd.f32 %v5755_v38, %v5715_v58  ;;  %v19121_v38 = vld [vmem:[%s21695_s26 + $0xf4] ss:$8 sps:$4 sm:$0xff]   ;;  %v19133_v61 = vld [vmem:[%s21695_s26 + $0xf0] ss:$8 sps:$4 sm:$0xff]   ;;  %v19157_v58 = vld [vmem:[%s21695_s26 + $0xe0] ss:$8 sps:$4 sm:$0xff]  }
 0x9d2   :  { %v5717_v55 = vpop.f32.mrf.mxu0  ;;  %v5758_v14 = vpop.f32.mrf.mxu1  ;;  %v19127_v39 = vld [vmem:[%s21695_s26 + $0x1f4] ss:$8 sps:$4 sm:$0xff]  }
 0x9d3   :  { %v19139_v55 = vld [vmem:[%s21695_s26 + $0x1f0] ss:$8 sps:$4 sm:$0xff]   ;;  %v19145_v14 = vld [vmem:[%s21695_s26 + $0xe4] ss:$8 sps:$4 sm:$0xff]  }
 0x9ec   :  { %v5794_v18 = vpop.f32.mrf.mxu0 }
 0x9ed   :  { %v5795_v12 = vadd.f32 %v5794_v18, %v5754_v15  ;;  %v19163_v15 = vld [vmem:[%s21695_s26 + $0x1e0] ss:$8 sps:$4 sm:$0xff]   ;;  %v19169_v18 = vld [vmem:[%s21695_s26 + $0xd4] ss:$8 sps:$4 sm:$0xff]  }
 0x9ee   :  { %v5796_v49 = vpop.f32.mrf.mxu0 }
 0x9ef   :  { %vm5801_vm12 = vcmp.ge.f32.partialorder %v5795_v12, 0.0  ;;  %v5803_v31 = vmul.f32 0.1, %v5795_v12  ;;  %v5797_v54 = vadd.f32 %v5796_v49, %v5756_v30  ;;  %v19175_v30 = vld [vmem:[%s21695_s26 + $0x1d4] ss:$8 sps:$4 sm:$0xff]  }
 0x9f0   :  { %v5798_v43 = vpop.f32.mrf.mxu0  ;;  %v19187_v49 = vld [vmem:[%s21695_s26 + $0x1d0] ss:$8 sps:$4 sm:$0xff]  }
 0x9f1   :  { %vm5802_vm13 = vcmp.ge.f32.partialorder %v5797_v54, 0.0  ;;  %v5804_v53 = vmul.f32 0.1, %v5797_v54  ;;  %v5805_v56 = vsel %vm5801_vm12, %v5795_v12, %v5803_v31  ;;  %v19181_v12 = vld [vmem:[%s21695_s26 + $0xd0] ss:$8 sps:$4 sm:$0xff]   ;;  %22356 = vst [vmem:[#allocation6_spill] sm:$0xff] %v19187_v49 }
 0x9f2   :  { %v5799_v42 = vpop.f32.mrf.mxu0  ;;  %v5807_v32 = vpack.c.bf16 %v5805_v56, %v5805_v56  ;;  %22355 = vst [vmem:[#allocation5_spill] sm:$0xff] %v19181_v12  ;;  %v19199_v31 = vld [vmem:[%s21695_s26 + $0x1c4] ss:$8 sps:$4 sm:$0xff]   ;;  %v19211_v43 = vld [vmem:[%s21695_s26 + $0x1c0] ss:$8 sps:$4 sm:$0xff]  }
 0x9f3   :  { %v5806_v19 = vsel %vm5802_vm13, %v5797_v54, %v5804_v53  ;;  %22358 = vst [vmem:[#allocation8_spill] sm:$0xff] %v19199_v31  ;;  %v19205_v54 = vld [vmem:[%s21695_s26 + $0xc0] ss:$8 sps:$4 sm:$0xff]   ;;  %22360 = vst [vmem:[#allocation10_spill] sm:$0xff] %v19211_v43  ;;  %v19217_v53 = vld [vmem:[%s21695_s26 + $0xb4] ss:$8 sps:$4 sm:$0xff]   ;;  %v6285_v42 = vcombine.high %v18929_v16, %v18929_v16 }
 0x9f4   :  { %v5808_v40 = vpack.c.bf16 %v5806_v19, %v5806_v19  ;;  %22359 = vst [vmem:[#allocation9_spill] sm:$0xff] %v19205_v54  ;;  %22361 = vst [vmem:[#allocation11_spill] sm:$0xff] %v19217_v53  ;;  %v19223_v56 = vld [vmem:[%s21695_s26 + $0x1b4] ss:$8 sps:$4 sm:$0xff]   ;;  %v19237_v19 = vld [vmem:[%s21695_s26 + $0x1b0] ss:$8 sps:$4 sm:$0xff]  }
 0x9f5   :  { %22362 = vst [vmem:[#allocation12_spill] sm:$0xff] %v19223_v56  ;;  %22364 = vst [vmem:[#allocation14_spill] sm:$0xff] %v19237_v19  ;;  %v19249_v16 = vld [vmem:[%s21695_s26 + $0x1a4] ss:$8 sps:$4 sm:$0xff]  }
 0x9f6   :  { %6226 = vmatprep.mubr.bf16.mxu1 %v5808_v40  ;;  %6267 = vmatprep.mubr.bf16.mxu0 %v5808_v40  ;;  %v19243_v40 = vld [vmem:[%s21695_s26 + $0xa4] ss:$8 sps:$4 sm:$0xff]   ;;  %22366 = vst [vmem:[#allocation16_spill] sm:$0xff] %v19249_v16 }
 0x9f7   :  { %6227 = vmatmul.mubr.bf16.vlgmr.msra.gmra.mxu1 %v5807_v32  ;;  %6268 = vmatmul.mubr.bf16.vlgmr.msra.gmra.mxu0 %v5807_v32  ;;  %22365 = vst [vmem:[#allocation15_spill] sm:$0xff] %v19243_v40  ;;  %v19253_v32 = vrot.slane %v6285_v42, %v13946_v48  ;;  %v19276_v42 = vld [vmem:[%s21695_s26 + $0x194] ss:$8 sps:$4 sm:$0xff]  }
 0x9f8   :  { %6358 = vmatpush1.bf16.msra.mxu1 %v18941_v41  ;;  %6399 = vmatpush1.bf16.msra.mxu0 %v18947_v46  ;;  %22370 = vst [vmem:[#allocation20_spill] sm:$0xff] %v19276_v42 }
 0x9f9   :  { %6359 = vmatprep.subr.bf16.mxu1 %v18953_v60  ;;  %6400 = vmatprep.subr.bf16.mxu0 %v18959_v62 }
 0x9fa   :  { %6389 = vmatprep.mubr.bf16.mxu1 %v6322_v44  ;;  %6430 = vmatprep.mubr.bf16.mxu0 %v6332_v45  ;;  %v19231_v44 = vld [vmem:[%s21695_s26 + $0xb0] ss:$8 sps:$4 sm:$0xff]   ;;  %v19258_v45 = vld [vmem:[%s21695_s26 + $0xa0] ss:$8 sps:$4 sm:$0xff]  }
 0x9fb   :  { %22363 = vst [vmem:[#allocation13_spill] sm:$0xff] %v19231_v44  ;;  %22367 = vst [vmem:[#allocation17_spill] sm:$0xff] %v19258_v45 }
 0x9fc   :  { %6360 = vmatpush1.bf16.msra.mxu1 %v18965_v63  ;;  %6401 = vmatpush1.bf16.msra.mxu0 %v18971_v0 }
 0x9fd   :  { %6361 = vmatprep.subr.bf16.mxu1 %v18977_v1  ;;  %6402 = vmatprep.subr.bf16.mxu0 %v18983_v2 }
 0xa00   :  { %6362 = vmatpush1.bf16.msra.mxu1 %v18989_v3  ;;  %6403 = vmatpush1.bf16.msra.mxu0 %v18995_v4 }
 0xa01   :  { %6363 = vmatprep.subr.bf16.mxu1 %v19001_v6  ;;  %6404 = vmatprep.subr.bf16.mxu0 %v19007_v7 }
 0xa04   :  { %6364 = vmatpush1.bf16.msra.mxu1 %v19013_v8  ;;  %6405 = vmatpush1.bf16.msra.mxu0 %v19019_v9 }
 0xa05   :  { %6365 = vmatprep.subr.bf16.mxu1 %v19025_v22  ;;  %6406 = vmatprep.subr.bf16.mxu0 %v19031_v29 }
 0xa08   :  { %6366 = vmatpush1.bf16.msra.mxu1 %v19037_v26  ;;  %6407 = vmatpush1.bf16.msra.mxu0 %v19043_v27 }
 0xa09   :  { %6367 = vmatprep.subr.bf16.mxu1 %v19049_v5  ;;  %6408 = vmatprep.subr.bf16.mxu0 %v19055_v50 }
 0xa0c   :  { %6368 = vmatpush1.bf16.msra.mxu1 %v19061_v24  ;;  %6409 = vmatpush1.bf16.msra.mxu0 %v19067_v23 }
 0xa0d   :  { %6369 = vmatprep.subr.bf16.mxu1 %v19073_v28  ;;  %6410 = vmatprep.subr.bf16.mxu0 %v19079_v21 }
 0xa10   :  { %6370 = vmatpush1.bf16.msra.mxu1 %v19085_v25  ;;  %6411 = vmatpush1.bf16.msra.mxu0 %v19091_v13 }
 0xa11   :  { %6371 = vmatprep.subr.bf16.mxu1 %v19097_v20  ;;  %6412 = vmatprep.subr.bf16.mxu0 %v19103_v33 }
 0xa14   :  { %6372 = vmatpush1.bf16.msra.mxu1 %v19109_v35  ;;  %6413 = vmatpush1.bf16.msra.mxu0 %v19115_v37 }
 0xa15   :  { %6373 = vmatprep.subr.bf16.mxu1 %v19121_v38  ;;  %6414 = vmatprep.subr.bf16.mxu0 %v19127_v39 }
 0xa18   :  { %6374 = vmatpush2.bf16.msra.mxu1 %v19133_v61  ;;  %6415 = vmatpush2.bf16.msra.mxu0 %v19139_v55 }
 0xa19   :  { %6375 = vmatprep.subr.bf16.mxu1 %v19145_v14  ;;  %6416 = vmatprep.subr.bf16.mxu0 %v19151_v59 }
 0xa1c   :  { %6376 = vmatpush2.bf16.msra.mxu1 %v19157_v58  ;;  %6417 = vmatpush2.bf16.msra.mxu0 %v19163_v15 }
 0xa1d   :  { %6377 = vmatprep.subr.bf16.mxu1 %v19169_v18  ;;  %6418 = vmatprep.subr.bf16.mxu0 %v19175_v30 }
 0xa20   :  { %6378 = vmatpush2.bf16.msra.mxu1 %v19181_v12  ;;  %6419 = vmatpush2.bf16.msra.mxu0 %v19187_v49 }
 0xa21   :  { %6379 = vmatprep.subr.bf16.mxu1 %v19193_v57  ;;  %6420 = vmatprep.subr.bf16.mxu0 %v19199_v31 }
 0xa24   :  { %6380 = vmatpush2.bf16.msra.mxu1 %v19205_v54  ;;  %6421 = vmatpush2.bf16.msra.mxu0 %v19211_v43 }
 0xa25   :  { %6381 = vmatprep.subr.bf16.mxu1 %v19217_v53  ;;  %6422 = vmatprep.subr.bf16.mxu0 %v19223_v56  ;;  %v12732_v56 = vld [vmem:[%s21247_s3 + $0xe28] ss:$16 sps:$4 sm:$0xff]  }
 0xa28   :  { %6382 = vmatpush2.bf16.msra.mxu1 %v19231_v44  ;;  %6423 = vmatpush2.bf16.msra.mxu0 %v19237_v19  ;;  %v19286_v19 = vld [vmem:[%s21695_s26 + $0x90] ss:$8 sps:$4 sm:$0xff]  }
 0xa29   :  { %6383 = vmatprep.subr.bf16.mxu1 %v19243_v40  ;;  %6424 = vmatprep.subr.bf16.mxu0 %v19249_v16  ;;  %v19264_v40 = vld [vmem:[%s21695_s26 + $0x1a0] ss:$8 sps:$4 sm:$0xff]   ;;  %v19270_v16 = vld [vmem:[%s21695_s26 + $0x94] ss:$8 sps:$4 sm:$0xff]   ;;  %22371 = vst [vmem:[#allocation21_spill] sm:$0xff] %v19286_v19 }
 0xa2a   :  { %22368 = vst [vmem:[#allocation18_spill] sm:$0xff] %v19264_v40  ;;  %22369 = vst [vmem:[#allocation19_spill] sm:$0xff] %v19270_v16 }
 0xa2c   :  { %6384 = vmatpush2.bf16.msra.mxu1 %v19258_v45  ;;  %6425 = vmatpush2.bf16.msra.mxu0 %v19264_v40  ;;  %v6301_v45 = vcombine.high %v19253_v32, %v19253_v32  ;;  %v6308_v40 = vrot.slane %v18933_v47, %v13946_v48  ;;  %v19304_v47 = vld [vmem:[%s21695_s26 + $0x184] ss:$8 sps:$4 sm:$0xff]  }
 0xa2d   :  { %6385 = vmatprep.subr.bf16.mxu1 %v19270_v16  ;;  %6426 = vmatprep.subr.bf16.mxu0 %v19276_v42  ;;  %v19292_v16 = vld [vmem:[%s21695_s26 + $0x190] ss:$8 sps:$4 sm:$0xff]   ;;  %v19298_v42 = vld [vmem:[%s21695_s26 + $0x84] ss:$8 sps:$4 sm:$0xff]   ;;  %22374 = vst [vmem:[#allocation24_spill] sm:$0xff] %v19304_v47 }
 0xa2e   :  { %22372 = vst [vmem:[#allocation22_spill] sm:$0xff] %v19292_v16  ;;  %22373 = vst [vmem:[#allocation23_spill] sm:$0xff] %v19298_v42  ;;  %v6330_v44 = vcombine.high %v6308_v40, %v6308_v40 }
 0xa30   :  { %6386 = vmatpush2.bf16.msra.mxu1 %v19286_v19  ;;  %6427 = vmatpush2.bf16.msra.mxu0 %v19292_v16  ;;  %v6329_v19 = vrot.slane %v6301_v45, %v13946_v48  ;;  %v19311_v16 = vld [vmem:[%s21695_s26 + $0x80] ss:$8 sps:$4 sm:$0xff]   ;;  %v19329_v45 = vld [vmem:[%s21695_s26 + $0x374] ss:$8 sps:$4 sm:$0xff]  }
 0xa31   :  { %6387 = vmatprep.subr.bf16.mxu1 %v19298_v42  ;;  %6428 = vmatprep.subr.bf16.mxu0 %v19304_v47  ;;  %22375 = vst [vmem:[#allocation25_spill] sm:$0xff] %v19311_v16  ;;  %v19317_v42 = vld [vmem:[%s21695_s26 + $0x180] ss:$8 sps:$4 sm:$0xff]   ;;  %v19323_v47 = vld [vmem:[%s21695_s26 + $0x274] ss:$8 sps:$4 sm:$0xff]   ;;  %22378 = vst [vmem:[#allocation28_spill] sm:$0xff] %v19329_v45 }
 0xa32   :  { %22376 = vst [vmem:[#allocation26_spill] sm:$0xff] %v19317_v42  ;;  %22377 = vst [vmem:[#allocation27_spill] sm:$0xff] %v19323_v47 }
 0xa34   :  { %6388 = vmatpush2.bf16.msra.mxu1 %v19311_v16  ;;  %6429 = vmatpush2.bf16.msra.mxu0 %v19317_v42  ;;  %v6333_v16 = vcombine.high %v6329_v19, %v6329_v19  ;;  %v19335_v42 = vld [vmem:[%s21695_s26 + $0x270] ss:$8 sps:$4 sm:$0xff]  }
 0xa35   :  { %6439 = vmatprep.subr.bf16.mxu1 %v19323_v47  ;;  %6480 = vmatprep.subr.bf16.mxu0 %v19329_v45  ;;  %22379 = vst [vmem:[#allocation29_spill] sm:$0xff] %v19335_v42  ;;  %v19341_v47 = vld [vmem:[%s21695_s26 + $0x370] ss:$8 sps:$4 sm:$0xff]   ;;  %v19347_v45 = vld [vmem:[%s21695_s26 + $0x264] ss:$8 sps:$4 sm:$0xff]  }
 0xa36   :  { %22380 = vst [vmem:[#allocation30_spill] sm:$0xff] %v19341_v47  ;;  %22381 = vst [vmem:[#allocation31_spill] sm:$0xff] %v19347_v45 }
 0xa37   :  { %6390 = vmatmul.mubr.bf16.vlgmr.msra.gmra.mxu1 %v6308_v40  ;;  %6431 = vmatmul.mubr.bf16.vlgmr.msra.gmra.mxu0 %v6330_v44  ;;  %v19353_v44 = vld [vmem:[%s21695_s26 + $0x364] ss:$8 sps:$4 sm:$0xff]   ;;  %v19359_v40 = vld [vmem:[%s21695_s26 + $0x260] ss:$8 sps:$4 sm:$0xff]  }
 0xa38   :  { %6440 = vmatpush1.bf16.msra.mxu1 %v19335_v42  ;;  %6481 = vmatpush1.bf16.msra.mxu0 %v19341_v47  ;;  %22382 = vst [vmem:[#allocation32_spill] sm:$0xff] %v19353_v44  ;;  %22383 = vst [vmem:[#allocation33_spill] sm:$0xff] %v19359_v40  ;;  %v12696_v47 = vld [vmem:[%s21247_s3 + $0xee8] ss:$16 sps:$4 sm:$0xff]  }
 0xa39   :  { %6441 = vmatprep.subr.bf16.mxu1 %v19347_v45  ;;  %6482 = vmatprep.subr.bf16.mxu0 %v19353_v44  ;;  %v19365_v45 = vld [vmem:[%s21695_s26 + $0x360] ss:$8 sps:$4 sm:$0xff]   ;;  %v19371_v44 = vld [vmem:[%s21695_s26 + $0x254] ss:$8 sps:$4 sm:$0xff]  }
 0xa3a   :  { %6471 = vmatprep.mubr.bf16.mxu1 %v6329_v19  ;;  %6512 = vmatprep.mubr.bf16.mxu0 %v6333_v16  ;;  %22384 = vst [vmem:[#allocation34_spill] sm:$0xff] %v19365_v45  ;;  %22385 = vst [vmem:[#allocation35_spill] sm:$0xff] %v19371_v44  ;;  %v19377_v19 = vld [vmem:[%s21695_s26 + $0x354] ss:$8 sps:$4 sm:$0xff]   ;;  %v19383_v16 = vld [vmem:[%s21695_s26 + $0x250] ss:$8 sps:$4 sm:$0xff]  }
 0xa3b   :  { %22386 = vst [vmem:[#allocation36_spill] sm:$0xff] %v19377_v19  ;;  %22387 = vst [vmem:[#allocation37_spill] sm:$0xff] %v19383_v16 }
 0xa3c   :  { %6442 = vmatpush1.bf16.msra.mxu1 %v19359_v40  ;;  %6483 = vmatpush1.bf16.msra.mxu0 %v19365_v45  ;;  %v19389_v45 = vld [vmem:[%s21695_s26 + $0x350] ss:$8 sps:$4 sm:$0xff]   ;;  %v19697_v40 = vld [vmem:[%s21695_s26 + $0x280] ss:$8 sps:$4 sm:$0xff]  }
 0xa3d   :  { %6443 = vmatprep.subr.bf16.mxu1 %v19371_v44  ;;  %6484 = vmatprep.subr.bf16.mxu0 %v19377_v19  ;;  %22388 = vst [vmem:[#allocation38_spill] sm:$0xff] %v19389_v45  ;;  %v19395_v44 = vld [vmem:[%s21695_s26 + $0x244] ss:$8 sps:$4 sm:$0xff]   ;;  %22439 = vst [vmem:[#allocation89_spill] sm:$0xff] %v19697_v40 }
 0xa3e   :  { %22389 = vst [vmem:[#allocation39_spill] sm:$0xff] %v19395_v44  ;;  %v19401_v19 = vld [vmem:[%s21695_s26 + $0x344] ss:$8 sps:$4 sm:$0xff]  }
 0xa3f   :  { %22390 = vst [vmem:[#allocation40_spill] sm:$0xff] %v19401_v19 }
 0xa40   :  { %6444 = vmatpush1.bf16.msra.mxu1 %v19383_v16  ;;  %6485 = vmatpush1.bf16.msra.mxu0 %v19389_v45  ;;  %v19407_v16 = vld [vmem:[%s21695_s26 + $0x240] ss:$8 sps:$4 sm:$0xff]  }
 0xa41   :  { %6445 = vmatprep.subr.bf16.mxu1 %v19395_v44  ;;  %6486 = vmatprep.subr.bf16.mxu0 %v19401_v19  ;;  %22391 = vst [vmem:[#allocation41_spill] sm:$0xff] %v19407_v16  ;;  %v19413_v45 = vld [vmem:[%s21695_s26 + $0x340] ss:$8 sps:$4 sm:$0xff]   ;;  %v19419_v44 = vld [vmem:[%s21695_s26 + $0x234] ss:$8 sps:$4 sm:$0xff]  }
 0xa42   :  { %22392 = vst [vmem:[#allocation42_spill] sm:$0xff] %v19413_v45  ;;  %22393 = vst [vmem:[#allocation43_spill] sm:$0xff] %v19419_v44  ;;  %v19425_v19 = vld [vmem:[%s21695_s26 + $0x334] ss:$8 sps:$4 sm:$0xff]  }
 0xa43   :  { %22394 = vst [vmem:[#allocation44_spill] sm:$0xff] %v19425_v19 }
 0xa44   :  { %6446 = vmatpush1.bf16.msra.mxu1 %v19407_v16  ;;  %6487 = vmatpush1.bf16.msra.mxu0 %v19413_v45  ;;  %v19431_v16 = vld [vmem:[%s21695_s26 + $0x230] ss:$8 sps:$4 sm:$0xff]  }
 0xa45   :  { %6447 = vmatprep.subr.bf16.mxu1 %v19419_v44  ;;  %6488 = vmatprep.subr.bf16.mxu0 %v19425_v19  ;;  %22395 = vst [vmem:[#allocation45_spill] sm:$0xff] %v19431_v16  ;;  %v19437_v45 = vld [vmem:[%s21695_s26 + $0x330] ss:$8 sps:$4 sm:$0xff]   ;;  %v19443_v44 = vld [vmem:[%s21695_s26 + $0x224] ss:$8 sps:$4 sm:$0xff]  }
 0xa46   :  { %22396 = vst [vmem:[#allocation46_spill] sm:$0xff] %v19437_v45  ;;  %22397 = vst [vmem:[#allocation47_spill] sm:$0xff] %v19443_v44  ;;  %v19449_v19 = vld [vmem:[%s21695_s26 + $0x324] ss:$8 sps:$4 sm:$0xff]  }
 0xa47   :  { %22398 = vst [vmem:[#allocation48_spill] sm:$0xff] %v19449_v19 }
 0xa48   :  { %6448 = vmatpush1.bf16.msra.mxu1 %v19431_v16  ;;  %6489 = vmatpush1.bf16.msra.mxu0 %v19437_v45  ;;  %v19455_v16 = vld [vmem:[%s21695_s26 + $0x220] ss:$8 sps:$4 sm:$0xff]  }
 0xa49   :  { %6449 = vmatprep.subr.bf16.mxu1 %v19443_v44  ;;  %6490 = vmatprep.subr.bf16.mxu0 %v19449_v19  ;;  %22399 = vst [vmem:[#allocation49_spill] sm:$0xff] %v19455_v16  ;;  %v19461_v45 = vld [vmem:[%s21695_s26 + $0x320] ss:$8 sps:$4 sm:$0xff]   ;;  %v19467_v44 = vld [vmem:[%s21695_s26 + $0x214] ss:$8 sps:$4 sm:$0xff]  }
 0xa4a   :  { %22400 = vst [vmem:[#allocation50_spill] sm:$0xff] %v19461_v45  ;;  %22401 = vst [vmem:[#allocation51_spill] sm:$0xff] %v19467_v44  ;;  %v19473_v19 = vld [vmem:[%s21695_s26 + $0x314] ss:$8 sps:$4 sm:$0xff]  }
 0xa4b   :  { %22402 = vst [vmem:[#allocation52_spill] sm:$0xff] %v19473_v19 }
 0xa4c   :  { %6450 = vmatpush1.bf16.msra.mxu1 %v19455_v16  ;;  %6491 = vmatpush1.bf16.msra.mxu0 %v19461_v45  ;;  %v19479_v16 = vld [vmem:[%s21695_s26 + $0x210] ss:$8 sps:$4 sm:$0xff]  }
 0xa4d   :  { %6451 = vmatprep.subr.bf16.mxu1 %v19467_v44  ;;  %6492 = vmatprep.subr.bf16.mxu0 %v19473_v19  ;;  %22403 = vst [vmem:[#allocation53_spill] sm:$0xff] %v19479_v16  ;;  %v19485_v45 = vld [vmem:[%s21695_s26 + $0x310] ss:$8 sps:$4 sm:$0xff]   ;;  %v19491_v44 = vld [vmem:[%s21695_s26 + $0x204] ss:$8 sps:$4 sm:$0xff]  }
 0xa4e   :  { %22404 = vst [vmem:[#allocation54_spill] sm:$0xff] %v19485_v45  ;;  %22405 = vst [vmem:[#allocation55_spill] sm:$0xff] %v19491_v44  ;;  %v19497_v19 = vld [vmem:[%s21695_s26 + $0x304] ss:$8 sps:$4 sm:$0xff]  }
 0xa4f   :  { %22406 = vst [vmem:[#allocation56_spill] sm:$0xff] %v19497_v19 }
 0xa50   :  { %6452 = vmatpush1.bf16.msra.mxu1 %v19479_v16  ;;  %6493 = vmatpush1.bf16.msra.mxu0 %v19485_v45  ;;  %v19503_v16 = vld [vmem:[%s21695_s26 + $0x200] ss:$8 sps:$4 sm:$0xff]  }
 0xa51   :  { %6453 = vmatprep.subr.bf16.mxu1 %v19491_v44  ;;  %6494 = vmatprep.subr.bf16.mxu0 %v19497_v19  ;;  %22407 = vst [vmem:[#allocation57_spill] sm:$0xff] %v19503_v16  ;;  %v19509_v45 = vld [vmem:[%s21695_s26 + $0x300] ss:$8 sps:$4 sm:$0xff]   ;;  %v19515_v44 = vld [vmem:[%s21695_s26 + $0x2f4] ss:$8 sps:$4 sm:$0xff]  }
 0xa52   :  { %22408 = vst [vmem:[#allocation58_spill] sm:$0xff] %v19509_v45  ;;  %22409 = vst [vmem:[#allocation59_spill] sm:$0xff] %v19515_v44  ;;  %v19521_v19 = vld [vmem:[%s21695_s26 + $0x3f4] ss:$8 sps:$4 sm:$0xff]  }
 0xa53   :  { %22410 = vst [vmem:[#allocation60_spill] sm:$0xff] %v19521_v19 }
 0xa54   :  { %6454 = vmatpush1.bf16.msra.mxu1 %v19503_v16  ;;  %6495 = vmatpush1.bf16.msra.mxu0 %v19509_v45  ;;  %v19527_v16 = vld [vmem:[%s21695_s26 + $0x2f0] ss:$8 sps:$4 sm:$0xff]  }
 0xa55   :  { %6455 = vmatprep.subr.bf16.mxu1 %v19515_v44  ;;  %6496 = vmatprep.subr.bf16.mxu0 %v19521_v19  ;;  %22411 = vst [vmem:[#allocation61_spill] sm:$0xff] %v19527_v16  ;;  %v19533_v45 = vld [vmem:[%s21695_s26 + $0x3f0] ss:$8 sps:$4 sm:$0xff]   ;;  %v19539_v44 = vld [vmem:[%s21695_s26 + $0x2e4] ss:$8 sps:$4 sm:$0xff]  }
 0xa56   :  { %22412 = vst [vmem:[#allocation62_spill] sm:$0xff] %v19533_v45  ;;  %22413 = vst [vmem:[#allocation63_spill] sm:$0xff] %v19539_v44  ;;  %v19545_v19 = vld [vmem:[%s21695_s26 + $0x3e4] ss:$8 sps:$4 sm:$0xff]  }
 0xa57   :  { %22414 = vst [vmem:[#allocation64_spill] sm:$0xff] %v19545_v19 }
 0xa58   :  { %6456 = vmatpush2.bf16.msra.mxu1 %v19527_v16  ;;  %6497 = vmatpush2.bf16.msra.mxu0 %v19533_v45  ;;  %v19551_v16 = vld [vmem:[%s21695_s26 + $0x2e0] ss:$8 sps:$4 sm:$0xff]  }
 0xa59   :  { %6457 = vmatprep.subr.bf16.mxu1 %v19539_v44  ;;  %6498 = vmatprep.subr.bf16.mxu0 %v19545_v19  ;;  %22415 = vst [vmem:[#allocation65_spill] sm:$0xff] %v19551_v16  ;;  %v19557_v45 = vld [vmem:[%s21695_s26 + $0x3e0] ss:$8 sps:$4 sm:$0xff]   ;;  %v19563_v44 = vld [vmem:[%s21695_s26 + $0x2d4] ss:$8 sps:$4 sm:$0xff]  }
 0xa5a   :  { %22416 = vst [vmem:[#allocation66_spill] sm:$0xff] %v19557_v45  ;;  %22417 = vst [vmem:[#allocation67_spill] sm:$0xff] %v19563_v44  ;;  %v19569_v19 = vld [vmem:[%s21695_s26 + $0x3d4] ss:$8 sps:$4 sm:$0xff]  }
 0xa5b   :  { %22418 = vst [vmem:[#allocation68_spill] sm:$0xff] %v19569_v19 }
 0xa5c   :  { %6458 = vmatpush2.bf16.msra.mxu1 %v19551_v16  ;;  %6499 = vmatpush2.bf16.msra.mxu0 %v19557_v45  ;;  %v19575_v16 = vld [vmem:[%s21695_s26 + $0x2d0] ss:$8 sps:$4 sm:$0xff]  }
 0xa5d   :  { %6459 = vmatprep.subr.bf16.mxu1 %v19563_v44  ;;  %6500 = vmatprep.subr.bf16.mxu0 %v19569_v19  ;;  %22419 = vst [vmem:[#allocation69_spill] sm:$0xff] %v19575_v16  ;;  %v19581_v45 = vld [vmem:[%s21695_s26 + $0x3d0] ss:$8 sps:$4 sm:$0xff]   ;;  %v19587_v44 = vld [vmem:[%s21695_s26 + $0x2c4] ss:$8 sps:$4 sm:$0xff]  }
 0xa5e   :  { %22420 = vst [vmem:[#allocation70_spill] sm:$0xff] %v19581_v45  ;;  %22421 = vst [vmem:[#allocation71_spill] sm:$0xff] %v19587_v44  ;;  %v19593_v19 = vld [vmem:[%s21695_s26 + $0x3c4] ss:$8 sps:$4 sm:$0xff]  }
 0xa5f   :  { %22422 = vst [vmem:[#allocation72_spill] sm:$0xff] %v19593_v19 }
 0xa60   :  { %6460 = vmatpush2.bf16.msra.mxu1 %v19575_v16  ;;  %6501 = vmatpush2.bf16.msra.mxu0 %v19581_v45  ;;  %v19599_v16 = vld [vmem:[%s21695_s26 + $0x2c0] ss:$8 sps:$4 sm:$0xff]  }
 0xa61   :  { %6461 = vmatprep.subr.bf16.mxu1 %v19587_v44  ;;  %6502 = vmatprep.subr.bf16.mxu0 %v19593_v19  ;;  %22423 = vst [vmem:[#allocation73_spill] sm:$0xff] %v19599_v16  ;;  %v19605_v45 = vld [vmem:[%s21695_s26 + $0x3c0] ss:$8 sps:$4 sm:$0xff]   ;;  %v19611_v44 = vld [vmem:[%s21695_s26 + $0x2b4] ss:$8 sps:$4 sm:$0xff]  }
 0xa62   :  { %22424 = vst [vmem:[#allocation74_spill] sm:$0xff] %v19605_v45  ;;  %22425 = vst [vmem:[#allocation75_spill] sm:$0xff] %v19611_v44  ;;  %v19617_v19 = vld [vmem:[%s21695_s26 + $0x3b4] ss:$8 sps:$4 sm:$0xff]  }
 0xa63   :  { %22426 = vst [vmem:[#allocation76_spill] sm:$0xff] %v19617_v19 }
 0xa64   :  { %6462 = vmatpush2.bf16.msra.mxu1 %v19599_v16  ;;  %6503 = vmatpush2.bf16.msra.mxu0 %v19605_v45  ;;  %v19623_v16 = vld [vmem:[%s21695_s26 + $0x2b0] ss:$8 sps:$4 sm:$0xff]  }
 0xa65   :  { %6463 = vmatprep.subr.bf16.mxu1 %v19611_v44  ;;  %6504 = vmatprep.subr.bf16.mxu0 %v19617_v19  ;;  %22427 = vst [vmem:[#allocation77_spill] sm:$0xff] %v19623_v16  ;;  %v19629_v45 = vld [vmem:[%s21695_s26 + $0x3b0] ss:$8 sps:$4 sm:$0xff]   ;;  %v19635_v44 = vld [vmem:[%s21695_s26 + $0x2a4] ss:$8 sps:$4 sm:$0xff]  }
 0xa66   :  { %22428 = vst [vmem:[#allocation78_spill] sm:$0xff] %v19629_v45  ;;  %22429 = vst [vmem:[#allocation79_spill] sm:$0xff] %v19635_v44  ;;  %v19641_v19 = vld [vmem:[%s21695_s26 + $0x3a4] ss:$8 sps:$4 sm:$0xff]  }
 0xa67   :  { %22430 = vst [vmem:[#allocation80_spill] sm:$0xff] %v19641_v19 }
 0xa68   :  { %6464 = vmatpush2.bf16.msra.mxu1 %v19623_v16  ;;  %6505 = vmatpush2.bf16.msra.mxu0 %v19629_v45  ;;  %v19647_v16 = vld [vmem:[%s21695_s26 + $0x2a0] ss:$8 sps:$4 sm:$0xff]  }
 0xa69   :  { %6465 = vmatprep.subr.bf16.mxu1 %v19635_v44  ;;  %6506 = vmatprep.subr.bf16.mxu0 %v19641_v19  ;;  %22431 = vst [vmem:[#allocation81_spill] sm:$0xff] %v19647_v16  ;;  %v19653_v45 = vld [vmem:[%s21695_s26 + $0x3a0] ss:$8 sps:$4 sm:$0xff]   ;;  %v19659_v44 = vld [vmem:[%s21695_s26 + $0x294] ss:$8 sps:$4 sm:$0xff]  }
 0xa6a   :  { %22432 = vst [vmem:[#allocation82_spill] sm:$0xff] %v19653_v45  ;;  %22433 = vst [vmem:[#allocation83_spill] sm:$0xff] %v19659_v44  ;;  %v19665_v19 = vld [vmem:[%s21695_s26 + $0x394] ss:$8 sps:$4 sm:$0xff]  }
 0xa6b   :  { %22434 = vst [vmem:[#allocation84_spill] sm:$0xff] %v19665_v19 }
 0xa6c   :  { %6466 = vmatpush2.bf16.msra.mxu1 %v19647_v16  ;;  %6507 = vmatpush2.bf16.msra.mxu0 %v19653_v45  ;;  %v6315_v16 = vrot.slane %v19253_v32, %v13946_v48  ;;  %v19673_v45 = vld [vmem:[%s21695_s26 + $0x290] ss:$8 sps:$4 sm:$0xff]   ;;  %v19691_v32 = vld [vmem:[%s21695_s26 + $0x384] ss:$8 sps:$4 sm:$0xff]  }
 0xa6d   :  { %6467 = vmatprep.subr.bf16.mxu1 %v19659_v44  ;;  %6508 = vmatprep.subr.bf16.mxu0 %v19665_v19  ;;  %22435 = vst [vmem:[#allocation85_spill] sm:$0xff] %v19673_v45  ;;  %v19679_v44 = vld [vmem:[%s21695_s26 + $0x390] ss:$8 sps:$4 sm:$0xff]   ;;  %v19685_v19 = vld [vmem:[%s21695_s26 + $0x284] ss:$8 sps:$4 sm:$0xff]   ;;  %22438 = vst [vmem:[#allocation88_spill] sm:$0xff] %v19691_v32 }
 0xa6e   :  { %22436 = vst [vmem:[#allocation86_spill] sm:$0xff] %v19679_v44  ;;  %22437 = vst [vmem:[#allocation87_spill] sm:$0xff] %v19685_v19 }
 0xa70   :  { %6468 = vmatpush2.bf16.msra.mxu1 %v19673_v45  ;;  %6509 = vmatpush2.bf16.msra.mxu0 %v19679_v44  ;;  %v6331_v45 = vcombine.high %v6315_v16, %v6315_v16  ;;  %v19703_v44 = vld [vmem:[%s21695_s26 + $0x380] ss:$8 sps:$4 sm:$0xff]  }
 0xa71   :  { %6469 = vmatprep.subr.bf16.mxu1 %v19685_v19  ;;  %6510 = vmatprep.subr.bf16.mxu0 %v19691_v32  ;;  %22440 = vst [vmem:[#allocation90_spill] sm:$0xff] %v19703_v44  ;;  %v19709_v19 = vld [vmem:[%s21695_s26 + $0x474] ss:$8 sps:$4 sm:$0xff]  }
 0xa72   :  { %22441 = vst [vmem:[#allocation91_spill] sm:$0xff] %v19709_v19 }
 0xa74   :  { %6470 = vmatpush2.bf16.msra.mxu1 %v19697_v40  ;;  %6511 = vmatpush2.bf16.msra.mxu0 %v19703_v44  ;;  %v19715_v40 = vld [vmem:[%s21695_s26 + $0x470] ss:$8 sps:$4 sm:$0xff]   ;;  %v19722_v44 = vld [vmem:[%s21695_s26 + $0x464] ss:$8 sps:$4 sm:$0xff]  }
 0xa75   :  { %6521 = vmatprep.subr.bf16.mxu1 %v19709_v19  ;;  %22442 = vst [vmem:[#allocation92_spill] sm:$0xff] %v19715_v40  ;;  %22443 = vst [vmem:[#allocation93_spill] sm:$0xff] %v19722_v44  ;;  %v19758_v19 = vld [vmem:[%s21695_s26 + $0x444] ss:$8 sps:$4 sm:$0xff]  }
 0xa76   :  { %22447 = vst [vmem:[#allocation97_spill] sm:$0xff] %v19758_v19 }
 0xa77   :  { %6472 = vmatmul.mubr.bf16.vlgmr.msra.gmra.mxu1 %v6315_v16  ;;  %6513 = vmatmul.mubr.bf16.vlgmr.msra.gmra.mxu0 %v6331_v45  ;;  %v19728_v45 = vld [vmem:[%s21695_s26 + $0x460] ss:$8 sps:$4 sm:$0xff]   ;;  %v19734_v16 = vld [vmem:[%s21695_s26 + $0x454] ss:$8 sps:$4 sm:$0xff]  }
 0xa78   :  { %6522 = vmatpush1.bf16.msra.mxu1 %v19715_v40  ;;  %6553 = vmatprep.mubr.bf16.mxu1 %v22334_v11  ;;  %22444 = vst [vmem:[#allocation94_spill] sm:$0xff] %v19728_v45  ;;  %22445 = vst [vmem:[#allocation95_spill] sm:$0xff] %v19734_v16  ;;  %v12693_v11 = vld [vmem:[%s21247_s3 + $0xee0] ss:$16 sps:$4 sm:$0xff]   ;;  %v12701_v40 = vld [vmem:[%s21247_s3 + $0xec4] ss:$16 sps:$4 sm:$0xff]  }
 0xa79   :  { %6523 = vmatprep.subr.bf16.mxu1 %v19722_v44  ;;  %v12695_v44 = vld [vmem:[%s21247_s3 + $0xee4] ss:$16 sps:$4 sm:$0xff]  }
 0xa7a   :  { %6955 = vmatprep.subr.bf16.mxu0 %v12695_v44  ;;  %v12707_v44 = vld [vmem:[%s21247_s3 + $0xea4] ss:$16 sps:$4 sm:$0xff]  }
 0xa7b   :  { %6956 = vmatpush1.bf16.msra.mxu0 %v12693_v11  ;;  %v19767_v11 = vld [vmem:[%s21695_s26 + $0x440] ss:$8 sps:$4 sm:$0xff]  }
 0xa7c   :  { %6524 = vmatpush1.bf16.msra.mxu1 %v19728_v45  ;;  %v19749_v45 = vld [vmem:[%s21695_s26 + $0x450] ss:$8 sps:$4 sm:$0xff]   ;;  %6957 = vmatprep.subr.bf16.mxu0 %v12701_v40  ;;  %22448 = vst [vmem:[#allocation98_spill] sm:$0xff] %v19767_v11  ;;  %v19776_v40 = vld [vmem:[%s21695_s26 + $0x434] ss:$8 sps:$4 sm:$0xff]  }
 0xa7d   :  { %6525 = vmatprep.subr.bf16.mxu1 %v19734_v16  ;;  %22446 = vst [vmem:[#allocation96_spill] sm:$0xff] %v19749_v45  ;;  %v12699_v16 = vld [vmem:[%s21247_s3 + $0xec0] ss:$16 sps:$4 sm:$0xff]   ;;  %22449 = vst [vmem:[#allocation99_spill] sm:$0xff] %v19776_v40 }
 0xa7f   :  { %6958 = vmatpush1.bf16.msra.mxu0 %v12699_v16  ;;  %v19785_v16 = vld [vmem:[%s21695_s26 + $0x430] ss:$8 sps:$4 sm:$0xff]  }
 0xa80   :  { %6526 = vmatpush1.bf16.msra.mxu1 %v19749_v45  ;;  %v12705_v45 = vld [vmem:[%s21247_s3 + $0xea0] ss:$16 sps:$4 sm:$0xff]   ;;  %6959 = vmatprep.subr.bf16.mxu0 %v12707_v44  ;;  %22450 = vst [vmem:[#allocation100_spill] sm:$0xff] %v19785_v16  ;;  %v19794_v44 = vld [vmem:[%s21695_s26 + $0x424] ss:$8 sps:$4 sm:$0xff]  }
 0xa81   :  { %6527 = vmatprep.subr.bf16.mxu1 %v19758_v19  ;;  %v12713_v19 = vld [vmem:[%s21247_s3 + $0xe84] ss:$16 sps:$4 sm:$0xff]   ;;  %22451 = vst [vmem:[#allocation101_spill] sm:$0xff] %v19794_v44 }
 0xa83   :  { %6960 = vmatpush1.bf16.msra.mxu0 %v12705_v45  ;;  %v19803_v45 = vld [vmem:[%s21695_s26 + $0x420] ss:$8 sps:$4 sm:$0xff]  }
 0xa84   :  { %6528 = vmatpush1.bf16.msra.mxu1 %v19767_v11  ;;  %v12711_v11 = vld [vmem:[%s21247_s3 + $0xe80] ss:$16 sps:$4 sm:$0xff]   ;;  %6961 = vmatprep.subr.bf16.mxu0 %v12713_v19  ;;  %22452 = vst [vmem:[#allocation102_spill] sm:$0xff] %v19803_v45  ;;  %v19812_v19 = vld [vmem:[%s21695_s26 + $0x414] ss:$8 sps:$4 sm:$0xff]  }
 0xa85   :  { %6529 = vmatprep.subr.bf16.mxu1 %v19776_v40  ;;  %v12719_v40 = vld [vmem:[%s21247_s3 + $0xe64] ss:$16 sps:$4 sm:$0xff]   ;;  %22453 = vst [vmem:[#allocation103_spill] sm:$0xff] %v19812_v19 }
 0xa87   :  { %6962 = vmatpush1.bf16.msra.mxu0 %v12711_v11  ;;  %v19821_v11 = vld [vmem:[%s21695_s26 + $0x410] ss:$8 sps:$4 sm:$0xff]  }
 0xa88   :  { %6530 = vmatpush1.bf16.msra.mxu1 %v19785_v16  ;;  %v12717_v16 = vld [vmem:[%s21247_s3 + $0xe60] ss:$16 sps:$4 sm:$0xff]   ;;  %6963 = vmatprep.subr.bf16.mxu0 %v12719_v40  ;;  %22454 = vst [vmem:[#allocation104_spill] sm:$0xff] %v19821_v11 }
 0xa89   :  { %6531 = vmatprep.subr.bf16.mxu1 %v19794_v44  ;;  %v12725_v44 = vld [vmem:[%s21247_s3 + $0xe44] ss:$16 sps:$4 sm:$0xff]   ;;  %v12723_v40 = vld [vmem:[%s21247_s3 + $0xe40] ss:$16 sps:$4 sm:$0xff]  }
 0xa8b   :  { %6964 = vmatpush1.bf16.msra.mxu0 %v12717_v16  ;;  %v19843_v16 = vld [vmem:[%s21695_s26 + $0x400] ss:$8 sps:$4 sm:$0xff]  }
 0xa8c   :  { %6532 = vmatpush1.bf16.msra.mxu1 %v19803_v45  ;;  %v11149_v45 = vld.sshfl [vmem:[%s21697_s20 + $0x47] sm:$0x1 pattern:$0x75316420]  ;;  %6965 = vmatprep.subr.bf16.mxu0 %v12725_v44  ;;  %22456 = vst [vmem:[#allocation106_spill] sm:$0xff] %v19843_v16 }
 0xa8d   :  { %6533 = vmatprep.subr.bf16.mxu1 %v19812_v19  ;;  %v19833_v19 = vld [vmem:[%s21695_s26 + $0x404] ss:$8 sps:$4 sm:$0xff]   ;;  %v6347_v32 = vrot.slane %v11149_v45, %v13946_v48  ;;  %v12702_v44 = vld [vmem:[%s21247_s3 + $0xec8] ss:$16 sps:$4 sm:$0xff]  }
 0xa8e   :  { %22455 = vst [vmem:[#allocation105_spill] sm:$0xff] %v19833_v19  ;;  %v12710_v45 = vld [vmem:[%s21247_s3 + $0xeac] ss:$16 sps:$4 sm:$0xff]  }
 0xa8f   :  { %6966 = vmatpush1.bf16.msra.mxu0 %v12723_v40  ;;  %v12720_v40 = vld [vmem:[%s21247_s3 + $0xe68] ss:$16 sps:$4 sm:$0xff]  }
 0xa90   :  { %6534 = vmatpush1.bf16.msra.mxu1 %v19821_v11  ;;  %v12698_v11 = vld [vmem:[%s21247_s3 + $0xeec] ss:$16 sps:$4 sm:$0xff]  }
 0xa91   :  { %6535 = vmatprep.subr.bf16.mxu1 %v19833_v19  ;;  %v12704_v19 = vld [vmem:[%s21247_s3 + $0xecc] ss:$16 sps:$4 sm:$0xff]  }
 0xa94   :  { %6536 = vmatpush1.bf16.msra.mxu1 %v19843_v16 }
 0xa95   :  { %6996 = vmatprep.subr.bf16.mxu1 %v12698_v11  ;;  %v12708_v11 = vld [vmem:[%s21247_s3 + $0xea8] ss:$16 sps:$4 sm:$0xff]  }
 0xa97   :  { %6554 = vmatmul.mubr.bf16.vlgmr.msra.gmra.mxu1 %v6347_v32  ;;  %v12716_v32 = vld [vmem:[%s21247_s3 + $0xe8c] ss:$16 sps:$4 sm:$0xff]  }
 0xa98   :  { %6997 = vmatpush1.bf16.msra.mxu1 %v12696_v47  ;;  %v12714_v47 = vld [vmem:[%s21247_s3 + $0xe88] ss:$16 sps:$4 sm:$0xff]  }
 0xa99   :  { %6998 = vmatprep.subr.bf16.mxu1 %v12704_v19  ;;  %v12722_v19 = vld [vmem:[%s21247_s3 + $0xe6c] ss:$16 sps:$4 sm:$0xff]  }
 0xa9c   :  { %6999 = vmatpush1.bf16.msra.mxu1 %v12702_v44  ;;  %v12728_v44 = vld [vmem:[%s21247_s3 + $0xe4c] ss:$16 sps:$4 sm:$0xff]  }
 0xa9d   :  { %7000 = vmatprep.subr.bf16.mxu1 %v12710_v45  ;;  %v12726_v45 = vld [vmem:[%s21247_s3 + $0xe48] ss:$16 sps:$4 sm:$0xff]  }
 0xaa0   :  { %7001 = vmatpush1.bf16.msra.mxu1 %v12708_v11 }
 0xaa1   :  { %7002 = vmatprep.subr.bf16.mxu1 %v12716_v32 }
 0xaa4   :  { %7003 = vmatpush1.bf16.msra.mxu1 %v12714_v47  ;;  %v12731_v47 = vld [vmem:[%s21247_s3 + $0xe24] ss:$16 sps:$4 sm:$0xff]  }
 0xaa5   :  { %7004 = vmatprep.subr.bf16.mxu1 %v12722_v19  ;;  %6967 = vmatprep.subr.bf16.mxu0 %v12731_v47  ;;  %v12735_v47 = vld [vmem:[%s21247_s3 + $0xe00] ss:$16 sps:$4 sm:$0xff]  }
 0xaa8   :  { %7005 = vmatpush1.bf16.msra.mxu1 %v12720_v40  ;;  %v12729_v40 = vld [vmem:[%s21247_s3 + $0xe20] ss:$16 sps:$4 sm:$0xff]  }
 0xaa9   :  { %7006 = vmatprep.subr.bf16.mxu1 %v12728_v44  ;;  %v12734_v44 = vld [vmem:[%s21247_s3 + $0xe2c] ss:$16 sps:$4 sm:$0xff]   ;;  %6968 = vmatpush1.bf16.msra.mxu0 %v12729_v40  ;;  %v12741_v40 = vld [vmem:[%s21247_s3 + $0xfe0] ss:$16 sps:$4 sm:$0xff]  }
 0xaac   :  { %7007 = vmatpush1.bf16.msra.mxu1 %v12726_v45 }
 0xaad   :  { %7008 = vmatprep.subr.bf16.mxu1 %v12734_v44  ;;  %v12746_v44 = vld [vmem:[%s21247_s3 + $0xfec] ss:$16 sps:$4 sm:$0xff]  }
 0xab0   :  { %7009 = vmatpush1.bf16.msra.mxu1 %v12732_v56  ;;  %v12743_v56 = vld [vmem:[%s21247_s3 + $0xfe4] ss:$16 sps:$4 sm:$0xff]  }
 0xab7   :  { %v6228_v11 = vpop.f32.mrf.mxu1  ;;  %v6269_v32 = vpop.f32.mrf.mxu0 }
 0xab8   :  { %v19883_v16 = vadd.f32 %v6228_v11, %v18794_v17  ;;  %v19886_v19 = vadd.f32 %v6269_v32, %v18797_v10 }
 0xab9   :  { %v6230_v45 = vpop.f32.mrf.mxu1  ;;  %v6271_v42 = vpop.f32.mrf.mxu0 }
 0xaba   :  { %22457 = vst [vmem:[#allocation107_spill] sm:$0xff] %v19883_v16  ;;  %22458 = vst [vmem:[#allocation108_spill] sm:$0xff] %v19886_v19  ;;  %v19898_v17 = vadd.f32 %v6230_v45, %v18809_v34  ;;  %v19901_v10 = vadd.f32 %v6271_v42, %v18812_v36  ;;  %v12737_v19 = vld [vmem:[%s21247_s3 + $0xe04] ss:$16 sps:$4 sm:$0xff]   ;;  %v12740_v34 = vld [vmem:[%s21247_s3 + $0xe0c] ss:$16 sps:$4 sm:$0xff]  }
 0xabb   :  { %v6232_v11 = vpop.f32.mrf.mxu1  ;;  %v6273_v32 = vpop.f32.mrf.mxu0  ;;  %6969 = vmatprep.subr.bf16.mxu0 %v12737_v19  ;;  %v12738_v42 = vld [vmem:[%s21247_s3 + $0xe08] ss:$16 sps:$4 sm:$0xff]   ;;  %7010 = vmatprep.subr.bf16.mxu1 %v12740_v34 }
 0xabc   :  { %22459 = vst [vmem:[#allocation109_spill] sm:$0xff] %v19898_v17  ;;  %22460 = vst [vmem:[#allocation110_spill] sm:$0xff] %v19901_v10  ;;  %6970 = vmatpush1.bf16.msra.mxu0 %v12735_v47  ;;  %7011 = vmatpush1.bf16.msra.mxu1 %v12738_v42  ;;  %v12744_v19 = vld [vmem:[%s21247_s3 + $0xfe8] ss:$16 sps:$4 sm:$0xff]   ;;  %v12749_v11 = vld [vmem:[%s21247_s3 + $0xfc4] ss:$16 sps:$4 sm:$0xff]  }
 0xabd   :  { %v6233_v45 = vpop.f32.mrf.mxu1  ;;  %v6274_v36 = vpop.f32.mrf.mxu0  ;;  %6971 = vmatprep.subr.bf16.mxu0 %v12743_v56  ;;  %7012 = vmatprep.subr.bf16.mxu1 %v12746_v44  ;;  %v12752_v32 = vld [vmem:[%s21247_s3 + $0xfcc] ss:$16 sps:$4 sm:$0xff]   ;;  %v12747_v47 = vld [vmem:[%s21247_s3 + $0xfc0] ss:$16 sps:$4 sm:$0xff]   ;;  %v12750_v34 = vld [vmem:[%s21247_s3 + $0xfc8] ss:$16 sps:$4 sm:$0xff]  }
 0xabe   :  { %v12755_v45 = vld [vmem:[%s21247_s3 + $0xfa4] ss:$16 sps:$4 sm:$0xff]   ;;  %v12758_v36 = vld [vmem:[%s21247_s3 + $0xfac] ss:$16 sps:$4 sm:$0xff]   ;;  %v12753_v42 = vld [vmem:[%s21247_s3 + $0xfa0] ss:$16 sps:$4 sm:$0xff]  }
 0xabf   :  { %v12756_v56 = vld [vmem:[%s21247_s3 + $0xfa8] ss:$16 sps:$4 sm:$0xff]   ;;  %v12764_v44 = vld [vmem:[%s21247_s3 + $0xf8c] ss:$16 sps:$4 sm:$0xff]  }
 0xac0   :  { %6972 = vmatpush2.bf16.msra.mxu0 %v12741_v40  ;;  %7013 = vmatpush2.bf16.msra.mxu1 %v12744_v19  ;;  %v12761_v40 = vld [vmem:[%s21247_s3 + $0xf84] ss:$16 sps:$4 sm:$0xff]   ;;  %v12759_v19 = vld [vmem:[%s21247_s3 + $0xf80] ss:$16 sps:$4 sm:$0xff]  }
 0xac1   :  { %6973 = vmatprep.subr.bf16.mxu0 %v12749_v11  ;;  %7014 = vmatprep.subr.bf16.mxu1 %v12752_v32  ;;  %v12762_v11 = vld [vmem:[%s21247_s3 + $0xf88] ss:$16 sps:$4 sm:$0xff]   ;;  %v12767_v32 = vld [vmem:[%s21247_s3 + $0xf64] ss:$16 sps:$4 sm:$0xff]  }
 0xac4   :  { %6974 = vmatpush2.bf16.msra.mxu0 %v12747_v47  ;;  %7015 = vmatpush2.bf16.msra.mxu1 %v12750_v34  ;;  %v12770_v47 = vld [vmem:[%s21247_s3 + $0xf6c] ss:$16 sps:$4 sm:$0xff]   ;;  %v12765_v34 = vld [vmem:[%s21247_s3 + $0xf60] ss:$16 sps:$4 sm:$0xff]  }
 0xac5   :  { %6975 = vmatprep.subr.bf16.mxu0 %v12755_v45  ;;  %7016 = vmatprep.subr.bf16.mxu1 %v12758_v36  ;;  %v12768_v45 = vld [vmem:[%s21247_s3 + $0xf68] ss:$16 sps:$4 sm:$0xff]   ;;  %v12773_v36 = vld [vmem:[%s21247_s3 + $0xf44] ss:$16 sps:$4 sm:$0xff]  }
 0xac8   :  { %6976 = vmatpush2.bf16.msra.mxu0 %v12753_v42  ;;  %7017 = vmatpush2.bf16.msra.mxu1 %v12756_v56  ;;  %v12776_v42 = vld [vmem:[%s21247_s3 + $0xf4c] ss:$16 sps:$4 sm:$0xff]   ;;  %v12771_v56 = vld [vmem:[%s21247_s3 + $0xf40] ss:$16 sps:$4 sm:$0xff]  }
 0xac9   :  { %6977 = vmatprep.subr.bf16.mxu0 %v12761_v40  ;;  %7018 = vmatprep.subr.bf16.mxu1 %v12764_v44  ;;  %v12774_v40 = vld [vmem:[%s21247_s3 + $0xf48] ss:$16 sps:$4 sm:$0xff]   ;;  %v12779_v44 = vld [vmem:[%s21247_s3 + $0xf24] ss:$16 sps:$4 sm:$0xff]  }
 0xacc   :  { %6978 = vmatpush2.bf16.msra.mxu0 %v12759_v19  ;;  %7019 = vmatpush2.bf16.msra.mxu1 %v12762_v11  ;;  %v12777_v19 = vld [vmem:[%s21247_s3 + $0xf20] ss:$16 sps:$4 sm:$0xff]   ;;  %v12782_v11 = vld [vmem:[%s21247_s3 + $0xf2c] ss:$16 sps:$4 sm:$0xff]  }
 0xacd   :  { %6979 = vmatprep.subr.bf16.mxu0 %v12767_v32  ;;  %7020 = vmatprep.subr.bf16.mxu1 %v12770_v47  ;;  %v12780_v32 = vld [vmem:[%s21247_s3 + $0xf28] ss:$16 sps:$4 sm:$0xff]   ;;  %v12785_v47 = vld [vmem:[%s21247_s3 + $0xf04] ss:$16 sps:$4 sm:$0xff]  }
 0xad0   :  { %6980 = vmatpush2.bf16.msra.mxu0 %v12765_v34  ;;  %7021 = vmatpush2.bf16.msra.mxu1 %v12768_v45  ;;  %v12783_v34 = vld [vmem:[%s21247_s3 + $0xf00] ss:$16 sps:$4 sm:$0xff]   ;;  %v12788_v45 = vld [vmem:[%s21247_s3 + $0xf0c] ss:$16 sps:$4 sm:$0xff]  }
 0xad1   :  { %6981 = vmatprep.subr.bf16.mxu0 %v12773_v36  ;;  %7022 = vmatprep.subr.bf16.mxu1 %v12776_v42  ;;  %v12786_v36 = vld [vmem:[%s21247_s3 + $0xf08] ss:$16 sps:$4 sm:$0xff]   ;;  %v13718_v42 = vld [vmem:[%s21695_s26 + $0x74] ss:$8 sps:$4 sm:$0xff]  }
 0xad4   :  { %6982 = vmatpush2.bf16.msra.mxu0 %v12771_v56  ;;  %7023 = vmatpush2.bf16.msra.mxu1 %v12774_v40  ;;  %v13719_v56 = vld [vmem:[%s21695_s26 + $0x174] ss:$8 sps:$4 sm:$0xff]  }
 0xad5   :  { %6983 = vmatprep.subr.bf16.mxu0 %v12779_v44  ;;  %7024 = vmatprep.subr.bf16.mxu1 %v12782_v11 }
 0xad8   :  { %6984 = vmatpush2.bf16.msra.mxu0 %v12777_v19  ;;  %7025 = vmatpush2.bf16.msra.mxu1 %v12780_v32 }
 0xad9   :  { %6985 = vmatprep.subr.bf16.mxu0 %v12785_v47  ;;  %7026 = vmatprep.subr.bf16.mxu1 %v12788_v45 }
 0xadc   :  { %6986 = vmatpush2.bf16.msra.mxu0 %v12783_v34  ;;  %7027 = vmatpush2.bf16.msra.mxu1 %v12786_v36 }
 0xadd   :  { %7118 = vmatprep.subr.bf16.mxu0 %v13718_v42  ;;  %7159 = vmatprep.subr.bf16.mxu1 %v13719_v56 }
 0xaf7   :  { %v6391_v40 = vpop.f32.mrf.mxu1  ;;  %v6432_v44 = vpop.f32.mrf.mxu0 }
 0xaf8   :  { %v6392_v19 = vadd.f32 %v6391_v40, %v14478_v51  ;;  %v20022_v40 = vld [vmem:[%s21697_s20 + $0x48] sm:$0xff] }
 0xaf9   :  { %v6393_v11 = vpop.f32.mrf.mxu1  ;;  %v6434_v32 = vpop.f32.mrf.mxu0 }
 0xafa   :  { %v6394_v47 = vadd.f32 %v6393_v11, %v14481_v52  ;;  %v6433_v34 = vadd.f32 %v6432_v44, %v6392_v19  ;;  %v20026_v19 = vrot.slane %v20022_v40, %v13946_v48 }
 0xafb   :  { %v6395_v45 = vpop.f32.mrf.mxu1  ;;  %v6436_v36 = vpop.f32.mrf.mxu0 }
 0xafc   :  { %v6435_v10 = vadd.f32 %v6434_v32, %v6394_v47 }
 0xafd   :  { %v6396_v17 = vpop.f32.mrf.mxu1  ;;  %v6437_v16 = vpop.f32.mrf.mxu0 }
 0xb37   :  { %v6473_v42 = vpop.f32.mrf.mxu1  ;;  %v6514_v53 = vpop.f32.mrf.mxu0 }
 0xb38   :  { %v6474_v12 = vadd.f32 %v6473_v42, %v6433_v34 }
 0xb39   :  { %v6475_v43 = vpop.f32.mrf.mxu1  ;;  %v6516_v54 = vpop.f32.mrf.mxu0 }
 0xb3a   :  { %v6476_v44 = vadd.f32 %v6475_v43, %v6435_v10  ;;  %v6515_v16 = vadd.f32 %v6514_v53, %v6474_v12  ;;  %v22494_v53 = vld [vmem:[#allocation38_spill] sm:$0xff] }
 0xb3b   :  { %v6477_v31 = vpop.f32.mrf.mxu1  ;;  %v6518_v56 = vpop.f32.mrf.mxu0 }
 0xb3c   :  { %v6517_v11 = vadd.f32 %v6516_v54, %v6476_v44  ;;  %v22496_v44 = vld [vmem:[#allocation40_spill] sm:$0xff] }
 0xb3d   :  { %v6478_v57 = vpop.f32.mrf.mxu1  ;;  %v6519_v49 = vpop.f32.mrf.mxu0 }
 0xb3e   :  { %v7061_v57 = vcombine.high %v20026_v19, %v20026_v19 }
 0xb40   :  { %v7083_v10 = vrot.slane %v7061_v57, %v13946_v48  ;;  %v22503_v57 = vld [vmem:[#allocation47_spill] sm:$0xff] }
 0xb42   :  { %v7093_v54 = vcombine.high %v7083_v10, %v7083_v10 }
 0xb57   :  { %v6555_v17 = vpop.f32.mrf.mxu1 }
 0xb58   :  { %v6556_v32 = vadd.f32 %v6555_v17, %v6515_v16  ;;  %v22498_v16 = vld [vmem:[#allocation42_spill] sm:$0xff]  ;;  %v22499_v17 = vld [vmem:[#allocation43_spill] sm:$0xff] }
 0xb59   :  { %v6557_v47 = vpop.f32.mrf.mxu1 }
 0xb5a   :  { %vm6562_vm14 = vcmp.ge.f32.partialorder %v6556_v32, 0.0  ;;  %v6564_v49 = vmul.f32 0.1, %v6556_v32  ;;  %v6558_v31 = vadd.f32 %v6557_v47, %v6517_v11  ;;  %v22500_v11 = vld [vmem:[#allocation44_spill] sm:$0xff]  ;;  %v22502_v47 = vld [vmem:[#allocation46_spill] sm:$0xff] }
 0xb5b   :  { %v6559_v34 = vpop.f32.mrf.mxu1 }
 0xb5c   :  { %vm6563_vm15 = vcmp.ge.f32.partialorder %v6558_v31, 0.0  ;;  %v6565_v45 = vmul.f32 0.1, %v6558_v31  ;;  %v6566_v36 = vsel %vm6562_vm14, %v6556_v32, %v6564_v49  ;;  %v22501_v32 = vld [vmem:[#allocation45_spill] sm:$0xff]  ;;  %v22504_v49 = vld [vmem:[#allocation48_spill] sm:$0xff]  ;;  %v22506_v34 = vld [vmem:[#allocation50_spill] sm:$0xff] }
 0xb5d   :  { %v6560_v43 = vpop.f32.mrf.mxu1  ;;  %v6568_v12 = vpack.c.bf16 %v6566_v36, %v6566_v36  ;;  %v22508_v36 = vld [vmem:[#allocation52_spill] sm:$0xff] }
 0xb5e   :  { %v6567_v42 = vsel %vm6563_vm15, %v6558_v31, %v6565_v45  ;;  %v22505_v31 = vld [vmem:[#allocation49_spill] sm:$0xff]  ;;  %v22507_v45 = vld [vmem:[#allocation51_spill] sm:$0xff] }
 0xb5f   :  { %v6569_v56 = vpack.c.bf16 %v6567_v42, %v6567_v42  ;;  %v22509_v43 = vld [vmem:[#allocation53_spill] sm:$0xff]  ;;  %v22511_v42 = vld [vmem:[#allocation55_spill] sm:$0xff] }
 0xb61   :  { %6987 = vmatprep.mubr.bf16.mxu0 %v6569_v56  ;;  %7028 = vmatprep.mubr.bf16.mxu1 %v6569_v56  ;;  %v22512_v56 = vld [vmem:[#allocation56_spill] sm:$0xff] }
 0xb62   :  { %6988 = vmatmul.mubr.bf16.vlgmr.msra.gmra.mxu0 %v6568_v12  ;;  %7029 = vmatmul.mubr.bf16.vlgmr.msra.gmra.mxu1 %v6568_v12  ;;  %v22513_v12 = vld [vmem:[#allocation57_spill] sm:$0xff] }
 0xb63   :  { %7119 = vmatpush1.bf16.msra.mxu0 %v18941_v41  ;;  %7160 = vmatpush1.bf16.msra.mxu1 %v18947_v46  ;;  %v22461_v41 = vld [vmem:[#allocation5_spill] sm:$0xff]  ;;  %v22462_v46 = vld [vmem:[#allocation6_spill] sm:$0xff] }
 0xb64   :  { %7120 = vmatprep.subr.bf16.mxu0 %v18953_v60  ;;  %7161 = vmatprep.subr.bf16.mxu1 %v18959_v62  ;;  %v22463_v60 = vld [vmem:[#allocation7_spill] sm:$0xff]  ;;  %v22464_v62 = vld [vmem:[#allocation8_spill] sm:$0xff] }
 0xb65   :  { %7150 = vmatprep.mubr.bf16.mxu0 %v7083_v10  ;;  %7191 = vmatprep.mubr.bf16.mxu1 %v7093_v54  ;;  %v22510_v10 = vld [vmem:[#allocation54_spill] sm:$0xff] }
 0xb66   :  { %v22514_v54 = vld [vmem:[#allocation58_spill] sm:$0xff] }
 0xb67   :  { %7121 = vmatpush1.bf16.msra.mxu0 %v18965_v63  ;;  %7162 = vmatpush1.bf16.msra.mxu1 %v18971_v0  ;;  %v22465_v63 = vld [vmem:[#allocation9_spill] sm:$0xff]  ;;  %v22466_v0 = vld [vmem:[#allocation10_spill] sm:$0xff] }
 0xb68   :  { %7122 = vmatprep.subr.bf16.mxu0 %v18977_v1  ;;  %7163 = vmatprep.subr.bf16.mxu1 %v18983_v2  ;;  %v22467_v1 = vld [vmem:[#allocation11_spill] sm:$0xff]  ;;  %v22468_v2 = vld [vmem:[#allocation12_spill] sm:$0xff] }
 0xb6b   :  { %7123 = vmatpush1.bf16.msra.mxu0 %v18989_v3  ;;  %7164 = vmatpush1.bf16.msra.mxu1 %v18995_v4  ;;  %v7046_v3 = vcombine.high %v20022_v40, %v20022_v40  ;;  %v22469_v4 = vld [vmem:[#allocation13_spill] sm:$0xff]  ;;  %v22495_v40 = vld [vmem:[#allocation39_spill] sm:$0xff] }
 0xb6c   :  { %7124 = vmatprep.subr.bf16.mxu0 %v19001_v6  ;;  %7165 = vmatprep.subr.bf16.mxu1 %v19007_v7  ;;  %v22470_v6 = vld [vmem:[#allocation14_spill] sm:$0xff]  ;;  %v22471_v7 = vld [vmem:[#allocation15_spill] sm:$0xff] }
 0xb6f   :  { %7125 = vmatpush1.bf16.msra.mxu0 %v19013_v8  ;;  %7166 = vmatpush1.bf16.msra.mxu1 %v19019_v9  ;;  %v22472_v8 = vld [vmem:[#allocation16_spill] sm:$0xff]  ;;  %v20086_v9 = vrot.slane %v7046_v3, %v13946_v48  ;;  %v22523_v3 = vld [vmem:[#allocation67_spill] sm:$0xff] }
 0xb70   :  { %7126 = vmatprep.subr.bf16.mxu0 %v19025_v22  ;;  %7167 = vmatprep.subr.bf16.mxu1 %v19031_v29  ;;  %v22473_v22 = vld [vmem:[#allocation17_spill] sm:$0xff]  ;;  %v22474_v29 = vld [vmem:[#allocation18_spill] sm:$0xff] }
 0xb73   :  { %7127 = vmatpush1.bf16.msra.mxu0 %v19037_v26  ;;  %7168 = vmatpush1.bf16.msra.mxu1 %v19043_v27  ;;  %v22475_v26 = vld [vmem:[#allocation19_spill] sm:$0xff]  ;;  %v22476_v27 = vld [vmem:[#allocation20_spill] sm:$0xff] }
 0xb74   :  { %7128 = vmatprep.subr.bf16.mxu0 %v19049_v5  ;;  %7169 = vmatprep.subr.bf16.mxu1 %v19055_v50  ;;  %v7062_v5 = vcombine.high %v20086_v9, %v20086_v9  ;;  %v7069_v50 = vrot.slane %v20026_v19, %v13946_v48  ;;  %v22497_v19 = vld [vmem:[#allocation41_spill] sm:$0xff] }
 0xb77   :  { %7129 = vmatpush1.bf16.msra.mxu0 %v19061_v24  ;;  %7170 = vmatpush1.bf16.msra.mxu1 %v19067_v23  ;;  %v22477_v24 = vld [vmem:[#allocation21_spill] sm:$0xff]  ;;  %v22478_v23 = vld [vmem:[#allocation22_spill] sm:$0xff] }
 0xb78   :  { %7130 = vmatprep.subr.bf16.mxu0 %v19073_v28  ;;  %7171 = vmatprep.subr.bf16.mxu1 %v19079_v21  ;;  %v22479_v28 = vld [vmem:[#allocation23_spill] sm:$0xff]  ;;  %v22480_v21 = vld [vmem:[#allocation24_spill] sm:$0xff] }
 0xb7b   :  { %7131 = vmatpush1.bf16.msra.mxu0 %v19085_v25  ;;  %7172 = vmatpush1.bf16.msra.mxu1 %v19091_v13  ;;  %v7090_v25 = vrot.slane %v7062_v5, %v13946_v48  ;;  %v7091_v13 = vcombine.high %v7069_v50, %v7069_v50  ;;  %v22532_v5 = vld [vmem:[#allocation76_spill] sm:$0xff] }
 0xb7c   :  { %7132 = vmatprep.subr.bf16.mxu0 %v19097_v20  ;;  %7173 = vmatprep.subr.bf16.mxu1 %v19103_v33  ;;  %v22481_v20 = vld [vmem:[#allocation25_spill] sm:$0xff]  ;;  %v22482_v33 = vld [vmem:[#allocation26_spill] sm:$0xff] }
 0xb7f   :  { %7133 = vmatpush1.bf16.msra.mxu0 %v19109_v35  ;;  %7174 = vmatpush1.bf16.msra.mxu1 %v19115_v37  ;;  %v22483_v35 = vld [vmem:[#allocation27_spill] sm:$0xff]  ;;  %v22484_v37 = vld [vmem:[#allocation28_spill] sm:$0xff] }
 0xb80   :  { %7134 = vmatprep.subr.bf16.mxu0 %v19121_v38  ;;  %7175 = vmatprep.subr.bf16.mxu1 %v19127_v39  ;;  %v7094_v38 = vcombine.high %v7090_v25, %v7090_v25  ;;  %v22485_v39 = vld [vmem:[#allocation29_spill] sm:$0xff] }
 0xb83   :  { %7135 = vmatpush2.bf16.msra.mxu0 %v19133_v61  ;;  %7176 = vmatpush2.bf16.msra.mxu1 %v19139_v55  ;;  %v22486_v61 = vld [vmem:[#allocation30_spill] sm:$0xff]  ;;  %v22487_v55 = vld [vmem:[#allocation31_spill] sm:$0xff] }
 0xb84   :  { %7136 = vmatprep.subr.bf16.mxu0 %v19145_v14  ;;  %7177 = vmatprep.subr.bf16.mxu1 %v19151_v59  ;;  %v22488_v14 = vld [vmem:[#allocation32_spill] sm:$0xff]  ;;  %v22489_v59 = vld [vmem:[#allocation33_spill] sm:$0xff] }
 0xb87   :  { %7137 = vmatpush2.bf16.msra.mxu0 %v19157_v58  ;;  %7178 = vmatpush2.bf16.msra.mxu1 %v19163_v15  ;;  %v22490_v58 = vld [vmem:[#allocation34_spill] sm:$0xff]  ;;  %v22491_v15 = vld [vmem:[#allocation35_spill] sm:$0xff] }
 0xb88   :  { %7138 = vmatprep.subr.bf16.mxu0 %v19169_v18  ;;  %7179 = vmatprep.subr.bf16.mxu1 %v19175_v30  ;;  %v22492_v18 = vld [vmem:[#allocation36_spill] sm:$0xff]  ;;  %v22493_v30 = vld [vmem:[#allocation37_spill] sm:$0xff] }
 0xb8b   :  { %7139 = vmatpush2.bf16.msra.mxu0 %v22461_v41  ;;  %7180 = vmatpush2.bf16.msra.mxu1 %v22462_v46  ;;  %v22515_v41 = vld [vmem:[#allocation59_spill] sm:$0xff]  ;;  %v22516_v46 = vld [vmem:[#allocation60_spill] sm:$0xff] }
 0xb8c   :  { %7140 = vmatprep.subr.bf16.mxu0 %v22463_v60  ;;  %7181 = vmatprep.subr.bf16.mxu1 %v22464_v62  ;;  %v22517_v60 = vld [vmem:[#allocation61_spill] sm:$0xff]  ;;  %v22518_v62 = vld [vmem:[#allocation62_spill] sm:$0xff] }
 0xb8f   :  { %7141 = vmatpush2.bf16.msra.mxu0 %v22465_v63  ;;  %7182 = vmatpush2.bf16.msra.mxu1 %v22466_v0  ;;  %v22519_v63 = vld [vmem:[#allocation63_spill] sm:$0xff]  ;;  %v22520_v0 = vld [vmem:[#allocation64_spill] sm:$0xff] }
 0xb90   :  { %7142 = vmatprep.subr.bf16.mxu0 %v22467_v1  ;;  %7183 = vmatprep.subr.bf16.mxu1 %v22468_v2  ;;  %v22521_v1 = vld [vmem:[#allocation65_spill] sm:$0xff]  ;;  %v22522_v2 = vld [vmem:[#allocation66_spill] sm:$0xff] }
 0xb93   :  { %7143 = vmatpush2.bf16.msra.mxu0 %v22469_v4  ;;  %7184 = vmatpush2.bf16.msra.mxu1 %v22470_v6  ;;  %v22524_v4 = vld [vmem:[#allocation68_spill] sm:$0xff]  ;;  %v22525_v6 = vld [vmem:[#allocation69_spill] sm:$0xff] }
 0xb94   :  { %7144 = vmatprep.subr.bf16.mxu0 %v22471_v7  ;;  %7185 = vmatprep.subr.bf16.mxu1 %v22472_v8  ;;  %v22526_v7 = vld [vmem:[#allocation70_spill] sm:$0xff]  ;;  %v22527_v8 = vld [vmem:[#allocation71_spill] sm:$0xff] }
 0xb97   :  { %7145 = vmatpush2.bf16.msra.mxu0 %v22473_v22  ;;  %7186 = vmatpush2.bf16.msra.mxu1 %v22474_v29  ;;  %v22528_v22 = vld [vmem:[#allocation72_spill] sm:$0xff]  ;;  %v22529_v29 = vld [vmem:[#allocation73_spill] sm:$0xff] }
 0xb98   :  { %7146 = vmatprep.subr.bf16.mxu0 %v22475_v26  ;;  %7187 = vmatprep.subr.bf16.mxu1 %v22476_v27  ;;  %v22530_v26 = vld [vmem:[#allocation74_spill] sm:$0xff]  ;;  %v22531_v27 = vld [vmem:[#allocation75_spill] sm:$0xff] }
 0xb9b   :  { %7147 = vmatpush2.bf16.msra.mxu0 %v22477_v24  ;;  %7188 = vmatpush2.bf16.msra.mxu1 %v22478_v23  ;;  %v22534_v24 = vld [vmem:[#allocation78_spill] sm:$0xff]  ;;  %v22535_v23 = vld [vmem:[#allocation79_spill] sm:$0xff] }
 0xb9c   :  { %7148 = vmatprep.subr.bf16.mxu0 %v22479_v28  ;;  %7189 = vmatprep.subr.bf16.mxu1 %v22480_v21  ;;  %v22536_v28 = vld [vmem:[#allocation80_spill] sm:$0xff]  ;;  %v22537_v21 = vld [vmem:[#allocation81_spill] sm:$0xff] }
 0xb9f   :  { %7149 = vmatpush2.bf16.msra.mxu0 %v22481_v20  ;;  %7190 = vmatpush2.bf16.msra.mxu1 %v22482_v33  ;;  %v22540_v20 = vld [vmem:[#allocation84_spill] sm:$0xff]  ;;  %v7076_v33 = vrot.slane %v20086_v9, %v13946_v48  ;;  %v22549_v9 = vmov 0  }
 0xba0   :  { %7200 = vmatprep.subr.bf16.mxu0 %v22483_v35  ;;  %7241 = vmatprep.subr.bf16.mxu1 %v22484_v37  ;;  %v22541_v35 = vld [vmem:[#allocation85_spill] sm:$0xff]  ;;  %v22542_v37 = vld [vmem:[#allocation86_spill] sm:$0xff] }
 0xba2   :  { %7151 = vmatmul.mubr.bf16.vlgmr.msra.gmra.mxu0 %v7069_v50  ;;  %7192 = vmatmul.mubr.bf16.vlgmr.msra.gmra.mxu1 %v7091_v13  ;;  %v22533_v50 = vld [vmem:[#allocation77_spill] sm:$0xff]  ;;  %v22539_v13 = vld [vmem:[#allocation83_spill] sm:$0xff] }
 0xba3   :  { %7201 = vmatpush1.bf16.msra.mxu0 %v22485_v39  ;;  %7242 = vmatpush1.bf16.msra.mxu1 %v22486_v61  ;;  %v22544_v39 = vld [vmem:[#allocation88_spill] sm:$0xff]  ;;  %v7092_v61 = vcombine.high %v7076_v33, %v7076_v33 }
 0xba4   :  { %7202 = vmatprep.subr.bf16.mxu0 %v22487_v55  ;;  %7243 = vmatprep.subr.bf16.mxu1 %v22488_v14  ;;  %v22545_v55 = vld [vmem:[#allocation89_spill] sm:$0xff]  ;;  %v22546_v14 = vld [vmem:[#allocation90_spill] sm:$0xff] }
 0xba5   :  { %7232 = vmatprep.mubr.bf16.mxu0 %v7090_v25  ;;  %7273 = vmatprep.mubr.bf16.mxu1 %v7094_v38  ;;  %v22538_v25 = vld [vmem:[#allocation82_spill] sm:$0xff]  ;;  %v22543_v38 = vld [vmem:[#allocation87_spill] sm:$0xff] }
 0xba7   :  { %7203 = vmatpush1.bf16.msra.mxu0 %v22489_v59  ;;  %7244 = vmatpush1.bf16.msra.mxu1 %v22490_v58  ;;  %v22547_v59 = vld [vmem:[#allocation91_spill] sm:$0xff]  ;;  %v22548_v58 = vld [vmem:[#allocation92_spill] sm:$0xff] }
 0xba8   :  { %7204 = vmatprep.subr.bf16.mxu0 %v22491_v15  ;;  %7245 = vmatprep.subr.bf16.mxu1 %v22492_v18  ;;  %v22550_v15 = vld [vmem:[#allocation93_spill] sm:$0xff]  ;;  %v22551_v18 = vld [vmem:[#allocation94_spill] sm:$0xff] }
 0xbab   :  { %7205 = vmatpush1.bf16.msra.mxu0 %v22493_v30  ;;  %7246 = vmatpush1.bf16.msra.mxu1 %v22494_v53  ;;  %v22552_v30 = vld [vmem:[#allocation95_spill] sm:$0xff]  ;;  %v12790_v53 = vld [vmem:[%s21247_s3 + $0x10e0] ss:$16 sps:$4 sm:$0xff]  }
 0xbac   :  { %7206 = vmatprep.subr.bf16.mxu0 %v22495_v40  ;;  %7247 = vmatprep.subr.bf16.mxu1 %v22496_v44  ;;  %v12792_v40 = vld [vmem:[%s21247_s3 + $0x10e4] ss:$16 sps:$4 sm:$0xff]  }
 0xbad   :  { %v12798_v44 = vld [vmem:[%s21247_s3 + $0x10c4] ss:$16 sps:$4 sm:$0xff]  }
 0xbaf   :  { %7207 = vmatpush1.bf16.msra.mxu0 %v22497_v19  ;;  %7248 = vmatpush1.bf16.msra.mxu1 %v22498_v16  ;;  %v22553_v19 = vld [vmem:[#allocation96_spill] sm:$0xff] }
 0xbb0   :  { %7208 = vmatprep.subr.bf16.mxu0 %v22499_v17  ;;  %7249 = vmatprep.subr.bf16.mxu1 %v22500_v11  ;;  %v12796_v16 = vld [vmem:[%s21247_s3 + $0x10c0] ss:$16 sps:$4 sm:$0xff]   ;;  %v22554_v17 = vld [vmem:[#allocation97_spill] sm:$0xff]  ;;  %v12804_v11 = vld [vmem:[%s21247_s3 + $0x10a4] ss:$16 sps:$4 sm:$0xff]  }
 0xbb3   :  { %7209 = vmatpush1.bf16.msra.mxu0 %v22501_v32  ;;  %7250 = vmatpush1.bf16.msra.mxu1 %v22502_v47  ;;  %v22555_v32 = vld [vmem:[#allocation98_spill] sm:$0xff] }
 0xbb4   :  { %7210 = vmatprep.subr.bf16.mxu0 %v22503_v57  ;;  %7251 = vmatprep.subr.bf16.mxu1 %v22504_v49  ;;  %v12802_v47 = vld [vmem:[%s21247_s3 + $0x10a0] ss:$16 sps:$4 sm:$0xff]   ;;  %v22556_v57 = vld [vmem:[#allocation99_spill] sm:$0xff]  ;;  %v12810_v49 = vld [vmem:[%s21247_s3 + $0x1084] ss:$16 sps:$4 sm:$0xff]  }
 0xbb7   :  { %7211 = vmatpush1.bf16.msra.mxu0 %v22505_v31  ;;  %7252 = vmatpush1.bf16.msra.mxu1 %v22506_v34  ;;  %v22557_v31 = vld [vmem:[#allocation100_spill] sm:$0xff] }
 0xbb8   :  { %7212 = vmatprep.subr.bf16.mxu0 %v22507_v45  ;;  %7253 = vmatprep.subr.bf16.mxu1 %v22508_v36  ;;  %v12808_v34 = vld [vmem:[%s21247_s3 + $0x1080] ss:$16 sps:$4 sm:$0xff]   ;;  %v22558_v45 = vld [vmem:[#allocation101_spill] sm:$0xff]  ;;  %v12816_v36 = vld [vmem:[%s21247_s3 + $0x1064] ss:$16 sps:$4 sm:$0xff]  }
 0xbbb   :  { %7213 = vmatpush1.bf16.msra.mxu0 %v22509_v43  ;;  %7254 = vmatpush1.bf16.msra.mxu1 %v22510_v10  ;;  %v22559_v43 = vld [vmem:[#allocation102_spill] sm:$0xff] }
 0xbbc   :  { %7214 = vmatprep.subr.bf16.mxu0 %v22511_v42  ;;  %7255 = vmatprep.subr.bf16.mxu1 %v22512_v56  ;;  %v12814_v10 = vld [vmem:[%s21247_s3 + $0x1060] ss:$16 sps:$4 sm:$0xff]   ;;  %v22560_v42 = vld [vmem:[#allocation103_spill] sm:$0xff]  ;;  %v12822_v56 = vld [vmem:[%s21247_s3 + $0x1044] ss:$16 sps:$4 sm:$0xff]  }
 0xbbf   :  { %7215 = vmatpush1.bf16.msra.mxu0 %v22513_v12  ;;  %7256 = vmatpush1.bf16.msra.mxu1 %v22514_v54  ;;  %v22561_v12 = vld [vmem:[#allocation104_spill] sm:$0xff] }
 0xbc0   :  { %7216 = vmatprep.subr.bf16.mxu0 %v22515_v41  ;;  %7257 = vmatprep.subr.bf16.mxu1 %v22516_v46  ;;  %v11280_v54 = vld.sshfl [vmem:[%s21697_s20 + $0x50] sm:$0x1 pattern:$0x75316420]  ;;  %v22562_v46 = vld [vmem:[#allocation105_spill] sm:$0xff] }
 0xbc1   :  { %v12820_v41 = vld [vmem:[%s21247_s3 + $0x1040] ss:$16 sps:$4 sm:$0xff]  }
 0xbc3   :  { %7217 = vmatpush2.bf16.msra.mxu0 %v22517_v60  ;;  %7258 = vmatpush2.bf16.msra.mxu1 %v22518_v62  ;;  %v12795_v60 = vld [vmem:[%s21247_s3 + $0x10ec] ss:$16 sps:$4 sm:$0xff]   ;;  %v7108_v62 = vrot.slane %v11280_v54, %v13946_v48  ;;  %v12870_v54 = vld [vmem:[%s21247_s3 + $0x1144] ss:$16 sps:$4 sm:$0xff]  }
 0xbc4   :  { %7218 = vmatprep.subr.bf16.mxu0 %v22519_v63  ;;  %7259 = vmatprep.subr.bf16.mxu1 %v22520_v0  ;;  %v22563_v63 = vld [vmem:[#allocation106_spill] sm:$0xff]  ;;  %v12793_v0 = vld [vmem:[%s21247_s3 + $0x10e8] ss:$16 sps:$4 sm:$0xff]   ;;  %v12807_v48 = vld [vmem:[%s21247_s3 + $0x10ac] ss:$16 sps:$4 sm:$0xff]  }
 0xbc7   :  { %7219 = vmatpush2.bf16.msra.mxu0 %v22521_v1  ;;  %7260 = vmatpush2.bf16.msra.mxu1 %v22522_v2  ;;  %v12801_v1 = vld [vmem:[%s21247_s3 + $0x10cc] ss:$16 sps:$4 sm:$0xff]   ;;  %v12799_v2 = vld [vmem:[%s21247_s3 + $0x10c8] ss:$16 sps:$4 sm:$0xff]  }
 0xbc8   :  { %7220 = vmatprep.subr.bf16.mxu0 %v22523_v3  ;;  %7261 = vmatprep.subr.bf16.mxu1 %v22524_v4  ;;  %v12805_v3 = vld [vmem:[%s21247_s3 + $0x10a8] ss:$16 sps:$4 sm:$0xff]   ;;  %v12813_v4 = vld [vmem:[%s21247_s3 + $0x108c] ss:$16 sps:$4 sm:$0xff]  }
 0xbcb   :  { %7221 = vmatpush2.bf16.msra.mxu0 %v22525_v6  ;;  %7262 = vmatpush2.bf16.msra.mxu1 %v22526_v7  ;;  %v12811_v6 = vld [vmem:[%s21247_s3 + $0x1088] ss:$16 sps:$4 sm:$0xff]   ;;  %v12819_v7 = vld [vmem:[%s21247_s3 + $0x106c] ss:$16 sps:$4 sm:$0xff]  }
 0xbcc   :  { %7222 = vmatprep.subr.bf16.mxu0 %v22527_v8  ;;  %7263 = vmatprep.subr.bf16.mxu1 %v22528_v22  ;;  %v12817_v8 = vld [vmem:[%s21247_s3 + $0x1068] ss:$16 sps:$4 sm:$0xff]   ;;  %v12825_v22 = vld [vmem:[%s21247_s3 + $0x104c] ss:$16 sps:$4 sm:$0xff]  }
 0xbcf   :  { %7223 = vmatpush2.bf16.msra.mxu0 %v22529_v29  ;;  %7264 = vmatpush2.bf16.msra.mxu1 %v22530_v26  ;;  %v12823_v29 = vld [vmem:[%s21247_s3 + $0x1048] ss:$16 sps:$4 sm:$0xff]  }
 0xbd0   :  { %7224 = vmatprep.subr.bf16.mxu0 %v22531_v27  ;;  %7265 = vmatprep.subr.bf16.mxu1 %v22532_v5  ;;  %v22564_v5 = vld [vmem:[#allocation107_spill] sm:$0xff] }
 0xbd3   :  { %7225 = vmatpush2.bf16.msra.mxu0 %v22533_v50  ;;  %7266 = vmatpush2.bf16.msra.mxu1 %v22534_v24  ;;  %v22565_v24 = vld [vmem:[#allocation108_spill] sm:$0xff] }
 0xbd4   :  { %7226 = vmatprep.subr.bf16.mxu0 %v22535_v23  ;;  %7267 = vmatprep.subr.bf16.mxu1 %v22536_v28  ;;  %v12828_v28 = vld [vmem:[%s21247_s3 + $0x1024] ss:$16 sps:$4 sm:$0xff]  }
 0xbd7   :  { %7227 = vmatpush2.bf16.msra.mxu0 %v22537_v21  ;;  %7268 = vmatpush2.bf16.msra.mxu1 %v22538_v25  ;;  %v12831_v21 = vld [vmem:[%s21247_s3 + $0x102c] ss:$16 sps:$4 sm:$0xff]  }
 0xbd8   :  { %7228 = vmatprep.subr.bf16.mxu0 %v22539_v13  ;;  %7269 = vmatprep.subr.bf16.mxu1 %v22540_v20  ;;  %v12826_v20 = vld [vmem:[%s21247_s3 + $0x1020] ss:$16 sps:$4 sm:$0xff]  }
 0xbdb   :  { %7229 = vmatpush2.bf16.msra.mxu0 %v22541_v35  ;;  %7270 = vmatpush2.bf16.msra.mxu1 %v22542_v37  ;;  %v22566_v35 = vld [vmem:[#allocation109_spill] sm:$0xff] }
 0xbdc   :  { %7230 = vmatprep.subr.bf16.mxu0 %v22543_v38  ;;  %7271 = vmatprep.subr.bf16.mxu1 %v22544_v39  ;;  %v22567_v38 = vld [vmem:[#allocation110_spill] sm:$0xff] }
 0xbdf   :  { %7231 = vmatpush2.bf16.msra.mxu0 %v22545_v55  ;;  %7272 = vmatpush2.bf16.msra.mxu1 %v22546_v14  ;;  %v12834_v14 = vld [vmem:[%s21247_s3 + $0x1004] ss:$16 sps:$4 sm:$0xff]  }
 0xbe0   :  { %7282 = vmatprep.subr.bf16.mxu0 %v22547_v59  ;;  %7716 = vmatprep.subr.bf16.mxu1 %v12792_v40  ;;  %v12837_v59 = vld [vmem:[%s21247_s3 + $0x100c] ss:$16 sps:$4 sm:$0xff]  }
 0xbe1   :  { %v12843_v40 = vld [vmem:[%s21247_s3 + $0x11ec] ss:$16 sps:$4 sm:$0xff]  }
 0xbe2   :  { %7233 = vmatmul.mubr.bf16.vlgmr.msra.gmra.mxu0 %v7076_v33  ;;  %7274 = vmatmul.mubr.bf16.vlgmr.msra.gmra.mxu1 %v7092_v61  ;;  %v12829_v33 = vld [vmem:[%s21247_s3 + $0x1028] ss:$16 sps:$4 sm:$0xff]  }
 0xbe3   :  { %7283 = vmatpush1.bf16.msra.mxu0 %v22548_v58  ;;  %7314 = vmatprep.mubr.bf16.mxu0 %v22549_v9 }
 0xbe4   :  { %7284 = vmatprep.subr.bf16.mxu0 %v22550_v15  ;;  %7717 = vmatpush1.bf16.msra.mxu1 %v12790_v53  ;;  %v12840_v53 = vld [vmem:[%s21247_s3 + $0x11e4] ss:$16 sps:$4 sm:$0xff]  }
 0xbe5   :  { %7718 = vmatprep.subr.bf16.mxu1 %v12798_v44  ;;  %v12838_v44 = vld [vmem:[%s21247_s3 + $0x11e0] ss:$16 sps:$4 sm:$0xff]  }
 0xbe7   :  { %7285 = vmatpush1.bf16.msra.mxu0 %v22551_v18  ;;  %v12832_v18 = vld [vmem:[%s21247_s3 + $0x1000] ss:$16 sps:$4 sm:$0xff]  }
 0xbe8   :  { %7286 = vmatprep.subr.bf16.mxu0 %v22552_v30  ;;  %7719 = vmatpush1.bf16.msra.mxu1 %v12796_v16  ;;  %v12835_v30 = vld [vmem:[%s21247_s3 + $0x1008] ss:$16 sps:$4 sm:$0xff]   ;;  %v12846_v16 = vld [vmem:[%s21247_s3 + $0x11c4] ss:$16 sps:$4 sm:$0xff]  }
 0xbe9   :  { %7720 = vmatprep.subr.bf16.mxu1 %v12804_v11  ;;  %v12844_v11 = vld [vmem:[%s21247_s3 + $0x11c0] ss:$16 sps:$4 sm:$0xff]  }
 0xbeb   :  { %7287 = vmatpush1.bf16.msra.mxu0 %v22553_v19  ;;  %v12841_v19 = vld [vmem:[%s21247_s3 + $0x11e8] ss:$16 sps:$4 sm:$0xff]  }
 0xbec   :  { %7288 = vmatprep.subr.bf16.mxu0 %v22554_v17  ;;  %7721 = vmatpush1.bf16.msra.mxu1 %v12802_v47  ;;  %v12849_v17 = vld [vmem:[%s21247_s3 + $0x11cc] ss:$16 sps:$4 sm:$0xff]   ;;  %v12852_v47 = vld [vmem:[%s21247_s3 + $0x11a4] ss:$16 sps:$4 sm:$0xff]  }
 0xbed   :  { %7722 = vmatprep.subr.bf16.mxu1 %v12810_v49  ;;  %v12850_v49 = vld [vmem:[%s21247_s3 + $0x11a0] ss:$16 sps:$4 sm:$0xff]  }
 0xbef   :  { %7289 = vmatpush1.bf16.msra.mxu0 %v22555_v32  ;;  %v12847_v32 = vld [vmem:[%s21247_s3 + $0x11c8] ss:$16 sps:$4 sm:$0xff]  }
 0xbf0   :  { %7290 = vmatprep.subr.bf16.mxu0 %v22556_v57  ;;  %7723 = vmatpush1.bf16.msra.mxu1 %v12808_v34  ;;  %v12855_v57 = vld [vmem:[%s21247_s3 + $0x11ac] ss:$16 sps:$4 sm:$0xff]   ;;  %v12858_v34 = vld [vmem:[%s21247_s3 + $0x1184] ss:$16 sps:$4 sm:$0xff]  }
 0xbf1   :  { %7724 = vmatprep.subr.bf16.mxu1 %v12816_v36  ;;  %v12856_v36 = vld [vmem:[%s21247_s3 + $0x1180] ss:$16 sps:$4 sm:$0xff]  }
 0xbf3   :  { %7291 = vmatpush1.bf16.msra.mxu0 %v22557_v31  ;;  %v12853_v31 = vld [vmem:[%s21247_s3 + $0x11a8] ss:$16 sps:$4 sm:$0xff]  }
 0xbf4   :  { %7292 = vmatprep.subr.bf16.mxu0 %v22558_v45  ;;  %7725 = vmatpush1.bf16.msra.mxu1 %v12814_v10  ;;  %v12861_v45 = vld [vmem:[%s21247_s3 + $0x118c] ss:$16 sps:$4 sm:$0xff]   ;;  %v12864_v10 = vld [vmem:[%s21247_s3 + $0x1164] ss:$16 sps:$4 sm:$0xff]  }
 0xbf5   :  { %7726 = vmatprep.subr.bf16.mxu1 %v12822_v56  ;;  %v12862_v56 = vld [vmem:[%s21247_s3 + $0x1160] ss:$16 sps:$4 sm:$0xff]  }
 0xbf7   :  { %7293 = vmatpush1.bf16.msra.mxu0 %v22559_v43  ;;  %v12859_v43 = vld [vmem:[%s21247_s3 + $0x1188] ss:$16 sps:$4 sm:$0xff]  }
 0xbf8   :  { %7294 = vmatprep.subr.bf16.mxu0 %v22560_v42  ;;  %7727 = vmatpush1.bf16.msra.mxu1 %v12820_v41  ;;  %v12867_v42 = vld [vmem:[%s21247_s3 + $0x116c] ss:$16 sps:$4 sm:$0xff]  }
 0xbf9   :  { %7728 = vmatprep.subr.bf16.mxu1 %v12828_v28  ;;  %v12873_v41 = vld [vmem:[%s21247_s3 + $0x114c] ss:$16 sps:$4 sm:$0xff]  }
 0xbfb   :  { %7295 = vmatpush1.bf16.msra.mxu0 %v22561_v12  ;;  %v12865_v12 = vld [vmem:[%s21247_s3 + $0x1168] ss:$16 sps:$4 sm:$0xff]  }
 0xbfc   :  { %7296 = vmatprep.subr.bf16.mxu0 %v22562_v46  ;;  %7729 = vmatpush1.bf16.msra.mxu1 %v12826_v20  ;;  %v12868_v46 = vld [vmem:[%s21247_s3 + $0x1140] ss:$16 sps:$4 sm:$0xff]  }
 0xbfd   :  { %7730 = vmatprep.subr.bf16.mxu1 %v12834_v14 }
 0xbff   :  { %7297 = vmatpush1.bf16.msra.mxu0 %v22563_v63  ;;  %v12879_v63 = vld [vmem:[%s21247_s3 + $0x112c] ss:$16 sps:$4 sm:$0xff]  }
 0xc00   :  { %7757 = vmatprep.subr.bf16.mxu0 %v12795_v60  ;;  %7731 = vmatpush1.bf16.msra.mxu1 %v12832_v18  ;;  %v12871_v60 = vld [vmem:[%s21247_s3 + $0x1148] ss:$16 sps:$4 sm:$0xff]  }
 0xc01   :  { %7732 = vmatprep.subr.bf16.mxu1 %v12840_v53 }
 0xc02   :  { %7315 = vmatmul.mubr.bf16.vlgmr.msra.gmra.mxu0 %v7108_v62  ;;  %v12876_v62 = vld [vmem:[%s21247_s3 + $0x1124] ss:$16 sps:$4 sm:$0xff]  }
 0xc03   :  { %7758 = vmatpush1.bf16.msra.mxu0 %v12793_v0  ;;  %v12874_v0 = vld [vmem:[%s21247_s3 + $0x1120] ss:$16 sps:$4 sm:$0xff]  }
 0xc04   :  { %7759 = vmatprep.subr.bf16.mxu0 %v12801_v1  ;;  %7733 = vmatpush2.bf16.msra.mxu1 %v12838_v44  ;;  %v12877_v1 = vld [vmem:[%s21247_s3 + $0x1128] ss:$16 sps:$4 sm:$0xff]  }
 0xc05   :  { %7734 = vmatprep.subr.bf16.mxu1 %v12846_v16 }
 0xc07   :  { %7760 = vmatpush1.bf16.msra.mxu0 %v12799_v2  ;;  %v12882_v2 = vld [vmem:[%s21247_s3 + $0x1104] ss:$16 sps:$4 sm:$0xff]  }
 0xc08   :  { %7761 = vmatprep.subr.bf16.mxu0 %v12807_v48  ;;  %7735 = vmatpush2.bf16.msra.mxu1 %v12844_v11  ;;  %v12885_v48 = vld [vmem:[%s21247_s3 + $0x110c] ss:$16 sps:$4 sm:$0xff]  }
 0xc09   :  { %7736 = vmatprep.subr.bf16.mxu1 %v12852_v47 }
 0xc0b   :  { %7762 = vmatpush1.bf16.msra.mxu0 %v12805_v3  ;;  %v12880_v3 = vld [vmem:[%s21247_s3 + $0x1100] ss:$16 sps:$4 sm:$0xff]  }
 0xc0c   :  { %7763 = vmatprep.subr.bf16.mxu0 %v12813_v4  ;;  %7737 = vmatpush2.bf16.msra.mxu1 %v12850_v49  ;;  %v12883_v4 = vld [vmem:[%s21247_s3 + $0x1108] ss:$16 sps:$4 sm:$0xff]  }
 0xc0d   :  { %7738 = vmatprep.subr.bf16.mxu1 %v12858_v34  ;;  %v12888_v49 = vld [vmem:[%s21250_s5 + $0x38] sm:$0xff]  }
 0xc0f   :  { %7764 = vmatpush1.bf16.msra.mxu0 %v12811_v6  ;;  %v12886_v6 = vld [vmem:[%s21250_s5 + $0x78] sm:$0xff]  }
 0xc10   :  { %7765 = vmatprep.subr.bf16.mxu0 %v12819_v7  ;;  %7739 = vmatpush2.bf16.msra.mxu1 %v12856_v36  ;;  %v12887_v7 = vld [vmem:[%s21250_s5 + $0xf8] sm:$0xff]   ;;  %v12891_v36 = vld [vmem:[%s21250_s5 + $0xf0] sm:$0xff]  }
 0xc11   :  { %7740 = vmatprep.subr.bf16.mxu1 %v12864_v10  ;;  %v12893_v10 = vld [vmem:[%s21250_s5 + $0xb0] sm:$0xff]  }
 0xc13   :  { %7766 = vmatpush1.bf16.msra.mxu0 %v12817_v8 }
 0xc14   :  { %7767 = vmatprep.subr.bf16.mxu0 %v12825_v22  ;;  %7741 = vmatpush2.bf16.msra.mxu1 %v12862_v56  ;;  %v12895_v56 = vld [vmem:[%s21250_s5 + $0xe8] sm:$0xff]  }
 0xc15   :  { %7742 = vmatprep.subr.bf16.mxu1 %v12870_v54  ;;  %v12897_v54 = vld [vmem:[%s21250_s5 + $0xa8] sm:$0xff]  }
 0xc17   :  { %7768 = vmatpush1.bf16.msra.mxu0 %v12823_v29 }
 0xc18   :  { %7769 = vmatprep.subr.bf16.mxu0 %v12831_v21  ;;  %7743 = vmatpush2.bf16.msra.mxu1 %v12868_v46  ;;  %v12899_v46 = vld [vmem:[%s21250_s5 + $0xe0] sm:$0xff]  }
 0xc19   :  { %7744 = vmatprep.subr.bf16.mxu1 %v12876_v62  ;;  %v12901_v62 = vld [vmem:[%s21250_s5 + $0xa0] sm:$0xff]  }
 0xc1b   :  { %7770 = vmatpush1.bf16.msra.mxu0 %v12829_v33 }
 0xc1c   :  { %7771 = vmatprep.subr.bf16.mxu0 %v12837_v59  ;;  %7745 = vmatpush2.bf16.msra.mxu1 %v12874_v0  ;;  %v12903_v0 = vld [vmem:[%s21250_s5 + $0xd8] sm:$0xff]  }
 0xc1d   :  { %7746 = vmatprep.subr.bf16.mxu1 %v12882_v2  ;;  %v12905_v2 = vld [vmem:[%s21250_s5 + $0x98] sm:$0xff]  }
 0xc1f   :  { %7772 = vmatpush1.bf16.msra.mxu0 %v12835_v30 }
 0xc20   :  { %7773 = vmatprep.subr.bf16.mxu0 %v12843_v40  ;;  %7747 = vmatpush2.bf16.msra.mxu1 %v12880_v3  ;;  %v12907_v3 = vld [vmem:[%s21250_s5 + $0xd0] sm:$0xff]  }
 0xc21   :  { %11669 = vmatprep.subr.bf16.mxu1 %v12886_v6  ;;  %v12909_v6 = vld [vmem:[%s21250_s5 + $0x90] sm:$0xff]  }
 0xc22   :  { %v6989_v26 = vpop.f32.mrf.mxu0  ;;  %v7030_v27 = vpop.f32.mrf.mxu1 }
 0xc23   :  { %v20263_v50 = vadd.f32 %v6989_v26, %v22564_v5  ;;  %v20266_v23 = vadd.f32 %v7030_v27, %v22565_v24  ;;  %7774 = vmatpush2.bf16.msra.mxu0 %v12841_v19 }
 0xc24   :  { %v6991_v25 = vpop.f32.mrf.mxu0  ;;  %v7032_v13 = vpop.f32.mrf.mxu1  ;;  %7775 = vmatprep.subr.bf16.mxu0 %v12849_v17 }
 0xc25   :  { %v20281_v37 = vadd.f32 %v6991_v25, %v22566_v35  ;;  %v20284_v39 = vadd.f32 %v7032_v13, %v22567_v38 }
 0xc26   :  { %v6993_v61 = vpop.f32.mrf.mxu0  ;;  %v7034_v55 = vpop.f32.mrf.mxu1 }
 0xc27   :  { %7776 = vmatpush2.bf16.msra.mxu0 %v12847_v32 }
 0xc28   :  { %v6994_v58 = vpop.f32.mrf.mxu0  ;;  %v7035_v15 = vpop.f32.mrf.mxu1  ;;  %7777 = vmatprep.subr.bf16.mxu0 %v12855_v57 }
 0xc2b   :  { %7778 = vmatpush2.bf16.msra.mxu0 %v12853_v31  ;;  %v12889_v31 = vld [vmem:[%s21250_s5 + $0xb8] sm:$0xff]  }
 0xc2c   :  { %7779 = vmatprep.subr.bf16.mxu0 %v12861_v45  ;;  %v12890_v45 = vld [vmem:[%s21250_s5 + $0x70] sm:$0xff]  }
 0xc2f   :  { %7780 = vmatpush2.bf16.msra.mxu0 %v12859_v43  ;;  %v12892_v43 = vld [vmem:[%s21250_s5 + $0x30] sm:$0xff]  }
 0xc30   :  { %7781 = vmatprep.subr.bf16.mxu0 %v12867_v42  ;;  %v12894_v42 = vld [vmem:[%s21250_s5 + $0x68] sm:$0xff]  }
 0xc33   :  { %7782 = vmatpush2.bf16.msra.mxu0 %v12865_v12  ;;  %v12896_v12 = vld [vmem:[%s21250_s5 + $0x28] sm:$0xff]  }
 0xc34   :  { %7783 = vmatprep.subr.bf16.mxu0 %v12873_v41  ;;  %v12898_v41 = vld [vmem:[%s21250_s5 + $0x60] sm:$0xff]  }
 0xc37   :  { %7784 = vmatpush2.bf16.msra.mxu0 %v12871_v60  ;;  %v12900_v60 = vld [vmem:[%s21250_s5 + $0x20] sm:$0xff]  }
 0xc38   :  { %7785 = vmatprep.subr.bf16.mxu0 %v12879_v63  ;;  %v12902_v63 = vld [vmem:[%s21250_s5 + $0x58] sm:$0xff]  }
 0xc3b   :  { %7786 = vmatpush2.bf16.msra.mxu0 %v12877_v1  ;;  %v12904_v1 = vld [vmem:[%s21250_s5 + $0x18] sm:$0xff]  }
 0xc3c   :  { %7787 = vmatprep.subr.bf16.mxu0 %v12885_v48  ;;  %v12906_v48 = vld [vmem:[%s21250_s5 + $0x50] sm:$0xff]  }
 0xc3f   :  { %7788 = vmatpush2.bf16.msra.mxu0 %v12883_v4  ;;  %v12908_v4 = vld [vmem:[%s21250_s5 + $0x10] sm:$0xff]  }
 0xc40   :  { %11691 = vmatprep.subr.bf16.mxu0 %v12887_v7  ;;  %v12910_v7 = vld [vmem:[%s21250_s5 + $0x48] sm:$0xff]  }
 0xc62   :  { %v7152_v8 = vpop.f32.mrf.mxu0  ;;  %v7193_v22 = vpop.f32.mrf.mxu1 }
 0xc63   :  { %v7153_v29 = vadd.f32 %v7152_v8, %v14478_v51  ;;  %v12911_v8 = vld [vmem:[%s21250_s5 + $0xc8] sm:$0xff]  }
 0xc64   :  { %v7154_v26 = vpop.f32.mrf.mxu0  ;;  %v7195_v27 = vpop.f32.mrf.mxu1 }
 0xc65   :  { %v7155_v5 = vadd.f32 %v7154_v26, %v14481_v52  ;;  %v7194_v24 = vadd.f32 %v7193_v22, %v7153_v29  ;;  %v12912_v22 = vld [vmem:[%s21250_s5 + $0x8] sm:$0xff]   ;;  %v12914_v26 = vld [vmem:[%s21250_s5 + $0x40] sm:$0xff]  }
 0xc66   :  { %v7156_v28 = vpop.f32.mrf.mxu0  ;;  %v7197_v21 = vpop.f32.mrf.mxu1  ;;  %v12913_v29 = vld [vmem:[%s21250_s5 + $0x88] sm:$0xff]  }
 0xc67   :  { %v7196_v25 = vadd.f32 %v7195_v27, %v7155_v5  ;;  %v12915_v27 = vld [vmem:[%s21250_s5 + $0xc0] sm:$0xff]  }
 0xc68   :  { %v7157_v13 = vpop.f32.mrf.mxu0  ;;  %v7198_v20 = vpop.f32.mrf.mxu1  ;;  %v12916_v5 = vld [vmem:[%s21250_s5] sm:$0xff]  }
 0xc69   :  { %v8221_v28 = vld [vmem:[%s21251_s7 + $0x1c0] sm:$0xff] }
 0xc6a   :  { %v8225_v21 = vld [vmem:[%s21251_s7 + $0x1e0] sm:$0xff] }
 0xc6b   :  { %v11498_v13 = vcombine.low %v8221_v28, %v8225_v21  ;;  %v11499_v20 = vcombine.high %v8221_v28, %v8225_v21  ;;  %v8181_v21 = vld [vmem:[%s21251_s7 + $0x80] sm:$0xff] }
 0xca2   :  { %v7234_v33 = vpop.f32.mrf.mxu0  ;;  %v7275_v35 = vpop.f32.mrf.mxu1 }
 0xca3   :  { %v7235_v15 = vadd.f32 %v7234_v33, %v7194_v24  ;;  %v12917_v24 = vld [vmem:[%s21250_s5 + $0x80] sm:$0xff]   ;;  %v8226_v33 = vld [vmem:[%s21251_s7 + $0x1e8] sm:$0xff] }
 0xca4   :  { %v7236_v38 = vpop.f32.mrf.mxu0  ;;  %v7277_v61 = vpop.f32.mrf.mxu1 }
 0xca5   :  { %v7237_v51 = vadd.f32 %v7236_v38, %v7196_v25  ;;  %v7276_v18 = vadd.f32 %v7275_v35, %v7235_v15  ;;  %v8222_v25 = vld [vmem:[%s21251_s7 + $0x1c8] sm:$0xff] }
 0xca6   :  { %v7238_v55 = vpop.f32.mrf.mxu0  ;;  %v7279_v14 = vpop.f32.mrf.mxu1  ;;  %v11500_v35 = vcombine.low %v8222_v25, %v8226_v33  ;;  %v11501_v38 = vcombine.high %v8222_v25, %v8226_v33  ;;  %v8185_v25 = vld [vmem:[%s21251_s7 + $0xa0] sm:$0xff]  ;;  %v8186_v33 = vld [vmem:[%s21251_s7 + $0xa8] sm:$0xff] }
 0xca7   :  { %v7278_v53 = vadd.f32 %v7277_v61, %v7237_v51 }
 0xca8   :  { %v7239_v59 = vpop.f32.mrf.mxu0  ;;  %v7280_v58 = vpop.f32.mrf.mxu1 }
 0xcc2   :  { %v7316_v30 = vpop.f32.mrf.mxu0 }
 0xcc3   :  { %v7317_v52 = vadd.f32 %v7316_v30, %v7276_v18 }
 0xcc4   :  { %v7318_v40 = vpop.f32.mrf.mxu0 }
 0xcc5   :  { %vm7323_vm0 = vcmp.ge.f32.partialorder %v7317_v52, 0.0  ;;  %v7325_v44 = vmul.f32 0.1, %v7317_v52  ;;  %v7319_v19 = vadd.f32 %v7318_v40, %v7278_v53 }
 0xcc6   :  { %v7320_v16 = vpop.f32.mrf.mxu0 }
 0xcc7   :  { %vm7324_vm1 = vcmp.ge.f32.partialorder %v7319_v19, 0.0  ;;  %v7326_v17 = vmul.f32 0.1, %v7319_v19  ;;  %v7327_v11 = vsel %vm7323_vm0, %v7317_v52, %v7325_v44 }
 0xcc8   :  { %v7321_v32 = vpop.f32.mrf.mxu0  ;;  %v7329_v34 = vpack.c.bf16 %v7327_v11, %v7327_v11 }
 0xcc9   :  { %v7328_v47 = vsel %vm7324_vm1, %v7319_v19, %v7326_v17  ;;  %v8214_v32 = vld [vmem:[%s21251_s7 + $0x188] sm:$0xff]  ;;  %vm13723_vm1 = vmmov 0  }
 0xcca   :  { %v7330_v57 = vpack.c.bf16 %v7328_v47, %v7328_v47  ;;  %v8218_v47 = vld [vmem:[%s21251_s7 + $0x1a8] sm:$0xff] }
 0xccc   :  { %7748 = vmatprep.mubr.bf16.mxu1 %v7330_v57  ;;  %7789 = vmatprep.mubr.bf16.mxu0 %v7330_v57 }
 0xccd   :  { %7749 = vmatmul.mubr.bf16.vlgmr.msra.gmra.mxu1 %v7329_v34  ;;  %7790 = vmatmul.mubr.bf16.vlgmr.msra.gmra.mxu0 %v7329_v34 }
 0xcce   :  { %11670 = vmatpush3.bf16.msra.mxu1 %v12888_v49  ;;  %11692 = vmatpush3.bf16.msra.mxu0 %v12889_v31 }
 0xccf   :  { %11671 = vmatprep.subr.bf16.mxu1 %v12890_v45  ;;  %11693 = vmatprep.subr.bf16.mxu0 %v12891_v36 }
 0xcd2   :  { %11672 = vmatpush3.bf16.msra.mxu1 %v12892_v43  ;;  %11694 = vmatpush3.bf16.msra.mxu0 %v12893_v10  ;;  %v11493_v43 = vcombine.high %v8214_v32, %v8218_v47  ;;  %v8205_v10 = vld [vmem:[%s21251_s7 + $0x140] sm:$0xff] }
 0xcd3   :  { %11673 = vmatprep.subr.bf16.mxu1 %v12894_v42  ;;  %11695 = vmatprep.subr.bf16.mxu0 %v12895_v56  ;;  %v8209_v42 = vld [vmem:[%s21251_s7 + $0x160] sm:$0xff]  ;;  %v8206_v56 = vld [vmem:[%s21251_s7 + $0x148] sm:$0xff] }
 0xcd6   :  { %11674 = vmatpush3.bf16.msra.mxu1 %v12896_v12  ;;  %11696 = vmatpush3.bf16.msra.mxu0 %v12897_v54  ;;  %v8210_v12 = vld [vmem:[%s21251_s7 + $0x168] sm:$0xff] }
 0xcd7   :  { %11675 = vmatprep.subr.bf16.mxu1 %v12898_v41  ;;  %11697 = vmatprep.subr.bf16.mxu0 %v12899_v46  ;;  %v11492_v41 = vcombine.low %v8214_v32, %v8218_v47  ;;  %v11483_v46 = vcombine.high %v8205_v10, %v8209_v42  ;;  %v8228_v47 = vld [vmem:[%s21251_s7 + $0x1f8] sm:$0xff] }
 0xcda   :  { %11676 = vmatpush3.bf16.msra.mxu1 %v12900_v60  ;;  %11698 = vmatpush3.bf16.msra.mxu0 %v12901_v62  ;;  %v11485_v60 = vcombine.high %v8206_v56, %v8210_v12  ;;  %v8197_v62 = vld [vmem:[%s21251_s7 + $0x100] sm:$0xff] }
 0xcdb   :  { %11677 = vmatprep.subr.bf16.mxu1 %v12902_v63  ;;  %11699 = vmatprep.subr.bf16.mxu0 %v12903_v0  ;;  %v8201_v63 = vld [vmem:[%s21251_s7 + $0x120] sm:$0xff]  ;;  %v8198_v0 = vld [vmem:[%s21251_s7 + $0x108] sm:$0xff] }
 0xcde   :  { %11678 = vmatpush3.bf16.msra.mxu1 %v12904_v1  ;;  %11700 = vmatpush3.bf16.msra.mxu0 %v12905_v2  ;;  %v8202_v1 = vld [vmem:[%s21251_s7 + $0x128] sm:$0xff]  ;;  %v11482_v2 = vcombine.low %v8205_v10, %v8209_v42 }
 0xcdf   :  { %11679 = vmatprep.subr.bf16.mxu1 %v12906_v48  ;;  %11701 = vmatprep.subr.bf16.mxu0 %v12907_v3  ;;  %v11484_v48 = vcombine.low %v8206_v56, %v8210_v12  ;;  %v11475_v3 = vcombine.high %v8197_v62, %v8201_v63 }
 0xce2   :  { %11680 = vmatpush3.bf16.msra.mxu1 %v12908_v4  ;;  %11702 = vmatpush3.bf16.msra.mxu0 %v12909_v6  ;;  %v11477_v4 = vcombine.high %v8198_v0, %v8202_v1  ;;  %v8189_v6 = vld [vmem:[%s21251_s7 + $0xc0] sm:$0xff] }
 0xce3   :  { %11681 = vmatprep.subr.bf16.mxu1 %v12910_v7  ;;  %11703 = vmatprep.subr.bf16.mxu0 %v12911_v8  ;;  %v8193_v7 = vld [vmem:[%s21251_s7 + $0xe0] sm:$0xff]  ;;  %v8190_v8 = vld [vmem:[%s21251_s7 + $0xc8] sm:$0xff] }
 0xce6   :  { %11682 = vmatpush3.bf16.msra.mxu1 %v12912_v22  ;;  %11704 = vmatpush3.bf16.msra.mxu0 %v12913_v29  ;;  %v8194_v22 = vld [vmem:[%s21251_s7 + $0xe8] sm:$0xff]  ;;  %v11474_v29 = vcombine.low %v8197_v62, %v8201_v63  ;;  %v8215_v62 = vld [vmem:[%s21251_s7 + $0x190] sm:$0xff] }
 0xce7   :  { %11683 = vmatprep.subr.bf16.mxu1 %v12914_v26  ;;  %11705 = vmatprep.subr.bf16.mxu0 %v12915_v27  ;;  %v11476_v26 = vcombine.low %v8198_v0, %v8202_v1  ;;  %v11467_v27 = vcombine.high %v8189_v6, %v8193_v7  ;;  %v11468_v28 = vcombine.low %v8190_v8, %v8194_v22  ;;  %v8219_v0 = vld [vmem:[%s21251_s7 + $0x1b0] sm:$0xff]  ;;  %v8216_v1 = vld [vmem:[%s21251_s7 + $0x198] sm:$0xff] }
 0xcea   :  { %11684 = vmatpush3.bf16.msra.mxu1 %v12916_v5  ;;  %11706 = vmatpush3.bf16.msra.mxu0 %v12917_v24  ;;  %v11469_v5 = vcombine.high %v8190_v8, %v8194_v22  ;;  %v11466_v24 = vcombine.low %v8189_v6, %v8193_v7  ;;  %v8207_v7 = vld [vmem:[%s21251_s7 + $0x150] sm:$0xff]  ;;  %v8208_v22 = vld [vmem:[%s21251_s7 + $0x158] sm:$0xff] }
 0xceb   :  { %8591 = vmatprep.subr.bf16.mxu1 %v11499_v20  ;;  %8632 = vmatprep.subr.bf16.mxu0 %v11501_v38  ;;  %v11459_v20 = vcombine.high %v8181_v21, %v8185_v25  ;;  %v8211_v8 = vld [vmem:[%s21251_s7 + $0x170] sm:$0xff] }
 0xd8d   :  { %v7750_v61 = vpop.f32.mrf.mxu1  ;;  %v7791_v55 = vpop.f32.mrf.mxu0 }
 0xd8e   :  { %v7798_v14 = vadd.f32 %v7750_v61, %v20263_v50  ;;  %v7800_v59 = vadd.f32 %v7791_v55, %v20266_v23  ;;  %v8213_v23 = vld [vmem:[%s21251_s7 + $0x180] sm:$0xff] }
 0xd8f   :  { %v7752_v58 = vpop.f32.mrf.mxu1  ;;  %v7793_v15 = vpop.f32.mrf.mxu0  ;;  %v8173_v55 = vld [vmem:[%s21251_s7 + $0x40] sm:$0xff] }
 0xd90   :  { %v7806_v51 = vmul.f32 0.1, %v7798_v14  ;;  %vm7802_vm2 = vcmp.ge.f32.partialorder %v7798_v14, 0.0  ;;  %v7808_v18 = vmul.f32 0.1, %v7800_v59  ;;  %v7799_v30 = vadd.f32 %v7752_v58, %v20281_v37  ;;  %v8217_v37 = vld [vmem:[%s21251_s7 + $0x1a0] sm:$0xff] }
 0xd91   :  { %v7801_v53 = vadd.f32 %v7793_v15, %v20284_v39  ;;  %v7754_v52 = vpop.f32.mrf.mxu1  ;;  %v7795_v40 = vpop.f32.mrf.mxu0  ;;  %vm7804_vm3 = vcmp.ge.f32.partialorder %v7800_v59, 0.0  ;;  %v11491_v45 = vcombine.high %v8213_v23, %v8217_v37  ;;  %v11490_v54 = vcombine.low %v8213_v23, %v8217_v37  ;;  %v8178_v15 = vld [vmem:[%s21251_s7 + $0x68] sm:$0xff]  ;;  %v8223_v23 = vld [vmem:[%s21251_s7 + $0x1d0] sm:$0xff] }
 0xd92   :  { %vm7803_vm4 = vcmp.ge.f32.partialorder %v7799_v30, 0.0  ;;  %v7807_v44 = vmul.f32 0.1, %v7799_v30  ;;  %v7810_v17 = vsel %vm7802_vm2, %v7798_v14, %v7806_v51  ;;  %v7812_v11 = vsel %vm7804_vm3, %v7800_v59, %v7808_v18  ;;  %v8177_v14 = vld [vmem:[%s21251_s7 + $0x60] sm:$0xff]  ;;  %v8174_v59 = vld [vmem:[%s21251_s7 + $0x48] sm:$0xff]  ;;  %v8227_v37 = vld [vmem:[%s21251_s7 + $0x1f0] sm:$0xff] }
 0xd93   :  { %v7755_v19 = vpop.f32.mrf.mxu1  ;;  %v7796_v16 = vpop.f32.mrf.mxu0  ;;  %vm7805_vm5 = vcmp.ge.f32.partialorder %v7801_v53, 0.0  ;;  %v7809_v50 = vmul.f32 0.1, %v7801_v53  ;;  %v7814_v31 = vpack.c.bf16 %v7810_v17, %v7810_v17  ;;  %v7816_v36 = vpack.c.bf16 %v7812_v11, %v7812_v11  ;;  %v8169_v52 = vld [vmem:[%s21251_s7 + $0x20] sm:$0xff]  ;;  %v8166_v40 = vld [vmem:[%s21251_s7 + $0x8] sm:$0xff]  ;;  %v8224_v11 = vld [vmem:[%s21251_s7 + $0x1d8] sm:$0xff] }
 0xd94   :  { %v7811_v39 = vsel %vm7803_vm4, %v7799_v30, %v7807_v44  ;;  %v11451_v58 = vcombine.high %v8173_v55, %v8177_v14  ;;  %v11450_v51 = vcombine.low %v8173_v55, %v8177_v14  ;;  %v11452_v18 = vcombine.low %v8174_v59, %v8178_v15  ;;  %v8170_v19 = vld [vmem:[%s21251_s7 + $0x28] sm:$0xff]  ;;  %v8195_v55 = vld [vmem:[%s21251_s7 + $0xf0] sm:$0xff]  ;;  %v8196_v14 = vld [vmem:[%s21251_s7 + $0xf8] sm:$0xff] }
 0xd95   :  { %v7815_v57 = vpack.c.bf16 %v7811_v39, %v7811_v39  ;;  %v7813_v49 = vsel %vm7805_vm5, %v7801_v53, %v7809_v50  ;;  %v11453_v30 = vcombine.high %v8174_v59, %v8178_v15  ;;  %v8165_v53 = vld [vmem:[%s21251_s7] sm:$0xff]  ;;  %v11444_v17 = vcombine.low %v8166_v40, %v8170_v19 }
 0xd96   :  { %v7817_v34 = vpack.c.bf16 %v7813_v49, %v7813_v49  ;;  %v11443_v44 = vcombine.high %v8165_v53, %v8169_v52  ;;  %v11442_v16 = vcombine.low %v8165_v53, %v8169_v52  ;;  %v11445_v50 = vcombine.high %v8166_v40, %v8170_v19  ;;  %v8184_v53 = vld [vmem:[%s21251_s7 + $0x98] sm:$0xff] }
 0xd97   :  { %8113 = vmatprep.mubr.bf16.mxu1 %v7815_v57  ;;  %v11502_v39 = vcombine.low %v8223_v23, %v8227_v37  ;;  %v11503_v32 = vcombine.high %v8223_v23, %v8227_v37  ;;  %v11504_v57 = vcombine.low %v8224_v11, %v8228_v47  ;;  %v11505_v49 = vcombine.high %v8224_v11, %v8228_v47  ;;  %v8188_v52 = vld [vmem:[%s21251_s7 + $0xb8] sm:$0xff] }
 0xd98   :  { %8153 = vmatprep.mubr.bf16.mxu0 %v7817_v34  ;;  %8114 = vmatmul.mubr.bf16.vlgmr.msra.gmra.mxu1 %v7814_v31  ;;  %v8176_v23 = vld [vmem:[%s21251_s7 + $0x58] sm:$0xff] }
 0xd99   :  { %8154 = vmatmul.mubr.bf16.vlgmr.msra.gmra.mxu0 %v7816_v36  ;;  %8592 = vmatpush1.bf16.msra.mxu1 %v11498_v13  ;;  %v8182_v13 = vld [vmem:[%s21251_s7 + $0x88] sm:$0xff]  ;;  %v8180_v37 = vld [vmem:[%s21251_s7 + $0x78] sm:$0xff] }
 0xd9a   :  { %8633 = vmatpush1.bf16.msra.mxu0 %v11500_v35  ;;  %8593 = vmatprep.subr.bf16.mxu1 %v11491_v45  ;;  %v11458_v35 = vcombine.low %v8181_v21, %v8185_v25  ;;  %v11460_v38 = vcombine.low %v8182_v13, %v8186_v33  ;;  %v11461_v61 = vcombine.high %v8182_v13, %v8186_v33  ;;  %v11409_v45 = vld [vmem:[%s21253_s6] ss:$0 sm:$0xff]  ;;  %v8203_v21 = vld [vmem:[%s21251_s7 + $0x130] sm:$0xff]  ;;  %v8200_v25 = vld [vmem:[%s21251_s7 + $0x118] sm:$0xff] }
 0xd9b   :  { %8634 = vmatprep.subr.bf16.mxu0 %v11493_v43  ;;  %8623 = vmatprep.mubr.bf16.mxu1 %v22549_v9  ;;  %v8204_v13 = vld [vmem:[%s21251_s7 + $0x138] sm:$0xff]  ;;  %v11457_v47 = vcombine.high %v8176_v23, %v8180_v37 }
 0xd9c   :  { %8664 = vmatprep.mubr.bf16.mxu0 %v22549_v9 }
 0xd9d   :  { %8594 = vmatpush1.bf16.msra.mxu1 %v11490_v54 }
 0xd9e   :  { %8635 = vmatpush1.bf16.msra.mxu0 %v11492_v41  ;;  %8595 = vmatprep.subr.bf16.mxu1 %v11483_v46 }
 0xd9f   :  { %8636 = vmatprep.subr.bf16.mxu0 %v11485_v60 }
 0xda1   :  { %8596 = vmatpush1.bf16.msra.mxu1 %v11482_v2  ;;  %v8220_v2 = vld [vmem:[%s21251_s7 + $0x1b8] sm:$0xff] }
 0xda2   :  { %8637 = vmatpush1.bf16.msra.mxu0 %v11484_v48  ;;  %8597 = vmatprep.subr.bf16.mxu1 %v11475_v3  ;;  %v11497_v6 = vcombine.high %v8216_v1, %v8220_v2 }
 0xda3   :  { %8638 = vmatprep.subr.bf16.mxu0 %v11477_v4  ;;  %v11495_v4 = vcombine.high %v8215_v62, %v8219_v0 }
 0xda5   :  { %8598 = vmatpush1.bf16.msra.mxu1 %v11474_v29  ;;  %v8212_v29 = vld [vmem:[%s21251_s7 + $0x178] sm:$0xff] }
 0xda6   :  { %8639 = vmatpush1.bf16.msra.mxu0 %v11476_v26  ;;  %8599 = vmatprep.subr.bf16.mxu1 %v11467_v27  ;;  %v11494_v26 = vcombine.low %v8215_v62, %v8219_v0  ;;  %v11496_v27 = vcombine.low %v8216_v1, %v8220_v2  ;;  %v11488_v33 = vcombine.low %v8208_v22, %v8212_v29  ;;  %v12929_v62 = vld [vmem:[%s21252_s9 + $0x164] ss:$8 sps:$4 sm:$0xff]   ;;  %v12927_v0 = vld [vmem:[%s21252_s9 + $0x160] ss:$8 sps:$4 sm:$0xff]   ;;  %v12932_v1 = vld [vmem:[%s21252_s9 + $0x54] ss:$8 sps:$4 sm:$0xff]  }
 0xda7   :  { %8640 = vmatprep.subr.bf16.mxu0 %v11469_v5  ;;  %v11487_v5 = vcombine.high %v8207_v7, %v8211_v8  ;;  %v12935_v2 = vld [vmem:[%s21252_s9 + $0x154] ss:$8 sps:$4 sm:$0xff]  }
 0xda9   :  { %8600 = vmatpush1.bf16.msra.mxu1 %v11466_v24  ;;  %v11489_v24 = vcombine.high %v8208_v22, %v8212_v29  ;;  %v12944_v22 = vld [vmem:[%s21252_s9 + $0x34] ss:$8 sps:$4 sm:$0xff]  }
 0xdaa   :  { %8641 = vmatpush1.bf16.msra.mxu0 %v11468_v28  ;;  %8601 = vmatprep.subr.bf16.mxu1 %v11459_v20  ;;  %v8199_v28 = vld [vmem:[%s21251_s7 + $0x110] sm:$0xff]  ;;  %v11486_v20 = vcombine.low %v8207_v7, %v8211_v8  ;;  %v12936_v7 = vld [vmem:[%s21252_s9 + $0x40] ss:$8 sps:$4 sm:$0xff]  }
 0xdab   :  { %8642 = vmatprep.subr.bf16.mxu0 %v11461_v61  ;;  %v8191_v61 = vld [vmem:[%s21251_s7 + $0xd0] sm:$0xff]  ;;  %v11478_v59 = vcombine.low %v8199_v28, %v8203_v21  ;;  %v12939_v8 = vld [vmem:[%s21252_s9 + $0x140] ss:$8 sps:$4 sm:$0xff]  }
 0xdac   :  { %v11471_v15 = vcombine.high %v8191_v61, %v8195_v55  ;;  %v11470_v40 = vcombine.low %v8191_v61, %v8195_v55  ;;  %v12947_v29 = vld [vmem:[%s21252_s9 + $0x134] ss:$8 sps:$4 sm:$0xff]   ;;  %v12960_v61 = vld [vmem:[%s21252_s9] ss:$8 sps:$4 sm:$0xff]  }
 0xdad   :  { %8602 = vmatpush1.bf16.msra.mxu1 %v11458_v35  ;;  %v11479_v35 = vcombine.high %v8199_v28, %v8203_v21  ;;  %v12948_v28 = vld [vmem:[%s21252_s9 + $0x20] ss:$8 sps:$4 sm:$0xff]  }
 0xdae   :  { %8643 = vmatpush1.bf16.msra.mxu0 %v11460_v38  ;;  %8603 = vmatprep.subr.bf16.mxu1 %v11451_v58  ;;  %v11481_v38 = vcombine.high %v8200_v25, %v8204_v13  ;;  %v11480_v58 = vcombine.low %v8200_v25, %v8204_v13  ;;  %v12951_v21 = vld [vmem:[%s21252_s9 + $0x120] ss:$8 sps:$4 sm:$0xff]   ;;  %v12956_v25 = vld [vmem:[%s21252_s9 + $0x14] ss:$8 sps:$4 sm:$0xff]  }
 0xdaf   :  { %8644 = vmatprep.subr.bf16.mxu0 %v11453_v30  ;;  %v8187_v30 = vld [vmem:[%s21251_s7 + $0xb0] sm:$0xff]  ;;  %v12963_v55 = vld [vmem:[%s21252_s9 + $0x100] ss:$8 sps:$4 sm:$0xff]  }
 0xdb0   :  { %v12959_v13 = vld [vmem:[%s21252_s9 + $0x114] ss:$8 sps:$4 sm:$0xff]  }
 0xdb1   :  { %8604 = vmatpush1.bf16.msra.mxu1 %v11450_v51 }
 0xdb2   :  { %8645 = vmatpush1.bf16.msra.mxu0 %v11452_v18  ;;  %8605 = vmatprep.subr.bf16.mxu1 %v11443_v44  ;;  %v8183_v18 = vld [vmem:[%s21251_s7 + $0x90] sm:$0xff] }
 0xdb3   :  { %8646 = vmatprep.subr.bf16.mxu0 %v11445_v50  ;;  %v11463_v19 = vcombine.high %v8183_v18, %v8187_v30  ;;  %v8179_v50 = vld [vmem:[%s21251_s7 + $0x70] sm:$0xff]  ;;  %v11462_v11 = vcombine.low %v8183_v18, %v8187_v30  ;;  %v12972_v18 = vld [vmem:[%s21252_s9 + $0xe0] ss:$8 sps:$4 sm:$0xff]  }
 0xdb4   :  { %v12975_v30 = vld [vmem:[%s21252_s9 + $0x1e0] ss:$8 sps:$4 sm:$0xff]  }
 0xdb5   :  { %8606 = vmatpush1.bf16.msra.mxu1 %v11442_v16  ;;  %v11465_v16 = vcombine.high %v8184_v53, %v8188_v52 }
 0xdb6   :  { %8647 = vmatpush1.bf16.msra.mxu0 %v11444_v17  ;;  %8673 = vmatprep.subr.bf16.mxu1 %v11503_v32  ;;  %v8175_v17 = vld [vmem:[%s21251_s7 + $0x50] sm:$0xff] }
 0xdb7   :  { %8714 = vmatprep.subr.bf16.mxu0 %v11505_v49  ;;  %v11455_v32 = vcombine.high %v8175_v17, %v8179_v50  ;;  %v8171_v49 = vld [vmem:[%s21251_s7 + $0x30] sm:$0xff] }
 0xe58   :  { %v11685_v31 = vpop.f32.mrf.mxu1 }
 0xe59   :  { %v11707_v34 = vpop.f32.mrf.mxu0 }
 0xe5a   :  { %v11686_v36 = vpop.f32.mrf.mxu1 }
 0xe5b   :  { %v11687_v43 = vadd.f32 %v11686_v36, %v11685_v31  ;;  %v11708_v10 = vpop.f32.mrf.mxu0  ;;  %v8168_v31 = vld [vmem:[%s21251_s7 + $0x18] sm:$0xff]  ;;  %v11456_v36 = vcombine.low %v8176_v23, %v8180_v37 }
 0xe5c   :  { %v11688_v42 = vpop.f32.mrf.mxu1  ;;  %v11709_v12 = vadd.f32 %v11708_v10, %v11707_v34  ;;  %v8172_v34 = vld [vmem:[%s21251_s7 + $0x38] sm:$0xff] }
 0xe5d   :  { %v8116_v56 = vadd.f32 %v11687_v43, %v11409_v45  ;;  %v11710_v54 = vpop.f32.mrf.mxu0  ;;  %v11454_v45 = vcombine.low %v8175_v17, %v8179_v50  ;;  %v11449_v10 = vcombine.high %v8168_v31, %v8172_v34  ;;  %v12984_v17 = vld [vmem:[%s21252_s9 + $0xc0] ss:$8 sps:$4 sm:$0xff]   ;;  %v12992_v23 = vld [vmem:[%s21252_s9 + $0xb4] ss:$8 sps:$4 sm:$0xff]  }
 0xe5e   :  { %v11689_v41 = vpop.f32.mrf.mxu1  ;;  %v12923_v54 = vld [vmem:[%s21252_s9 + $0x174] ss:$8 sps:$4 sm:$0xff]   ;;  %v12987_v50 = vld [vmem:[%s21252_s9 + $0x1c0] ss:$8 sps:$4 sm:$0xff]  }
 0xe5f   :  { %v8156_v46 = vadd.f32 %v11709_v12, %v8116_v56  ;;  %v11711_v60 = vpop.f32.mrf.mxu0  ;;  %v11448_v56 = vcombine.low %v8168_v31, %v8172_v34  ;;  %v12920_v12 = vld [vmem:[%s21252_s9 + $0x74] ss:$8 sps:$4 sm:$0xff]   ;;  %v12918_v41 = vld [vmem:[%s21252_s9 + $0x70] ss:$8 sps:$4 sm:$0xff]  }
 0xe60   :  { %v12926_v60 = vld [vmem:[%s21252_s9 + $0x64] ss:$8 sps:$4 sm:$0xff]   ;;  %v12995_v37 = vld [vmem:[%s21252_s9 + $0x1b4] ss:$8 sps:$4 sm:$0xff]  }
 0xe61   :  { %vm8161_vm6 = vcmp.ge.f32.partialorder %v8156_v46, 0.0  ;;  %v8162_v63 = vmul.f32 0.1, %v8156_v46  ;;  %v13004_v31 = vld [vmem:[%s21252_s9 + $0x94] ss:$8 sps:$4 sm:$0xff]  }
 0xe62   :  { %v13007_v34 = vld [vmem:[%s21252_s9 + $0x194] ss:$8 sps:$4 sm:$0xff]  }
 0xe63   :  { %v8163_v48 = vsel %vm8161_vm6, %v8156_v46, %v8162_v63  ;;  %v12921_v46 = vld [vmem:[%s21252_s9 + $0x170] ss:$8 sps:$4 sm:$0xff]   ;;  %v12924_v63 = vld [vmem:[%s21252_s9 + $0x60] ss:$8 sps:$4 sm:$0xff]  }
 0xe64   :  { %v20621_v3 = vpack.c.bf16 %v8163_v48, %v8163_v48  ;;  %v12930_v48 = vld [vmem:[%s21252_s9 + $0x50] ss:$8 sps:$4 sm:$0xff]  }
 0xe66   :  { %8624 = vmatmul.mubr.bf16.vlgmr.msra.gmra.mxu1 %v20621_v3  ;;  %8665 = vmatmul.mubr.bf16.vlgmr.msra.gmra.mxu0 %v20621_v3 }
 0xe67   :  { %8674 = vmatpush1.bf16.msra.mxu1 %v11502_v39  ;;  %8715 = vmatpush1.bf16.msra.mxu0 %v11504_v57  ;;  %v11464_v39 = vcombine.low %v8184_v53, %v8188_v52  ;;  %v8167_v57 = vld [vmem:[%s21251_s7 + $0x10] sm:$0xff] }
 0xe68   :  { %8675 = vmatprep.subr.bf16.mxu1 %v11495_v4  ;;  %8716 = vmatprep.subr.bf16.mxu0 %v11497_v6  ;;  %v11447_v43 = vcombine.high %v8167_v57, %v8171_v49  ;;  %v11446_v42 = vcombine.low %v8167_v57, %v8171_v49  ;;  %v12938_v4 = vld [vmem:[%s21252_s9 + $0x44] ss:$8 sps:$4 sm:$0xff]   ;;  %v12980_v53 = vld [vmem:[%s21252_s9 + $0xd4] ss:$8 sps:$4 sm:$0xff]   ;;  %v12996_v57 = vld [vmem:[%s21252_s9 + $0xa0] ss:$8 sps:$4 sm:$0xff]  }
 0xe69   :  { %8705 = vmatprep.mubr.bf16.mxu1 %v22549_v9  ;;  %8746 = vmatprep.mubr.bf16.mxu0 %v22549_v9  ;;  %v8192_v9 = vld [vmem:[%s21251_s7 + $0xd8] sm:$0xff]  ;;  %v12941_v6 = vld [vmem:[%s21252_s9 + $0x144] ss:$8 sps:$4 sm:$0xff]   ;;  %v12999_v49 = vld [vmem:[%s21252_s9 + $0x1a0] ss:$8 sps:$4 sm:$0xff]  }
 0xe6a   :  { %v11473_v51 = vcombine.high %v8192_v9, %v8196_v14  ;;  %v11472_v44 = vcombine.low %v8192_v9, %v8196_v14  ;;  %v12968_v9 = vld [vmem:[%s21252_s9 + $0xf4] ss:$8 sps:$4 sm:$0xff]  }
 0xe6b   :  { %8676 = vmatpush1.bf16.msra.mxu1 %v11494_v26  ;;  %8717 = vmatpush1.bf16.msra.mxu0 %v11496_v27  ;;  %v12942_v26 = vld [vmem:[%s21252_s9 + $0x30] ss:$8 sps:$4 sm:$0xff]   ;;  %v12971_v14 = vld [vmem:[%s21252_s9 + $0x1f4] ss:$8 sps:$4 sm:$0xff]  }
 0xe6c   :  { %8677 = vmatprep.subr.bf16.mxu1 %v11487_v5  ;;  %8718 = vmatprep.subr.bf16.mxu0 %v11489_v24  ;;  %v12945_v27 = vld [vmem:[%s21252_s9 + $0x130] ss:$8 sps:$4 sm:$0xff]   ;;  %v12950_v5 = vld [vmem:[%s21252_s9 + $0x24] ss:$8 sps:$4 sm:$0xff]   ;;  %v12983_v52 = vld [vmem:[%s21252_s9 + $0x1d4] ss:$8 sps:$4 sm:$0xff]  }
 0xe6d   :  { %v12953_v24 = vld [vmem:[%s21252_s9 + $0x124] ss:$8 sps:$4 sm:$0xff]  }
 0xe6f   :  { %8678 = vmatpush1.bf16.msra.mxu1 %v11486_v20  ;;  %8719 = vmatpush1.bf16.msra.mxu0 %v11488_v33  ;;  %v12954_v20 = vld [vmem:[%s21252_s9 + $0x10] ss:$8 sps:$4 sm:$0xff]  }
 0xe70   :  { %8679 = vmatprep.subr.bf16.mxu1 %v11479_v35  ;;  %8720 = vmatprep.subr.bf16.mxu0 %v11481_v38  ;;  %v12957_v33 = vld [vmem:[%s21252_s9 + $0x110] ss:$8 sps:$4 sm:$0xff]   ;;  %v12962_v35 = vld [vmem:[%s21252_s9 + $0x4] ss:$8 sps:$4 sm:$0xff]  }
 0xe71   :  { %v12965_v38 = vld [vmem:[%s21252_s9 + $0x104] ss:$8 sps:$4 sm:$0xff]  }
 0xe73   :  { %8680 = vmatpush1.bf16.msra.mxu1 %v11478_v59  ;;  %8721 = vmatpush1.bf16.msra.mxu0 %v11480_v58  ;;  %v12966_v59 = vld [vmem:[%s21252_s9 + $0xf0] ss:$8 sps:$4 sm:$0xff]  }
 0xe74   :  { %8681 = vmatprep.subr.bf16.mxu1 %v11471_v15  ;;  %8722 = vmatprep.subr.bf16.mxu0 %v11473_v51  ;;  %v12969_v58 = vld [vmem:[%s21252_s9 + $0x1f0] ss:$8 sps:$4 sm:$0xff]   ;;  %v12974_v15 = vld [vmem:[%s21252_s9 + $0xe4] ss:$8 sps:$4 sm:$0xff]  }
 0xe75   :  { %v12977_v51 = vld [vmem:[%s21252_s9 + $0x1e4] ss:$8 sps:$4 sm:$0xff]  }
 0xe77   :  { %8682 = vmatpush1.bf16.msra.mxu1 %v11470_v40  ;;  %8723 = vmatpush1.bf16.msra.mxu0 %v11472_v44  ;;  %v12978_v40 = vld [vmem:[%s21252_s9 + $0xd0] ss:$8 sps:$4 sm:$0xff]  }
 0xe78   :  { %8683 = vmatprep.subr.bf16.mxu1 %v11463_v19  ;;  %8724 = vmatprep.subr.bf16.mxu0 %v11465_v16  ;;  %v12981_v44 = vld [vmem:[%s21252_s9 + $0x1d0] ss:$8 sps:$4 sm:$0xff]   ;;  %v12986_v19 = vld [vmem:[%s21252_s9 + $0xc4] ss:$8 sps:$4 sm:$0xff]  }
 0xe79   :  { %v12989_v16 = vld [vmem:[%s21252_s9 + $0x1c4] ss:$8 sps:$4 sm:$0xff]  }
 0xe7b   :  { %8684 = vmatpush1.bf16.msra.mxu1 %v11462_v11  ;;  %8725 = vmatpush1.bf16.msra.mxu0 %v11464_v39  ;;  %v12990_v11 = vld [vmem:[%s21252_s9 + $0xb0] ss:$8 sps:$4 sm:$0xff]  }
 0xe7c   :  { %8685 = vmatprep.subr.bf16.mxu1 %v11455_v32  ;;  %8726 = vmatprep.subr.bf16.mxu0 %v11457_v47  ;;  %v12993_v39 = vld [vmem:[%s21252_s9 + $0x1b0] ss:$8 sps:$4 sm:$0xff]   ;;  %v12998_v32 = vld [vmem:[%s21252_s9 + $0xa4] ss:$8 sps:$4 sm:$0xff]  }
 0xe7d   :  { %v13001_v47 = vld [vmem:[%s21252_s9 + $0x1a4] ss:$8 sps:$4 sm:$0xff]  }
 0xe7f   :  { %8686 = vmatpush1.bf16.msra.mxu1 %v11454_v45  ;;  %8727 = vmatpush1.bf16.msra.mxu0 %v11456_v36  ;;  %v13002_v45 = vld [vmem:[%s21252_s9 + $0x90] ss:$8 sps:$4 sm:$0xff]  }
 0xe80   :  { %8687 = vmatprep.subr.bf16.mxu1 %v11447_v43  ;;  %8728 = vmatprep.subr.bf16.mxu0 %v11449_v10  ;;  %v13005_v36 = vld [vmem:[%s21252_s9 + $0x190] ss:$8 sps:$4 sm:$0xff]   ;;  %v13010_v43 = vld [vmem:[%s21252_s9 + $0x84] ss:$8 sps:$4 sm:$0xff]  }
 0xe81   :  { %v13013_v10 = vld [vmem:[%s21252_s9 + $0x184] ss:$8 sps:$4 sm:$0xff]  }
 0xe83   :  { %8688 = vmatpush1.bf16.msra.mxu1 %v11446_v42  ;;  %8729 = vmatpush1.bf16.msra.mxu0 %v11448_v56  ;;  %v13008_v42 = vld [vmem:[%s21252_s9 + $0x80] ss:$8 sps:$4 sm:$0xff]  }
 0xe84   :  { %9567 = vmatprep.subr.bf16.mxu1 %v12920_v12  ;;  %9608 = vmatprep.subr.bf16.mxu0 %v12923_v54  ;;  %v13011_v56 = vld [vmem:[%s21252_s9 + $0x180] ss:$8 sps:$4 sm:$0xff]   ;;  %v13016_v12 = vld [vmem:[%s21252_s9 + $0x274] ss:$8 sps:$4 sm:$0xff]  }
 0xe85   :  { %v13019_v54 = vld [vmem:[%s21252_s9 + $0x374] ss:$8 sps:$4 sm:$0xff]  }
 0xe86   :  { %8706 = vmatmul.mubr.bf16.vlgmr.msra.gmra.mxu1 %v20621_v3  ;;  %8747 = vmatmul.mubr.bf16.vlgmr.msra.gmra.mxu0 %v20621_v3  ;;  %v12933_v3 = vld [vmem:[%s21252_s9 + $0x150] ss:$8 sps:$4 sm:$0xff]  }
 0xe87   :  { %9568 = vmatpush1.bf16.msra.mxu1 %v12918_v41  ;;  %9609 = vmatpush1.bf16.msra.mxu0 %v12921_v46  ;;  %v20902_v41 = vld [vmem:[%s21254_s8] sm:$0xff]  ;;  %v22568_v46 = vld [vmem:[#allocation3_spill] sm:$0xff] }
 0xe88   :  { %9569 = vmatprep.subr.bf16.mxu1 %v12926_v60  ;;  %9610 = vmatprep.subr.bf16.mxu0 %v12929_v62  ;;  %v8234_v60 = vrot.slane %v20902_v41, %v22568_v46  ;;  %v22569_v62 = vld [vmem:[#allocation2_spill] sm:$0xff] }
 0xe8b   :  { %9570 = vmatpush1.bf16.msra.mxu1 %v12924_v63  ;;  %9611 = vmatpush1.bf16.msra.mxu0 %v12927_v0  ;;  %v22570_v63 = vsub.s32 2, %v22569_v62 }
 0xe8c   :  { %9571 = vmatprep.subr.bf16.mxu1 %v12932_v1  ;;  %9612 = vmatprep.subr.bf16.mxu0 %v12935_v2 }
 0xe8d   :  { %v8242_v0 = vrot.slane %v20902_v41, %v22570_v63 }
 0xe8f   :  { %9572 = vmatpush1.bf16.msra.mxu1 %v12930_v48  ;;  %9613 = vmatpush1.bf16.msra.mxu0 %v12933_v3  ;;  %v22571_v48 = vld [vmem:[#allocation4_spill] sm:$0xff] }
 0xe90   :  { %9573 = vmatprep.subr.bf16.mxu1 %v12938_v4  ;;  %9614 = vmatprep.subr.bf16.mxu0 %v12941_v6  ;;  %v8238_v3 = vrot.slane %v20902_v41, %v22571_v48  ;;  %v22572_v4 = vsub.s32 3, %v22569_v62 }
 0xe92   :  { %v8246_v6 = vrot.slane %v20902_v41, %v22572_v4 }
 0xe93   :  { %9574 = vmatpush1.bf16.msra.mxu1 %v12936_v7  ;;  %9615 = vmatpush1.bf16.msra.mxu0 %v12939_v8 }
 0xe94   :  { %9575 = vmatprep.subr.bf16.mxu1 %v12944_v22  ;;  %9616 = vmatprep.subr.bf16.mxu0 %v12947_v29 }
 0xe97   :  { %9576 = vmatpush1.bf16.msra.mxu1 %v12942_v26  ;;  %9617 = vmatpush1.bf16.msra.mxu0 %v12945_v27 }
 0xe98   :  { %9577 = vmatprep.subr.bf16.mxu1 %v12950_v5  ;;  %9618 = vmatprep.subr.bf16.mxu0 %v12953_v24 }
 0xe9b   :  { %9578 = vmatpush1.bf16.msra.mxu1 %v12948_v28  ;;  %9619 = vmatpush1.bf16.msra.mxu0 %v12951_v21 }
 0xe9c   :  { %9579 = vmatprep.subr.bf16.mxu1 %v12956_v25  ;;  %9620 = vmatprep.subr.bf16.mxu0 %v12959_v13 }
 0xe9f   :  { %9580 = vmatpush1.bf16.msra.mxu1 %v12954_v20  ;;  %9621 = vmatpush1.bf16.msra.mxu0 %v12957_v33 }
 0xea0   :  { %9581 = vmatprep.subr.bf16.mxu1 %v12962_v35  ;;  %9622 = vmatprep.subr.bf16.mxu0 %v12965_v38 }
 0xea3   :  { %9582 = vmatpush1.bf16.msra.mxu1 %v12960_v61  ;;  %9623 = vmatpush1.bf16.msra.mxu0 %v12963_v55 }
 0xea4   :  { %9583 = vmatprep.subr.bf16.mxu1 %v12968_v9  ;;  %9624 = vmatprep.subr.bf16.mxu0 %v12971_v14  ;;  %v13014_v14 = vld [vmem:[%s21252_s9 + $0x270] ss:$8 sps:$4 sm:$0xff]  }
 0xea7   :  { %9584 = vmatpush2.bf16.msra.mxu1 %v12966_v59  ;;  %9625 = vmatpush2.bf16.msra.mxu0 %v12969_v58 }
 0xea8   :  { %9585 = vmatprep.subr.bf16.mxu1 %v12974_v15  ;;  %9626 = vmatprep.subr.bf16.mxu0 %v12977_v51  ;;  %v13017_v15 = vld [vmem:[%s21252_s9 + $0x370] ss:$8 sps:$4 sm:$0xff]   ;;  %v13022_v51 = vld [vmem:[%s21252_s9 + $0x264] ss:$8 sps:$4 sm:$0xff]  }
 0xeab   :  { %9586 = vmatpush2.bf16.msra.mxu1 %v12972_v18  ;;  %9627 = vmatpush2.bf16.msra.mxu0 %v12975_v30  ;;  %v13025_v30 = vld [vmem:[%s21252_s9 + $0x364] ss:$8 sps:$4 sm:$0xff]  }
 0xeac   :  { %9587 = vmatprep.subr.bf16.mxu1 %v12980_v53  ;;  %9628 = vmatprep.subr.bf16.mxu0 %v12983_v52  ;;  %v13020_v53 = vld [vmem:[%s21252_s9 + $0x260] ss:$8 sps:$4 sm:$0xff]  }
 0xead   :  { %v13023_v52 = vld [vmem:[%s21252_s9 + $0x360] ss:$8 sps:$4 sm:$0xff]  }
 0xeaf   :  { %9588 = vmatpush2.bf16.msra.mxu1 %v12978_v40  ;;  %9629 = vmatpush2.bf16.msra.mxu0 %v12981_v44  ;;  %v13028_v40 = vld [vmem:[%s21252_s9 + $0x254] ss:$8 sps:$4 sm:$0xff]  }
 0xeb0   :  { %9589 = vmatprep.subr.bf16.mxu1 %v12986_v19  ;;  %9630 = vmatprep.subr.bf16.mxu0 %v12989_v16  ;;  %v13031_v44 = vld [vmem:[%s21252_s9 + $0x354] ss:$8 sps:$4 sm:$0xff]   ;;  %v13026_v19 = vld [vmem:[%s21252_s9 + $0x250] ss:$8 sps:$4 sm:$0xff]  }
 0xeb1   :  { %v13029_v16 = vld [vmem:[%s21252_s9 + $0x350] ss:$8 sps:$4 sm:$0xff]  }
 0xeb3   :  { %9590 = vmatpush2.bf16.msra.mxu1 %v12984_v17  ;;  %9631 = vmatpush2.bf16.msra.mxu0 %v12987_v50  ;;  %v13034_v17 = vld [vmem:[%s21252_s9 + $0x244] ss:$8 sps:$4 sm:$0xff]  }
 0xeb4   :  { %9591 = vmatprep.subr.bf16.mxu1 %v12992_v23  ;;  %9632 = vmatprep.subr.bf16.mxu0 %v12995_v37  ;;  %v13037_v50 = vld [vmem:[%s21252_s9 + $0x344] ss:$8 sps:$4 sm:$0xff]   ;;  %v13032_v23 = vld [vmem:[%s21252_s9 + $0x240] ss:$8 sps:$4 sm:$0xff]  }
 0xeb5   :  { %v13035_v37 = vld [vmem:[%s21252_s9 + $0x340] ss:$8 sps:$4 sm:$0xff]  }
 0xeb7   :  { %9592 = vmatpush2.bf16.msra.mxu1 %v12990_v11  ;;  %9633 = vmatpush2.bf16.msra.mxu0 %v12993_v39  ;;  %v13040_v11 = vld [vmem:[%s21252_s9 + $0x234] ss:$8 sps:$4 sm:$0xff]  }
 0xeb8   :  { %9593 = vmatprep.subr.bf16.mxu1 %v12998_v32  ;;  %9634 = vmatprep.subr.bf16.mxu0 %v13001_v47  ;;  %v13043_v39 = vld [vmem:[%s21252_s9 + $0x334] ss:$8 sps:$4 sm:$0xff]   ;;  %v13038_v32 = vld [vmem:[%s21252_s9 + $0x230] ss:$8 sps:$4 sm:$0xff]  }
 0xeb9   :  { %v13041_v47 = vld [vmem:[%s21252_s9 + $0x330] ss:$8 sps:$4 sm:$0xff]  }
 0xebb   :  { %9594 = vmatpush2.bf16.msra.mxu1 %v12996_v57  ;;  %9635 = vmatpush2.bf16.msra.mxu0 %v12999_v49  ;;  %v13046_v57 = vld [vmem:[%s21252_s9 + $0x224] ss:$8 sps:$4 sm:$0xff]  }
 0xebc   :  { %9595 = vmatprep.subr.bf16.mxu1 %v13004_v31  ;;  %9636 = vmatprep.subr.bf16.mxu0 %v13007_v34  ;;  %v13049_v49 = vld [vmem:[%s21252_s9 + $0x324] ss:$8 sps:$4 sm:$0xff]   ;;  %v8253_v31 = vsub.s32 5, %v22569_v62  ;;  %v8261_v34 = vsub.s32 7, %v22569_v62 }
 0xebf   :  { %9596 = vmatpush2.bf16.msra.mxu1 %v13002_v45  ;;  %9637 = vmatpush2.bf16.msra.mxu0 %v13005_v36  ;;  %v13044_v45 = vld [vmem:[%s21252_s9 + $0x220] ss:$8 sps:$4 sm:$0xff]  }
 0xec0   :  { %9597 = vmatprep.subr.bf16.mxu1 %v13010_v43  ;;  %9638 = vmatprep.subr.bf16.mxu0 %v13013_v10  ;;  %v13047_v36 = vld [vmem:[%s21252_s9 + $0x320] ss:$8 sps:$4 sm:$0xff]   ;;  %v13052_v43 = vld [vmem:[%s21252_s9 + $0x214] ss:$8 sps:$4 sm:$0xff]  }
 0xec1   :  { %v13055_v10 = vld [vmem:[%s21252_s9 + $0x314] ss:$8 sps:$4 sm:$0xff]  }
 0xec3   :  { %9598 = vmatpush2.bf16.msra.mxu1 %v13008_v42  ;;  %9639 = vmatpush2.bf16.msra.mxu0 %v13011_v56 }
 0xec4   :  { %9649 = vmatprep.subr.bf16.mxu1 %v13016_v12  ;;  %9690 = vmatprep.subr.bf16.mxu0 %v13019_v54  ;;  %v8254_v12 = vrot.slane %v20902_v41, %v8253_v31  ;;  %v8262_v54 = vrot.slane %v20902_v41, %v8261_v34  ;;  %v13098_v31 = vld [vmem:[%s21252_s9 + $0x290] ss:$8 sps:$4 sm:$0xff]  }
 0xec5   :  { %v13101_v34 = vld [vmem:[%s21252_s9 + $0x390] ss:$8 sps:$4 sm:$0xff]  }
 0xf26   :  { %v8625_v1 = vpop.f32.mrf.mxu1  ;;  %v8666_v2 = vpop.f32.mrf.mxu0 }
 0xf27   :  { %v8626_v7 = vadd.f32 %v8625_v1, %v8234_v60  ;;  %v8667_v8 = vadd.f32 %v8666_v2, %v8242_v0  ;;  %v13050_v60 = vld [vmem:[%s21252_s9 + $0x210] ss:$8 sps:$4 sm:$0xff]   ;;  %v13058_v2 = vld [vmem:[%s21252_s9 + $0x204] ss:$8 sps:$4 sm:$0xff]  }
 0xf28   :  { %v8627_v22 = vpop.f32.mrf.mxu1  ;;  %v8668_v29 = vpop.f32.mrf.mxu0  ;;  %v13053_v1 = vld [vmem:[%s21252_s9 + $0x310] ss:$8 sps:$4 sm:$0xff]  }
 0xf29   :  { %v8763_v26 = vmul.f32 0.2, %v8626_v7  ;;  %vm8755_vm7 = vcmp.ge.f32.partialorder %v8626_v7, 0.0  ;;  %v8765_v27 = vmul.f32 0.2, %v8667_v8  ;;  %v8628_v5 = vadd.f32 %v8627_v22, %v8238_v3 }
 0xf2a   :  { %v8669_v24 = vadd.f32 %v8668_v29, %v8246_v6  ;;  %v8629_v28 = vpop.f32.mrf.mxu1  ;;  %v8670_v21 = vpop.f32.mrf.mxu0  ;;  %vm8757_vm8 = vcmp.ge.f32.partialorder %v8667_v8, 0.0  ;;  %v13061_v3 = vld [vmem:[%s21252_s9 + $0x304] ss:$8 sps:$4 sm:$0xff]   ;;  %v13056_v22 = vld [vmem:[%s21252_s9 + $0x200] ss:$8 sps:$4 sm:$0xff]  }
 0xf2b   :  { %vm8756_vm9 = vcmp.ge.f32.partialorder %v8628_v5, 0.0  ;;  %v8764_v25 = vmul.f32 0.2, %v8628_v5  ;;  %v8771_v33 = vsel %vm8755_vm7, %v8626_v7, %v8763_v26  ;;  %v8773_v38 = vsel %vm8757_vm8, %v8667_v8, %v8765_v27  ;;  %v13059_v29 = vld [vmem:[%s21252_s9 + $0x300] ss:$8 sps:$4 sm:$0xff]  }
 0xf2c   :  { %v8630_v13 = vpop.f32.mrf.mxu1  ;;  %v8671_v20 = vpop.f32.mrf.mxu0  ;;  %vm8758_vm10 = vcmp.ge.f32.partialorder %v8669_v24, 0.0  ;;  %v8766_v35 = vmul.f32 0.2, %v8669_v24  ;;  %v8779_v59 = vpack.c.bf16 %v8771_v33, %v8771_v33  ;;  %v8781_v18 = vpack.c.bf16 %v8773_v38, %v8773_v38  ;;  %v13067_v21 = vld [vmem:[%s21252_s9 + $0x3f4] ss:$8 sps:$4 sm:$0xff]  }
 0xf2d   :  { %v8772_v61 = vsel %vm8756_vm9, %v8628_v5, %v8764_v25  ;;  %v13062_v33 = vld [vmem:[%s21252_s9 + $0x2f0] ss:$8 sps:$4 sm:$0xff]  }
 0xf2e   :  { %v8780_v55 = vpack.c.bf16 %v8772_v61, %v8772_v61  ;;  %v8774_v9 = vsel %vm8758_vm10, %v8669_v24, %v8766_v35  ;;  %v13064_v24 = vld [vmem:[%s21252_s9 + $0x2f4] ss:$8 sps:$4 sm:$0xff]   ;;  %v13065_v38 = vld [vmem:[%s21252_s9 + $0x3f0] ss:$8 sps:$4 sm:$0xff]   ;;  %v13070_v61 = vld [vmem:[%s21252_s9 + $0x2e4] ss:$8 sps:$4 sm:$0xff]  }
 0xf2f   :  { %v8782_v58 = vpack.c.bf16 %v8774_v9, %v8774_v9  ;;  %v13068_v9 = vld [vmem:[%s21252_s9 + $0x2e0] ss:$8 sps:$4 sm:$0xff]  }
 0xf30   :  { %9599 = vmatprep.mubr.bf16.mxu1 %v8780_v55  ;;  %v13073_v55 = vld [vmem:[%s21252_s9 + $0x3e4] ss:$8 sps:$4 sm:$0xff]  }
 0xf31   :  { %9640 = vmatprep.mubr.bf16.mxu0 %v8782_v58  ;;  %9600 = vmatmul.mubr.bf16.vlgmr.msra.gmra.mxu1 %v8779_v59  ;;  %v13076_v59 = vld [vmem:[%s21252_s9 + $0x2d4] ss:$8 sps:$4 sm:$0xff]  }
 0xf32   :  { %9641 = vmatmul.mubr.bf16.vlgmr.msra.gmra.mxu0 %v8781_v18  ;;  %9650 = vmatpush1.bf16.msra.mxu1 %v13014_v14  ;;  %v13071_v14 = vld [vmem:[%s21252_s9 + $0x3e0] ss:$8 sps:$4 sm:$0xff]   ;;  %v13079_v58 = vld [vmem:[%s21252_s9 + $0x3d4] ss:$8 sps:$4 sm:$0xff]   ;;  %v13082_v18 = vld [vmem:[%s21252_s9 + $0x2c4] ss:$8 sps:$4 sm:$0xff]  }
 0xf33   :  { %9691 = vmatpush1.bf16.msra.mxu0 %v13017_v15  ;;  %9651 = vmatprep.subr.bf16.mxu1 %v13022_v51  ;;  %v13074_v15 = vld [vmem:[%s21252_s9 + $0x2d0] ss:$8 sps:$4 sm:$0xff]  }
 0xf34   :  { %9692 = vmatprep.subr.bf16.mxu0 %v13025_v30  ;;  %v13077_v51 = vld [vmem:[%s21252_s9 + $0x3d0] ss:$8 sps:$4 sm:$0xff]   ;;  %v13085_v30 = vld [vmem:[%s21252_s9 + $0x3c4] ss:$8 sps:$4 sm:$0xff]  }
 0xf36   :  { %9652 = vmatpush1.bf16.msra.mxu1 %v13020_v53  ;;  %v13080_v53 = vld [vmem:[%s21252_s9 + $0x2c0] ss:$8 sps:$4 sm:$0xff]  }
 0xf37   :  { %9693 = vmatpush1.bf16.msra.mxu0 %v13023_v52  ;;  %9653 = vmatprep.subr.bf16.mxu1 %v13028_v40  ;;  %v13083_v52 = vld [vmem:[%s21252_s9 + $0x3c0] ss:$8 sps:$4 sm:$0xff]   ;;  %v13088_v40 = vld [vmem:[%s21252_s9 + $0x2b4] ss:$8 sps:$4 sm:$0xff]  }
 0xf38   :  { %9694 = vmatprep.subr.bf16.mxu0 %v13031_v44  ;;  %v8249_v44 = vsub.s32 4, %v22569_v62 }
 0xf3a   :  { %9654 = vmatpush1.bf16.msra.mxu1 %v13026_v19  ;;  %v13091_v19 = vld [vmem:[%s21252_s9 + $0x3b4] ss:$8 sps:$4 sm:$0xff]  }
 0xf3b   :  { %9695 = vmatpush1.bf16.msra.mxu0 %v13029_v16  ;;  %9655 = vmatprep.subr.bf16.mxu1 %v13034_v17  ;;  %v8257_v16 = vsub.s32 6, %v22569_v62  ;;  %v13086_v17 = vld [vmem:[%s21252_s9 + $0x2b0] ss:$8 sps:$4 sm:$0xff]   ;;  %v13097_v62 = vld [vmem:[%s21252_s9 + $0x3a4] ss:$8 sps:$4 sm:$0xff]  }
 0xf3c   :  { %9696 = vmatprep.subr.bf16.mxu0 %v13037_v50  ;;  %v13089_v50 = vld [vmem:[%s21252_s9 + $0x3b0] ss:$8 sps:$4 sm:$0xff]  }
 0xf3e   :  { %9656 = vmatpush1.bf16.msra.mxu1 %v13032_v23  ;;  %v13094_v23 = vld [vmem:[%s21252_s9 + $0x2a4] ss:$8 sps:$4 sm:$0xff]  }
 0xf3f   :  { %9697 = vmatpush1.bf16.msra.mxu0 %v13035_v37  ;;  %9657 = vmatprep.subr.bf16.mxu1 %v13040_v11  ;;  %v8250_v37 = vrot.slane %v20902_v41, %v8249_v44  ;;  %v8258_v11 = vrot.slane %v20902_v41, %v8257_v16  ;;  %v13103_v41 = vld [vmem:[%s21252_s9 + $0x394] ss:$8 sps:$4 sm:$0xff]  }
 0xf40   :  { %9698 = vmatprep.subr.bf16.mxu0 %v13043_v39  ;;  %v13092_v39 = vld [vmem:[%s21252_s9 + $0x2a0] ss:$8 sps:$4 sm:$0xff]  }
 0xf42   :  { %9658 = vmatpush1.bf16.msra.mxu1 %v13038_v32  ;;  %v13095_v32 = vld [vmem:[%s21252_s9 + $0x3a0] ss:$8 sps:$4 sm:$0xff]  }
 0xf43   :  { %9699 = vmatpush1.bf16.msra.mxu0 %v13041_v47  ;;  %9659 = vmatprep.subr.bf16.mxu1 %v13046_v57  ;;  %v13100_v47 = vld [vmem:[%s21252_s9 + $0x294] ss:$8 sps:$4 sm:$0xff]  }
 0xf44   :  { %9700 = vmatprep.subr.bf16.mxu0 %v13049_v49 }
 0xf46   :  { %v20988_v42 = vpop.f32.mrf.mxu1  ;;  %v20990_v56 = vpop.f32.mrf.mxu0  ;;  %9660 = vmatpush1.bf16.msra.mxu1 %v13044_v45  ;;  %v13106_v45 = vld [vmem:[%s21252_s9 + $0x284] ss:$8 sps:$4 sm:$0xff]  }
 0xf47   :  { %9701 = vmatpush1.bf16.msra.mxu0 %v13047_v36  ;;  %9661 = vmatprep.subr.bf16.mxu1 %v13052_v43  ;;  %v8708_v57 = vadd.f32 %v20988_v42, %v8250_v37  ;;  %v8749_v49 = vadd.f32 %v20990_v56, %v8258_v11  ;;  %v13109_v43 = vld [vmem:[%s21252_s9 + $0x384] ss:$8 sps:$4 sm:$0xff]   ;;  %v13104_v42 = vld [vmem:[%s21252_s9 + $0x280] ss:$8 sps:$4 sm:$0xff]  }
 0xf48   :  { %v8709_v63 = vpop.f32.mrf.mxu1  ;;  %v8750_v0 = vpop.f32.mrf.mxu0  ;;  %9702 = vmatprep.subr.bf16.mxu0 %v13055_v10  ;;  %v13107_v56 = vld [vmem:[%s21252_s9 + $0x380] ss:$8 sps:$4 sm:$0xff]  }
 0xf49   :  { %v8710_v4 = vadd.f32 %v8709_v63, %v8254_v12  ;;  %v8751_v6 = vadd.f32 %v8750_v0, %v8262_v54  ;;  %v8767_v36 = vmul.f32 0.2, %v8708_v57  ;;  %vm8759_vm13 = vcmp.ge.f32.partialorder %v8708_v57, 0.0  ;;  %v13110_v0 = vld [vmem:[%s21255_s11 + $0x78] sm:$0xff]  }
 0xf4a   :  { %v8711_v7 = vpop.f32.mrf.mxu1  ;;  %v8752_v8 = vpop.f32.mrf.mxu0  ;;  %9662 = vmatpush1.bf16.msra.mxu1 %v13050_v60  ;;  %v8769_v10 = vmul.f32 0.2, %v8749_v49  ;;  %vm8761_vm14 = vcmp.ge.f32.partialorder %v8749_v49, 0.0 }
 0xf4b   :  { %vm8760_vm11 = vcmp.ge.f32.partialorder %v8710_v4, 0.0  ;;  %v8768_v26 = vmul.f32 0.2, %v8710_v4  ;;  %9703 = vmatpush1.bf16.msra.mxu0 %v13053_v1  ;;  %9663 = vmatprep.subr.bf16.mxu1 %v13058_v2  ;;  %vm8762_vm12 = vcmp.ge.f32.partialorder %v8751_v6, 0.0  ;;  %v8770_v28 = vmul.f32 0.2, %v8751_v6 }
 0xf4c   :  { %v8712_v27 = vpop.f32.mrf.mxu1  ;;  %v8753_v5 = vpop.f32.mrf.mxu0  ;;  %9704 = vmatprep.subr.bf16.mxu0 %v13061_v3  ;;  %v8775_v12 = vsel %vm8759_vm13, %v8708_v57, %v8767_v36  ;;  %v8777_v54 = vsel %vm8761_vm14, %v8749_v49, %v8769_v10  ;;  %v13111_v1 = vld [vmem:[%s21255_s11 + $0x38] sm:$0xff]   ;;  %v13112_v2 = vld [vmem:[%s21255_s11 + $0x70] sm:$0xff]   ;;  %v13116_v7 = vld [vmem:[%s21255_s11 + $0x60] sm:$0xff]  }
 0xf4d   :  { %v8776_v25 = vsel %vm8760_vm11, %v8710_v4, %v8768_v26  ;;  %v8778_v20 = vsel %vm8762_vm12, %v8751_v6, %v8770_v28  ;;  %v8783_v60 = vpack.c.bf16 %v8775_v12, %v8775_v12  ;;  %v8785_v63 = vpack.c.bf16 %v8777_v54, %v8777_v54  ;;  %v13113_v3 = vld [vmem:[%s21255_s11 + $0x30] sm:$0xff]   ;;  %v13114_v4 = vld [vmem:[%s21255_s11 + $0x68] sm:$0xff]   ;;  %v13117_v8 = vld [vmem:[%s21255_s11 + $0x20] sm:$0xff]  }
 0xf4e   :  { %9664 = vmatpush1.bf16.msra.mxu1 %v13056_v22  ;;  %v8784_v13 = vpack.c.bf16 %v8776_v25, %v8776_v25  ;;  %v8786_v35 = vpack.c.bf16 %v8778_v20, %v8778_v20  ;;  %v13115_v6 = vld [vmem:[%s21255_s11 + $0x28] sm:$0xff]   ;;  %v13118_v22 = vld [vmem:[%s21255_s11 + $0x58] sm:$0xff]   ;;  %v13120_v26 = vld [vmem:[%s21255_s11 + $0x50] sm:$0xff]   ;;  %v13722_v25 = vmov 0.0  }
 0xf4f   :  { %9705 = vmatpush1.bf16.msra.mxu0 %v13059_v29  ;;  %9665 = vmatprep.subr.bf16.mxu1 %v13064_v24  ;;  %v13119_v29 = vld [vmem:[%s21255_s11 + $0x18] sm:$0xff]   ;;  %v13121_v27 = vld [vmem:[%s21255_s11 + $0x10] sm:$0xff]   ;;  %v13122_v5 = vld [vmem:[%s21255_s11 + $0x48] sm:$0xff]  }
 0xf50   :  { %9681 = vmatprep.mubr.bf16.mxu1 %v8784_v13  ;;  %9706 = vmatprep.subr.bf16.mxu0 %v13067_v21  ;;  %v13123_v24 = vld [vmem:[%s21255_s11 + $0x8] sm:$0xff]   ;;  %v13124_v28 = vld [vmem:[%s21255_s11 + $0x40] sm:$0xff]   ;;  %v13126_v13 = vld [vmem:[%s21256_s13 + $0x38] sm:$0xff]  }
 0xf51   :  { %9722 = vmatprep.mubr.bf16.mxu0 %v8786_v35  ;;  %v13125_v21 = vld [vmem:[%s21255_s11] sm:$0xff]   ;;  %v13127_v20 = vld [vmem:[%s21256_s13 + $0x30] sm:$0xff]   ;;  %v13136_v12 = vld [vmem:[%s21258_s15 + $0x28] sm:$0xff]  }
 0xf52   :  { %9666 = vmatpush2.bf16.msra.mxu1 %v13062_v33  ;;  %v13128_v33 = vld [vmem:[%s21256_s13 + $0x28] sm:$0xff]   ;;  %v13129_v35 = vld [vmem:[%s21256_s13 + $0x20] sm:$0xff]   ;;  %v13131_v36 = vld [vmem:[%s21256_s13 + $0x10] sm:$0xff]  }
 0xf53   :  { %9707 = vmatpush2.bf16.msra.mxu0 %v13065_v38  ;;  %9667 = vmatprep.subr.bf16.mxu1 %v13070_v61  ;;  %v13130_v38 = vld [vmem:[%s21256_s13 + $0x18] sm:$0xff]   ;;  %v13133_v10 = vld [vmem:[%s21256_s13] sm:$0xff]  }
 0xf54   :  { %9708 = vmatprep.subr.bf16.mxu0 %v13073_v55  ;;  %v13137_v54 = vld [vmem:[%s21258_s15 + $0x20] sm:$0xff]  }
 0xf56   :  { %9668 = vmatpush2.bf16.msra.mxu1 %v13068_v9 }
 0xf57   :  { %9709 = vmatpush2.bf16.msra.mxu0 %v13071_v14  ;;  %9669 = vmatprep.subr.bf16.mxu1 %v13076_v59 }
 0xf58   :  { %9710 = vmatprep.subr.bf16.mxu0 %v13079_v58 }
 0xf5a   :  { %9670 = vmatpush2.bf16.msra.mxu1 %v13074_v15 }
 0xf5b   :  { %9711 = vmatpush2.bf16.msra.mxu0 %v13077_v51  ;;  %9671 = vmatprep.subr.bf16.mxu1 %v13082_v18  ;;  %v8915_v18 = vld [vmem:[%s21257_s10] sm:$0x3] }
 0xf5c   :  { %9712 = vmatprep.subr.bf16.mxu0 %v13085_v30  ;;  %v8920_v30 = vrot.slane %v8915_v18, %v22568_v46 }
 0xf5e   :  { %9672 = vmatpush2.bf16.msra.mxu1 %v13080_v53  ;;  %v8924_v53 = vrot.slane %v8915_v18, %v22571_v48 }
 0xf5f   :  { %9713 = vmatpush2.bf16.msra.mxu0 %v13083_v52  ;;  %9673 = vmatprep.subr.bf16.mxu1 %v13088_v40 }
 0xf60   :  { %9714 = vmatprep.subr.bf16.mxu0 %v13091_v19 }
 0xf62   :  { %9674 = vmatpush2.bf16.msra.mxu1 %v13086_v17 }
 0xf63   :  { %9715 = vmatpush2.bf16.msra.mxu0 %v13089_v50  ;;  %9675 = vmatprep.subr.bf16.mxu1 %v13094_v23 }
 0xf64   :  { %9716 = vmatprep.subr.bf16.mxu0 %v13097_v62 }
 0xf66   :  { %9676 = vmatpush2.bf16.msra.mxu1 %v13092_v39 }
 0xf67   :  { %9717 = vmatpush2.bf16.msra.mxu0 %v13095_v32  ;;  %9677 = vmatprep.subr.bf16.mxu1 %v13100_v47 }
 0xf68   :  { %9718 = vmatprep.subr.bf16.mxu0 %v13103_v41 }
 0xf6a   :  { %9678 = vmatpush2.bf16.msra.mxu1 %v13098_v31 }
 0xf6b   :  { %9719 = vmatpush2.bf16.msra.mxu0 %v13101_v34  ;;  %9679 = vmatprep.subr.bf16.mxu1 %v13106_v45 }
 0xf6c   :  { %9720 = vmatprep.subr.bf16.mxu0 %v13109_v43  ;;  %v13132_v43 = vld [vmem:[%s21256_s13 + $0x8] sm:$0xff]  }
 0xf6e   :  { %9680 = vmatpush2.bf16.msra.mxu1 %v13104_v42  ;;  %v13134_v42 = vld [vmem:[%s21258_s15 + $0x38] sm:$0xff]  }
 0xf6f   :  { %9721 = vmatpush2.bf16.msra.mxu0 %v13107_v56  ;;  %11713 = vmatprep.subr.bf16.mxu1 %v13110_v0  ;;  %v13135_v56 = vld [vmem:[%s21258_s15 + $0x30] sm:$0xff]  }
 0xf70   :  { %11753 = vmatprep.subr.bf16.mxu0 %v13722_v25 }
 0xf71   :  { %9682 = vmatmul.mubr.bf16.vlgmr.msra.gmra.mxu1 %v8783_v60  ;;  %v13138_v60 = vld [vmem:[%s21258_s15 + $0x18] sm:$0xff]  }
 0xf72   :  { %9723 = vmatmul.mubr.bf16.vlgmr.msra.gmra.mxu0 %v8785_v63  ;;  %11714 = vmatpush3.bf16.msra.mxu1 %v13111_v1  ;;  %v13139_v63 = vld [vmem:[%s21258_s15 + $0x10] sm:$0xff]   ;;  %v11634_v1 = vld [vmem:[%s21259_s12] ss:$0 sm:$0xff] }
 0xf73   :  { %11715 = vmatprep.subr.bf16.mxu1 %v13112_v2  ;;  %11754 = vmatpush3.bf16.msra.mxu0 %v13126_v13 }
 0xf74   :  { %11755 = vmatprep.subr.bf16.mxu0 %v13722_v25  ;;  %11769 = vmatprep.mubr.msk.bf16.mxu0 %vm13723_vm1, %v13722_v25 }
 0xf76   :  { %11716 = vmatpush3.bf16.msra.mxu1 %v13113_v3 }
 0xf77   :  { %11717 = vmatprep.subr.bf16.mxu1 %v13114_v4  ;;  %11756 = vmatpush3.bf16.msra.mxu0 %v13127_v20 }
 0xf78   :  { %11757 = vmatprep.subr.bf16.mxu0 %v13722_v25 }
 0xf7a   :  { %11718 = vmatpush3.bf16.msra.mxu1 %v13115_v6 }
 0xf7b   :  { %11719 = vmatprep.subr.bf16.mxu1 %v13116_v7  ;;  %11758 = vmatpush3.bf16.msra.mxu0 %v13128_v33 }
 0xf7c   :  { %11759 = vmatprep.subr.bf16.mxu0 %v13722_v25 }
 0xf7e   :  { %11720 = vmatpush3.bf16.msra.mxu1 %v13117_v8 }
 0xf7f   :  { %11721 = vmatprep.subr.bf16.mxu1 %v13118_v22  ;;  %11760 = vmatpush3.bf16.msra.mxu0 %v13129_v35 }
 0xf80   :  { %11761 = vmatprep.subr.bf16.mxu0 %v13722_v25 }
 0xf82   :  { %11722 = vmatpush3.bf16.msra.mxu1 %v13119_v29 }
 0xf83   :  { %11723 = vmatprep.subr.bf16.mxu1 %v13120_v26  ;;  %11762 = vmatpush3.bf16.msra.mxu0 %v13130_v38  ;;  %v13140_v26 = vld [vmem:[%s21258_s15 + $0x8] sm:$0xff]  }
 0xf84   :  { %11763 = vmatprep.subr.bf16.mxu0 %v13722_v25 }
 0xf86   :  { %11724 = vmatpush3.bf16.msra.mxu1 %v13121_v27  ;;  %v13141_v27 = vld [vmem:[%s21258_s15] sm:$0xff]  }
 0xf87   :  { %11725 = vmatprep.subr.bf16.mxu1 %v13122_v5  ;;  %11764 = vmatpush3.bf16.msra.mxu0 %v13131_v36  ;;  %v11651_v5 = vld [vmem:[%s21260_s14] ss:$0 sm:$0xff] }
 0xf88   :  { %11765 = vmatprep.subr.bf16.mxu0 %v13722_v25 }
 0xf8a   :  { %11726 = vmatpush3.bf16.msra.mxu1 %v13123_v24 }
 0xf8b   :  { %11727 = vmatprep.subr.bf16.mxu1 %v13124_v28  ;;  %11766 = vmatpush3.bf16.msra.mxu0 %v13132_v43 }
 0xf8c   :  { %11767 = vmatprep.subr.bf16.mxu0 %v13722_v25 }
 0xf8e   :  { %11728 = vmatpush3.bf16.msra.mxu1 %v13125_v21 }
 0xf8f   :  { %11773 = vmatprep.subr.bf16.mxu1 %v13722_v25  ;;  %11768 = vmatpush3.bf16.msra.mxu0 %v13133_v10 }
 0xff1   :  { %v9601_v61 = vpop.f32.mrf.mxu1 }
 0xff2   :  { %v9642_v55 = vpop.f32.mrf.mxu0  ;;  %v9602_v52 = vadd.f32 %v9601_v61, %v8920_v30 }
 0xff3   :  { %v9603_v9 = vpop.f32.mrf.mxu1 }
 0xff4   :  { %v9644_v14 = vpop.f32.mrf.mxu0  ;;  %v9604_v40 = vadd.f32 %v9603_v9, %v8924_v53  ;;  %v9643_v44 = vadd.f32 %v9642_v55, %v9602_v52 }
 0xff5   :  { %v9605_v59 = vpop.f32.mrf.mxu1 }
 0xff6   :  { %v9646_v58 = vpop.f32.mrf.mxu0  ;;  %v9645_v16 = vadd.f32 %v9644_v14, %v9604_v40 }
 0xff7   :  { %v9606_v15 = vpop.f32.mrf.mxu1 }
 0xff8   :  { %v9647_v51 = vpop.f32.mrf.mxu0 }
0x1031   :  { %v9683_v19 = vpop.f32.mrf.mxu1 }
0x1032   :  { %v9684_v17 = vadd.f32 %v9683_v19, %v9643_v44  ;;  %v9724_v50 = vpop.f32.mrf.mxu0 }
0x1033   :  { %v9685_v23 = vpop.f32.mrf.mxu1 }
0x1034   :  { %v9725_v37 = vadd.f32 %v9724_v50, %v9684_v17  ;;  %v9686_v62 = vadd.f32 %v9685_v23, %v9645_v16  ;;  %v9726_v11 = vpop.f32.mrf.mxu0 }
0x1035   :  { %v9687_v39 = vpop.f32.mrf.mxu1 }
0x1036   :  { %vm9731_vm15 = vcmp.ge.f32.partialorder %v9725_v37, 0.0  ;;  %v9733_v32 = vmul.f32 0.2, %v9725_v37  ;;  %v9727_v47 = vadd.f32 %v9726_v11, %v9686_v62  ;;  %v9728_v57 = vpop.f32.mrf.mxu0 }
0x1037   :  { %v9688_v41 = vpop.f32.mrf.mxu1 }
0x1038   :  { %vm9732_vm0 = vcmp.ge.f32.partialorder %v9727_v47, 0.0  ;;  %v9734_v46 = vmul.f32 0.2, %v9727_v47  ;;  %v9729_v48 = vpop.f32.mrf.mxu0  ;;  %v9735_v49 = vsel %vm9731_vm15, %v9725_v37, %v9733_v32 }
0x1039   :  { %v9737_v45 = vpack.c.bf16 %v9735_v49, %v9735_v49 }
0x103a   :  { %v9736_v31 = vsel %vm9732_vm0, %v9727_v47, %v9734_v46 }
0x103b   :  { %v9738_v34 = vpack.c.bf16 %v9736_v31, %v9736_v31 }
0x103d   :  { %9906 = vmatprep.mubr.bf16.mxu1 %v9738_v34 }
0x103e   :  { %9907 = vmatmul.mubr.bf16.vlgmr.msra.gmra.mxu1 %v9737_v45 }
0x103f   :  { %11789 = vmatprep.mubr.msk.bf16.mxu1 %vm13723_vm1, %v13722_v25  ;;  %11774 = vmatpush3.bf16.msra.mxu1 %v13134_v42 }
0x1040   :  { %11775 = vmatprep.subr.bf16.mxu1 %v13722_v25 }
0x1043   :  { %11776 = vmatpush3.bf16.msra.mxu1 %v13135_v56 }
0x1044   :  { %11777 = vmatprep.subr.bf16.mxu1 %v13722_v25 }
0x1047   :  { %11778 = vmatpush3.bf16.msra.mxu1 %v13136_v12 }
0x1048   :  { %11779 = vmatprep.subr.bf16.mxu1 %v13722_v25 }
0x104b   :  { %11780 = vmatpush3.bf16.msra.mxu1 %v13137_v54 }
0x104c   :  { %11781 = vmatprep.subr.bf16.mxu1 %v13722_v25 }
0x104f   :  { %11782 = vmatpush3.bf16.msra.mxu1 %v13138_v60 }
0x1050   :  { %11783 = vmatprep.subr.bf16.mxu1 %v13722_v25 }
0x1053   :  { %11784 = vmatpush3.bf16.msra.mxu1 %v13139_v63 }
0x1054   :  { %11785 = vmatprep.subr.bf16.mxu1 %v13722_v25 }
0x1057   :  { %11786 = vmatpush3.bf16.msra.mxu1 %v13140_v26 }
0x1058   :  { %11787 = vmatprep.subr.bf16.mxu1 %v13722_v25  ;;  %v11660_v25 = vld [vmem:[%s21261_s16] ss:$0 sm:$0xff] }
0x105b   :  { %11788 = vmatpush3.bf16.msra.mxu1 %v13141_v27 }
0x10fe   :  { %v11729_v0 = vpop.f32.mrf.mxu1 }
0x1100   :  { %v11730_v2 = vpop.f32.mrf.mxu1 }
0x1101   :  { %v11731_v3 = vadd.f32 %v11730_v2, %v11729_v0 }
0x1102   :  { %v11732_v4 = vpop.f32.mrf.mxu1 }
0x1103   :  { %v9909_v6 = vadd.f32 %v11731_v3, %v11634_v1 }
0x1104   :  { %v11733_v7 = vpop.f32.mrf.mxu1 }
0x1105   :  { %vm9914_vm2 = vcmp.ge.f32.partialorder %v9909_v6, 0.0  ;;  %v9915_v8 = vmul.f32 0.2, %v9909_v6 }
0x1107   :  { %v9916_v22 = vsel %vm9914_vm2, %v9909_v6, %v9915_v8 }
0x1108   :  { %v9917_v29 = vpack.c.bf16 %v9916_v22, %v9916_v22 }
0x110a   :  { %11770 = vmatmul.mubr.bf16.vlgmr.msra.gmra.mxu0 %v9917_v29 }
0x11ca   :  { %v10023_v24 = vpop.f32.mrf.mxu0 }
0x11cb   :  { %v10024_v28 = vadd.f32 %v11651_v5, %v10023_v24 }
0x11cc   :  { %v11771_v21 = vpop.f32.mrf.mxu0 }
0x11cd   :  { %vm10029_vm3 = vcmp.ge.f32.partialorder %v10024_v28, 0.0  ;;  %v10030_v13 = vmul.f32 0.2, %v10024_v28 }
0x11ce   :  { %v10026_v20 = vpop.f32.mrf.mxu0 }
0x11cf   :  { %v10031_v33 = vsel %vm10029_vm3, %v10024_v28, %v10030_v13 }
0x11d0   :  { %v10032_v35 = vpack.c.bf16 %v10031_v33, %v10031_v33  ;;  %v11772_v38 = vpop.f32.mrf.mxu0 }
0x11d2   :  { %11790 = vmatmul.mubr.bf16.vlgmr.msra.gmra.mxu1 %v10032_v35 }
0x1292   :  { %v10138_v61 = vpop.f32.mrf.mxu1 }
0x1293   :  { %v10139_v55 = vadd.f32 %v11660_v25, %v10138_v61 }
0x1294   :  { %v11791_v9 = vpop.f32.mrf.mxu1 }
0x1295   :  { %vm10144_vm4 = vcmp.ge.f32.partialorder %v10139_v55, 0.0  ;;  %v10145_v14 = vmul.f32 0.2, %v10139_v55 }
0x1296   :  { %v10141_v59 = vpop.f32.mrf.mxu1 }
0x1297   :  { %v10146_v58 = vsel %vm10144_vm4, %v10139_v55, %v10145_v14 }
0x1298   :  { %10147 = vst [vmem:[%s21262_s17] sm:$0x3] %v10146_v58  ;;  %v11792_v15 = vpop.f32.mrf.mxu1 }

</bundles_post_ra>
